<compile_context>
chip_gen: v5e
topology: v5e:2x2
jax: 0.10.0
libtpu: 0.0.40
codegen_flags: <defaults>
</compile_context>

<pallas_src>
import jax
import jax.numpy as jnp
from jax.experimental import pallas as pl
from jax.experimental.pallas import tpu as pltpu


def _res_block_kernel(st_ref, nt_ref,                          # scalar prefetch (SMEM)
                      dst_ref, norm_ref, f_ref, invd_ref, xn_ref,
                      wnn_ref, bnn_ref, wnd_ref, bnd_ref,      # VMEM inputs
                      o_ref,                                   # output
                      agg_acc):                                # VMEM scratch
    n = pl.program_id(0)
    e = pl.program_id(1)
    tn = o_ref.shape[0]
    te = dst_ref.shape[1]
    o_pad = o_ref.shape[1]

    @pl.when(e == 0)
    def _init():
        agg_acc[...] = jnp.zeros_like(agg_acc)

    # Only edge tiles whose (dst-sorted) destinations can land in this node tile
    # are processed; other steps are ~free (compute skipped, DMA not re-issued
    # because the clamped index_map returns the same block index).
    @pl.when(e < nt_ref[n])
    def _accumulate():
        # per-edge messages: relu(f @ W_nn + b_nn) * edge_weight
        # (bf16 MXU operands, f32 accumulate; the norm multiply stays f32)
        msg = jnp.dot(f_ref[...], wnn_ref[...],
                      preferred_element_type=jnp.float32) + bnn_ref[...]
        msg = jnp.maximum(msg, 0.0) * norm_ref[...]            # [te, O_pad] * [te, 1]

        # 0/1 incidence block for this (node tile, edge tile) from int32 dst ids;
        # padded edges carry the sentinel dst = N_pad and never hit.
        node_ids = (jax.lax.broadcasted_iota(jnp.int32, (tn, te), 0) + n * tn)
        hit = (node_ids == dst_ref[...]).astype(jnp.bfloat16)  # single cast, no where
        agg_acc[...] += jnp.dot(hit, msg.astype(jnp.bfloat16),
                                preferred_element_type=jnp.float32)

    @pl.when(e == pl.num_programs(1) - 1)
    def _finalize():
        out = agg_acc[...] * invd_ref[...]                     # exact precomputed 1/deg
        # fused node epilogue: lin_r (+ res_scale residual folded into W_r) and
        # the global-pool MLP in a single f32 matmul, once per node tile.
        nod = jnp.dot(xn_ref[...], wnd_ref[...],
                      preferred_element_type=jnp.float32) + bnd_ref[...]
        out = out + nod[:, :o_pad] + jnp.maximum(nod[:, o_pad:], 0.0)
        o_ref[...] = out.astype(o_ref.dtype)


def _round_up(a, b):
    return (a + b - 1) // b * b


def res_block_attr_edge_gp(x, edge_index, edge_weight, edge_attr, params,
                           channels, res_scale=1.0, *, tn=256, te=2048,
                           max_edge_steps=None):
    """ResBlock(channels, conv='attr_edge_gp').forward(x, edge, edge_weight, edge_attr).

    Tile guidance: tn=256 / te=2048 on v6e/v7x (MXU is 256-high, VMEM is not the
    binder even at 64 MiB); pass tn=128 on v5e (128-high MXU).  Small graphs
    (N <= 256) automatically drop tn to 128 so both v7x TensorCores get a node
    tile.  `max_edge_steps` optionally tightens the static edge-step extent; it
    must cover the worst-case per-node-tile edge-tile span (default is always
    safe = E_pad // te).
    """
    N = x.shape[0]
    E = edge_index.shape[1]
    C = channels
    O = channels                          # ResBlock: in_channels == out_channels
    F = 2 * C + 4

    # tile sizing: keep the MXU fed, keep >=2 node tiles for small graphs (v7x
    # dual TensorCore), and do not over-pad tiny edge sets.
    if _round_up(N, 128) <= 256:
        tn = min(tn, 128)
    te = min(te, _round_up(max(E, 1), 128))

    O_pad = _round_up(max(O, 128), 128)   # lane-dense output
    N_pad = _round_up(N, tn)
    E_pad = _round_up(E, te)
    num_nt = N_pad // tn
    num_et = E_pad // te
    num_edge_steps = num_et if max_edge_steps is None else min(max_edge_steps, num_et)

    x = x.astype(jnp.float32)
    x_loc = x[:, :C]

    src = edge_index[0].astype(jnp.int32)
    dst = edge_index[1].astype(jnp.int32)
    if edge_weight is None:
        norm = jnp.ones((E,), jnp.float32)
    else:
        norm = edge_weight.astype(jnp.float32).reshape(E)

    # --- sort edges by destination so each node tile touches a contiguous (and
    #     usually small) range of edge tiles.
    order = jnp.argsort(dst)
    dst_s = dst[order]
    src_s = src[order]
    norm_s = norm[order]
    attr_s = edge_attr.astype(jnp.float32)[order]

    # --- per-edge features built directly in bf16 (gather stays in XLA).
    # TODO(synk): move the row gather into the kernel (x_loc resident in VMEM +
    # scalar-prefetched src/dst ids) so the [E, 2C+4] intermediate never hits HBM.
    x_i = x_loc[dst_s]
    x_j = x_loc[src_s]
    f = jnp.concatenate([x_i.astype(jnp.bfloat16),
                         (x_j - x_i).astype(jnp.bfloat16),
                         attr_s.astype(jnp.bfloat16)], axis=1)
    f = jnp.pad(f, ((0, E_pad - E), (0, 0)))                        # [E_pad, F]

    # padded edges: sentinel dst = N_pad keeps the array sorted and never matches
    # any node row id in [0, N_pad); weight 0 as belt-and-braces.
    dst_p = jnp.pad(dst_s, (0, E_pad - E),
                    constant_values=N_pad).reshape(1, E_pad)
    norm_p = jnp.pad(norm_s, (0, E_pad - E)).reshape(E_pad, 1)

    # --- exact in-degree -> 1/clamped-deg, precomputed once in XLA.
    cnt = jnp.zeros((N_pad,), jnp.float32).at[dst].add(1.0)
    inv_deg = (1.0 / jnp.maximum(cnt, 1.0)).reshape(N_pad, 1)

    xn = jnp.pad(x, ((0, N_pad - N), (0, 0)))                       # [N_pad, 2C]

    # --- per-node-tile edge-tile ranges (scalar prefetch, int32 SMEM).
    bounds = jnp.arange(num_nt + 1, dtype=jnp.int32) * tn
    pos = jnp.searchsorted(dst_p.reshape(E_pad), bounds,
                           side='left').astype(jnp.int32)
    lo, hi = pos[:-1], pos[1:]
    start_tile = jnp.minimum(lo // te, num_et - 1).astype(jnp.int32)
    num_tiles = jnp.where(hi > lo,
                          (hi - 1) // te - lo // te + 1, 0).astype(jnp.int32)

    # --- weights: pad out_channels to O_pad lanes (zero columns are MXU-free).
    wnn = jnp.pad(params["w_nn"].astype(jnp.float32),
                  ((0, 0), (0, O_pad - O))).astype(jnp.bfloat16)    # [F, O_pad]
    bnn = jnp.pad(params["b_nn"].astype(jnp.float32),
                  (0, O_pad - O)).reshape(1, O_pad)

    # fused node weight: blockdiag(W_r + res_scale*I, W_mlp), biases concatenated.
    # Kept f32 so the residual identity does not round through bf16.
    w_r_eff = (params["w_r"].astype(jnp.float32)
               + res_scale * jnp.eye(C, dtype=jnp.float32))
    wnd = jnp.zeros((2 * C, 2 * O_pad), jnp.float32)
    wnd = wnd.at[:C, :O].set(w_r_eff)
    wnd = wnd.at[C:, O_pad:O_pad + O].set(params["w_mlp"].astype(jnp.float32))
    bnd = jnp.zeros((1, 2 * O_pad), jnp.float32)
    bnd = bnd.at[0, :O].set(params["b_r"].astype(jnp.float32))
    bnd = bnd.at[0, O_pad:O_pad + O].set(params["b_mlp"].astype(jnp.float32))

    def edge_block(n, e, st, nt):
        # clamp keeps skipped steps in-bounds; within the guarded region
        # (e < nt[n]) the clamp never triggers, so visited tiles are exact.
        return jnp.minimum(st[n] + e, num_et - 1)

    grid_spec = pltpu.PrefetchScalarGridSpec(
        num_scalar_prefetch=2,
        grid=(num_nt, num_edge_steps),
        in_specs=[
            pl.BlockSpec((1, te), lambda n, e, st, nt: (0, edge_block(n, e, st, nt))),   # dst ids
            pl.BlockSpec((te, 1), lambda n, e, st, nt: (edge_block(n, e, st, nt), 0)),   # edge weights
            pl.BlockSpec((te, F), lambda n, e, st, nt: (edge_block(n, e, st, nt), 0)),   # edge features
            pl.BlockSpec((tn, 1), lambda n, e, st, nt: (n, 0)),                          # 1/deg
            pl.BlockSpec((tn, 2 * C), lambda n, e, st, nt: (n, 0)),                      # node features
            pl.BlockSpec((F, O_pad), lambda n, e, st, nt: (0, 0)),                       # W_nn (padded)
            pl.BlockSpec((1, O_pad), lambda n, e, st, nt: (0, 0)),                       # b_nn (padded)
            pl.BlockSpec((2 * C, 2 * O_pad), lambda n, e, st, nt: (0, 0)),               # fused node weight
            pl.BlockSpec((1, 2 * O_pad), lambda n, e, st, nt: (0, 0)),                   # fused node bias
        ],
        out_specs=pl.BlockSpec((tn, O_pad), lambda n, e, st, nt: (n, 0)),
        scratch_shapes=[pltpu.VMEM((tn, O_pad), jnp.float32)],      # f32 agg accumulator
    )

    out = pl.pallas_call(
        _res_block_kernel,
        out_shape=jax.ShapeDtypeStruct((N_pad, O_pad), jnp.float32),
        grid_spec=grid_spec,
        compiler_params=pltpu.CompilerParams(
            dimension_semantics=("parallel", "arbitrary")),
    )(start_tile, num_tiles, dst_p, norm_p, f, inv_deg, xn, wnn, bnn, wnd, bnd)

    return out[:N, :O]


def _reference(x, edge_index, edge_weight, edge_attr, params, C, res_scale):
    O = C
    src, dst = edge_index[0], edge_index[1]
    x_loc, x_glb = x[:, :C], x[:, C:]
    f = jnp.concatenate([x_loc[dst], x_loc[src] - x_loc[dst], edge_attr], axis=1)
    msg = jnp.maximum(f @ params["w_nn"] + params["b_nn"], 0.0)
    if edge_weight is not None:
        msg = msg * edge_weight.reshape(-1, 1)
    N = x.shape[0]
    summed = jnp.zeros((N, O), jnp.float32).at[dst].add(msg)
    cnt = jnp.maximum(jnp.zeros((N,), jnp.float32).at[dst].add(1.0), 1.0)
    agg = summed / cnt[:, None]
    out = agg + (x_loc @ params["w_r"] + params["b_r"])
    out = out + jnp.maximum(x_glb @ params["w_mlp"] + params["b_mlp"], 0.0)
    out = out + x_loc * res_scale                      # ResBlock residual
    return out


if __name__ == "__main__":
    C = 16               # ResBlock channels (in_channels == out_channels)
    N, E = 300, 4000     # nodes, edges (2 node tiles x 2 edge tiles at defaults)
    RES_SCALE = 1.0

    key = jax.random.PRNGKey(0)
    ks = jax.random.split(key, 10)

    # deterministic synthetic parameters (shapes from module __init__)
    params = {
        "w_nn":  jax.random.normal(ks[0], (2 * C + 4, C), jnp.float32) * 0.1,  # MLP([2C+4, C], relu)
        "b_nn":  jax.random.normal(ks[1], (C,), jnp.float32) * 0.1,
        "w_r":   jax.random.normal(ks[2], (C, C), jnp.float32) * 0.1,          # lin_r
        "b_r":   jax.random.normal(ks[3], (C,), jnp.float32) * 0.1,
        "w_mlp": jax.random.normal(ks[4], (C, C), jnp.float32) * 0.1,          # MultiSeq(MLP([C, C]))
        "b_mlp": jax.random.normal(ks[5], (C,), jnp.float32) * 0.1,
    }

    # inputs: x holds local || global-pool features ([N, 2C]), edge_attr has 4 dims
    x = jax.random.normal(ks[6], (N, 2 * C), jnp.float32)
    edge_index = jax.random.randint(ks[7], (2, E), 0, N, dtype=jnp.int32)
    edge_weight = jax.random.uniform(ks[8], (E,), jnp.float32, 0.5, 1.5)
    edge_attr = jax.random.normal(ks[9], (E, 4), jnp.float32)

    # uses the production defaults tn=256, te=2048 (per perf review)
    out = res_block_attr_edge_gp(x, edge_index, edge_weight, edge_attr, params,
                                 channels=C, res_scale=RES_SCALE)
    out = jax.block_until_ready(out)

    ref = _reference(x, edge_index, edge_weight, edge_attr, params, C, RES_SCALE)
    assert out.shape == (N, C)
    # bf16 MXU operands (f32 accumulation) -> slightly looser tolerance than pure-f32
    assert jnp.allclose(out, ref, rtol=2e-2, atol=2e-2), "mismatch vs JAX reference"

    print("KERNEL_OK")
</pallas_src>

<mosaic_0001>
module attributes {stable_mosaic.version = 11 : i64} {
  func.func @_res_block_kernel(%arg0: i32, %arg1: i32, %arg2: memref<2xi32, #tpu.memory_space<smem>>, %arg3: memref<2xi32, #tpu.memory_space<smem>>, %arg4: memref<1x2048xi32, #tpu.memory_space<vmem>>, %arg5: memref<2048x1xf32, #tpu.memory_space<vmem>>, %arg6: memref<2048x36xbf16, #tpu.memory_space<vmem>>, %arg7: memref<256x1xf32, #tpu.memory_space<vmem>>, %arg8: memref<256x32xf32, #tpu.memory_space<vmem>>, %arg9: memref<36x128xbf16, #tpu.memory_space<vmem>>, %arg10: memref<1x128xf32, #tpu.memory_space<vmem>>, %arg11: memref<32x256xf32, #tpu.memory_space<vmem>>, %arg12: memref<1x256xf32, #tpu.memory_space<vmem>>, %arg13: memref<256x128xf32, #tpu.memory_space<vmem>>, %arg14: memref<256x128xf32, #tpu.memory_space<vmem>>) attributes {dimension_semantics = [#tpu.dimension_semantics<parallel>, #tpu.dimension_semantics<arbitrary>], iteration_bounds = array<i64: 2, 2>, scalar_prefetch = 2 : i64, scratch_operands = 1 : i64, tpu.core_type = #tpu.core_type<tc>, window_params = [{transform_indices = @transform_0, window_bounds = array<i64: 1, 2048>}, {transform_indices = @transform_1, window_bounds = array<i64: 2048, 1>}, {transform_indices = @transform_2, window_bounds = array<i64: 2048, 36>}, {transform_indices = @transform_3, window_bounds = array<i64: 256, 1>}, {transform_indices = @transform_4, window_bounds = array<i64: 256, 32>}, {pipeline_mode = #tpu.pipeline_mode<synchronous>, transform_indices = @transform_5, window_bounds = array<i64: 36, 128>}, {pipeline_mode = #tpu.pipeline_mode<synchronous>, transform_indices = @transform_6, window_bounds = array<i64: 1, 128>}, {pipeline_mode = #tpu.pipeline_mode<synchronous>, transform_indices = @transform_7, window_bounds = array<i64: 32, 256>}, {pipeline_mode = #tpu.pipeline_mode<synchronous>, transform_indices = @transform_8, window_bounds = array<i64: 1, 256>}, {transform_indices = @transform_9, window_bounds = array<i64: 256, 128>}]} {
    %c0_i32 = arith.constant 0 : i32
    %0 = arith.cmpi eq, %arg1, %c0_i32 : i32
    %1 = arith.extui %0 : i1 to i32
    %c0_i32_0 = arith.constant 0 : i32
    %2 = arith.cmpi ne, %1, %c0_i32_0 : i32
    scf.if %2 {
      %cst = arith.constant 0.000000e+00 : f32
      %11 = vector.broadcast %cst : f32 to vector<256x128xf32>
      %c0 = arith.constant 0 : index
      %c0_3 = arith.constant 0 : index
      %12 = vector.load %arg14[%c0, %c0_3] : memref<256x128xf32, #tpu.memory_space<vmem>>, vector<256x128xf32>
      tpu.vector_store %arg14[%c0, %c0_3], %11 {strides = array<i32>} : memref<256x128xf32, #tpu.memory_space<vmem>>, vector<256x128xf32>,
    } else {
    }
    %3 = arith.index_cast %arg0 : i32 to index
    %4 = memref.load %arg3[%3] : memref<2xi32, #tpu.memory_space<smem>>
    %5 = arith.cmpi slt, %arg1, %4 : i32
    %6 = arith.extui %5 : i1 to i32
    %c0_i32_1 = arith.constant 0 : i32
    %7 = arith.cmpi ne, %6, %c0_i32_1 : i32
    scf.if %7 {
      %c0 = arith.constant 0 : index
      %c0_3 = arith.constant 0 : index
      %11 = vector.load %arg6[%c0, %c0_3] : memref<2048x36xbf16, #tpu.memory_space<vmem>>, vector<2048x36xbf16>
      %c0_4 = arith.constant 0 : index
      %c0_5 = arith.constant 0 : index
      %12 = vector.load %arg9[%c0_4, %c0_5] : memref<36x128xbf16, #tpu.memory_space<vmem>>, vector<36x128xbf16>
      %cst = arith.constant dense<0.000000e+00> : vector<2048x128xf32>
      %13 = tpu.matmul %11, %12, %cst {dimension_numbers = #tpu.dot_dimension_numbers<[1], [0], [0], [1], [0, 0, 1, 1], [], []>} : vector<2048x36xbf16>, vector<36x128xbf16>, vector<2048x128xf32> -> vector<2048x128xf32>
      %c0_6 = arith.constant 0 : index
      %c0_7 = arith.constant 0 : index
      %14 = vector.load %arg10[%c0_6, %c0_7] : memref<1x128xf32, #tpu.memory_space<vmem>>, vector<1x128xf32>
      %15 = vector.broadcast %14 : vector<1x128xf32> to vector<2048x128xf32>
      %16 = arith.addf %13, %15 : vector<2048x128xf32>
      %cst_8 = arith.constant 0.000000e+00 : f32
      %17 = vector.broadcast %cst_8 : f32 to vector<2048x128xf32>
      %18 = arith.maximumf %16, %17 : vector<2048x128xf32>
      %c0_9 = arith.constant 0 : index
      %c0_10 = arith.constant 0 : index
      %19 = vector.load %arg5[%c0_9, %c0_10] : memref<2048x1xf32, #tpu.memory_space<vmem>>, vector<2048x1xf32>
      %20 = vector.broadcast %19 : vector<2048x1xf32> to vector<2048x128xf32>
      %21 = arith.mulf %18, %20 : vector<2048x128xf32>
      %22 = tpu.iota {dimensions = array<i32: 0>} : vector<256x2048xi32>
      %c256_i32 = arith.constant 256 : i32
      %23 = arith.muli %arg0, %c256_i32 : i32
      %24 = vector.broadcast %23 : i32 to vector<256x2048xi32>
      %25 = arith.addi %22, %24 : vector<256x2048xi32>
      %c0_11 = arith.constant 0 : index
      %c0_12 = arith.constant 0 : index
      %26 = vector.load %arg4[%c0_11, %c0_12] : memref<1x2048xi32, #tpu.memory_space<vmem>>, vector<1x2048xi32>
      %27 = vector.broadcast %26 : vector<1x2048xi32> to vector<256x2048xi32>
      %28 = arith.cmpi eq, %25, %27 : vector<256x2048xi32>
      %29 = arith.extui %28 : vector<256x2048xi1> to vector<256x2048xi32>
      %30 = arith.sitofp %29 : vector<256x2048xi32> to vector<256x2048xf32>
      %31 = arith.truncf %30 : vector<256x2048xf32> to vector<256x2048xbf16>
      %c0_13 = arith.constant 0 : index
      %c0_14 = arith.constant 0 : index
      %32 = vector.load %arg14[%c0_13, %c0_14] : memref<256x128xf32, #tpu.memory_space<vmem>>, vector<256x128xf32>
      %33 = arith.truncf %21 : vector<2048x128xf32> to vector<2048x128xbf16>
      %cst_15 = arith.constant dense<0.000000e+00> : vector<256x128xf32>
      %34 = tpu.matmul %31, %33, %cst_15 {dimension_numbers = #tpu.dot_dimension_numbers<[1], [0], [0], [1], [0, 0, 1, 1], [], []>} : vector<256x2048xbf16>, vector<2048x128xbf16>, vector<256x128xf32> -> vector<256x128xf32>
      %35 = arith.addf %32, %34 : vector<256x128xf32>
      %c0_16 = arith.constant 0 : index
      %c0_17 = arith.constant 0 : index
      %36 = vector.load %arg14[%c0_16, %c0_17] : memref<256x128xf32, #tpu.memory_space<vmem>>, vector<256x128xf32>
      tpu.vector_store %arg14[%c0_16, %c0_17], %35 {strides = array<i32>} : memref<256x128xf32, #tpu.memory_space<vmem>>, vector<256x128xf32>,
    } else {
    }
    %c1_i32 = arith.constant 1 : i32
    %8 = arith.cmpi eq, %arg1, %c1_i32 : i32
    %9 = arith.extui %8 : i1 to i32
    %c0_i32_2 = arith.constant 0 : i32
    %10 = arith.cmpi ne, %9, %c0_i32_2 : i32
    scf.if %10 {
      %c0 = arith.constant 0 : index
      %c0_3 = arith.constant 0 : index
      %11 = vector.load %arg14[%c0, %c0_3] : memref<256x128xf32, #tpu.memory_space<vmem>>, vector<256x128xf32>
      %c0_4 = arith.constant 0 : index
      %c0_5 = arith.constant 0 : index
      %12 = vector.load %arg7[%c0_4, %c0_5] : memref<256x1xf32, #tpu.memory_space<vmem>>, vector<256x1xf32>
      %13 = vector.broadcast %12 : vector<256x1xf32> to vector<256x128xf32>
      %14 = arith.mulf %11, %13 : vector<256x128xf32>
      %c0_6 = arith.constant 0 : index
      %c0_7 = arith.constant 0 : index
      %15 = vector.load %arg8[%c0_6, %c0_7] : memref<256x32xf32, #tpu.memory_space<vmem>>, vector<256x32xf32>
      %c0_8 = arith.constant 0 : index
      %c0_9 = arith.constant 0 : index
      %16 = vector.load %arg11[%c0_8, %c0_9] : memref<32x256xf32, #tpu.memory_space<vmem>>, vector<32x256xf32>
      %cst = arith.constant dense<0.000000e+00> : vector<256x256xf32>
      %17 = tpu.matmul %15, %16, %cst {dimension_numbers = #tpu.dot_dimension_numbers<[1], [0], [0], [1], [0, 0, 1, 1], [], []>} : vector<256x32xf32>, vector<32x256xf32>, vector<256x256xf32> -> vector<256x256xf32>
      %c0_10 = arith.constant 0 : index
      %c0_11 = arith.constant 0 : index
      %18 = vector.load %arg12[%c0_10, %c0_11] : memref<1x256xf32, #tpu.memory_space<vmem>>, vector<1x256xf32>
      %19 = vector.broadcast %18 : vector<1x256xf32> to vector<256x256xf32>
      %20 = arith.addf %17, %19 : vector<256x256xf32>
      %21 = vector.extract_strided_slice %20 {offsets = [0, 0], sizes = [256, 128], strides = [1, 1]} : vector<256x256xf32> to vector<256x128xf32>
      %22 = arith.addf %14, %21 : vector<256x128xf32>
      %23 = vector.extract_strided_slice %20 {offsets = [0, 128], sizes = [256, 128], strides = [1, 1]} : vector<256x256xf32> to vector<256x128xf32>
      %cst_12 = arith.constant 0.000000e+00 : f32
      %24 = vector.broadcast %cst_12 : f32 to vector<256x128xf32>
      %25 = arith.maximumf %23, %24 : vector<256x128xf32>
      %26 = arith.addf %22, %25 : vector<256x128xf32>
      %c0_13 = arith.constant 0 : index
      %c0_14 = arith.constant 0 : index
      %27 = vector.load %arg13[%c0_13, %c0_14] : memref<256x128xf32, #tpu.memory_space<vmem>>, vector<256x128xf32>
      tpu.vector_store %arg13[%c0_13, %c0_14], %26 {strides = array<i32>} : memref<256x128xf32, #tpu.memory_space<vmem>>, vector<256x128xf32>,
    } else {
    }
    return
  }
  func.func @transform_0(%arg0: i32, %arg1: i32, %arg2: memref<2xi32, #tpu.memory_space<smem>>, %arg3: memref<2xi32, #tpu.memory_space<smem>>) -> (i32, i32) {
    %0 = arith.index_cast %arg0 : i32 to index
    %1 = memref.load %arg2[%0] : memref<2xi32, #tpu.memory_space<smem>>
    %2 = arith.addi %1, %arg1 : i32
    %c1_i32 = arith.constant 1 : i32
    %3 = arith.minsi %2, %c1_i32 : i32
    %c0_i32 = arith.constant 0 : i32
    %c0_i32_0 = arith.constant 0 : i32
    return %c0_i32, %3 : i32, i32
  }
  func.func @transform_1(%arg0: i32, %arg1: i32, %arg2: memref<2xi32, #tpu.memory_space<smem>>, %arg3: memref<2xi32, #tpu.memory_space<smem>>) -> (i32, i32) {
    %0 = arith.index_cast %arg0 : i32 to index
    %1 = memref.load %arg2[%0] : memref<2xi32, #tpu.memory_space<smem>>
    %2 = arith.addi %1, %arg1 : i32
    %c1_i32 = arith.constant 1 : i32
    %3 = arith.minsi %2, %c1_i32 : i32
    %c0_i32 = arith.constant 0 : i32
    %c0_i32_0 = arith.constant 0 : i32
    return %3, %c0_i32 : i32, i32
  }
  func.func @transform_2(%arg0: i32, %arg1: i32, %arg2: memref<2xi32, #tpu.memory_space<smem>>, %arg3: memref<2xi32, #tpu.memory_space<smem>>) -> (i32, i32) {
    %0 = arith.index_cast %arg0 : i32 to index
    %1 = memref.load %arg2[%0] : memref<2xi32, #tpu.memory_space<smem>>
    %2 = arith.addi %1, %arg1 : i32
    %c1_i32 = arith.constant 1 : i32
    %3 = arith.minsi %2, %c1_i32 : i32
    %c0_i32 = arith.constant 0 : i32
    %c0_i32_0 = arith.constant 0 : i32
    return %3, %c0_i32 : i32, i32
  }
  func.func @transform_3(%arg0: i32, %arg1: i32, %arg2: memref<2xi32, #tpu.memory_space<smem>>, %arg3: memref<2xi32, #tpu.memory_space<smem>>) -> (i32, i32) {
    %c0_i32 = arith.constant 0 : i32
    %c0_i32_0 = arith.constant 0 : i32
    return %arg0, %c0_i32 : i32, i32
  }
  func.func @transform_4(%arg0: i32, %arg1: i32, %arg2: memref<2xi32, #tpu.memory_space<smem>>, %arg3: memref<2xi32, #tpu.memory_space<smem>>) -> (i32, i32) {
    %c0_i32 = arith.constant 0 : i32
    %c0_i32_0 = arith.constant 0 : i32
    return %arg0, %c0_i32 : i32, i32
  }
  func.func @transform_5(%arg0: i32, %arg1: i32, %arg2: memref<2xi32, #tpu.memory_space<smem>>, %arg3: memref<2xi32, #tpu.memory_space<smem>>) -> (i32, i32) {
    %c0_i32 = arith.constant 0 : i32
    %c0_i32_0 = arith.constant 0 : i32
    %c0_i32_1 = arith.constant 0 : i32
    return %c0_i32, %c0_i32_0 : i32, i32
  }
  func.func @transform_6(%arg0: i32, %arg1: i32, %arg2: memref<2xi32, #tpu.memory_space<smem>>, %arg3: memref<2xi32, #tpu.memory_space<smem>>) -> (i32, i32) {
    %c0_i32 = arith.constant 0 : i32
    %c0_i32_0 = arith.constant 0 : i32
    %c0_i32_1 = arith.constant 0 : i32
    return %c0_i32, %c0_i32_0 : i32, i32
  }
  func.func @transform_7(%arg0: i32, %arg1: i32, %arg2: memref<2xi32, #tpu.memory_space<smem>>, %arg3: memref<2xi32, #tpu.memory_space<smem>>) -> (i32, i32) {
    %c0_i32 = arith.constant 0 : i32
    %c0_i32_0 = arith.constant 0 : i32
    %c0_i32_1 = arith.constant 0 : i32
    return %c0_i32, %c0_i32_0 : i32, i32
  }
  func.func @transform_8(%arg0: i32, %arg1: i32, %arg2: memref<2xi32, #tpu.memory_space<smem>>, %arg3: memref<2xi32, #tpu.memory_space<smem>>) -> (i32, i32) {
    %c0_i32 = arith.constant 0 : i32
    %c0_i32_0 = arith.constant 0 : i32
    %c0_i32_1 = arith.constant 0 : i32
    return %c0_i32, %c0_i32_0 : i32, i32
  }
  func.func @transform_9(%arg0: i32, %arg1: i32, %arg2: memref<2xi32, #tpu.memory_space<smem>>, %arg3: memref<2xi32, #tpu.memory_space<smem>>) -> (i32, i32) {
    %c0_i32 = arith.constant 0 : i32
    %c0_i32_0 = arith.constant 0 : i32
    return %arg0, %c0_i32 : i32, i32
  }
}

</mosaic_0001>

<bundles_post_ra>
// kernel: tpu_custom_call.1
= control target key start
LH: loop header
LB: loop body
LE: loop exit
PB: predicated region body
PF: predicated region fallthrough
CT: control target
= control target key end

     0   :  { %s11122_s23 = smov [#allocation4]   ;;  %s11123_s24 = smov [#allocation5]   ;;  %s17064_s0 = inlined_call_operand.vmem [shape: s32[2], index: 0, kind: input, shape index: {}]   ;;  %s17065_s2 = inlined_call_operand.vmem [shape: s32[1,4096], index: 2, kind: input, shape index: {}]   ;;  %s17066_s3 = inlined_call_operand.vmem [shape: f32[4096,1], index: 3, kind: input, shape index: {}]   ;;  %s17067_s4 = inlined_call_operand.vmem [shape: bf16[4096,36], index: 4, kind: input, shape index: {}]   ;;  %s17068_s5 = inlined_call_operand.vmem [shape: f32[512,1], index: 5, kind: input, shape index: {}]   ;;  %s17069_s6 = inlined_call_operand.vmem [shape: f32[512,32], index: 6, kind: input, shape index: {}]   ;;  %s17070_s7 = inlined_call_operand.vmem [shape: bf16[36,128], index: 7, kind: input, shape index: {}]   ;;  %s17071_s8 = inlined_call_operand.vmem [shape: f32[1,128], index: 8, kind: input, shape index: {}]   ;;  %s17072_s9 = inlined_call_operand.vmem [shape: f32[32,256], index: 9, kind: input, shape index: {}]   ;;  %s17073_s10 = inlined_call_operand.vmem [shape: f32[1,256], index: 10, kind: input, shape index: {}]   ;;  %s17074_s11 = inlined_call_operand.hbm [shape: f32[512,128], index: 11, kind: output, shape index: {}]   ;;  %s17075_s1 = inlined_call_operand.vmem [shape: s32[2], index: 1, kind: input, shape index: {}]  }
   0x1   :  { %s17_s19 = sshll.u32 %s17064_s0, 4  ;;  %s22_s22 = sshll.u32 %s17075_s1, 4  ;;  %s18_s19 = int_to_ptr.vmem [resolvable:$true] %s17_s19  ;;  %s23_s22 = int_to_ptr.vmem [resolvable:$true] %s22_s22 }
   0x2   :  { %20 = dma.vmem_to_smem %s18_s19, 16, %s11122_s23, [#allocation3] }
   0x3   :  { %25 = dma.vmem_to_smem %s23_s22, 16, %s11123_s24, [#allocation3] }
   0x4   :  { %11084 = dma.done.wait [#allocation3], 32 }
   0x5   :  { %11085 = vsyncadd [#allocation3], 4294967264 }
   0x6   :  { %28 = sfence }
   0x7   :  { %29 = vsyncpa [#allocation7], 0 }
   0x8   :  { %31 = vsyncpa [#allocation7 + $0x1], 0  ;;  %s11196_s25 = smov 0   ;;  %s11198_s26 = smov 0  }
   0x9   :  { %s11200_s0 = smov 0   ;;  %s11202_s27 = smov 0  }
   0xa   :  { %s11204_s1 = smov 0   ;;  %s11206_s28 = smov 0  }
   0xb   :  { %s11208_s29 = smov 0   ;;  %s11210_s30 = smov 0  }
   0xc LB: > { %17265 = sst [smem:[#allocation10_spill]] %s11092_s25  ;;  %s8994_s12 = sadd.s32 4294967295, %s11120_s30   ;;  %s11120_s30 = sphi %s11210_s30, %s37_s30   ;;  %s11116_s29 = sphi %s11208_s29, %s18596_s29   ;;  %s11112_s28 = sphi %s11206_s28, %s18595_s28   ;;  %s11108_s1 = sphi %s11204_s1, %s18594_s1   ;;  %s11104_s27 = sphi %s11202_s27, %s18593_s27   ;;  %s11100_s0 = sphi %s11200_s0, %s18592_s0   ;;  %s11096_s26 = sphi %s11198_s26, %s18598_s26   ;;  %s11092_s25 = sphi %s11196_s25, %s18597_s25  }
   0xd   : > { %17266 = sst [smem:[#allocation11_spill]] %s11100_s0  ;;  %s8995_s13 = sadd.s32 4294967294, %s11120_s30  }
   0xe   : > { %17267 = sst [smem:[#allocation12_spill]] %s11112_s28  ;;  %s46_s14 = sadd.s32 1, %s11112_s28 }
   0xf   : > { %17268 = sst [smem:[#allocation13_spill]] %s11116_s29  ;;  %p47_p0 = scmp.ge.s32.totalorder %s46_s14, 2 }
  0x10   : > { %17269 = sst [smem:[#allocation14_spill]] %s11120_s30  ;;  %s49_s15 = sadd.s32 1, %s11116_s29 }
  0x11   : > { %p304_p1 = scmp.ne.s32.totalorder %s11100_s0, %s11096_s26  ;;  %p305_p2 = scmp.eq.s32.totalorder %s8994_s12, 3 }
  0x12   : > { %s18600_s14 = smov (%p47_p0, %s46_s14), 0  ;;  %s18602_s15 = smov (!%p47_p0, %s49_s15), %s11116_s29 }
  0x13   : > { %17270 = sst [smem:[#allocation15_spill]] %s18600_s14  ;;  %p11245_p3 = por %p305_p2, %p304_p1 }
  0x14   : > { %p310_p4 = scmp.ne.s32.totalorder %s11096_s26, %s11092_s25  ;;  %p51_p5 = scmp.ge.s32.totalorder %s18602_s15, 2 }
  0x15   : > { %p311_p6 = scmp.eq.s32.totalorder %s8995_s13, 3  ;;  %p8998_p7 = scmp.ge.s32.totalorder %s11120_s30, 1 }
  0x16   : > { %p409_p8 = scmp.lt.s32.totalorder %s11120_s30, 5  ;;  %s18604_s15 = smov (%p51_p5, %s18602_s15), 0 }
  0x17   : > { %17272 = sst [smem:[#allocation16_spill]] %s18604_s15  ;;  %p11255_p9 = por %p311_p6, %p310_p4 }
  0x18   : > { %p410_p10 = pnand %p8998_p7, %p409_p8  ;;  %s291_s18 = ssub.s32 %s11116_s29, %s18604_s15 }
  0x19   : > { %s17273_s17 = scalar_select %p11255_p9, 1, 0 }
  0x1a   : > { %s294_s19 = sadd.s32 1, %s11100_s0  ;;  %p292_p11 = scmp.eq.s32.totalorder %s291_s18, 0 }
  0x1b   : > { %17274 = sst [smem:[#allocation17_spill]] %s17273_s17  ;;  %413 = sbr.rel (%p410_p10) target bundleno = 2989 (0xbad), region = 56 }
  0x1c   : > { %s11263_s20 = scalar_select %p292_p11, %s11100_s0, %s294_s19  }
  0x1d   : > { %s17078_s21 = sand.u32 (!%p410_p10), 1, %s11096_s26   ;;  %s476_s22 = sld [smem:[#allocation4 + %s11108_s1]] (!%p410_p10) }
  0x1e   : > { %17275 = sst [smem:[#allocation18_spill]] %s11263_s20  ;;  %s11269_s23 = sshll.u32 (!%p410_p10), %s17078_s21, 8 }
  0x1f   : > { %s489_s24 = sld [smem:[#allocation4 + %s11108_s1]] (!%p410_p10)  ;;  %s9005_s14 = sshll.u32 (!%p410_p10), %s11108_s1, 5 }
  0x20   : > { %s503_s12 = sld [smem:[#allocation4 + %s11108_s1]]  ;;  %p518_p4 = scmp.lt.s32.totalorder %s9005_s14, 63 }
  0x21   : > { %p9009_p6 = scmp.ne.s32.totalorder %s11104_s27, 0 }
  0x22   : > { %s18616_s14 = smov (!%p518_p4, %s9005_s14), 63 }
  0x23   : > { %s477_s13 = sadd.s32 %s11104_s27, %s476_s22 }
  0x24   : > { %p478_p12 = scmp.lt.s32.totalorder %s477_s13, 1 }
  0x25   : > { %s490_s18 = sadd.s32 %s11104_s27, %s489_s24 }
  0x26   : > { %p491_p13 = scmp.lt.s32.totalorder %s490_s18, 1  ;;  %s504_s19 = sadd.s32 %s11104_s27, %s503_s12 }
  0x27   : > { %s18606_s13 = smov (!%p478_p12, %s477_s13), 1  ;;  %p505_p2 = scmp.lt.s32.totalorder %s504_s19, 1 }
  0x28   : > { %s18608_s18 = smov (!%p491_p13, %s490_s18), 1  ;;  %s9000_s15 = sshll.u32 %s18606_s13, 4 }
  0x29   : > { %p481_p0 = scmp.lt.s32.totalorder %s9000_s15, 31  ;;  %s9001_s29 = sshll.u32 %s18608_s18, 8 }
  0x2a   : > { %p494_p1 = scmp.lt.s32.totalorder %s9001_s29, 511  ;;  %s18614_s19 = smov (!%p505_p2, %s504_s19), 1 }
  0x2b   : > { %s18610_s15 = smov (!%p481_p0, %s9000_s15), 31  ;;  %s9003_s13 = sshll.u32 %s18614_s19, 8 }
  0x2c   : > { %s18612_s29 = smov (!%p494_p1, %s9001_s29), 511  ;;  %s11280_s20 = scalar_lea.vmem %s17065_s2, %s18610_s15 }
  0x2d   : > { %s9002_s22 = sshll.u32 %s18612_s29, 3  ;;  %p508_p5 = scmp.lt.s32.totalorder %s9003_s13, 511 }
  0x2e   : > { %s11285_s0 = scalar_lea.vmem %s17066_s3, %s9002_s22  ;;  %s9006_s18 = sshll.u32 %s18616_s14, 3 }
  0x2f   : > { %s11290_s30 = scalar_lea.vmem %s17068_s5, %s9006_s18  ;;  %s11295_s21 = scalar_lea.vmem %s17069_s6, %s9006_s18 }
  0x30   : > { %s18618_s13 = smov (!%p508_p5, %s9003_s13), 511  ;;  %s11303_s19 = scalar_lea.vmem [#allocation6], %s11269_s23 }
  0x31   : > { %s9004_s29 = sshll.u32 %s18618_s13, 2  ;;  %534 = sbr.rel (%p9009_p6) target bundleno = 87 (0x57), region = 60 }
  0x32   : > { %s11300_s12 = scalar_lea.vmem %s17067_s4, %s9004_s29 }
  0x36   : > { %v11124_v0 = vmov 0.0  }
  0x37   : > { %535 = vst [vmem:[#allocation2 + $0xb0] sm:$0xff] %v11124_v0 }
  0x38   : > { %536 = vst [vmem:[#allocation2] sm:$0xff] %v11124_v0 }
  0x39   : > { %537 = vst [vmem:[#allocation2 + $0xd8] sm:$0xff] %v11124_v0 }
  0x3a   : > { %538 = vst [vmem:[#allocation2 + $0x18] sm:$0xff] %v11124_v0 }
  0x3b   : > { %539 = vst [vmem:[#allocation2 + $0x50] sm:$0xff] %v11124_v0 }
  0x3c   : > { %540 = vst [vmem:[#allocation2 + $0x68] sm:$0xff] %v11124_v0 }
  0x3d   : > { %541 = vst [vmem:[#allocation2 + $0x30] sm:$0xff] %v11124_v0 }
  0x3e   : > { %542 = vst [vmem:[#allocation2 + $0x48] sm:$0xff] %v11124_v0 }
  0x3f   : > { %543 = vst [vmem:[#allocation2 + $0x80] sm:$0xff] %v11124_v0 }
  0x40   : > { %544 = vst [vmem:[#allocation2 + $0x88] sm:$0xff] %v11124_v0 }
  0x41   : > { %545 = vst [vmem:[#allocation2 + $0xe8] sm:$0xff] %v11124_v0 }
  0x42   : > { %546 = vst [vmem:[#allocation2 + $0xb8] sm:$0xff] %v11124_v0 }
  0x43   : > { %547 = vst [vmem:[#allocation2 + $0x60] sm:$0xff] %v11124_v0 }
  0x44   : > { %548 = vst [vmem:[#allocation2 + $0xf0] sm:$0xff] %v11124_v0 }
  0x45   : > { %549 = vst [vmem:[#allocation2 + $0x8] sm:$0xff] %v11124_v0 }
  0x46   : > { %550 = vst [vmem:[#allocation2 + $0x78] sm:$0xff] %v11124_v0 }
  0x47   : > { %551 = vst [vmem:[#allocation2 + $0x38] sm:$0xff] %v11124_v0 }
  0x48   : > { %552 = vst [vmem:[#allocation2 + $0x58] sm:$0xff] %v11124_v0 }
  0x49   : > { %553 = vst [vmem:[#allocation2 + $0x40] sm:$0xff] %v11124_v0 }
  0x4a   : > { %554 = vst [vmem:[#allocation2 + $0xc8] sm:$0xff] %v11124_v0 }
  0x4b   : > { %555 = vst [vmem:[#allocation2 + $0xe0] sm:$0xff] %v11124_v0 }
  0x4c   : > { %556 = vst [vmem:[#allocation2 + $0x90] sm:$0xff] %v11124_v0 }
  0x4d   : > { %557 = vst [vmem:[#allocation2 + $0x70] sm:$0xff] %v11124_v0 }
  0x4e   : > { %558 = vst [vmem:[#allocation2 + $0xc0] sm:$0xff] %v11124_v0 }
  0x4f   : > { %559 = vst [vmem:[#allocation2 + $0xa8] sm:$0xff] %v11124_v0 }
  0x50   : > { %560 = vst [vmem:[#allocation2 + $0xd0] sm:$0xff] %v11124_v0 }
  0x51   : > { %561 = vst [vmem:[#allocation2 + $0x10] sm:$0xff] %v11124_v0 }
  0x52   : > { %562 = vst [vmem:[#allocation2 + $0x28] sm:$0xff] %v11124_v0 }
  0x53   : > { %563 = vst [vmem:[#allocation2 + $0xa0] sm:$0xff] %v11124_v0 }
  0x54   : > { %564 = vst [vmem:[#allocation2 + $0xf8] sm:$0xff] %v11124_v0 }
  0x55   : > { %565 = vst [vmem:[#allocation2 + $0x20] sm:$0xff] %v11124_v0 }
  0x56   : > { %566 = vst [vmem:[#allocation2 + $0x98] sm:$0xff] %v11124_v0 }
  0x57 PF: > { %s567_s25 = sld [smem:[#allocation5 + %s11108_s1]] }
  0x5d   : > { %p9010_p7 = scmp.ge.s32.totalorder %s11104_s27, %s567_s25 }
  0x5f   : > { %571 = sbr.rel (%p9010_p7) target bundleno = 2695 (0xa87), region = 64 }
  0x64   : > { %v2800_v1 = vld [vmem:[%s11285_s0 + $0x70] sm:$0xff]  ;;  %v2798_v2 = vld [vmem:[%s11285_s0 + $0x60] sm:$0xff]  ;;  %v11125_v4 = vmov 0   ;;  %vm1877_vm0 = vcmask 1041408   ;;  %v2799_v9 = vld [vmem:[%s11285_s0 + $0x68] sm:$0xff]  ;;  %vm1492_vm1 = vcmask 293888  }
  0x65   : > { %v2796_v3 = vld [vmem:[%s11285_s0 + $0x50] sm:$0xff]  ;;  %10985 = vset.pattern.permute.xlu2 %v11125_v4  ;;  %10984 = vset.pattern.permute.xlu1 %v11125_v4  ;;  %v2801_v10 = vld [vmem:[%s11285_s0 + $0x78] sm:$0xff]  ;;  %v10883_v12 = vld [vmem:[%s17070_s7 + $0x8] sm:$0xff]  ;;  %s9659_s25 = sshll.u32 %s11108_s1, 8 }
  0x66   : > { %v832_v5 = vld [vmem:[%s17070_s7 + $0x10] sm:$0x3]  ;;  %10983 = vset.pattern.permute.xlu0 %v11125_v4  ;;  %3104 = vperm.xlu1 %10984, %v2798_v2   ;;  %v2797_v11 = vld [vmem:[%s11285_s0 + $0x58] sm:$0xff]  ;;  %v10882_v13 = vld [vmem:[%s17070_s7] sm:$0xff] }
  0x67   : > { %v1486_v6 = vunpack.c.l.b16 %v832_v5  ;;  %3114 = vperm.xlu0 %10983, %v2800_v1   ;;  %3094 = vperm.xlu2 %10985, %v2796_v3   ;;  %v10754_v14 = vld [vmem:[%s11300_s12] sm:$0xff]  ;;  %v2833_v15 = vld [vmem:[%s11285_s0 + $0x178] sm:$0xff]  ;;  %v2832_v16 = vld [vmem:[%s11285_s0 + $0x170] sm:$0xff] }
  0x68   : > { %v2794_v17 = vld [vmem:[%s11285_s0 + $0x40] sm:$0xff]  ;;  %v2795_v19 = vld [vmem:[%s11285_s0 + $0x48] sm:$0xff]  ;;  %v2793_v22 = vld [vmem:[%s11285_s0 + $0x38] sm:$0xff] }
  0x69   : > { %v1489_v7 = vpack.c.b16 %v1486_v6, %v1486_v6  ;;  %v2830_v18 = vld [vmem:[%s11285_s0 + $0x160] sm:$0xff]  ;;  %v2831_v20 = vld [vmem:[%s11285_s0 + $0x168] sm:$0xff]  ;;  %v2792_v23 = vld [vmem:[%s11285_s0 + $0x30] sm:$0xff] }
  0x6a   : > { %v10755_v21 = vld [vmem:[%s11300_s12 + $0x8] sm:$0xff]  ;;  %v2828_v24 = vld [vmem:[%s11285_s0 + $0x150] sm:$0xff]  ;;  %v2790_v25 = vld [vmem:[%s11285_s0 + $0x20] sm:$0xff] }
  0x6b   : > { %v1879_v8 = vsel %vm1877_vm0, %v1489_v7, 0  ;;  %v2829_v26 = vld [vmem:[%s11285_s0 + $0x158] sm:$0xff]  ;;  %v2791_v27 = vld [vmem:[%s11285_s0 + $0x28] sm:$0xff]  ;;  %v10756_v28 = vld [vmem:[%s11300_s12 + $0x10] sm:$0xff] }
  0x6c   : > { %1886 = vmatpush.bf16.msra.mxu0 %v1879_v8  ;;  %10885 = vmatpush.bf16.msra.mxu2 %v1879_v8  ;;  %v2827_v29 = vld [vmem:[%s11285_s0 + $0x148] sm:$0xff]  ;;  %v2826_v30 = vld [vmem:[%s11285_s0 + $0x140] sm:$0xff]  ;;  %v2788_v31 = vld [vmem:[%s11285_s0 + $0x10] sm:$0xff] }
  0x6d   : > { %v2824_v32 = vld [vmem:[%s11285_s0 + $0x130] sm:$0xff]  ;;  %v2789_v33 = vld [vmem:[%s11285_s0 + $0x18] sm:$0xff]  ;;  %v2787_v36 = vld [vmem:[%s11285_s0 + $0x8] sm:$0xff] }
  0x6e   : > { %3109 = vperm.xlu1 %10984, %v2799_v9   ;;  %v2825_v34 = vld [vmem:[%s11285_s0 + $0x138] sm:$0xff]  ;;  %v2786_v37 = vld [vmem:[%s11285_s0] sm:$0xff]  ;;  %v2820_v39 = vld [vmem:[%s11285_s0 + $0x110] sm:$0xff] }
  0x6f   : > { %3119 = vperm.xlu0 %10983, %v2801_v10   ;;  %3099 = vperm.xlu2 %10985, %v2797_v11   ;;  %v10757_v35 = vld [vmem:[%s11300_s12 + $0x18] sm:$0xff]  ;;  %v2822_v38 = vld [vmem:[%s11285_s0 + $0x120] sm:$0xff]  ;;  %v2823_v40 = vld [vmem:[%s11285_s0 + $0x128] sm:$0xff] }
  0x70   : > { %1887 = vmatpush.bf16.msra.mxu0 %v10883_v12  ;;  %10886 = vmatpush.bf16.msra.mxu2 %v10883_v12  ;;  %v2821_v41 = vld [vmem:[%s11285_s0 + $0x118] sm:$0xff]  ;;  %v10758_v42 = vld [vmem:[%s11300_s12 + $0x20] sm:$0xff]  ;;  %v2819_v43 = vld [vmem:[%s11285_s0 + $0x108] sm:$0xff] }
  0x71   : > { %v2818_v44 = vld [vmem:[%s11285_s0 + $0x100] sm:$0xff]  ;;  %v2848_v45 = vld [vmem:[%s11285_s0 + $0x1f0] sm:$0xff]  ;;  %v2849_v47 = vld [vmem:[%s11285_s0 + $0x1f8] sm:$0xff] }
  0x72   : > { %v2846_v46 = vld [vmem:[%s11285_s0 + $0x1e0] sm:$0xff]  ;;  %v2847_v48 = vld [vmem:[%s11285_s0 + $0x1e8] sm:$0xff]  ;;  %v2845_v51 = vld [vmem:[%s11285_s0 + $0x1d8] sm:$0xff] }
  0x73   : > { %v10759_v50 = vld [vmem:[%s11300_s12 + $0x28] sm:$0xff]  ;;  %v2844_v52 = vld [vmem:[%s11285_s0 + $0x1d0] sm:$0xff]  ;;  %v2842_v55 = vld [vmem:[%s11285_s0 + $0x1c0] sm:$0xff] }
  0x74   : > { %1888 = vmatpush.bf16.msra.mxu0 %v10882_v13  ;;  %10887 = vmatpush.bf16.msra.mxu2 %v10882_v13  ;;  %v2880_v53 = vld [vmem:[%s11285_s0 + $0x2f0] sm:$0xff]  ;;  %v2881_v56 = vld [vmem:[%s11285_s0 + $0x2f8] sm:$0xff]  ;;  %v2843_v57 = vld [vmem:[%s11285_s0 + $0x1c8] sm:$0xff] }
  0x75   : > { %v10760_v59 = vld [vmem:[%s11300_s12 + $0x30] sm:$0xff]  ;;  %v2879_v60 = vld [vmem:[%s11285_s0 + $0x2e8] sm:$0xff]  ;;  %v2878_v61 = vld [vmem:[%s11285_s0 + $0x2e0] sm:$0xff] }
  0x76   : > { %3279 = vperm.xlu1 %10984, %v2833_v15   ;;  %v2840_v62 = vld [vmem:[%s11285_s0 + $0x1b0] sm:$0xff]  ;;  %v2841_v3 = vld [vmem:[%s11285_s0 + $0x1b8] sm:$0xff]  ;;  %v2839_v9 = vld [vmem:[%s11285_s0 + $0x1a8] sm:$0xff] }
  0x77   : > { %9531 = vmatmul.msk.bf16.vlgmr.msra.gmra.mxu0 %vm1492_vm1, %v10754_v14  ;;  %3274 = vperm.xlu0 %10983, %v2832_v16   ;;  %v2876_v2 = vld [vmem:[%s11285_s0 + $0x2d0] sm:$0xff]  ;;  %v2877_v4 = vld [vmem:[%s11285_s0 + $0x2d8] sm:$0xff]  ;;  %v2838_v10 = vld [vmem:[%s11285_s0 + $0x1a0] sm:$0xff] }
  0x78   : > { %3084 = vperm.xlu2 %10985, %v2794_v17   ;;  %v10761_v8 = vld [vmem:[%s11300_s12 + $0x38] sm:$0xff]  ;;  %v2874_v11 = vld [vmem:[%s11285_s0 + $0x2c0] sm:$0xff]  ;;  %v2836_v15 = vld [vmem:[%s11285_s0 + $0x190] sm:$0xff] }
  0x79   : > { %v2875_v16 = vld [vmem:[%s11285_s0 + $0x2c8] sm:$0xff]  ;;  %v2837_v17 = vld [vmem:[%s11285_s0 + $0x198] sm:$0xff] }
  0x7e   : > { %3264 = vperm.xlu1 %10984, %v2830_v18  }
  0x7f   : > { %3089 = vperm.xlu0 %10983, %v2795_v19  }
  0x80   : > { %3269 = vperm.xlu2 %10985, %v2831_v20  }
  0x86   : > { %3079 = vperm.xlu1 %10984, %v2793_v22   ;;  %v10762_v22 = vld [vmem:[%s11300_s12 + $0x40] sm:$0xff] }
  0x87   : > { %9532 = vmatmul.msk.bf16.gmra.mxu0 %vm1492_vm1, %v10755_v21  ;;  %3074 = vperm.xlu0 %10983, %v2792_v23   ;;  %v10851_v21 = vld [vmem:[%s11300_s12 + $0x308] sm:$0xff]  ;;  %v2873_v23 = vld [vmem:[%s11285_s0 + $0x2b8] sm:$0xff] }
  0x88   : > { %3254 = vperm.xlu2 %10985, %v2828_v24   ;;  %9628 = vmatmul.msk.bf16.vlgmr.msra.gmra.mxu2 %vm1492_vm1, %v10851_v21 }
  0x8e   : > { %3064 = vperm.xlu1 %10984, %v2790_v25   ;;  %v2872_v25 = vld [vmem:[%s11285_s0 + $0x2b0] sm:$0xff] }
  0x8f   : > { %3259 = vperm.xlu0 %10983, %v2829_v26   ;;  %v2834_v26 = vld [vmem:[%s11285_s0 + $0x180] sm:$0xff] }
  0x90   : > { %3069 = vperm.xlu2 %10985, %v2791_v27  }
  0x96   : > { %3249 = vperm.xlu1 %10984, %v2827_v29  }
  0x97   : > { %9533 = vmatmul.msk.bf16.gmra.mxu0 %vm1492_vm1, %v10756_v28  ;;  %3244 = vperm.xlu0 %10983, %v2826_v30   ;;  %v2870_v30 = vld [vmem:[%s11285_s0 + $0x2a0] sm:$0xff] }
  0x98   : > { %3054 = vperm.xlu2 %10985, %v2788_v31  }
  0x9e   : > { %3234 = vperm.xlu1 %10984, %v2824_v32   ;;  %v2835_v32 = vld [vmem:[%s11285_s0 + $0x188] sm:$0xff] }
  0x9f   : > { %3059 = vperm.xlu0 %10983, %v2789_v33   ;;  %v2871_v33 = vld [vmem:[%s11285_s0 + $0x2a8] sm:$0xff] }
  0xa0   : > { %3239 = vperm.xlu2 %10985, %v2825_v34  }
  0xa6   : > { %3049 = vperm.xlu1 %10984, %v2787_v36  }
  0xa7   : > { %9534 = vmatmul.msk.bf16.gmra.mxu0 %vm1492_vm1, %v10757_v35  ;;  %3044 = vperm.xlu0 %10983, %v2786_v37   ;;  %v10852_v37 = vld [vmem:[%s11300_s12 + $0x310] sm:$0xff] }
  0xa8   : > { %3224 = vperm.xlu2 %10985, %v2822_v38   ;;  %v10763_v38 = vld [vmem:[%s11300_s12 + $0x48] sm:$0xff]  ;;  %9629 = vmatmul.msk.bf16.gmra.mxu2 %vm1492_vm1, %v10852_v37 }
  0xae   : > { %3214 = vperm.xlu1 %10984, %v2820_v39   ;;  %v2869_v39 = vld [vmem:[%s11285_s0 + $0x298] sm:$0xff] }
  0xaf   : > { %3229 = vperm.xlu0 %10983, %v2823_v40  }
  0xb0   : > { %3219 = vperm.xlu2 %10985, %v2821_v41   ;;  %v2868_v41 = vld [vmem:[%s11285_s0 + $0x290] sm:$0xff] }
  0xb6   : > { %3209 = vperm.xlu1 %10984, %v2819_v43   ;;  %v11447_v43 = vld [vmem:[%s17071_s8] ss:$0 sm:$0xff] }
  0xb7   : > { %9535 = vmatmul.msk.bf16.gmra.mxu0 %vm1492_vm1, %v10758_v42  ;;  %3204 = vperm.xlu0 %10983, %v2818_v44   ;;  %v2866_v42 = vld [vmem:[%s11285_s0 + $0x280] sm:$0xff] }
  0xb8   : > { %3354 = vperm.xlu2 %10985, %v2848_v45  }
  0xbe   : > { %3344 = vperm.xlu1 %10984, %v2846_v46  }
  0xbf   : > { %3359 = vperm.xlu0 %10983, %v2849_v47  }
  0xc0   : > { %3349 = vperm.xlu2 %10985, %v2847_v48   ;;  %v2816_v48 = vld [vmem:[%s11285_s0 + $0xf0] sm:$0xff] }
  0xc1   : > { %v11363_v49 = vpop.permute.xlu2 %3094 }
  0xc6   : > { %3339 = vperm.xlu1 %10984, %v2845_v51   ;;  %v2867_v51 = vld [vmem:[%s11285_s0 + $0x288] sm:$0xff] }
  0xc7   : > { %9536 = vmatmul.msk.bf16.gmra.mxu0 %vm1492_vm1, %v10759_v50  ;;  %3334 = vperm.xlu0 %10983, %v2844_v52  }
  0xc8   : > { %3514 = vperm.xlu2 %10985, %v2880_v53   ;;  %v2817_v53 = vld [vmem:[%s11285_s0 + $0xf8] sm:$0xff] }
  0xc9   : > { %v11370_v54 = vpop.permute.xlu2 %3099 }
  0xce   : > { %3324 = vperm.xlu1 %10984, %v2842_v55  }
  0xcf   : > { %3519 = vperm.xlu0 %10983, %v2881_v56  }
  0xd0   : > { %3329 = vperm.xlu2 %10985, %v2843_v57  }
  0xd2   : > { %v11375_v58 = vpop.permute.xlu2 %3084 }
  0xd6   : > { %3509 = vperm.xlu1 %10984, %v2879_v60  }
  0xd7   : > { %9537 = vmatmul.msk.bf16.gmra.mxu0 %vm1492_vm1, %v10760_v59  ;;  %3504 = vperm.xlu0 %10983, %v2878_v61  }
  0xd8   : > { %3314 = vperm.xlu2 %10985, %v2840_v62   ;;  %v11382_v63 = vpop.permute.xlu1 %3104 }
  0xd9   : > { %v11384_v0 = vpop.permute.xlu0 %3114 }
  0xda   : > { %v11386_v1 = vpop.permute.xlu2 %3269 }
  0xde   : > { %3494 = vperm.xlu1 %10984, %v2876_v2   ;;  %v10853_v2 = vld [vmem:[%s11300_s12 + $0x318] sm:$0xff] }
  0xdf   : > { %3319 = vperm.xlu0 %10983, %v2841_v3   ;;  %9630 = vmatmul.msk.bf16.gmra.mxu2 %vm1492_vm1, %v10853_v2 }
  0xe0   : > { %3499 = vperm.xlu2 %10985, %v2877_v4   ;;  %v11391_v5 = vpop.permute.xlu1 %3109  ;;  %v10764_v4 = vld [vmem:[%s11300_s12 + $0x50] sm:$0xff] }
  0xe1   : > { %v11393_v6 = vpop.permute.xlu0 %3119 }
  0xe2   : > { %v11395_v7 = vpop.permute.xlu2 %3254 }
  0xe6   : > { %3309 = vperm.xlu1 %10984, %v2839_v9  }
  0xe7   : > { %9538 = vmatmul.msk.bf16.gmra.mxu0 %vm1492_vm1, %v10761_v8  ;;  %3304 = vperm.xlu0 %10983, %v2838_v10   ;;  %v2815_v8 = vld [vmem:[%s11285_s0 + $0xe8] sm:$0xff] }
  0xe8   : > { %3484 = vperm.xlu2 %10985, %v2874_v11   ;;  %v11402_v12 = vpop.permute.xlu1 %3279  ;;  %v2814_v11 = vld [vmem:[%s11285_s0 + $0xe0] sm:$0xff] }
  0xe9   : > { %v11404_v13 = vpop.permute.xlu0 %3274 }
  0xea   : > { %v11406_v14 = vpop.permute.xlu2 %3069 }
  0xee   : > { %3294 = vperm.xlu1 %10984, %v2836_v15  }
  0xef   : > { %3489 = vperm.xlu0 %10983, %v2875_v16   ;;  %v2812_v16 = vld [vmem:[%s11285_s0 + $0xd0] sm:$0xff] }
  0xf0   : > { %3299 = vperm.xlu2 %10985, %v2837_v17   ;;  %v11411_v18 = vpop.permute.xlu1 %3264 }
  0xf1   : > { %v11413_v19 = vpop.permute.xlu0 %3089 }
  0xf2   : > { %v3055_v20 = vpop.permute.xlu2 %3054 }
  0xf4   : > { %v1890_v24 = vpop.f32.mrf.mxu0 }
  0xf5   : > { %v1891_v9 = vadd.f32 %v11447_v43, %v1890_v24 }
  0xf6   : > { %3479 = vperm.xlu1 %10984, %v2873_v23  }
  0xf7   : > { %9539 = vmatmul.msk.bf16.gmra.mxu0 %vm1492_vm1, %v10762_v22  ;;  %3474 = vperm.xlu0 %10983, %v2872_v25  }
  0xf8   : > { %3284 = vperm.xlu2 %10985, %v2834_v26   ;;  %v11422_v27 = vpop.permute.xlu1 %3079 }
  0xf9   : > { %v11424_v28 = vpop.permute.xlu0 %3074 }
  0xfa   : > { %v11426_v29 = vpop.permute.xlu2 %3239 }
  0xfc   : > { %v1892_v31 = vpop.f32.mrf.mxu0 }
  0xfd   : > { %v1893_v3 = vadd.f32 %v11447_v43, %v1892_v31 }
  0xfe   : > { %3464 = vperm.xlu1 %10984, %v2870_v30   ;;  %v2810_v30 = vld [vmem:[%s11285_s0 + $0xc0] sm:$0xff] }
  0xff   : > { %3289 = vperm.xlu0 %10983, %v2835_v32   ;;  %v2531_v17 = vmax.f32 %v1893_v3, 0.0  ;;  %v2813_v32 = vld [vmem:[%s11285_s0 + $0xd8] sm:$0xff] }
 0x100   : > { %3469 = vperm.xlu2 %10985, %v2871_v33   ;;  %v11431_v34 = vpop.permute.xlu1 %3064  ;;  %v2897_v33 = vld [vmem:[%s11285_s0 + $0x378] sm:$0xff] }
 0x101   : > { %v11433_v35 = vpop.permute.xlu0 %3259 }
 0x102   : > { %v11435_v36 = vpop.permute.xlu2 %3224 }
 0x104   : > { %v1895_v40 = vpop.f32.mrf.mxu0 }
 0x105   : > { %v1896_v46 = vadd.f32 %v11447_v43, %v1895_v40 }
 0x106   : > { %3459 = vperm.xlu1 %10984, %v2869_v39   ;;  %v2811_v39 = vld [vmem:[%s11285_s0 + $0xc8] sm:$0xff] }
 0x107   : > { %9540 = vmatmul.msk.bf16.gmra.mxu0 %vm1492_vm1, %v10763_v38  ;;  %3454 = vperm.xlu0 %10983, %v2868_v41   ;;  %v2532_v55 = vmax.f32 %v1896_v46, 0.0 }
 0x108   : > { %3444 = vperm.xlu2 %10985, %v2866_v42   ;;  %v11449_v44 = vpop.permute.xlu1 %3249 }
 0x109   : > { %v11451_v45 = vpop.permute.xlu0 %3244  ;;  %v11462_v60 = vmul.f32 %v3055_v20, %v2532_v55  ;;  %v2530_v20 = vmax.f32 %v1891_v9, 0.0 }
 0x10a   : > { %v11454_v47 = vpop.permute.xlu2 %3219 }
 0x10c   : > { %v1897_v50 = vpop.f32.mrf.mxu0 }
 0x10d   : > { %v1898_v52 = vadd.f32 %v11447_v43, %v1897_v50 }
 0x10e   : > { %3194 = vperm.xlu1 %10984, %v2816_v48  }
 0x10f   : > { %3449 = vperm.xlu0 %10983, %v2867_v51   ;;  %v2533_v56 = vmax.f32 %v1898_v52, 0.0  ;;  %v10854_v51 = vld [vmem:[%s11300_s12 + $0x320] sm:$0xff]  ;;  %v10765_v52 = vld [vmem:[%s11300_s12 + $0x58] sm:$0xff] }
 0x110   : > { %3199 = vperm.xlu2 %10985, %v2817_v53   ;;  %v11460_v57 = vpop.permute.xlu1 %3234  ;;  %v2809_v53 = vld [vmem:[%s11285_s0 + $0xb8] sm:$0xff]  ;;  %9631 = vmatmul.msk.bf16.gmra.mxu2 %vm1492_vm1, %v10854_v51 }
 0x111   : > { %v3060_v59 = vpop.permute.xlu0 %3059 }
 0x112   : > { %v11464_v61 = vmul.f32 %v3060_v59, %v2533_v56  ;;  %v11466_v62 = vpop.permute.xlu2 %3354  ;;  %v2808_v59 = vld [vmem:[%s11285_s0 + $0xb0] sm:$0xff] }
 0x114   : > { %v1900_v10 = vpop.f32.mrf.mxu0 }
 0x115   : > { %v1901_v22 = vadd.f32 %v11447_v43, %v1900_v10  ;;  %v2807_v10 = vld [vmem:[%s11285_s0 + $0xa8] sm:$0xff] }
 0x116   : > { %3189 = vperm.xlu1 %10984, %v2815_v8   ;;  %v2804_v8 = vld [vmem:[%s11285_s0 + $0x90] sm:$0xff] }
 0x117   : > { %9541 = vmatmul.msk.bf16.gmra.mxu0 %vm1492_vm1, %v10764_v4  ;;  %3184 = vperm.xlu0 %10983, %v2814_v11   ;;  %v2534_v37 = vmax.f32 %v1901_v22, 0.0 }
 0x118   : > { %3174 = vperm.xlu2 %10985, %v2812_v16   ;;  %v3050_v21 = vpop.permute.xlu1 %3049 }
 0x119   : > { %v11480_v23 = vmul.f32 %v3050_v21, %v2531_v17  ;;  %v3045_v24 = vpop.permute.xlu0 %3044  ;;  %v11495_v42 = vmul.f32 %v11431_v34, %v2534_v37  ;;  %v2806_v34 = vld [vmem:[%s11285_s0 + $0xa0] sm:$0xff]  ;;  %v2805_v17 = vld [vmem:[%s11285_s0 + $0x98] sm:$0xff] }
 0x11a   : > { %v11482_v25 = vpop.permute.xlu2 %3349  ;;  %v11484_v26 = vmul.f32 %v3045_v24, %v2530_v20  ;;  %v10766_v37 = vld [vmem:[%s11300_s12 + $0x60] sm:$0xff] }
 0x11b   : > { %17276 = vst [vmem:[#allocation19_spill] sm:$0xff] %v11482_v25  ;;  %v10867_v25 = vld [vmem:[%s11300_s12 + $0x388] sm:$0xff] }
 0x11c   : > { %v1902_v31 = vpop.f32.mrf.mxu0 }
 0x11d   : > { %v1903_v38 = vadd.f32 %v11447_v43, %v1902_v31 }
 0x11e   : > { %3164 = vperm.xlu1 %10984, %v2810_v30  }
 0x11f   : > { %v2535_v40 = vmax.f32 %v1903_v38, 0.0  ;;  %3179 = vperm.xlu0 %10983, %v2813_v32   ;;  %v10855_v32 = vld [vmem:[%s11300_s12 + $0x328] sm:$0xff] }
 0x120   : > { %3169 = vperm.xlu2 %10985, %v2811_v39   ;;  %v11492_v41 = vpop.permute.xlu1 %3214  ;;  %9632 = vmatmul.msk.bf16.gmra.mxu2 %vm1492_vm1, %v10855_v32 }
 0x121   : > { %v11497_v46 = vpop.permute.xlu0 %3229  ;;  %v11500_v48 = vmul.f32 %v11406_v14, %v2535_v40  ;;  %v2896_v40 = vld [vmem:[%s11285_s0 + $0x370] sm:$0xff] }
 0x122   : > { %v11502_v50 = vpop.permute.xlu2 %3514 }
 0x123   : > { %17277 = vst [vmem:[#allocation20_spill] sm:$0xff] %v11502_v50 }
 0x124   : > { %v1905_v56 = vpop.f32.mrf.mxu0 }
 0x125   : > { %v1906_v2 = vadd.f32 %v11447_v43, %v1905_v56  ;;  %v2803_v56 = vld [vmem:[%s11285_s0 + $0x88] sm:$0xff] }
 0x126   : > { %3159 = vperm.xlu1 %10984, %v2809_v53  }
 0x127   : > { %9542 = vmatmul.msk.bf16.gmra.mxu0 %vm1492_vm1, %v10765_v52  ;;  %3154 = vperm.xlu0 %10983, %v2808_v59   ;;  %v2536_v11 = vmax.f32 %v1906_v2, 0.0  ;;  %v10856_v2 = vld [vmem:[%s11300_s12 + $0x330] sm:$0xff] }
 0x128   : > { %3144 = vperm.xlu2 %10985, %v2806_v34   ;;  %v11513_v14 = vpop.permute.xlu1 %3209 }
 0x129   : > { %v11516_v3 = vpop.permute.xlu0 %3204  ;;  %v11527_v22 = vmul.f32 %v11424_v28, %v2536_v11  ;;  %v2802_v28 = vld [vmem:[%s11285_s0 + $0x80] sm:$0xff] }
 0x12a   : > { %v11518_v4 = vpop.permute.xlu2 %3329 }
 0x12b   : > { %17278 = vst [vmem:[#allocation21_spill] sm:$0xff] %v11518_v4 }
 0x12c   : > { %v1907_v9 = vpop.f32.mrf.mxu0 }
 0x12d   : > { %v1908_v16 = vadd.f32 %v11447_v43, %v1907_v9 }
 0x12e   : > { %3134 = vperm.xlu1 %10984, %v2804_v8   ;;  %v10767_v8 = vld [vmem:[%s11300_s12 + $0x68] sm:$0xff] }
 0x12f   : > { %v2537_v20 = vmax.f32 %v1908_v16, 0.0  ;;  %3149 = vperm.xlu0 %10983, %v2807_v10  }
 0x130   : > { %3139 = vperm.xlu2 %10985, %v2805_v17   ;;  %v11524_v21 = vpop.permute.xlu1 %3344  ;;  %9633 = vmatmul.msk.bf16.gmra.mxu2 %vm1492_vm1, %v10856_v2 }
 0x131   : > { %17279 = vst [vmem:[#allocation22_spill] sm:$0xff] %v11524_v21  ;;  %v11529_v24 = vpop.permute.xlu0 %3359  ;;  %v11532_v30 = vmul.f32 %v11422_v27, %v2537_v20  ;;  %v10859_v21 = vld [vmem:[%s11300_s12 + $0x348] sm:$0xff] }
 0x132   : > { %v11534_v31 = vpop.permute.xlu2 %3314 }
 0x134   : > { %v11540_v39 = vpop.f32.mrf.mxu0 }
 0x136   : > { %3599 = vperm.xlu1 %10984, %v2897_v33  }
 0x137   : > { %9543 = vmatmul.msk.bf16.gmra.mxu0 %vm1492_vm1, %v10766_v37  ;;  %3594 = vperm.xlu0 %10983, %v2896_v40   ;;  %v10857_v40 = vld [vmem:[%s11300_s12 + $0x338] sm:$0xff] }
 0x138   : > { %3124 = vperm.xlu2 %10985, %v2802_v28   ;;  %v11546_v27 = vpop.permute.xlu1 %3339  ;;  %v10768_v28 = vld [vmem:[%s11300_s12 + $0x70] sm:$0xff] }
 0x139   : > { %17280 = vst [vmem:[#allocation23_spill] sm:$0xff] %v11546_v27  ;;  %v11548_v51 = vpop.permute.xlu0 %3334 }
 0x13a   : > { %17281 = vst [vmem:[#allocation24_spill] sm:$0xff] %v11548_v51  ;;  %v11550_v52 = vpop.permute.xlu2 %3499 }
 0x13b   : > { %17282 = vst [vmem:[#allocation25_spill] sm:$0xff] %v11550_v52  ;;  %v2892_v52 = vld [vmem:[%s11285_s0 + $0x350] sm:$0xff] }
 0x13c   : > { %v11552_v53 = vpop.f32.mrf.mxu0 }
 0x13f   : > { %3129 = vperm.xlu0 %10983, %v2803_v56  }
 0x140   : > { %v11555_v59 = vpop.permute.xlu1 %3324  ;;  %9634 = vmatmul.msk.bf16.gmra.mxu2 %vm1492_vm1, %v10857_v40  ;;  %v10858_v40 = vld [vmem:[%s11300_s12 + $0x340] sm:$0xff] }
 0x141   : > { %17283 = vst [vmem:[#allocation26_spill] sm:$0xff] %v11555_v59  ;;  %v11557_v34 = vpop.permute.xlu0 %3519  ;;  %v2929_v59 = vld [vmem:[%s11285_s0 + $0x478] sm:$0xff] }
 0x142   : > { %17284 = vst [vmem:[#allocation27_spill] sm:$0xff] %v11557_v34  ;;  %v11562_v10 = vpop.permute.xlu2 %3484 }
 0x143   : > { %17285 = vst [vmem:[#allocation28_spill] sm:$0xff] %v11562_v10 }
 0x144   : > { %v1915_v9 = vpop.f32.mrf.mxu0 }
 0x147   : > { %9544 = vmatmul.msk.bf16.gmra.mxu0 %vm1492_vm1, %v10767_v8  ;;  %3574 = vperm.xlu0 %10983, %v2892_v52  }
 0x148   : > { %v11565_v11 = vpop.permute.xlu1 %3509 }
 0x149   : > { %17286 = vst [vmem:[#allocation29_spill] sm:$0xff] %v11565_v11  ;;  %v11567_v16 = vpop.permute.xlu0 %3504 }
 0x14a   : > { %17287 = vst [vmem:[#allocation30_spill] sm:$0xff] %v11567_v16  ;;  %v11569_v20 = vpop.permute.xlu2 %3299 }
 0x14c   : > { %v1917_v17 = vpop.f32.mrf.mxu0 }
 0x14f   : > { %3759 = vperm.xlu0 %10983, %v2929_v59   ;;  %v1916_v59 = vadd.f32 %v11447_v43, %v1915_v9 }
 0x150   : > { %v11571_v32 = vpop.permute.xlu1 %3494  ;;  %9635 = vmatmul.msk.bf16.gmra.mxu2 %vm1492_vm1, %v10858_v40 }
 0x151   : > { %17288 = vst [vmem:[#allocation31_spill] sm:$0xff] %v11571_v32  ;;  %v11573_v37 = vpop.permute.xlu0 %3319  ;;  %v2894_v32 = vld [vmem:[%s11285_s0 + $0x360] sm:$0xff] }
 0x152   : > { %v11584_v15 = vpop.permute.xlu2 %3284  ;;  %3584 = vperm.xlu1 %10984, %v2894_v32  }
 0x154   : > { %v1920_v56 = vpop.f32.mrf.mxu0 }
 0x155   : > { %v1921_v40 = vadd.f32 %v11447_v43, %v1920_v56  ;;  %v2890_v56 = vld [vmem:[%s11285_s0 + $0x340] sm:$0xff] }
 0x157   : > { %9545 = vmatmul.msk.bf16.gmra.mxu0 %vm1492_vm1, %v10768_v28  ;;  %v10769_v28 = vld [vmem:[%s11300_s12 + $0x78] sm:$0xff] }
 0x158   : > { %v11579_v2 = vpop.permute.xlu1 %3309 }
 0x159   : > { %v11581_v8 = vpop.permute.xlu0 %3304 }
 0x15a   : > { %v11594_v16 = vpop.permute.xlu2 %3469 }
 0x15b   : > { %17290 = vst [vmem:[#allocation33_spill] sm:$0xff] %v11594_v16 }
 0x15c   : > { %v1922_v55 = vpop.f32.mrf.mxu0 }
 0x15d   : > { %v1923_v52 = vadd.f32 %v11447_v43, %v1922_v55  ;;  %v2542_v55 = vmax.f32 %v1921_v40, 0.0 }
 0x160   : > { %v11586_v38 = vpop.permute.xlu1 %3294  ;;  %9636 = vmatmul.msk.bf16.gmra.mxu2 %vm1492_vm1, %v10859_v21 }
 0x161   : > { %v11588_v10 = vpop.permute.xlu0 %3489 }
 0x162   : > { %17289 = vst [vmem:[#allocation32_spill] sm:$0xff] %v11588_v10  ;;  %v2893_v10 = vld [vmem:[%s11285_s0 + $0x358] sm:$0xff] }
 0x163   : > { %3579 = vperm.xlu1 %10984, %v2893_v10  }
 0x164   : > { %v1925_v11 = vpop.f32.mrf.mxu0 }
 0x165   : > { %v1926_v34 = vadd.f32 %v11447_v43, %v1925_v11  ;;  %v1918_v11 = vadd.f32 %v11447_v43, %v1917_v17  ;;  %v1913_v17 = vadd.f32 %v11447_v43, %v11552_v53 }
 0x167   : > { %9546 = vmatmul.msk.bf16.gmra.mxu0 %vm1492_vm1, %v10769_v28  ;;  %v2544_v16 = vmax.f32 %v1926_v34, 0.0  ;;  %v2539_v53 = vmax.f32 %v1913_v17, 0.0 }
 0x168   : > { %v11598_v33 = vpop.permute.xlu1 %3479 }
 0x169   : > { %17291 = vst [vmem:[#allocation34_spill] sm:$0xff] %v11598_v33  ;;  %v11601_v50 = vpop.permute.xlu0 %3474  ;;  %v11608_v33 = vpop.permute.xlu2 %3444  ;;  %v4336_v27 = vmul.f32 %v11384_v0, %v2544_v16  ;;  %v1911_v0 = vadd.f32 %v11447_v43, %v11540_v39 }
 0x16a   : > { %17292 = vst [vmem:[#allocation35_spill] sm:$0xff] %v11601_v50  ;;  %v2543_v50 = vmax.f32 %v1923_v52, 0.0  ;;  %v2541_v52 = vmax.f32 %v1918_v11, 0.0 }
 0x16b   : > { %17293 = vst [vmem:[#allocation36_spill] sm:$0xff] %v11608_v33  ;;  %3564 = vperm.xlu1 %10984, %v2890_v56   ;;  %v2538_v11 = vmax.f32 %v1911_v0, 0.0  ;;  %v2924_v0 = vld [vmem:[%s11285_s0 + $0x450] sm:$0xff] }
 0x16c   : > { %v1927_v32 = vpop.f32.mrf.mxu0  ;;  %v4335_v9 = vmul.f32 %v11391_v5, %v2543_v50  ;;  %v4333_v5 = vmul.f32 %v11370_v54, %v2541_v52  ;;  %v11633_v50 = vpop.f32.mrf.mxu2 }
 0x16d   : > { %v1928_v28 = vadd.f32 %v11447_v43, %v1927_v32  ;;  %v2926_v32 = vld [vmem:[%s11285_s0 + $0x460] sm:$0xff]  ;;  %17295 = vst [vmem:[#allocation38_spill] sm:$0xff] %v11633_v50 }
 0x16e   : > { %3744 = vperm.xlu0 %10983, %v2926_v32   ;;  %v2862_v50 = vld [vmem:[%s11285_s0 + $0x260] sm:$0xff] }
 0x16f   : > { %v2545_v4 = vmax.f32 %v1928_v28, 0.0 }
 0x170   : > { %v11611_v10 = vpop.permute.xlu1 %3464 }
 0x171   : > { %17294 = vst [vmem:[#allocation37_spill] sm:$0xff] %v11611_v10  ;;  %v11614_v51 = vpop.permute.xlu0 %3289  ;;  %v4337_v34 = vmul.f32 %v11393_v6, %v2545_v4  ;;  %v10770_v10 = vld [vmem:[%s11300_s12 + $0x80] sm:$0xff]  ;;  %v2540_v6 = vmax.f32 %v1916_v59, 0.0  ;;  %v4334_v4 = vmul.f32 %v11382_v63, %v2542_v55  ;;  %v11635_v16 = vpop.permute.xlu2 %3199  ;;  %v2895_v63 = vld [vmem:[%s11285_s0 + $0x368] sm:$0xff] }
 0x172   : > { %v2927_v55 = vld [vmem:[%s11285_s0 + $0x468] sm:$0xff]  ;;  %3589 = vperm.xlu2 %10985, %v2895_v63  }
 0x173   : > { %v6494_v28 = vpack.c.bf16 %v4337_v34, %v4336_v27  ;;  %v6493_v27 = vpack.c.bf16 %v4335_v9, %v4334_v4  ;;  %v4332_v39 = vmul.f32 %v11363_v49, %v2540_v6  ;;  %3749 = vperm.xlu1 %10984, %v2927_v55   ;;  %v4331_v34 = vmul.f32 %v11413_v19, %v2539_v53  ;;  %v2928_v9 = vld [vmem:[%s11285_s0 + $0x470] sm:$0xff]  ;;  %v2886_v6 = vld [vmem:[%s11285_s0 + $0x320] sm:$0xff]  ;;  %v2891_v55 = vld [vmem:[%s11285_s0 + $0x348] sm:$0xff] }
 0x174   : > { %v11625_v40 = vpop.f32.mrf.mxu0  ;;  %v4330_v49 = vmul.f32 %v11375_v58, %v2538_v11  ;;  %v11649_v17 = vpop.f32.mrf.mxu2  ;;  %v10860_v4 = vld [vmem:[%s11300_s12 + $0x350] sm:$0xff]  ;;  %v10771_v58 = vld [vmem:[%s11300_s12 + $0x88] sm:$0xff] }
 0x175   : > { %6615 = vmatpush.bf16.msra.mxu1 %v6494_v28  ;;  %v6492_v54 = vpack.c.bf16 %v4333_v5, %v4332_v39  ;;  %17298 = vst [vmem:[#allocation41_spill] sm:$0xff] %v11649_v17  ;;  %9637 = vmatmul.msk.bf16.gmra.mxu2 %vm1492_vm1, %v10860_v4  ;;  %v17302_v39 = vpack.c.bf16 %v11500_v48, %v11495_v42  ;;  %v10861_v4 = vld [vmem:[%s11300_s12 + $0x358] sm:$0xff] }
 0x176   : > { %v6491_v32 = vpack.c.bf16 %v4331_v34, %v4330_v49  ;;  %v17303_v42 = vpack.c.bf16 %v11464_v61, %v11462_v60  ;;  %v17305_v49 = vpack.c.bf16 %v11480_v23, %v11484_v26  ;;  %v10772_v60 = vld [vmem:[%s11300_s12 + $0x90] sm:$0xff] }
 0x177   : > { %9547 = vmatmul.msk.bf16.gmra.mxu0 %vm1492_vm1, %v10770_v10  ;;  %v2889_v10 = vld [vmem:[%s11285_s0 + $0x338] sm:$0xff] }
 0x178   : > { %v11637_v21 = vpop.permute.xlu1 %3459  ;;  %3559 = vperm.xlu0 %10983, %v2889_v10   ;;  %v2887_v10 = vld [vmem:[%s11285_s0 + $0x328] sm:$0xff] }
 0x179   : > { %17296 = vst [vmem:[#allocation39_spill] sm:$0xff] %v11637_v21  ;;  %6616 = vmatpush.bf16.msra.mxu1 %v6493_v27  ;;  %v11640_v59 = vpop.permute.xlu0 %3454  ;;  %v11658_v19 = vpop.permute.xlu2 %3174  ;;  %v17300_v27 = vpack.c.bf16 %v11532_v30, %v11527_v22  ;;  %v2923_v22 = vld [vmem:[%s11285_s0 + $0x448] sm:$0xff] }
 0x17a   : > { %17297 = vst [vmem:[#allocation40_spill] sm:$0xff] %v11640_v59  ;;  %3754 = vperm.xlu2 %10985, %v2928_v9   ;;  %v2888_v9 = vld [vmem:[%s11285_s0 + $0x330] sm:$0xff] }
 0x17b   : > { %3734 = vperm.xlu1 %10984, %v2924_v0   ;;  %v2884_v0 = vld [vmem:[%s11285_s0 + $0x310] sm:$0xff] }
 0x17c   : > { %v11646_v56 = vpop.f32.mrf.mxu0  ;;  %v11667_v5 = vpop.f32.mrf.mxu2 }
 0x17d   : > { %6617 = vmatpush.bf16.msra.mxu1 %v6492_v54  ;;  %17301 = vst [vmem:[#allocation43_spill] sm:$0xff] %v11667_v5  ;;  %v10865_v5 = vld [vmem:[%s11300_s12 + $0x378] sm:$0xff] }
 0x180   : > { %v11651_v52 = vpop.permute.xlu1 %3194  ;;  %3544 = vperm.xlu0 %10983, %v2886_v6   ;;  %v2920_v6 = vld [vmem:[%s11285_s0 + $0x430] sm:$0xff] }
 0x181   : > { %6618 = vmatpush.bf16.msra.mxu1 %v6491_v32  ;;  %v11653_v28 = vpop.permute.xlu0 %3449  ;;  %v11679_v30 = vpop.permute.xlu2 %3169 }
 0x182   : > { %17299 = vst [vmem:[#allocation42_spill] sm:$0xff] %v11653_v28  ;;  %3569 = vperm.xlu2 %10985, %v2891_v55   ;;  %v2925_v55 = vld [vmem:[%s11285_s0 + $0x458] sm:$0xff]  ;;  %v2916_v28 = vld [vmem:[%s11285_s0 + $0x410] sm:$0xff] }
 0x183   : > { %3549 = vperm.xlu1 %10984, %v2887_v10   ;;  %v2921_v10 = vld [vmem:[%s11285_s0 + $0x438] sm:$0xff] }
 0x184   : > { %v1935_v53 = vpop.f32.mrf.mxu0  ;;  %v11684_v48 = vpop.f32.mrf.mxu2 }
 0x185   : > { %6619 = vmatpush.bf16.msra.mxu1 %v17300_v27  ;;  %17304 = vst [vmem:[#allocation44_spill] sm:$0xff] %v11684_v48  ;;  %9638 = vmatmul.msk.bf16.gmra.mxu2 %vm1492_vm1, %v10861_v4  ;;  %v2860_v48 = vld [vmem:[%s11285_s0 + $0x250] sm:$0xff] }
 0x187   : > { %9548 = vmatmul.msk.bf16.gmra.mxu0 %vm1492_vm1, %v10771_v58 }
 0x188   : > { %v11669_v11 = vpop.permute.xlu1 %3189  ;;  %3729 = vperm.xlu0 %10983, %v2923_v22   ;;  %v2883_v22 = vld [vmem:[%s11285_s0 + $0x308] sm:$0xff] }
 0x189   : > { %6620 = vmatpush.bf16.msra.mxu1 %v17302_v39  ;;  %v11674_v63 = vpop.permute.xlu0 %3184  ;;  %v3145_v58 = vpop.permute.xlu2 %3144 }
 0x18a   : > { %3554 = vperm.xlu2 %10985, %v2888_v9  }
 0x18b   : > { %3534 = vperm.xlu1 %10984, %v2884_v0  }
 0x18c   : > { %v1937_v54 = vpop.f32.mrf.mxu0  ;;  %v11700_v23 = vpop.f32.mrf.mxu2 }
 0x18d   : > { %6621 = vmatpush.bf16.msra.mxu1 %v17303_v42  ;;  %17306 = vst [vmem:[#allocation45_spill] sm:$0xff] %v11700_v23  ;;  %v1938_v27 = vadd.f32 %v11447_v43, %v1937_v54 }
 0x18f   : > { %v2549_v0 = vmax.f32 %v1938_v27, 0.0 }
 0x190   : > { %v11686_v34 = vpop.permute.xlu1 %3164  ;;  %3714 = vperm.xlu0 %10983, %v2920_v6  }
 0x191   : > { %6622 = vmatpush.bf16.msra.mxu1 %v17305_v49  ;;  %v11691_v32 = vpop.permute.xlu0 %3179  ;;  %v1936_v49 = vadd.f32 %v11447_v43, %v1935_v53  ;;  %v3140_v21 = vpop.permute.xlu2 %3139  ;;  %v2922_v53 = vld [vmem:[%s11285_s0 + $0x440] sm:$0xff] }
 0x192   : > { %3739 = vperm.xlu2 %10985, %v2925_v55   ;;  %v11713_v33 = vmul.f32 %v3140_v21, %v2549_v0 }
 0x193   : > { %3719 = vperm.xlu1 %10984, %v2921_v10   ;;  %v2548_v4 = vmax.f32 %v1936_v49, 0.0  ;;  %v10862_v49 = vld [vmem:[%s11300_s12 + $0x360] sm:$0xff] }
 0x194   : > { %v1940_v61 = vpop.f32.mrf.mxu0 }
 0x195   : > { %v1941_v42 = vadd.f32 %v11447_v43, %v1940_v61  ;;  %9639 = vmatmul.msk.bf16.gmra.mxu2 %vm1492_vm1, %v10862_v49 }
 0x197   : > { %9549 = vmatmul.msk.bf16.gmra.mxu0 %vm1492_vm1, %v10772_v60  ;;  %v2550_v54 = vmax.f32 %v1941_v42, 0.0  ;;  %v11709_v60 = vpop.f32.mrf.mxu2 }
 0x198   : > { %v3160_v26 = vpop.permute.xlu1 %3159  ;;  %3529 = vperm.xlu0 %10983, %v2883_v22   ;;  %17307 = vst [vmem:[#allocation46_spill] sm:$0xff] %v11709_v60  ;;  %v2918_v22 = vld [vmem:[%s11285_s0 + $0x420] sm:$0xff]  ;;  %v10776_v60 = vld [vmem:[%s11300_s12 + $0xb0] sm:$0xff] }
 0x199   : > { %v3155_v39 = vpop.permute.xlu0 %3154  ;;  %v11718_v27 = vmul.f32 %v3145_v58, %v2550_v54 }
 0x19a   : > { %3724 = vperm.xlu2 %10985, %v2922_v53   ;;  %v1933_v53 = vadd.f32 %v11447_v43, %v11646_v56  ;;  %v2864_v56 = vld [vmem:[%s11285_s0 + $0x270] sm:$0xff] }
 0x19b   : > { %3704 = vperm.xlu1 %10984, %v2918_v22  }
 0x19c   : > { %v1942_v9 = vpop.f32.mrf.mxu0  ;;  %v2547_v0 = vmax.f32 %v1933_v53, 0.0  ;;  %v2863_v53 = vld [vmem:[%s11285_s0 + $0x268] sm:$0xff] }
 0x19d   : > { %v1943_v6 = vadd.f32 %v11447_v43, %v1942_v9  ;;  %v10773_v9 = vld [vmem:[%s11300_s12 + $0x98] sm:$0xff] }
 0x19f   : > { %v2551_v61 = vmax.f32 %v1943_v6, 0.0  ;;  %v11730_v58 = vpop.f32.mrf.mxu2 }
 0x1a0   : > { %v3135_v55 = vpop.permute.xlu1 %3134  ;;  %3694 = vperm.xlu0 %10983, %v2916_v28   ;;  %17308 = vst [vmem:[#allocation47_spill] sm:$0xff] %v11730_v58  ;;  %v1931_v28 = vadd.f32 %v11447_v43, %v11625_v40  ;;  %v2882_v40 = vld [vmem:[%s11285_s0 + $0x300] sm:$0xff] }
 0x1a1   : > { %v11711_v59 = vmul.f32 %v3135_v55, %v2548_v4  ;;  %v3150_v10 = vpop.permute.xlu0 %3149  ;;  %v2917_v55 = vld [vmem:[%s11285_s0 + $0x418] sm:$0xff]  ;;  %v2942_v58 = vld [vmem:[%s11285_s0 + $0x4e0] sm:$0xff] }
 0x1a2   : > { %v11720_v42 = vmul.f32 %v3150_v10, %v2551_v61  ;;  %v2885_v61 = vld [vmem:[%s11285_s0 + $0x318] sm:$0xff]  ;;  %v2915_v10 = vld [vmem:[%s11285_s0 + $0x408] sm:$0xff] }
 0x1a3   : > { %3539 = vperm.xlu2 %10985, %v2885_v61   ;;  %3699 = vperm.xlu1 %10984, %v2917_v55   ;;  %v2546_v55 = vmax.f32 %v1931_v28, 0.0  ;;  %v10774_v28 = vld [vmem:[%s11300_s12 + $0xa0] sm:$0xff] }
 0x1a4   : > { %v1945_v21 = vpop.f32.mrf.mxu0 }
 0x1a5   : > { %v1946_v54 = vadd.f32 %v11447_v43, %v1945_v21  ;;  %v3125_v21 = vpop.permute.xlu2 %3124 }
 0x1a7   : > { %9550 = vmatmul.msk.bf16.gmra.mxu0 %vm1492_vm1, %v10773_v9  ;;  %v2552_v49 = vmax.f32 %v1946_v54, 0.0  ;;  %v11743_v61 = vpop.f32.mrf.mxu2  ;;  %v11752_v54 = vmul.f32 %v3125_v21, %v2546_v55  ;;  %v2914_v55 = vld [vmem:[%s11285_s0 + $0x400] sm:$0xff] }
 0x1a8   : > { %3689 = vperm.xlu0 %10983, %v2915_v10   ;;  %17310 = vst [vmem:[#allocation49_spill] sm:$0xff] %v11743_v61 }
 0x1a9   : > { %v11733_v4 = vpop.permute.xlu0 %3594  ;;  %v11745_v10 = vmul.f32 %v3155_v39, %v2552_v49  ;;  %v2861_v49 = vld [vmem:[%s11285_s0 + $0x258] sm:$0xff]  ;;  %v2855_v39 = vld [vmem:[%s11285_s0 + $0x228] sm:$0xff] }
 0x1aa   : > { %17309 = vst [vmem:[#allocation48_spill] sm:$0xff] %v11733_v4 }
 0x1ab   : > { %3524 = vperm.xlu2 %10985, %v2882_v40   ;;  %3434 = vperm.xlu1 %10984, %v2864_v56   ;;  %v2858_v40 = vld [vmem:[%s11285_s0 + $0x240] sm:$0xff]  ;;  %v2856_v56 = vld [vmem:[%s11285_s0 + $0x230] sm:$0xff] }
 0x1ac   : > { %v1947_v22 = vpop.f32.mrf.mxu0 }
 0x1ad   : > { %v1948_v9 = vadd.f32 %v11447_v43, %v1947_v22 }
 0x1af   : > { %v2553_v6 = vmax.f32 %v1948_v9, 0.0  ;;  %v10863_v9 = vld [vmem:[%s11300_s12 + $0x368] sm:$0xff] }
 0x1b0   : > { %3424 = vperm.xlu0 %10983, %v2862_v50   ;;  %9640 = vmatmul.msk.bf16.gmra.mxu2 %vm1492_vm1, %v10863_v9  ;;  %v10864_v9 = vld [vmem:[%s11300_s12 + $0x370] sm:$0xff] }
 0x1b1   : > { %v3130_v4 = vpop.permute.xlu0 %3129  ;;  %v11747_v17 = vmul.f32 %v3160_v26, %v2553_v6  ;;  %v2857_v6 = vld [vmem:[%s11285_s0 + $0x238] sm:$0xff] }
 0x1b2   : > { %v11754_v22 = vmul.f32 %v3130_v4, %v2547_v0  ;;  %v11766_v0 = vpop.f32.mrf.mxu2  ;;  %v2919_v4 = vld [vmem:[%s11285_s0 + $0x428] sm:$0xff] }
 0x1b3   : > { %17311 = vst [vmem:[#allocation50_spill] sm:$0xff] %v11766_v0  ;;  %3709 = vperm.xlu2 %10985, %v2919_v4   ;;  %3429 = vperm.xlu1 %10984, %v2863_v53   ;;  %v10866_v0 = vld [vmem:[%s11300_s12 + $0x380] sm:$0xff] }
 0x1b4   : > { %v11760_v26 = vpop.f32.mrf.mxu0 }
 0x1b7   : > { %9551 = vmatmul.msk.bf16.gmra.mxu0 %vm1492_vm1, %v10774_v28  ;;  %v10775_v28 = vld [vmem:[%s11300_s12 + $0xa8] sm:$0xff] }
 0x1b8   : > { %3419 = vperm.xlu0 %10983, %v2861_v49   ;;  %v2865_v49 = vld [vmem:[%s11285_s0 + $0x278] sm:$0xff] }
 0x1ba   : > { %v11773_v21 = vpop.f32.mrf.mxu2 }
 0x1bb   : > { %17312 = vst [vmem:[#allocation51_spill] sm:$0xff] %v11773_v21  ;;  %3684 = vperm.xlu2 %10985, %v2914_v55   ;;  %3404 = vperm.xlu1 %10984, %v2858_v40   ;;  %v11789_v40 = vpop.permute.xlu1 %3599  ;;  %v2940_v21 = vld [vmem:[%s11285_s0 + $0x4d0] sm:$0xff] }
 0x1bc   : > { %v11771_v50 = vpop.f32.mrf.mxu0  ;;  %17314 = vst [vmem:[#allocation53_spill] sm:$0xff] %v11789_v40 }
 0x1c0   : > { %3394 = vperm.xlu0 %10983, %v2856_v56   ;;  %9641 = vmatmul.msk.bf16.gmra.mxu2 %vm1492_vm1, %v10864_v9  ;;  %v2852_v9 = vld [vmem:[%s11285_s0 + $0x210] sm:$0xff] }
 0x1c2   : > { %v11784_v53 = vpop.f32.mrf.mxu2 }
 0x1c3   : > { %17313 = vst [vmem:[#allocation52_spill] sm:$0xff] %v11784_v53  ;;  %3439 = vperm.xlu2 %10985, %v2865_v49   ;;  %3399 = vperm.xlu1 %10984, %v2857_v6   ;;  %v11803_v49 = vpop.permute.xlu0 %3574  ;;  %v2853_v53 = vld [vmem:[%s11285_s0 + $0x218] sm:$0xff] }
 0x1c4   : > { %v11780_v4 = vpop.f32.mrf.mxu0  ;;  %v11801_v6 = vpop.permute.xlu1 %3584  ;;  %17318 = vst [vmem:[#allocation57_spill] sm:$0xff] %v11803_v49 }
 0x1c5   : > { %17317 = vst [vmem:[#allocation56_spill] sm:$0xff] %v11801_v6 }
 0x1c7   : > { %9552 = vmatmul.msk.bf16.gmra.mxu0 %vm1492_vm1, %v10775_v28  ;;  %v2944_v28 = vld [vmem:[%s11285_s0 + $0x4f0] sm:$0xff] }
 0x1c8   : > { %3389 = vperm.xlu0 %10983, %v2855_v39  }
 0x1ca   : > { %v11791_v56 = vpop.f32.mrf.mxu2 }
 0x1cb   : > { %17315 = vst [vmem:[#allocation54_spill] sm:$0xff] %v11791_v56  ;;  %3414 = vperm.xlu2 %10985, %v2860_v48   ;;  %3374 = vperm.xlu1 %10984, %v2852_v9   ;;  %v2859_v48 = vld [vmem:[%s11285_s0 + $0x248] sm:$0xff]  ;;  %v2945_v9 = vld [vmem:[%s11285_s0 + $0x4f8] sm:$0xff]  ;;  %v11815_v61 = vpop.permute.xlu0 %3759 }
 0x1cc   : > { %v1957_v55 = vpop.f32.mrf.mxu0  ;;  %v11799_v39 = vpop.permute.xlu2 %3589  ;;  %17322 = vst [vmem:[#allocation61_spill] sm:$0xff] %v11815_v61 }
 0x1cd   : > { %17316 = vst [vmem:[#allocation55_spill] sm:$0xff] %v11799_v39 }
 0x1d0   : > { %3834 = vperm.xlu0 %10983, %v2944_v28   ;;  %9642 = vmatmul.msk.bf16.gmra.mxu2 %vm1492_vm1, %v10865_v5  ;;  %v2851_v28 = vld [vmem:[%s11285_s0 + $0x208] sm:$0xff] }
 0x1d2   : > { %v11806_v40 = vpop.f32.mrf.mxu2 }
 0x1d3   : > { %17319 = vst [vmem:[#allocation58_spill] sm:$0xff] %v11806_v40  ;;  %3409 = vperm.xlu2 %10985, %v2859_v48   ;;  %3839 = vperm.xlu1 %10984, %v2945_v9   ;;  %v10777_v48 = vld [vmem:[%s11300_s12 + $0xb8] sm:$0xff]  ;;  %v2938_v40 = vld [vmem:[%s11285_s0 + $0x4c0] sm:$0xff] }
 0x1d4   : > { %v1960_v23 = vpop.f32.mrf.mxu0  ;;  %v11811_v39 = vpop.permute.xlu2 %3754 }
 0x1d5   : > { %17320 = vst [vmem:[#allocation59_spill] sm:$0xff] %v11811_v39  ;;  %v11813_v6 = vpop.permute.xlu1 %3579 }
 0x1d6   : > { %17321 = vst [vmem:[#allocation60_spill] sm:$0xff] %v11813_v6 }
 0x1d7   : > { %9553 = vmatmul.msk.bf16.gmra.mxu0 %vm1492_vm1, %v10776_v60  ;;  %v2854_v60 = vld [vmem:[%s11285_s0 + $0x220] sm:$0xff] }
 0x1d8   : > { %3369 = vperm.xlu0 %10983, %v2851_v28  }
 0x1da   : > { %v11817_v49 = vpop.f32.mrf.mxu2 }
 0x1db   : > { %17323 = vst [vmem:[#allocation62_spill] sm:$0xff] %v11817_v49  ;;  %3384 = vperm.xlu2 %10985, %v2854_v60   ;;  %3824 = vperm.xlu1 %10984, %v2942_v58   ;;  %v2941_v60 = vld [vmem:[%s11285_s0 + $0x4d8] sm:$0xff] }
 0x1dc   : > { %v1962_v5 = vpop.f32.mrf.mxu0  ;;  %v11825_v28 = vpop.permute.xlu2 %3569  ;;  %v2977_v58 = vld [vmem:[%s11285_s0 + $0x5f8] sm:$0xff] }
 0x1dd   : > { %17324 = vst [vmem:[#allocation63_spill] sm:$0xff] %v11825_v28  ;;  %v11827_v39 = vpop.permute.xlu1 %3564 }
 0x1de   : > { %17325 = vst [vmem:[#allocation64_spill] sm:$0xff] %v11827_v39 }
 0x1e0   : > { %3814 = vperm.xlu0 %10983, %v2940_v21   ;;  %9643 = vmatmul.msk.bf16.gmra.mxu2 %vm1492_vm1, %v10866_v0  ;;  %v11829_v61 = vpop.permute.xlu0 %3744  ;;  %v1963_v21 = vadd.f32 %v11447_v43, %v1962_v5 }
 0x1e1   : > { %17326 = vst [vmem:[#allocation65_spill] sm:$0xff] %v11829_v61 }
 0x1e2   : > { %v11832_v6 = vpop.f32.mrf.mxu2  ;;  %v2559_v5 = vmax.f32 %v1963_v21, 0.0 }
 0x1e3   : > { %17327 = vst [vmem:[#allocation66_spill] sm:$0xff] %v11832_v6  ;;  %3379 = vperm.xlu2 %10985, %v2853_v53   ;;  %3819 = vperm.xlu1 %10984, %v2941_v60   ;;  %v1958_v53 = vadd.f32 %v11447_v43, %v1957_v55  ;;  %v1953_v55 = vadd.f32 %v11447_v43, %v11771_v50 }
 0x1e4   : > { %v1965_v9 = vpop.f32.mrf.mxu0  ;;  %v11839_v39 = vpop.permute.xlu2 %3554 }
 0x1e5   : > { %v1966_v56 = vadd.f32 %v11447_v43, %v1965_v9  ;;  %17328 = vst [vmem:[#allocation67_spill] sm:$0xff] %v11839_v39  ;;  %v11843_v28 = vpop.permute.xlu1 %3749  ;;  %v1956_v39 = vadd.f32 %v11447_v43, %v11780_v4  ;;  %v2557_v21 = vmax.f32 %v1958_v53, 0.0 }
 0x1e6   : > { %17329 = vst [vmem:[#allocation68_spill] sm:$0xff] %v11843_v28  ;;  %v2974_v28 = vld [vmem:[%s11285_s0 + $0x5e0] sm:$0xff] }
 0x1e7   : > { %9554 = vmatmul.msk.bf16.gmra.mxu0 %vm1492_vm1, %v10777_v48  ;;  %v1961_v48 = vadd.f32 %v11447_v43, %v1960_v23  ;;  %v2560_v61 = vmax.f32 %v1966_v56, 0.0 }
 0x1e8   : > { %3999 = vperm.xlu0 %10983, %v2977_v58  }
 0x1e9   : > { %v2558_v49 = vmax.f32 %v1961_v48, 0.0  ;;  %v4352_v23 = vmul.f32 %v11651_v52, %v2560_v61  ;;  %v2556_v61 = vmax.f32 %v1956_v39, 0.0 }
 0x1ea   : > { %v11845_v6 = vpop.permute.xlu0 %3559  ;;  %v11848_v58 = vpop.f32.mrf.mxu2 }
 0x1eb   : > { %17330 = vst [vmem:[#allocation69_spill] sm:$0xff] %v11845_v6  ;;  %3804 = vperm.xlu1 %10984, %v2938_v40   ;;  %v10778_v6 = vld [vmem:[%s11300_s12 + $0xc0] sm:$0xff]  ;;  %v4350_v50 = vmul.f32 %v11674_v63, %v2558_v49  ;;  %v2943_v63 = vld [vmem:[%s11285_s0 + $0x4e8] sm:$0xff] }
 0x1ec   : > { %v1967_v0 = vpop.f32.mrf.mxu0  ;;  %17331 = vst [vmem:[#allocation70_spill] sm:$0xff] %v11848_v58  ;;  %v4351_v58 = vmul.f32 %v11669_v11, %v2559_v5  ;;  %v11863_v52 = vpop.permute.xlu2 %3739  ;;  %v2555_v11 = vmax.f32 %v1953_v55, 0.0  ;;  %v2975_v49 = vld [vmem:[%s11285_s0 + $0x5e8] sm:$0xff] }
 0x1ed   : > { %v1968_v9 = vadd.f32 %v11447_v43, %v1967_v0  ;;  %v2850_v0 = vld [vmem:[%s11285_s0 + $0x200] sm:$0xff]  ;;  %17332 = vst [vmem:[#allocation71_spill] sm:$0xff] %v11863_v52  ;;  %v11868_v40 = vpop.permute.xlu1 %3734 }
 0x1ee   : > { %3364 = vperm.xlu2 %10985, %v2850_v0   ;;  %17333 = vst [vmem:[#allocation72_spill] sm:$0xff] %v11868_v40 }
 0x1ef   : > { %v2561_v60 = vmax.f32 %v1968_v9, 0.0 }
 0x1f0   : > { %3984 = vperm.xlu0 %10983, %v2974_v28   ;;  %9644 = vmatmul.msk.bf16.gmra.mxu2 %vm1492_vm1, %v10867_v25  ;;  %v6501_v25 = vpack.c.bf16 %v4351_v58, %v4350_v50  ;;  %v4349_v28 = vmul.f32 %v11691_v32, %v2557_v21  ;;  %v2972_v50 = vld [vmem:[%s11285_s0 + $0x5d0] sm:$0xff] }
 0x1f1   : > { %v4353_v56 = vmul.f32 %v11635_v16, %v2561_v60  ;;  %v1951_v16 = vadd.f32 %v11447_v43, %v11760_v26  ;;  %v4348_v26 = vmul.f32 %v11658_v19, %v2556_v61  ;;  %v2937_v60 = vld [vmem:[%s11285_s0 + $0x4b8] sm:$0xff] }
 0x1f2   : > { %v11870_v48 = vpop.permute.xlu0 %3544  ;;  %v11874_v53 = vpop.f32.mrf.mxu2 }
 0x1f3   : > { %v6502_v9 = vpack.c.bf16 %v4353_v56, %v4352_v23  ;;  %17334 = vst [vmem:[#allocation73_spill] sm:$0xff] %v11870_v48  ;;  %v2554_v5 = vmax.f32 %v1951_v16, 0.0  ;;  %3989 = vperm.xlu1 %10984, %v2975_v49   ;;  %v6500_v23 = vpack.c.bf16 %v4349_v28, %v4348_v26  ;;  %v4347_v56 = vmul.f32 %v11679_v30, %v2555_v11  ;;  %v2934_v11 = vld [vmem:[%s11285_s0 + $0x4a0] sm:$0xff]  ;;  %v10779_v28 = vld [vmem:[%s11300_s12 + $0xc8] sm:$0xff] }
 0x1f4   : > { %v1970_v4 = vpop.f32.mrf.mxu0  ;;  %17335 = vst [vmem:[#allocation74_spill] sm:$0xff] %v11874_v53 }
 0x1f5   : > { %6704 = vmatpush.bf16.msrb.mxu2 %v6502_v9  ;;  %v1971_v39 = vadd.f32 %v11447_v43, %v1970_v4  ;;  %v4346_v19 = vmul.f32 %v11686_v34, %v2554_v5  ;;  %v11886_v55 = vpop.permute.xlu1 %3549  ;;  %v2976_v34 = vld [vmem:[%s11285_s0 + $0x5f0] sm:$0xff]  ;;  %v2965_v5 = vld [vmem:[%s11285_s0 + $0x598] sm:$0xff] }
 0x1f6   : > { %3829 = vperm.xlu2 %10985, %v2943_v63   ;;  %17337 = vst [vmem:[#allocation76_spill] sm:$0xff] %v11886_v55 }
 0x1f7   : > { %9555 = vmatmul.msk.bf16.gmra.mxu0 %vm1492_vm1, %v10778_v6  ;;  %v11882_v6 = vpop.permute.xlu2 %3724  ;;  %v2562_v58 = vmax.f32 %v1971_v39, 0.0  ;;  %v6499_v9 = vpack.c.bf16 %v4347_v56, %v4346_v19  ;;  %v2939_v56 = vld [vmem:[%s11285_s0 + $0x4c8] sm:$0xff] }
 0x1f8   : > { %3799 = vperm.xlu0 %10983, %v2937_v60   ;;  %17336 = vst [vmem:[#allocation75_spill] sm:$0xff] %v11882_v6  ;;  %v2971_v19 = vld [vmem:[%s11285_s0 + $0x5c8] sm:$0xff] }
 0x1f9   : > { %6705 = vmatpush.bf16.msrb.mxu2 %v6501_v25  ;;  %v11893_v16 = vmul.f32 %v11516_v3, %v2562_v58  ;;  %v10868_v25 = vld [vmem:[%s11300_s12 + $0x390] sm:$0xff] }
 0x1fa   : > { %v11888_v21 = vpop.permute.xlu0 %3729  ;;  %v11890_v4 = vpop.f32.mrf.mxu2 }
 0x1fb   : > { %17338 = vst [vmem:[#allocation77_spill] sm:$0xff] %v11888_v21  ;;  %3974 = vperm.xlu1 %10984, %v2972_v50  }
 0x1fc   : > { %v1972_v32 = vpop.f32.mrf.mxu0  ;;  %17339 = vst [vmem:[#allocation78_spill] sm:$0xff] %v11890_v4  ;;  %v10873_v4 = vld [vmem:[%s11300_s12 + $0x3b8] sm:$0xff] }
 0x1fd   : > { %v1973_v0 = vadd.f32 %v11447_v43, %v1972_v32  ;;  %6706 = vmatpush.bf16.msrb.mxu2 %v6500_v23  ;;  %v11911_v39 = vpop.permute.xlu1 %3534  ;;  %v17345_v23 = vpack.c.bf16 %v11720_v42, %v11718_v27  ;;  %v2935_v32 = vld [vmem:[%s11285_s0 + $0x4a8] sm:$0xff]  ;;  %v17347_v27 = vpack.c.bf16 %v11713_v33, %v11711_v59  ;;  %v2932_v33 = vld [vmem:[%s11285_s0 + $0x490] sm:$0xff] }
 0x1fe   : > { %3994 = vperm.xlu2 %10985, %v2976_v34   ;;  %17342 = vst [vmem:[#allocation80_spill] sm:$0xff] %v11911_v39  ;;  %v2968_v59 = vld [vmem:[%s11285_s0 + $0x5b0] sm:$0xff] }
 0x1ff   : > { %v2563_v30 = vmax.f32 %v1973_v0, 0.0  ;;  %v11906_v26 = vpop.permute.xlu2 %3539 }
 0x200   : > { %3784 = vperm.xlu0 %10983, %v2934_v11   ;;  %9645 = vmatmul.msk.bf16.gmra.mxu2 %vm1492_vm1, %v10868_v25  ;;  %17340 = vst [vmem:[#allocation79_spill] sm:$0xff] %v11906_v26  ;;  %v17351_v11 = vpack.c.bf16 %v11754_v22, %v11752_v54  ;;  %v2936_v25 = vld [vmem:[%s11285_s0 + $0x4b0] sm:$0xff]  ;;  %v2903_v26 = vld [vmem:[%s11285_s0 + $0x3a8] sm:$0xff] }
 0x201   : > { %6707 = vmatpush.bf16.msrb.mxu2 %v6499_v9  ;;  %v11896_v61 = vmul.f32 %v11513_v14, %v2563_v30  ;;  %v17341_v14 = vpack.c.bf16 %v11747_v17, %v11745_v10 }
 0x202   : > { %v11913_v63 = vpop.permute.xlu0 %3714  ;;  %v11916_v49 = vpop.f32.mrf.mxu2 }
 0x203   : > { %17343 = vst [vmem:[#allocation81_spill] sm:$0xff] %v11913_v63  ;;  %3789 = vperm.xlu1 %10984, %v2935_v32   ;;  %v2973_v32 = vld [vmem:[%s11285_s0 + $0x5d8] sm:$0xff] }
 0x204   : > { %v1975_v3 = vpop.f32.mrf.mxu0  ;;  %17344 = vst [vmem:[#allocation82_spill] sm:$0xff] %v11916_v49  ;;  %v2992_v49 = vld [vmem:[%s11285_s0 + $0x670] sm:$0xff] }
 0x205   : > { %6708 = vmatpush.bf16.msrb.mxu2 %v17341_v14  ;;  %v1976_v60 = vadd.f32 %v11447_v43, %v1975_v3  ;;  %v11931_v42 = vpop.permute.xlu1 %3719  ;;  %v10780_v3 = vld [vmem:[%s11300_s12 + $0xd0] sm:$0xff] }
 0x206   : > { %3809 = vperm.xlu2 %10985, %v2939_v56   ;;  %17348 = vst [vmem:[#allocation84_spill] sm:$0xff] %v11931_v42  ;;  %v10782_v42 = vld [vmem:[%s11300_s12 + $0xe0] sm:$0xff] }
 0x207   : > { %9556 = vmatmul.msk.bf16.gmra.mxu0 %vm1492_vm1, %v10779_v28  ;;  %v11925_v10 = vpop.permute.xlu2 %3524  ;;  %v2564_v58 = vmax.f32 %v1976_v60, 0.0  ;;  %v10869_v28 = vld [vmem:[%s11300_s12 + $0x398] sm:$0xff] }
 0x208   : > { %3969 = vperm.xlu0 %10983, %v2971_v19   ;;  %17346 = vst [vmem:[#allocation83_spill] sm:$0xff] %v11925_v10  ;;  %v2969_v19 = vld [vmem:[%s11285_s0 + $0x5b8] sm:$0xff] }
 0x209   : > { %6709 = vmatpush.bf16.msrb.mxu2 %v17345_v23  ;;  %v11938_v50 = vmul.f32 %v11492_v41, %v2564_v58  ;;  %v11966_v23 = vld [vmem:[%s17071_s8] ss:$0 sm:$0xff] }
 0x20a   : > { %v11933_v30 = vpop.permute.xlu0 %3529  ;;  %v11935_v34 = vpop.f32.mrf.mxu2 }
 0x20b   : > { %17349 = vst [vmem:[#allocation85_spill] sm:$0xff] %v11933_v30  ;;  %3774 = vperm.xlu1 %10984, %v2932_v33  }
 0x20c   : > { %v1977_v17 = vpop.f32.mrf.mxu0  ;;  %17350 = vst [vmem:[#allocation86_spill] sm:$0xff] %v11935_v34  ;;  %v2900_v34 = vld [vmem:[%s11285_s0 + $0x390] sm:$0xff] }
 0x20d   : > { %v1978_v0 = vadd.f32 %v11447_v43, %v1977_v17  ;;  %6710 = vmatpush.bf16.msrb.mxu2 %v17347_v27  ;;  %v2931_v17 = vld [vmem:[%s11285_s0 + $0x488] sm:$0xff] }
 0x20e   : > { %3794 = vperm.xlu2 %10985, %v2936_v25  }
 0x20f   : > { %v2565_v9 = vmax.f32 %v1978_v0, 0.0  ;;  %v11954_v54 = vpop.permute.xlu2 %3709 }
 0x210   : > { %3954 = vperm.xlu0 %10983, %v2968_v59   ;;  %9646 = vmatmul.msk.bf16.gmra.mxu2 %vm1492_vm1, %v10869_v28  ;;  %17352 = vst [vmem:[#allocation87_spill] sm:$0xff] %v11954_v54 }
 0x211   : > { %6711 = vmatpush.bf16.msrb.mxu2 %v17351_v11  ;;  %v11944_v43 = vmul.f32 %v11454_v47, %v2565_v9  ;;  %v11956_v47 = vpop.permute.xlu1 %3704 }
 0x212   : > { %17353 = vst [vmem:[#allocation88_spill] sm:$0xff] %v11956_v47  ;;  %v11958_v22 = vpop.permute.xlu0 %3694  ;;  %v11961_v60 = vpop.f32.mrf.mxu2 }
 0x213   : > { %17354 = vst [vmem:[#allocation89_spill] sm:$0xff] %v11958_v22  ;;  %3959 = vperm.xlu1 %10984, %v2969_v19   ;;  %v2964_v19 = vld [vmem:[%s11285_s0 + $0x590] sm:$0xff]  ;;  %v2906_v22 = vld [vmem:[%s11285_s0 + $0x3c0] sm:$0xff] }
 0x214   : > { %v1980_v14 = vpop.f32.mrf.mxu0  ;;  %17355 = vst [vmem:[#allocation90_spill] sm:$0xff] %v11961_v60 }
 0x215   : > { %v1981_v56 = vadd.f32 %v11966_v23, %v1980_v14  ;;  %v2970_v14 = vld [vmem:[%s11285_s0 + $0x5c0] sm:$0xff] }
 0x216   : > { %3979 = vperm.xlu2 %10985, %v2973_v32   ;;  %v2966_v32 = vld [vmem:[%s11285_s0 + $0x5a0] sm:$0xff] }
 0x217   : > { %9557 = vmatmul.msk.bf16.gmra.mxu0 %vm1492_vm1, %v10780_v3  ;;  %v11972_v0 = vpop.permute.xlu2 %3684  ;;  %v2566_v27 = vmax.f32 %v1981_v56, 0.0  ;;  %v10870_v56 = vld [vmem:[%s11300_s12 + $0x3a0] sm:$0xff] }
 0x218   : > { %3769 = vperm.xlu0 %10983, %v2931_v17   ;;  %17356 = vst [vmem:[#allocation91_spill] sm:$0xff] %v11972_v0  ;;  %v10781_v17 = vld [vmem:[%s11300_s12 + $0xd8] sm:$0xff]  ;;  %v10872_v0 = vld [vmem:[%s11300_s12 + $0x3b0] sm:$0xff] }
 0x219   : > { %v11975_v11 = vpop.permute.xlu1 %3699  ;;  %v11982_v28 = vmul.f32 %v11435_v36, %v2566_v27 }
 0x21a   : > { %17357 = vst [vmem:[#allocation92_spill] sm:$0xff] %v11975_v11  ;;  %v11977_v25 = vpop.permute.xlu0 %3689  ;;  %v11979_v59 = vpop.f32.mrf.mxu2 }
 0x21b   : > { %17358 = vst [vmem:[#allocation93_spill] sm:$0xff] %v11977_v25  ;;  %3944 = vperm.xlu1 %10984, %v2966_v32   ;;  %v2933_v32 = vld [vmem:[%s11285_s0 + $0x498] sm:$0xff]  ;;  %v2904_v25 = vld [vmem:[%s11285_s0 + $0x3b0] sm:$0xff] }
 0x21c   : > { %v1982_v58 = vpop.f32.mrf.mxu0  ;;  %17359 = vst [vmem:[#allocation94_spill] sm:$0xff] %v11979_v59 }
 0x21d   : > { %v1983_v9 = vadd.f32 %v11966_v23, %v1982_v58 }
 0x21e   : > { %3964 = vperm.xlu2 %10985, %v2970_v14  }
 0x21f   : > { %v2567_v33 = vmax.f32 %v1983_v9, 0.0  ;;  %v11995_v36 = vpop.permute.xlu2 %3439 }
 0x220   : > { %3934 = vperm.xlu0 %10983, %v2964_v19   ;;  %9647 = vmatmul.msk.bf16.gmra.mxu2 %vm1492_vm1, %v10870_v56  ;;  %17360 = vst [vmem:[#allocation95_spill] sm:$0xff] %v11995_v36  ;;  %v2963_v19 = vld [vmem:[%s11285_s0 + $0x588] sm:$0xff]  ;;  %v2898_v36 = vld [vmem:[%s11285_s0 + $0x380] sm:$0xff] }
 0x221   : > { %v11985_v3 = vmul.f32 %v11497_v46, %v2567_v33  ;;  %v11997_v46 = vpop.permute.xlu1 %3434 }
 0x222   : > { %17361 = vst [vmem:[#allocation96_spill] sm:$0xff] %v11997_v46  ;;  %v11999_v27 = vpop.permute.xlu0 %3424  ;;  %v12002_v33 = vpop.f32.mrf.mxu2  ;;  %v2986_v46 = vld [vmem:[%s11285_s0 + $0x640] sm:$0xff] }
 0x223   : > { %17362 = vst [vmem:[#allocation97_spill] sm:$0xff] %v11999_v27  ;;  %3939 = vperm.xlu1 %10984, %v2965_v5   ;;  %v3009_v27 = vld [vmem:[%s11285_s0 + $0x6f8] sm:$0xff] }
 0x224   : > { %v1985_v9 = vpop.f32.mrf.mxu0  ;;  %17363 = vst [vmem:[#allocation98_spill] sm:$0xff] %v12002_v33 }
 0x225   : > { %v1986_v14 = vadd.f32 %v11966_v23, %v1985_v9 }
 0x226   : > { %3779 = vperm.xlu2 %10985, %v2933_v32   ;;  %v2930_v32 = vld [vmem:[%s11285_s0 + $0x480] sm:$0xff] }
 0x227   : > { %9558 = vmatmul.msk.bf16.gmra.mxu0 %vm1492_vm1, %v10781_v17  ;;  %v12008_v41 = vpop.permute.xlu2 %3414  ;;  %v2568_v58 = vmax.f32 %v1986_v14, 0.0  ;;  %v2910_v14 = vld [vmem:[%s11285_s0 + $0x3e0] sm:$0xff] }
 0x228   : > { %3929 = vperm.xlu0 %10983, %v2963_v19   ;;  %17364 = vst [vmem:[#allocation99_spill] sm:$0xff] %v12008_v41  ;;  %v2912_v19 = vld [vmem:[%s11285_s0 + $0x3f0] sm:$0xff]  ;;  %v10874_v41 = vld [vmem:[%s11300_s12 + $0x3c0] sm:$0xff] }
 0x229   : > { %v12011_v6 = vpop.permute.xlu1 %3429  ;;  %v12018_v52 = vmul.f32 %v11460_v57, %v2568_v58 }
 0x22a   : > { %17365 = vst [vmem:[#allocation100_spill] sm:$0xff] %v12011_v6  ;;  %v12013_v9 = vpop.permute.xlu0 %3419  ;;  %v12015_v40 = vpop.f32.mrf.mxu2 }
 0x22b   : > { %17366 = vst [vmem:[#allocation101_spill] sm:$0xff] %v12013_v9  ;;  %3674 = vperm.xlu1 %10984, %v2912_v19   ;;  %v2911_v19 = vld [vmem:[%s11285_s0 + $0x3e8] sm:$0xff] }
 0x22c   : > { %v1987_v56 = vpop.f32.mrf.mxu0  ;;  %17367 = vst [vmem:[#allocation102_spill] sm:$0xff] %v12015_v40  ;;  %v3006_v40 = vld [vmem:[%s11285_s0 + $0x6e0] sm:$0xff] }
 0x22d   : > { %v1988_v17 = vadd.f32 %v11966_v23, %v1987_v56  ;;  %v10871_v56 = vld [vmem:[%s11300_s12 + $0x3a8] sm:$0xff] }
 0x22e   : > { %3764 = vperm.xlu2 %10985, %v2930_v32   ;;  %v2967_v32 = vld [vmem:[%s11285_s0 + $0x5a8] sm:$0xff] }
 0x22f   : > { %v2569_v21 = vmax.f32 %v1988_v17, 0.0 }
 0x230   : > { %3664 = vperm.xlu0 %10983, %v2910_v14   ;;  %9648 = vmatmul.msk.bf16.gmra.mxu2 %vm1492_vm1, %v10871_v56  ;;  %v2909_v14 = vld [vmem:[%s11285_s0 + $0x3d8] sm:$0xff] }
 0x231   : > { %v12021_v5 = vmul.f32 %v11426_v29, %v2569_v21  ;;  %v12033_v29 = vpop.permute.xlu2 %3409  ;;  %v12035_v57 = vpop.permute.xlu1 %3404 }
 0x232   : > { %17368 = vst [vmem:[#allocation103_spill] sm:$0xff] %v12033_v29  ;;  %v12037_v21 = vpop.permute.xlu0 %3394  ;;  %v2988_v29 = vld [vmem:[%s11285_s0 + $0x650] sm:$0xff] }
 0x233   : > { %17369 = vst [vmem:[#allocation104_spill] sm:$0xff] %v12035_v57  ;;  %v12040_v58 = vpop.f32.mrf.mxu2  ;;  %3669 = vperm.xlu1 %10984, %v2911_v19   ;;  %v2990_v57 = vld [vmem:[%s11285_s0 + $0x660] sm:$0xff] }
 0x234   : > { %v12030_v63 = vpop.f32.mrf.mxu0  ;;  %17370 = vst [vmem:[#allocation105_spill] sm:$0xff] %v12040_v58  ;;  %v3020_v58 = vld [vmem:[%s11285_s0 + $0x750] sm:$0xff] }
 0x236   : > { %3949 = vperm.xlu2 %10985, %v2967_v32   ;;  %v10783_v32 = vld [vmem:[%s11300_s12 + $0xe8] sm:$0xff] }
 0x237   : > { %9559 = vmatmul.msk.bf16.gmra.mxu0 %vm1492_vm1, %v10782_v42  ;;  %v2962_v42 = vld [vmem:[%s11285_s0 + $0x580] sm:$0xff] }
 0x238   : > { %3659 = vperm.xlu0 %10983, %v2909_v14  }
 0x239   : > { %v12047_v17 = vpop.permute.xlu2 %3384  ;;  %v12049_v54 = vpop.permute.xlu1 %3399 }
 0x23a   : > { %v12051_v47 = vpop.permute.xlu0 %3389 }
 0x23b   : > { %v12053_v11 = vpop.f32.mrf.mxu2  ;;  %3644 = vperm.xlu1 %10984, %v2906_v22   ;;  %v2913_v22 = vld [vmem:[%s11285_s0 + $0x3f8] sm:$0xff] }
 0x23c   : > { %v12045_v56 = vpop.f32.mrf.mxu0  ;;  %17371 = vst [vmem:[#allocation106_spill] sm:$0xff] %v12053_v11 }
 0x23d   : > { %v1993_v33 = vadd.f32 %v11966_v23, %v12045_v56  ;;  %v17085_v56 = vmov 1.0|1.0  }
 0x23e   : > { %3924 = vperm.xlu2 %10985, %v2962_v42  }
 0x240   : > { %3634 = vperm.xlu0 %10983, %v2904_v25   ;;  %9649 = vmatmul.msk.bf16.gmra.mxu2 %vm1492_vm1, %v10872_v0  ;;  %v2905_v25 = vld [vmem:[%s11285_s0 + $0x3b8] sm:$0xff] }
 0x241   : > { %v12063_v14 = vpop.permute.xlu2 %3379  ;;  %v12065_v55 = vpop.permute.xlu1 %3374 }
 0x242   : > { %v12067_v48 = vpop.permute.xlu0 %3834 }
 0x243   : > { %17372 = vst [vmem:[#allocation107_spill] sm:$0xff] %v12067_v48  ;;  %v12070_v42 = vpop.f32.mrf.mxu2  ;;  %3639 = vperm.xlu1 %10984, %v2905_v25  }
 0x244   : > { %v12060_v19 = vpop.f32.mrf.mxu0  ;;  %17373 = vst [vmem:[#allocation108_spill] sm:$0xff] %v12070_v42 }
 0x246   : > { %3679 = vperm.xlu2 %10985, %v2913_v22  }
 0x247   : > { %9560 = vmatmul.msk.bf16.gmra.mxu0 %vm1492_vm1, %v10783_v32  ;;  %v2908_v32 = vld [vmem:[%s11285_s0 + $0x3d0] sm:$0xff] }
 0x248   : > { %3629 = vperm.xlu0 %10983, %v2903_v26   ;;  %v10784_v26 = vld [vmem:[%s11300_s12 + $0xf0] sm:$0xff] }
 0x249   : > { %v12077_v39 = vpop.permute.xlu2 %3364  ;;  %v12079_v30 = vpop.permute.xlu1 %3839 }
 0x24a   : > { %17374 = vst [vmem:[#allocation109_spill] sm:$0xff] %v12079_v30  ;;  %v12081_v48 = vpop.permute.xlu0 %3369 }
 0x24b   : > { %v12083_v10 = vpop.f32.mrf.mxu2  ;;  %3614 = vperm.xlu1 %10984, %v2900_v34   ;;  %v2907_v34 = vld [vmem:[%s11285_s0 + $0x3c8] sm:$0xff] }
 0x24c   : > { %v12075_v0 = vpop.f32.mrf.mxu0  ;;  %17375 = vst [vmem:[#allocation110_spill] sm:$0xff] %v12083_v10  ;;  %v3040_v10 = vld [vmem:[%s11285_s0 + $0x7f0] sm:$0xff] }
 0x24e   : > { %3654 = vperm.xlu2 %10985, %v2908_v32   ;;  %v2993_v32 = vld [vmem:[%s11285_s0 + $0x678] sm:$0xff] }
 0x250   : > { %4074 = vperm.xlu0 %10983, %v2992_v49   ;;  %9650 = vmatmul.msk.bf16.gmra.mxu2 %vm1492_vm1, %v10873_v4  ;;  %v2899_v49 = vld [vmem:[%s11285_s0 + $0x388] sm:$0xff] }
 0x251   : > { %v12091_v25 = vpop.permute.xlu2 %3829  ;;  %v12093_v30 = vpop.permute.xlu1 %3824 }
 0x252   : > { %17376 = vst [vmem:[#allocation111_spill] sm:$0xff] %v12091_v25  ;;  %v12095_v53 = vpop.permute.xlu0 %3814 }
 0x253   : > { %17377 = vst [vmem:[#allocation112_spill] sm:$0xff] %v12093_v30  ;;  %v12098_v59 = vpop.f32.mrf.mxu2  ;;  %4079 = vperm.xlu1 %10984, %v2993_v32  }
 0x254   : > { %v2000_v22 = vpop.f32.mrf.mxu0  ;;  %17378 = vst [vmem:[#allocation113_spill] sm:$0xff] %v12095_v53 }
 0x256   : > { %3649 = vperm.xlu2 %10985, %v2907_v34   ;;  %v10785_v34 = vld [vmem:[%s11300_s12 + $0xf8] sm:$0xff] }
 0x257   : > { %9561 = vmatmul.msk.bf16.gmra.mxu0 %vm1492_vm1, %v10784_v26  ;;  %v2902_v26 = vld [vmem:[%s11285_s0 + $0x3a0] sm:$0xff] }
 0x258   : > { %3609 = vperm.xlu0 %10983, %v2899_v49  }
 0x259   : > { %v12103_v25 = vpop.permute.xlu2 %3994  ;;  %v12105_v30 = vpop.permute.xlu1 %3819 }
 0x25a   : > { %17379 = vst [vmem:[#allocation114_spill] sm:$0xff] %v12103_v25  ;;  %v12107_v60 = vpop.permute.xlu0 %3999 }
 0x25b   : > { %17380 = vst [vmem:[#allocation115_spill] sm:$0xff] %v12105_v30  ;;  %v12109_v53 = vpop.f32.mrf.mxu2  ;;  %4064 = vperm.xlu1 %10984, %v2990_v57   ;;  %v2989_v57 = vld [vmem:[%s11285_s0 + $0x658] sm:$0xff] }
 0x25c   : > { %v2002_v4 = vpop.f32.mrf.mxu0  ;;  %17381 = vst [vmem:[#allocation116_spill] sm:$0xff] %v12107_v60 }
 0x25e   : > { %3624 = vperm.xlu2 %10985, %v2902_v26   ;;  %v2901_v26 = vld [vmem:[%s11285_s0 + $0x398] sm:$0xff] }
 0x260   : > { %4054 = vperm.xlu0 %10983, %v2988_v29   ;;  %9651 = vmatmul.msk.bf16.gmra.mxu2 %vm1492_vm1, %v10874_v41  ;;  %v4578_v29 = vlaneseq  ;;  %v2003_v41 = vadd.f32 %v11966_v23, %v2002_v4  ;;  %v1998_v4 = vadd.f32 %v11966_v23, %v12075_v0  ;;  %v1996_v0 = vadd.f32 %v11966_v23, %v12060_v19 }
 0x261   : > { %v12117_v49 = vpop.permute.xlu2 %3809  ;;  %v12119_v60 = vpop.permute.xlu1 %3804 }
 0x262   : > { %17382 = vst [vmem:[#allocation117_spill] sm:$0xff] %v12117_v49  ;;  %v12121_v25 = vpop.permute.xlu0 %3984  ;;  %v2573_v19 = vmax.f32 %v1998_v4, 0.0  ;;  %v2571_v4 = vmax.f32 %v1993_v33, 0.0 }
 0x263   : > { %17383 = vst [vmem:[#allocation118_spill] sm:$0xff] %v12119_v60  ;;  %v12124_v30 = vpop.f32.mrf.mxu2  ;;  %4059 = vperm.xlu1 %10984, %v2989_v57   ;;  %v12131_v60 = vshrl.u32 %v4578_v29, 7  ;;  %v2575_v57 = vmax.f32 %v2003_v41, 0.0 }
 0x264   : > { %v2005_v32 = vpop.f32.mrf.mxu0  ;;  %17384 = vst [vmem:[#allocation119_spill] sm:$0xff] %v12121_v25  ;;  %v4363_v33 = vmul.f32 %v11449_v44, %v2571_v4 }
 0x265   : > { %17385 = vst [vmem:[#allocation120_spill] sm:$0xff] %v12124_v30  ;;  %v2006_v9 = vadd.f32 %v11966_v23, %v2005_v32  ;;  %v4581_v44 = vadd.s32 16, %v12131_v60 }
 0x266   : > { %3619 = vperm.xlu2 %10985, %v2901_v26  }
 0x267   : > { %9562 = vmatmul.msk.bf16.gmra.mxu0 %vm1492_vm1, %v10785_v34  ;;  %v2001_v34 = vadd.f32 %v11966_v23, %v2000_v22  ;;  %v2576_v30 = vmax.f32 %v2006_v9, 0.0  ;;  %v12147_v9 = vstv %s9659_s25  ;;  %v12150_v22 = vld [vmem:[%s11280_s20] sm:$0xff] }
 0x268   : > { %4159 = vperm.xlu0 %10983, %v3009_v27   ;;  %v4580_v27 = vadd.s32 8, %v12131_v60  ;;  %v12504_v11 = vperm.slane %v12150_v22, 1 }
 0x269   : > { %v12134_v25 = vpop.permute.xlu2 %3794  ;;  %v12138_v6 = vpop.permute.xlu1 %3989  ;;  %v2574_v41 = vmax.f32 %v2001_v34, 0.0 }
 0x26a   : > { %17386 = vst [vmem:[#allocation121_spill] sm:$0xff] %v12134_v25  ;;  %v12140_v26 = vpop.permute.xlu0 %3799 }
 0x26b   : > { %17387 = vst [vmem:[#allocation122_spill] sm:$0xff] %v12138_v6  ;;  %v12145_v25 = vpop.f32.mrf.mxu2  ;;  %v12157_v6 = vadd.s32 %v12147_v9, %v4580_v27  ;;  %v10875_v27 = vld [vmem:[%s11300_s12 + $0x3c8] sm:$0xff]  ;;  %4044 = vperm.xlu1 %10984, %v2986_v46   ;;  %v2572_v46 = vmax.f32 %v1996_v0, 0.0 }
 0x26c   : > { %v2007_v49 = vpop.f32.mrf.mxu0  ;;  %17388 = vst [vmem:[#allocation123_spill] sm:$0xff] %v12140_v26  ;;  %v12160_v26 = vperm.slane %v12150_v22, 0 }
 0x26d   : > { %v2008_v32 = vadd.f32 %v11966_v23, %v2007_v49  ;;  %17389 = vst [vmem:[#allocation124_spill] sm:$0xff] %v12145_v25  ;;  %v12154_v49 = vadd.s32 %v12147_v9, %v12131_v60 }
 0x26e   : > { %17391 = vst [vmem:[#allocation126_spill] sm:$0xff] %v12157_v6  ;;  %vm4679_vm3 = vcmp.eq.s32.totalorder %v12157_v6, %v12160_v26  ;;  %3604 = vperm.xlu2 %10985, %v2898_v36   ;;  %v1991_v36 = vadd.f32 %v11966_v23, %v12030_v63  ;;  %v4364_v63 = vmul.f32 %v11395_v7, %v2572_v46  ;;  %v4582_v46 = vadd.s32 24, %v12131_v60 }
 0x26f   : > { %v2577_v29 = vmax.f32 %v2008_v32, 0.0  ;;  %17390 = vst [vmem:[#allocation125_spill] sm:$0xff] %v12154_v49  ;;  %v4368_v32 = vmul.f32 %v11404_v13, %v2576_v30  ;;  %vm4663_vm2 = vcmp.eq.s32.totalorder %v12154_v49, %v12160_v26  ;;  %v10786_v13 = vld [vmem:[%s11300_s12 + $0x100] sm:$0xff] }
 0x270   : > { %vm10172_vm4 = vmpackc.low %vm4679_vm3, %vm4663_vm2  ;;  %4144 = vperm.xlu0 %10983, %v3006_v40   ;;  %9652 = vmatmul.msk.bf16.gmra.mxu2 %vm1492_vm1, %v10875_v27 }
 0x271   : > { %v4369_v25 = vmul.f32 %v11402_v12, %v2577_v29  ;;  %v4367_v12 = vmul.f32 %v11386_v1, %v2575_v57  ;;  %10173 = vmatmul.msk.bf16.vlgmr.msra.gmra.mxu1 %vm10172_vm4, %v17085_v56  ;;  %v12180_v29 = vpop.permute.xlu2 %3979  ;;  %v12185_v1 = vpop.permute.xlu1 %3974  ;;  %v2570_v56 = vmax.f32 %v1991_v36, 0.0 }
 0x272   : > { %17392 = vst [vmem:[#allocation127_spill] sm:$0xff] %v12180_v29  ;;  %v12187_v40 = vpop.permute.xlu0 %3784 }
 0x273   : > { %v6510_v34 = vpack.c.bf16 %v4369_v25, %v4368_v32  ;;  %v4366_v25 = vmul.f32 %v11411_v18, %v2574_v41  ;;  %17393 = vst [vmem:[#allocation128_spill] sm:$0xff] %v12185_v1  ;;  %v4365_v32 = vmul.f32 %v11433_v35, %v2573_v19  ;;  %v12191_v27 = vpop.f32.mrf.mxu2  ;;  %v2991_v18 = vld [vmem:[%s11285_s0 + $0x668] sm:$0xff]  ;;  %v4362_v35 = vmul.f32 %v11451_v45, %v2570_v56 }
 0x274   : > { %v2010_v30 = vpop.f32.mrf.mxu0  ;;  %17394 = vst [vmem:[#allocation129_spill] sm:$0xff] %v12187_v40  ;;  %v3007_v41 = vld [vmem:[%s11285_s0 + $0x6e8] sm:$0xff]  ;;  %v12212_v56 = vadd.s32 %v12147_v9, %v4581_v44 }
 0x275   : > { %6793 = vmatpush.bf16.msra.mxu3 %v6510_v34  ;;  %v6509_v57 = vpack.c.bf16 %v4367_v12, %v4366_v25  ;;  %17395 = vst [vmem:[#allocation130_spill] sm:$0xff] %v12191_v27  ;;  %v2011_v0 = vadd.f32 %v11966_v23, %v2010_v30  ;;  %v2985_v34 = vld [vmem:[%s11285_s0 + $0x638] sm:$0xff]  ;;  %4149 = vperm.xlu1 %10984, %v3007_v41   ;;  %v10876_v41 = vld [vmem:[%s11300_s12 + $0x3d0] sm:$0xff] }
 0x276   : > { %4069 = vperm.xlu2 %10985, %v2991_v18   ;;  %v6508_v1 = vpack.c.bf16 %v4365_v32, %v4364_v63  ;;  %v6507_v4 = vpack.c.bf16 %v4363_v33, %v4362_v35  ;;  %17400 = vst [vmem:[#allocation135_spill] sm:$0xff] %v12212_v56  ;;  %v3008_v63 = vld [vmem:[%s11285_s0 + $0x6f0] sm:$0xff]  ;;  %v2982_v18 = vld [vmem:[%s11285_s0 + $0x620] sm:$0xff]  ;;  %vm4695_vm5 = vcmp.eq.s32.totalorder %v12212_v56, %v12160_v26  ;;  %v17402_v33 = vmov 1.0|1.0  }
 0x277   : > { %9563 = vmatmul.msk.bf16.gmra.mxu0 %vm1492_vm1, %v10786_v13  ;;  %v2578_v19 = vmax.f32 %v2011_v0, 0.0  ;;  %v3004_v0 = vld [vmem:[%s11285_s0 + $0x6d0] sm:$0xff]  ;;  %v17404_v35 = vpack.c.bf16 %v12021_v5, %v12018_v52 }
 0x278   : > { %4039 = vperm.xlu0 %10983, %v2985_v34   ;;  %v10787_v34 = vld [vmem:[%s11300_s12 + $0x108] sm:$0xff] }
 0x279   : > { %6794 = vmatpush.bf16.msra.mxu3 %v6509_v57  ;;  %v12199_v12 = vpop.permute.xlu2 %3964  ;;  %v12203_v30 = vpop.permute.xlu1 %3789  ;;  %v12215_v57 = vadd.s32 %v12147_v9, %v4582_v46 }
 0x27a   : > { %17396 = vst [vmem:[#allocation131_spill] sm:$0xff] %v12199_v12  ;;  %v12205_v36 = vpop.permute.xlu0 %3969 }
 0x27b   : > { %17397 = vst [vmem:[#allocation132_spill] sm:$0xff] %v12203_v30  ;;  %v12209_v45 = vpop.f32.mrf.mxu2  ;;  %vm4711_vm6 = vcmp.eq.s32.totalorder %v12215_v57, %v12160_v26 }
 0x27c   : > { %v2012_v13 = vpop.f32.mrf.mxu0  ;;  %17398 = vst [vmem:[#allocation133_spill] sm:$0xff] %v12205_v36  ;;  %vm10174_vm7 = vmpackc.low %vm4711_vm6, %vm4695_vm5 }
 0x27d   : > { %v2013_v7 = vadd.f32 %v11966_v23, %v2012_v13  ;;  %6795 = vmatpush.bf16.msra.mxu3 %v6508_v1  ;;  %17399 = vst [vmem:[#allocation134_spill] sm:$0xff] %v12209_v45  ;;  %v12218_v1 = vmul.f32 %v11584_v15, %v2578_v19  ;;  %4134 = vperm.xlu1 %10984, %v3004_v0   ;;  %v3003_v0 = vld [vmem:[%s11285_s0 + $0x6c8] sm:$0xff]  ;;  %v10877_v15 = vld [vmem:[%s11300_s12 + $0x3d8] sm:$0xff] }
 0x27e   : > { %17401 = vst [vmem:[#allocation136_spill] sm:$0xff] %v12215_v57  ;;  %4154 = vperm.xlu2 %10985, %v3008_v63   ;;  %v2983_v63 = vld [vmem:[%s11285_s0 + $0x628] sm:$0xff] }
 0x27f   : > { %v2579_v25 = vmax.f32 %v2013_v7, 0.0 }
 0x280   : > { %4024 = vperm.xlu0 %10983, %v2982_v18   ;;  %9653 = vmatmul.msk.bf16.gmra.mxu2 %vm1492_vm1, %v10876_v41 }
 0x281   : > { %6796 = vmatpush.bf16.msra.mxu3 %v6507_v4  ;;  %v12221_v32 = vmul.f32 %v11614_v51, %v2579_v25  ;;  %10175 = vmatmul.msk.bf16.gmra.mxu1 %vm10174_vm7, %v17402_v33  ;;  %v12236_v13 = vpop.permute.xlu2 %3779  ;;  %v12241_v19 = vpop.permute.xlu1 %3774  ;;  %v17408_v25 = vpack.c.bf16 %v11985_v3, %v11982_v28  ;;  %v2987_v4 = vld [vmem:[%s11285_s0 + $0x648] sm:$0xff] }
 0x282   : > { %17403 = vst [vmem:[#allocation137_spill] sm:$0xff] %v12236_v13  ;;  %v12243_v7 = vpop.permute.xlu0 %3954 }
 0x283   : > { %17405 = vst [vmem:[#allocation138_spill] sm:$0xff] %v12241_v19  ;;  %v12246_v44 = vpop.f32.mrf.mxu2  ;;  %v2978_v19 = vld [vmem:[%s11285_s0 + $0x600] sm:$0xff] }
 0x284   : > { %v2015_v51 = vpop.f32.mrf.mxu0  ;;  %17406 = vst [vmem:[#allocation139_spill] sm:$0xff] %v12243_v7  ;;  %v3002_v7 = vld [vmem:[%s11285_s0 + $0x6c0] sm:$0xff] }
 0x285   : > { %6797 = vmatpush.bf16.msra.mxu3 %v17404_v35  ;;  %17407 = vst [vmem:[#allocation140_spill] sm:$0xff] %v12246_v44  ;;  %v2016_v46 = vadd.f32 %v11966_v23, %v2015_v51  ;;  %4029 = vperm.xlu1 %10984, %v2983_v63   ;;  %v4583_v51 = vadd.s32 32, %v12131_v60  ;;  %v4584_v35 = vadd.s32 40, %v12131_v60 }
 0x286   : > { %4049 = vperm.xlu2 %10985, %v2987_v4  }
 0x287   : > { %9564 = vmatmul.msk.bf16.gmra.mxu0 %vm1492_vm1, %v10787_v34  ;;  %v2580_v18 = vmax.f32 %v2016_v46, 0.0  ;;  %v17410_v34 = vpack.c.bf16 %v11944_v43, %v11938_v50  ;;  %v12270_v46 = vadd.s32 %v12147_v9, %v4583_v51  ;;  %v12273_v63 = vadd.s32 %v12147_v9, %v4584_v35 }
 0x288   : > { %4129 = vperm.xlu0 %10983, %v3003_v0   ;;  %v17416_v43 = vpack.c.bf16 %v11896_v61, %v11893_v16 }
 0x289   : > { %6798 = vmatpush.bf16.msra.mxu3 %v17408_v25  ;;  %v12255_v5 = vpop.permute.xlu2 %3764  ;;  %v12261_v28 = vpop.permute.xlu1 %3959  ;;  %17414 = vst [vmem:[#allocation145_spill] sm:$0xff] %v12270_v46  ;;  %v12276_v50 = vmul.f32 %v11586_v38, %v2580_v18  ;;  %vm4727_vm8 = vcmp.eq.s32.totalorder %v12270_v46, %v12160_v26  ;;  %vm4743_vm9 = vcmp.eq.s32.totalorder %v12273_v63, %v12160_v26  ;;  %v10788_v38 = vld [vmem:[%s11300_s12 + $0x110] sm:$0xff] }
 0x28a   : > { %17409 = vst [vmem:[#allocation141_spill] sm:$0xff] %v12255_v5  ;;  %v12263_v3 = vpop.permute.xlu0 %3769  ;;  %vm10176_vm10 = vmpackc.low %vm4743_vm9, %vm4727_vm8  ;;  %v2958_v5 = vld [vmem:[%s11285_s0 + $0x560] sm:$0xff]  ;;  %vm4664_vm8 = vcmp.eq.s32.totalorder %v12154_v49, %v12504_v11  ;;  %vm4680_vm9 = vcmp.eq.s32.totalorder %v12157_v6, %v12504_v11 }
 0x28b   : > { %17411 = vst [vmem:[#allocation142_spill] sm:$0xff] %v12261_v28  ;;  %v12267_v4 = vpop.f32.mrf.mxu2 }
 0x28c   : > { %v2017_v52 = vpop.f32.mrf.mxu0  ;;  %17412 = vst [vmem:[#allocation143_spill] sm:$0xff] %v12263_v3  ;;  %v2960_v3 = vld [vmem:[%s11285_s0 + $0x570] sm:$0xff] }
 0x28d   : > { %v2018_v41 = vadd.f32 %v11966_v23, %v2017_v52  ;;  %6799 = vmatpush.bf16.msra.mxu3 %v17410_v34  ;;  %17413 = vst [vmem:[#allocation144_spill] sm:$0xff] %v12267_v4  ;;  %v2984_v52 = vld [vmem:[%s11285_s0 + $0x630] sm:$0xff] }
 0x28e   : > { %17415 = vst [vmem:[#allocation146_spill] sm:$0xff] %v12273_v63  ;;  %v3000_v34 = vld [vmem:[%s11285_s0 + $0x6b0] sm:$0xff]  ;;  %4034 = vperm.xlu2 %10985, %v2984_v52   ;;  %v3001_v52 = vld [vmem:[%s11285_s0 + $0x6b8] sm:$0xff] }
 0x28f   : > { %v2581_v25 = vmax.f32 %v2018_v41, 0.0  ;;  %v2980_v41 = vld [vmem:[%s11285_s0 + $0x610] sm:$0xff] }
 0x290   : > { %4014 = vperm.xlu1 %10984, %v2980_v41   ;;  %4114 = vperm.xlu0 %10983, %v3000_v34   ;;  %v2979_v41 = vld [vmem:[%s11285_s0 + $0x608] sm:$0xff] }
 0x291   : > { %6800 = vmatpush.bf16.msra.mxu3 %v17416_v43  ;;  %v12282_v0 = vmul.f32 %v11569_v20, %v2581_v25  ;;  %9654 = vmatmul.msk.bf16.gmra.mxu2 %vm1492_vm1, %v10877_v15  ;;  %v12297_v61 = vpop.permute.xlu2 %3949  ;;  %v12299_v18 = vpop.permute.xlu1 %3944  ;;  %v3005_v43 = vld [vmem:[%s11285_s0 + $0x6d8] sm:$0xff] }
 0x292   : > { %10177 = vmatmul.msk.bf16.gmra.mxu1 %vm10176_vm10, %v17402_v33  ;;  %17417 = vst [vmem:[#allocation147_spill] sm:$0xff] %v12297_v61  ;;  %v12301_v51 = vpop.permute.xlu0 %3934  ;;  %v2998_v61 = vld [vmem:[%s11285_s0 + $0x6a0] sm:$0xff] }
 0x293   : > { %17418 = vst [vmem:[#allocation148_spill] sm:$0xff] %v12299_v18  ;;  %v12304_v35 = vpop.f32.mrf.mxu2  ;;  %v2996_v18 = vld [vmem:[%s11285_s0 + $0x690] sm:$0xff] }
 0x294   : > { %v2020_v16 = vpop.f32.mrf.mxu0  ;;  %17419 = vst [vmem:[#allocation149_spill] sm:$0xff] %v12301_v51 }
 0x295   : > { %17420 = vst [vmem:[#allocation150_spill] sm:$0xff] %v12304_v35  ;;  %v2021_v25 = vadd.f32 %v11966_v23, %v2020_v16  ;;  %v4585_v16 = vadd.s32 48, %v12131_v60 }
 0x296   : > { %4139 = vperm.xlu2 %10985, %v3005_v43   ;;  %v4586_v43 = vadd.s32 56, %v12131_v60 }
 0x297   : > { %9565 = vmatmul.msk.bf16.gmra.mxu0 %vm1492_vm1, %v10788_v38  ;;  %v2582_v20 = vmax.f32 %v2021_v25, 0.0  ;;  %v12322_v29 = vadd.s32 %v12147_v9, %v4585_v16 }
 0x298   : > { %4119 = vperm.xlu1 %10984, %v3001_v52   ;;  %4009 = vperm.xlu0 %10983, %v2979_v41   ;;  %v12325_v28 = vadd.s32 %v12147_v9, %v4586_v43 }
 0x299   : > { %v12310_v34 = vpop.permute.xlu2 %3924  ;;  %v12313_v12 = vpop.permute.xlu1 %3939  ;;  %17425 = vst [vmem:[#allocation155_spill] sm:$0xff] %v12322_v29  ;;  %v12328_v25 = vmul.f32 %v11581_v8, %v2582_v20  ;;  %vm4759_vm11 = vcmp.eq.s32.totalorder %v12322_v29, %v12160_v26  ;;  %v10789_v8 = vld [vmem:[%s11300_s12 + $0x118] sm:$0xff] }
 0x29a   : > { %17421 = vst [vmem:[#allocation151_spill] sm:$0xff] %v12310_v34  ;;  %v12315_v36 = vpop.permute.xlu0 %3929  ;;  %vm4775_vm12 = vcmp.eq.s32.totalorder %v12325_v28, %v12160_v26 }
 0x29b   : > { %17422 = vst [vmem:[#allocation152_spill] sm:$0xff] %v12313_v12  ;;  %v12319_v41 = vpop.f32.mrf.mxu2  ;;  %v10878_v12 = vld [vmem:[%s11300_s12 + $0x3e0] sm:$0xff]  ;;  %vm10178_vm13 = vmpackc.low %vm4775_vm12, %vm4759_vm11 }
 0x29c   : > { %v2022_v15 = vpop.f32.mrf.mxu0  ;;  %17423 = vst [vmem:[#allocation153_spill] sm:$0xff] %v12315_v36  ;;  %vm10204_vm12 = vmpackc.low %vm4680_vm9, %vm4664_vm8  ;;  %vm4728_vm8 = vcmp.eq.s32.totalorder %v12270_v46, %v12504_v11  ;;  %vm4744_vm9 = vcmp.eq.s32.totalorder %v12273_v63, %v12504_v11 }
 0x29d   : > { %v2023_v38 = vadd.f32 %v11966_v23, %v2022_v15  ;;  %17424 = vst [vmem:[#allocation154_spill] sm:$0xff] %v12319_v41 }
 0x29e   : > { %17426 = vst [vmem:[#allocation156_spill] sm:$0xff] %v12325_v28  ;;  %4124 = vperm.xlu2 %10985, %v3002_v7  }
 0x29f   : > { %v2583_v52 = vmax.f32 %v2023_v38, 0.0 }
 0x2a0   : > { %4104 = vperm.xlu1 %10984, %v2998_v61   ;;  %4094 = vperm.xlu0 %10983, %v2996_v18   ;;  %v2995_v18 = vld [vmem:[%s11285_s0 + $0x688] sm:$0xff] }
 0x2a1   : > { %v12331_v15 = vmul.f32 %v11579_v2, %v2583_v52  ;;  %9655 = vmatmul.msk.bf16.gmra.mxu2 %vm1492_vm1, %v10878_v12  ;;  %v12346_v38 = vpop.permute.xlu2 %3679  ;;  %v12348_v16 = vpop.permute.xlu1 %3674  ;;  %v2981_v52 = vld [vmem:[%s11285_s0 + $0x618] sm:$0xff] }
 0x2a2   : > { %10179 = vmatmul.msk.bf16.gmra.mxu1 %vm10178_vm13, %v17402_v33  ;;  %17427 = vst [vmem:[#allocation157_spill] sm:$0xff] %v12346_v38  ;;  %v12350_v43 = vpop.permute.xlu0 %3664  ;;  %v2997_v2 = vld [vmem:[%s11285_s0 + $0x698] sm:$0xff]  ;;  %v2952_v38 = vld [vmem:[%s11285_s0 + $0x530] sm:$0xff] }
 0x2a3   : > { %17428 = vst [vmem:[#allocation158_spill] sm:$0xff] %v12348_v16  ;;  %v12353_v7 = vpop.f32.mrf.mxu2  ;;  %v10880_v16 = vld [vmem:[%s11300_s12 + $0x3f0] sm:$0xff] }
 0x2a4   : > { %v2025_v20 = vpop.f32.mrf.mxu0  ;;  %17429 = vst [vmem:[#allocation159_spill] sm:$0xff] %v12350_v43 }
 0x2a5   : > { %17430 = vst [vmem:[#allocation160_spill] sm:$0xff] %v12353_v7  ;;  %v2026_v61 = vadd.f32 %v11966_v23, %v2025_v20  ;;  %v4587_v20 = vadd.s32 64, %v12131_v60  ;;  %v10881_v7 = vld [vmem:[%s11300_s12 + $0x3f8] sm:$0xff] }
 0x2a6   : > { %4019 = vperm.xlu2 %10985, %v2981_v52  }
 0x2a7   : > { %9566 = vmatmul.msk.bf16.gmra.mxu0 %vm1492_vm1, %v10789_v8  ;;  %v2584_v36 = vmax.f32 %v2026_v61, 0.0  ;;  %v12371_v40 = vadd.s32 %v12147_v9, %v4587_v20 }
 0x2a8   : > { %4099 = vperm.xlu1 %10984, %v2997_v2   ;;  %4089 = vperm.xlu0 %10983, %v2995_v18   ;;  %v4588_v2 = vadd.s32 72, %v12131_v60 }
 0x2a9   : > { %v12359_v51 = vpop.permute.xlu2 %3654  ;;  %v12362_v34 = vpop.permute.xlu1 %3669  ;;  %17435 = vst [vmem:[#allocation165_spill] sm:$0xff] %v12371_v40  ;;  %v12377_v61 = vmul.f32 %v11534_v31, %v2584_v36  ;;  %vm4791_vm14 = vcmp.eq.s32.totalorder %v12371_v40, %v12160_v26  ;;  %v10790_v31 = vld [vmem:[%s11300_s12 + $0x120] sm:$0xff] }
 0x2aa   : > { %17431 = vst [vmem:[#allocation161_spill] sm:$0xff] %v12359_v51  ;;  %v12364_v30 = vpop.permute.xlu0 %3659  ;;  %v12374_v13 = vadd.s32 %v12147_v9, %v4588_v2  ;;  %v10879_v51 = vld [vmem:[%s11300_s12 + $0x3e8] sm:$0xff] }
 0x2ab   : > { %17432 = vst [vmem:[#allocation162_spill] sm:$0xff] %v12362_v34  ;;  %v12368_v18 = vpop.f32.mrf.mxu2 }
 0x2ac   : > { %v2027_v12 = vpop.f32.mrf.mxu0  ;;  %17433 = vst [vmem:[#allocation163_spill] sm:$0xff] %v12364_v30  ;;  %vm4807_vm15 = vcmp.eq.s32.totalorder %v12374_v13, %v12160_v26  ;;  %v4590_v30 = vadd.s32 88, %v12131_v60 }
 0x2ad   : > { %v2028_v8 = vadd.f32 %v11966_v23, %v2027_v12  ;;  %17434 = vst [vmem:[#allocation164_spill] sm:$0xff] %v12368_v18  ;;  %vm10180_vm0 = vmpackc.low %vm4807_vm15, %vm4791_vm14  ;;  %vm4696_vm14 = vcmp.eq.s32.totalorder %v12212_v56, %v12504_v11  ;;  %vm4712_vm15 = vcmp.eq.s32.totalorder %v12215_v57, %v12504_v11 }
 0x2ae   : > { %17436 = vst [vmem:[#allocation166_spill] sm:$0xff] %v12374_v13  ;;  %4004 = vperm.xlu2 %10985, %v2978_v19  }
 0x2af   : > { %v2585_v52 = vmax.f32 %v2028_v8, 0.0 }
 0x2b0   : > { %3914 = vperm.xlu1 %10984, %v2960_v3   ;;  %3904 = vperm.xlu0 %10983, %v2958_v5   ;;  %v2999_v3 = vld [vmem:[%s11285_s0 + $0x6a8] sm:$0xff] }
 0x2b1   : > { %v12380_v12 = vmul.f32 %v11573_v37, %v2585_v52  ;;  %9656 = vmatmul.msk.bf16.gmra.mxu2 %vm1492_vm1, %v10879_v51  ;;  %v12397_v8 = vpop.permute.xlu2 %3649  ;;  %v12399_v20 = vpop.permute.xlu1 %3644  ;;  %v2959_v5 = vld [vmem:[%s11285_s0 + $0x568] sm:$0xff]  ;;  %v2957_v52 = vld [vmem:[%s11285_s0 + $0x558] sm:$0xff] }
 0x2b2   : > { %10181 = vmatmul.msk.bf16.gmra.mxu1 %vm10180_vm0, %v17402_v33  ;;  %17437 = vst [vmem:[#allocation167_spill] sm:$0xff] %v12397_v8  ;;  %v12401_v2 = vpop.permute.xlu0 %3634  ;;  %v4589_v8 = vadd.s32 80, %v12131_v60 }
 0x2b3   : > { %17438 = vst [vmem:[#allocation168_spill] sm:$0xff] %v12399_v20  ;;  %v12404_v19 = vpop.f32.mrf.mxu2 }
 0x2b4   : > { %v12393_v36 = vpop.f32.mrf.mxu0  ;;  %17439 = vst [vmem:[#allocation169_spill] sm:$0xff] %v12401_v2  ;;  %v12422_v34 = vadd.s32 %v12147_v9, %v4589_v8  ;;  %v10791_v8 = vld [vmem:[%s11300_s12 + $0x128] sm:$0xff] }
 0x2b5   : > { %17440 = vst [vmem:[#allocation170_spill] sm:$0xff] %v12404_v19 }
 0x2b6   : > { %4109 = vperm.xlu2 %10985, %v2999_v3   ;;  %17445 = vst [vmem:[#allocation175_spill] sm:$0xff] %v12422_v34  ;;  %v12425_v3 = vadd.s32 %v12147_v9, %v4590_v30  ;;  %vm4823_vm2 = vcmp.eq.s32.totalorder %v12422_v34, %v12160_v26 }
 0x2b7   : > { %9567 = vmatmul.msk.bf16.gmra.mxu0 %vm1492_vm1, %v10790_v31 }
 0x2b8   : > { %3909 = vperm.xlu1 %10984, %v2959_v5   ;;  %3899 = vperm.xlu0 %10983, %v2957_v52   ;;  %17446 = vst [vmem:[#allocation176_spill] sm:$0xff] %v12425_v3  ;;  %v2994_v5 = vld [vmem:[%s11285_s0 + $0x680] sm:$0xff]  ;;  %vm4839_vm3 = vcmp.eq.s32.totalorder %v12425_v3, %v12160_v26 }
 0x2b9   : > { %v12411_v37 = vpop.permute.xlu2 %3624  ;;  %v12413_v20 = vpop.permute.xlu1 %3639  ;;  %v2954_v52 = vld [vmem:[%s11285_s0 + $0x540] sm:$0xff]  ;;  %vm10182_vm4 = vmpackc.low %vm4839_vm3, %vm4823_vm2 }
 0x2ba   : > { %17441 = vst [vmem:[#allocation171_spill] sm:$0xff] %v12411_v37  ;;  %v12415_v31 = vpop.permute.xlu0 %3629  ;;  %vm10206_vm3 = vmpackc.low %vm4712_vm15, %vm4696_vm14 }
 0x2bb   : > { %17442 = vst [vmem:[#allocation172_spill] sm:$0xff] %v12413_v20  ;;  %v12419_v43 = vpop.f32.mrf.mxu2 }
 0x2bc   : > { %v12409_v51 = vpop.f32.mrf.mxu0  ;;  %17443 = vst [vmem:[#allocation173_spill] sm:$0xff] %v12415_v31 }
 0x2bd   : > { %17444 = vst [vmem:[#allocation174_spill] sm:$0xff] %v12419_v43  ;;  %v4592_v43 = vadd.s32 104, %v12131_v60 }
 0x2be   : > { %4084 = vperm.xlu2 %10985, %v2994_v5   ;;  %v2961_v5 = vld [vmem:[%s11285_s0 + $0x578] sm:$0xff] }
 0x2c0   : > { %3884 = vperm.xlu1 %10984, %v2954_v52   ;;  %3874 = vperm.xlu0 %10983, %v2952_v38   ;;  %v2953_v38 = vld [vmem:[%s11285_s0 + $0x538] sm:$0xff] }
 0x2c1   : > { %9657 = vmatmul.msk.bf16.gmra.mxu2 %vm1492_vm1, %v10880_v16  ;;  %v12440_v20 = vpop.permute.xlu2 %3619  ;;  %v12442_v2 = vpop.permute.xlu1 %3614  ;;  %v3025_v52 = vld [vmem:[%s11285_s0 + $0x778] sm:$0xff] }
 0x2c2   : > { %10183 = vmatmul.msk.bf16.gmra.mxu1 %vm10182_vm4, %v17402_v33  ;;  %17447 = vst [vmem:[#allocation177_spill] sm:$0xff] %v12440_v20  ;;  %v12444_v31 = vpop.permute.xlu0 %4074 }
 0x2c3   : > { %17448 = vst [vmem:[#allocation178_spill] sm:$0xff] %v12442_v2  ;;  %v12447_v37 = vpop.f32.mrf.mxu2 }
 0x2c4   : > { %v12436_v30 = vpop.f32.mrf.mxu0  ;;  %17449 = vst [vmem:[#allocation179_spill] sm:$0xff] %v12447_v37  ;;  %v4591_v37 = vadd.s32 96, %v12131_v60 }
 0x2c6   : > { %3919 = vperm.xlu2 %10985, %v2961_v5   ;;  %v12465_v18 = vadd.s32 %v12147_v9, %v4591_v37  ;;  %v12468_v5 = vadd.s32 %v12147_v9, %v4592_v43  ;;  %v10792_v37 = vld [vmem:[%s11300_s12 + $0x130] sm:$0xff] }
 0x2c7   : > { %9568 = vmatmul.msk.bf16.gmra.mxu0 %vm1492_vm1, %v10791_v8 }
 0x2c8   : > { %3879 = vperm.xlu1 %10984, %v2953_v38   ;;  %4239 = vperm.xlu0 %10983, %v3025_v52   ;;  %17453 = vst [vmem:[#allocation183_spill] sm:$0xff] %v12465_v18  ;;  %v2956_v38 = vld [vmem:[%s11285_s0 + $0x550] sm:$0xff]  ;;  %v2950_v52 = vld [vmem:[%s11285_s0 + $0x520] sm:$0xff]  ;;  %vm4855_vm5 = vcmp.eq.s32.totalorder %v12465_v18, %v12160_v26  ;;  %vm4871_vm6 = vcmp.eq.s32.totalorder %v12468_v5, %v12160_v26 }
 0x2c9   : > { %v12454_v20 = vpop.permute.xlu2 %3604  ;;  %v12456_v2 = vpop.permute.xlu1 %4079  ;;  %17454 = vst [vmem:[#allocation184_spill] sm:$0xff] %v12468_v5  ;;  %vm10184_vm7 = vmpackc.low %vm4871_vm6, %vm4855_vm5 }
 0x2ca   : > { %17450 = vst [vmem:[#allocation180_spill] sm:$0xff] %v12454_v20  ;;  %v12458_v8 = vpop.permute.xlu0 %3609  ;;  %v3022_v20 = vld [vmem:[%s11285_s0 + $0x760] sm:$0xff] }
 0x2cb   : > { %17451 = vst [vmem:[#allocation181_spill] sm:$0xff] %v12458_v8  ;;  %v12462_v19 = vpop.f32.mrf.mxu2 }
 0x2cc   : > { %v12452_v16 = vpop.f32.mrf.mxu0  ;;  %17452 = vst [vmem:[#allocation182_spill] sm:$0xff] %v12462_v19 }
 0x2ce   : > { %3894 = vperm.xlu2 %10985, %v2956_v38   ;;  %v2955_v38 = vld [vmem:[%s11285_s0 + $0x548] sm:$0xff] }
 0x2d0   : > { %3864 = vperm.xlu1 %10984, %v2950_v52   ;;  %4224 = vperm.xlu0 %10983, %v3022_v20   ;;  %v3023_v52 = vld [vmem:[%s11285_s0 + $0x768] sm:$0xff]  ;;  %v2949_v20 = vld [vmem:[%s11285_s0 + $0x518] sm:$0xff] }
 0x2d1   : > { %9658 = vmatmul.msk.bf16.gmra.mxu2 %vm1492_vm1, %v10881_v7  ;;  %v12481_v8 = vpop.permute.xlu2 %4069  ;;  %v12483_v19 = vpop.permute.xlu1 %4064 }
 0x2d2   : > { %10185 = vmatmul.msk.bf16.gmra.mxu1 %vm10184_vm7, %v17402_v33  ;;  %17455 = vst [vmem:[#allocation185_spill] sm:$0xff] %v12483_v19  ;;  %v12485_v41 = vpop.permute.xlu0 %4054 }
 0x2d3   : > { %17456 = vst [vmem:[#allocation186_spill] sm:$0xff] %v12485_v41  ;;  %v12488_v35 = vpop.f32.mrf.mxu2  ;;  %v2947_v41 = vld [vmem:[%s11285_s0 + $0x508] sm:$0xff] }
 0x2d4   : > { %v2040_v43 = vpop.f32.mrf.mxu0  ;;  %17457 = vst [vmem:[#allocation187_spill] sm:$0xff] %v12488_v35  ;;  %v4594_v35 = vadd.s32 120, %v12131_v60 }
 0x2d6   : > { %3889 = vperm.xlu2 %10985, %v2955_v38  }
 0x2d7   : > { %9569 = vmatmul.msk.bf16.gmra.mxu0 %vm1492_vm1, %v10792_v37  ;;  %v4593_v37 = vadd.s32 112, %v12131_v60 }
 0x2d8   : > { %4229 = vperm.xlu1 %10984, %v3023_v52   ;;  %3859 = vperm.xlu0 %10983, %v2949_v20   ;;  %v12510_v52 = vadd.s32 %v12147_v9, %v4594_v35  ;;  %v3024_v20 = vld [vmem:[%s11285_s0 + $0x770] sm:$0xff] }
 0x2d9   : > { %v12493_v4 = vpop.permute.xlu2 %4154  ;;  %v12495_v44 = vpop.permute.xlu1 %4059  ;;  %v12507_v38 = vadd.s32 %v12147_v9, %v4593_v37  ;;  %v10793_v37 = vld [vmem:[%s11300_s12 + $0x138] sm:$0xff] }
 0x2da   : > { %17458 = vst [vmem:[#allocation188_spill] sm:$0xff] %v12493_v4  ;;  %v12497_v45 = vpop.permute.xlu0 %4159  ;;  %vm4903_vm11 = vcmp.eq.s32.totalorder %v12510_v52, %v12160_v26  ;;  %v3041_v4 = vld [vmem:[%s11285_s0 + $0x7f8] sm:$0xff] }
 0x2db   : > { %17459 = vst [vmem:[#allocation189_spill] sm:$0xff] %v12495_v44  ;;  %v12501_v27 = vpop.f32.mrf.mxu2  ;;  %vm4887_vm10 = vcmp.eq.s32.totalorder %v12507_v38, %v12160_v26 }
 0x2dc   : > { %v2042_v7 = vpop.f32.mrf.mxu0  ;;  %17460 = vst [vmem:[#allocation190_spill] sm:$0xff] %v12497_v45  ;;  %vm10186_vm13 = vmpackc.low %vm4903_vm11, %vm4887_vm10 }
 0x2dd   : > { %17461 = vst [vmem:[#allocation191_spill] sm:$0xff] %v12501_v27  ;;  %v2043_v44 = vadd.f32 %v11966_v23, %v2042_v7  ;;  %v4595_v7 = vadd.s32 128, %v12131_v60  ;;  %vm10208_vm10 = vmpackc.low %vm4744_vm9, %vm4728_vm8 }
 0x2de   : > { %17462 = vst [vmem:[#allocation192_spill] sm:$0xff] %v12507_v38  ;;  %4234 = vperm.xlu2 %10985, %v3024_v20  }
 0x2df   : > { %17463 = vst [vmem:[#allocation193_spill] sm:$0xff] %v12510_v52  ;;  %v2041_v52 = vadd.f32 %v11966_v23, %v2040_v43  ;;  %v2036_v43 = vadd.f32 %v11966_v23, %v12436_v30 }
 0x2e0   : > { %4214 = vperm.xlu1 %10984, %v3020_v58   ;;  %4314 = vperm.xlu0 %10983, %v3040_v10   ;;  %v2951_v58 = vld [vmem:[%s11285_s0 + $0x528] sm:$0xff] }
 0x2e1   : > { %10205 = vmatmul.msk.bf16.vlgmr.msrb.gmra.mxu2 %vm10204_vm12, %v17402_v33  ;;  %v12526_v27 = vpop.permute.xlu2 %4049  ;;  %v12528_v42 = vpop.permute.xlu1 %4044 }
 0x2e2   : > { %10187 = vmatmul.msk.bf16.gmra.mxu1 %vm10186_vm13, %v17402_v33  ;;  %17464 = vst [vmem:[#allocation194_spill] sm:$0xff] %v12526_v27  ;;  %v12530_v45 = vpop.permute.xlu0 %4144 }
 0x2e3   : > { %17465 = vst [vmem:[#allocation195_spill] sm:$0xff] %v12528_v42  ;;  %v12533_v20 = vpop.f32.mrf.mxu2  ;;  %v2591_v42 = vmax.f32 %v2043_v44, 0.0 }
 0x2e4   : > { %v2045_v35 = vpop.f32.mrf.mxu0  ;;  %17466 = vst [vmem:[#allocation196_spill] sm:$0xff] %v12530_v45 }
 0x2e5   : > { %17467 = vst [vmem:[#allocation197_spill] sm:$0xff] %v12533_v20  ;;  %v2046_v10 = vadd.f32 %v11966_v23, %v2045_v35  ;;  %v4596_v35 = vadd.s32 136, %v12131_v60 }
 0x2e6   : > { %3869 = vperm.xlu2 %10985, %v2951_v58   ;;  %v12559_v58 = vadd.s32 %v12147_v9, %v4595_v7 }
 0x2e7   : > { %9570 = vmatmul.msk.bf16.gmra.mxu0 %vm1492_vm1, %v10793_v37  ;;  %v2592_v38 = vmax.f32 %v2046_v10, 0.0  ;;  %v2590_v10 = vmax.f32 %v2041_v52, 0.0  ;;  %v12595_v52 = vld [vmem:[%s17071_s8] ss:$0 sm:$0xff] }
 0x2e8   : > { %4319 = vperm.xlu1 %10984, %v3041_v4   ;;  %3849 = vperm.xlu0 %10983, %v2947_v41   ;;  %v2033_v4 = vadd.f32 %v11966_v23, %v12409_v51  ;;  %v2038_v41 = vadd.f32 %v11966_v23, %v12452_v16  ;;  %17472 = vst [vmem:[#allocation202_spill] sm:$0xff] %v12559_v58 }
 0x2e9   : > { %v12542_v37 = vpop.permute.xlu2 %4034  ;;  %v12544_v20 = vpop.permute.xlu1 %4149  ;;  %v4384_v51 = vmul.f32 %v11466_v62, %v2592_v38  ;;  %vm4919_vm0 = vcmp.eq.s32.totalorder %v12559_v58, %v12160_v26  ;;  %v2948_v62 = vld [vmem:[%s11285_s0 + $0x510] sm:$0xff]  ;;  %v10794_v38 = vld [vmem:[%s11300_s12 + $0x140] sm:$0xff]  ;;  %v2031_v7 = vadd.f32 %v12595_v52, %v12393_v36 }
 0x2ea   : > { %17468 = vst [vmem:[#allocation198_spill] sm:$0xff] %v12542_v37  ;;  %v12548_v19 = vpop.permute.xlu0 %4039 }
 0x2eb   : > { %17469 = vst [vmem:[#allocation199_spill] sm:$0xff] %v12544_v20 }
 0x2ec   : > { %v2047_v27 = vpop.f32.mrf.mxu0  ;;  %17470 = vst [vmem:[#allocation200_spill] sm:$0xff] %v12548_v19  ;;  %v12562_v19 = vadd.s32 %v12147_v9, %v4596_v35  ;;  %v2588_v35 = vmax.f32 %v2036_v43, 0.0  ;;  %v17481_v43 = vld [vmem:[#allocation23_spill] sm:$0xff] }
 0x2ed   : > { %v2048_v45 = vadd.f32 %v11966_v23, %v2047_v27  ;;  %v12554_v27 = vpop.f32.mrf.mxu2  ;;  %v3038_v23 = vld [vmem:[%s11285_s0 + $0x7e0] sm:$0xff] }
 0x2ee   : > { %17471 = vst [vmem:[#allocation201_spill] sm:$0xff] %v12554_v27  ;;  %v12567_v37 = vpop.f32.mrf.mxu1  ;;  %v12570_v27 = vperm.slane %v12150_v22, 2  ;;  %vm4935_vm2 = vcmp.eq.s32.totalorder %v12562_v19, %v12160_v26  ;;  %3854 = vperm.xlu2 %10985, %v2948_v62   ;;  %v2587_v62 = vmax.f32 %v2033_v4, 0.0  ;;  %v17484_v4 = vld [vmem:[#allocation21_spill] sm:$0xff] }
 0x2ef   : > { %v2593_v44 = vmax.f32 %v2048_v45, 0.0  ;;  %17473 = vst [vmem:[#allocation203_spill] sm:$0xff] %v12562_v19  ;;  %v17474_v45 = vld [vmem:[#allocation19_spill] sm:$0xff]  ;;  %vm10188_vm6 = vmpackc.low %vm4935_vm2, %vm4919_vm0  ;;  %vm4760_vm2 = vcmp.eq.s32.totalorder %v12322_v29, %v12504_v11 }
 0x2f0   : > { %v4383_v20 = vmul.f32 %v17474_v45, %v2591_v42  ;;  %17475 = vst [vmem:[#allocation19_spill] sm:$0xff] %v12567_v37  ;;  %v2589_v42 = vmax.f32 %v2038_v41, 0.0  ;;  %vm4665_vm4 = vcmp.eq.s32.totalorder %v12154_v49, %v12570_v27  ;;  %vm4681_vm5 = vcmp.eq.s32.totalorder %v12157_v6, %v12570_v27  ;;  %4304 = vperm.xlu0 %10983, %v3038_v23   ;;  %v17477_v41 = vld [vmem:[#allocation22_spill] sm:$0xff] }
 0x2f1   : > { %v4385_v16 = vmul.f32 %v11529_v24, %v2593_v44  ;;  %17476 = vst [vmem:[#allocation204_spill] sm:$0xff] %v12570_v27  ;;  %v3018_v24 = vld [vmem:[%s11285_s0 + $0x740] sm:$0xff]  ;;  %10207 = vmatmul.msk.bf16.gmra.mxu2 %vm10206_vm3, %v17402_v33  ;;  %v4382_v44 = vmul.f32 %v17477_v41, %v2590_v10  ;;  %vm10236_vm7 = vmpackc.low %vm4681_vm5, %vm4665_vm4  ;;  %v2586_v23 = vmax.f32 %v2031_v7, 0.0  ;;  %v3021_v49 = vld [vmem:[%s11285_s0 + $0x758] sm:$0xff]  ;;  %v4379_v19 = vmul.f32 %v17484_v4, %v2587_v62 }
 0x2f2   : > { %4204 = vperm.xlu1 %10984, %v3018_v24   ;;  %10189 = vmatmul.msk.bf16.gmra.mxu1 %vm10188_vm6, %v17402_v33  ;;  %v12605_v45 = vpop.permute.xlu0 %4024  ;;  %v4381_v10 = vmul.f32 %v17481_v43, %v2589_v42  ;;  %v17485_v42 = vld [vmem:[#allocation26_spill] sm:$0xff]  ;;  %vm4697_vm14 = vcmp.eq.s32.totalorder %v12212_v56, %v12570_v27  ;;  %vm4713_vm15 = vcmp.eq.s32.totalorder %v12215_v57, %v12570_v27 }
 0x2f3   : > { %v6518_v30 = vpack.c.bf16 %v4385_v16, %v4384_v51  ;;  %v12600_v51 = vpop.permute.xlu2 %4139  ;;  %v12602_v16 = vpop.permute.xlu1 %4134  ;;  %17480 = vst [vmem:[#allocation206_spill] sm:$0xff] %v12605_v45  ;;  %10237 = vmatmul.msk.bf16.vlgmr.msra.gmra.mxu3 %vm10236_vm7, %v17402_v33  ;;  %v6517_v36 = vpack.c.bf16 %v4383_v20, %v4382_v44  ;;  %v3039_v45 = vld [vmem:[%s11285_s0 + $0x7e8] sm:$0xff]  ;;  %vm10238_vm0 = vmpackc.low %vm4713_vm15, %vm4697_vm14  ;;  %vm4776_vm3 = vcmp.eq.s32.totalorder %v12325_v28, %v12504_v11  ;;  %v3037_v4 = vld [vmem:[%s11285_s0 + $0x7d8] sm:$0xff] }
 0x2f4   : > { %v2050_v22 = vpop.f32.mrf.mxu0  ;;  %17478 = vst [vmem:[#allocation22_spill] sm:$0xff] %v12600_v51  ;;  %vm10210_vm4 = vmpackc.low %vm4776_vm3, %vm4760_vm2  ;;  %vm4729_vm8 = vcmp.eq.s32.totalorder %v12270_v46, %v12570_v27  ;;  %vm4745_vm9 = vcmp.eq.s32.totalorder %v12273_v63, %v12570_v27  ;;  %vm4761_vm2 = vcmp.eq.s32.totalorder %v12322_v29, %v12570_v27  ;;  %vm4777_vm3 = vcmp.eq.s32.totalorder %v12325_v28, %v12570_v27  ;;  %v3029_v28 = vld [vmem:[%s11285_s0 + $0x798] sm:$0xff] }
 0x2f5   : > { %6882 = vmatpush.bf16.msrb.mxu1 %v6518_v30  ;;  %17479 = vst [vmem:[#allocation205_spill] sm:$0xff] %v12602_v16  ;;  %v12610_v24 = vpop.f32.mrf.mxu2  ;;  %v17482_v30 = vld [vmem:[#allocation24_spill] sm:$0xff]  ;;  %v2051_v37 = vadd.f32 %v12595_v52, %v2050_v22  ;;  %v3017_v16 = vld [vmem:[%s11285_s0 + $0x738] sm:$0xff] }
 0x2f6   : > { %v4380_v41 = vmul.f32 %v17482_v30, %v2588_v35  ;;  %v12614_v6 = vpop.f32.mrf.mxu1  ;;  %4219 = vperm.xlu2 %10985, %v3021_v49   ;;  %v3036_v30 = vld [vmem:[%s11285_s0 + $0x7d0] sm:$0xff] }
 0x2f7   : > { %9571 = vmatmul.msk.bf16.gmra.mxu0 %vm1492_vm1, %v10794_v38  ;;  %17483 = vst [vmem:[#allocation23_spill] sm:$0xff] %v12614_v6  ;;  %v4378_v38 = vmul.f32 %v17485_v42, %v2586_v23  ;;  %v2594_v7 = vmax.f32 %v2051_v37, 0.0  ;;  %v4598_v37 = vadd.s32 152, %v12131_v60  ;;  %v17489_v42 = vpack.c.bf16 %v12380_v12, %v12377_v61 }
 0x2f8   : > { %v6516_v51 = vpack.c.bf16 %v4381_v10, %v4380_v41  ;;  %4199 = vperm.xlu0 %10983, %v3017_v16   ;;  %v4597_v16 = vadd.s32 144, %v12131_v60  ;;  %v3014_v41 = vld [vmem:[%s11285_s0 + $0x720] sm:$0xff]  ;;  %v17491_v61 = vpack.c.bf16 %v12331_v15, %v12328_v25 }
 0x2f9   : > { %6883 = vmatpush.bf16.msrb.mxu1 %v6517_v36  ;;  %v6515_v49 = vpack.c.bf16 %v4379_v19, %v4378_v38  ;;  %v12644_v19 = vadd.s32 %v12147_v9, %v4598_v37  ;;  %v3015_v37 = vld [vmem:[%s11285_s0 + $0x728] sm:$0xff] }
 0x2fa   : > { %4309 = vperm.xlu1 %10984, %v3039_v45   ;;  %v12626_v36 = vpop.permute.xlu0 %4129  ;;  %v12641_v23 = vadd.s32 %v12147_v9, %v4597_v16  ;;  %v3019_v16 = vld [vmem:[%s11285_s0 + $0x748] sm:$0xff] }
 0x2fb   : > { %v12622_v22 = vpop.permute.xlu2 %4124  ;;  %v12624_v44 = vpop.permute.xlu1 %4029  ;;  %17488 = vst [vmem:[#allocation26_spill] sm:$0xff] %v12644_v19  ;;  %vm4967_vm12 = vcmp.eq.s32.totalorder %v12644_v19, %v12160_v26 }
 0x2fc   : > { %v2052_v20 = vpop.f32.mrf.mxu0  ;;  %17487 = vst [vmem:[#allocation21_spill] sm:$0xff] %v12641_v23  ;;  %vm4951_vm11 = vcmp.eq.s32.totalorder %v12641_v23, %v12160_v26 }
 0x2fd   : > { %v2053_v35 = vadd.f32 %v12595_v52, %v2052_v20  ;;  %6884 = vmatpush.bf16.msrb.mxu1 %v6516_v51  ;;  %v12628_v45 = vpop.f32.mrf.mxu2  ;;  %v12633_v51 = vmul.f32 %v12077_v39, %v2594_v7  ;;  %v2946_v39 = vld [vmem:[%s11285_s0 + $0x500] sm:$0xff]  ;;  %vm10190_vm13 = vmpackc.low %vm4967_vm12, %vm4951_vm11  ;;  %vm4792_vm11 = vcmp.eq.s32.totalorder %v12371_v40, %v12504_v11  ;;  %vm4808_vm12 = vcmp.eq.s32.totalorder %v12374_v13, %v12504_v11 }
 0x2fe   : > { %v12638_v10 = vpop.f32.mrf.mxu1  ;;  %3844 = vperm.xlu2 %10985, %v2946_v39   ;;  %v3035_v39 = vld [vmem:[%s11285_s0 + $0x7c8] sm:$0xff] }
 0x2ff   : > { %v2595_v62 = vmax.f32 %v2053_v35, 0.0  ;;  %17486 = vst [vmem:[#allocation24_spill] sm:$0xff] %v12638_v10 }
 0x300   : > { %4184 = vperm.xlu0 %10983, %v3014_v41  }
 0x301   : > { %v12636_v43 = vmul.f32 %v12081_v48, %v2595_v62  ;;  %6885 = vmatpush.bf16.msrb.mxu1 %v6515_v49  ;;  %v10795_v48 = vld [vmem:[%s11300_s12 + $0x148] sm:$0xff]  ;;  %10209 = vmatmul.msk.bf16.gmra.mxu2 %vm10208_vm10, %v17402_v33  ;;  %vm10240_vm10 = vmpackc.low %vm4745_vm9, %vm4729_vm8 }
 0x302   : > { %4294 = vperm.xlu1 %10984, %v3036_v30   ;;  %10191 = vmatmul.msk.bf16.gmra.mxu1 %vm10190_vm13, %v17402_v33  ;;  %v12673_v35 = vpop.permute.xlu0 %4114  ;;  %vm10212_vm13 = vmpackc.low %vm4808_vm12, %vm4792_vm11  ;;  %vm4793_vm11 = vcmp.eq.s32.totalorder %v12371_v40, %v12570_v27  ;;  %vm4809_vm12 = vcmp.eq.s32.totalorder %v12374_v13, %v12570_v27  ;;  %v4605_v40 = vadd.s32 208, %v12131_v60 }
 0x303   : > { %v12668_v38 = vpop.permute.xlu2 %4019  ;;  %v12670_v7 = vpop.permute.xlu1 %4014  ;;  %10239 = vmatmul.msk.bf16.gmra.mxu3 %vm10238_vm0, %v17402_v33 }
 0x304   : > { %v2055_v20 = vpop.f32.mrf.mxu0 }
 0x305   : > { %6886 = vmatpush.bf16.msrb.mxu1 %v17489_v42  ;;  %v12677_v62 = vpop.f32.mrf.mxu2  ;;  %v2056_v49 = vadd.f32 %v12595_v52, %v2055_v20  ;;  %v17493_v42 = vpack.c.bf16 %v12282_v0, %v12276_v50 }
 0x306   : > { %17490 = vst [vmem:[#allocation207_spill] sm:$0xff] %v12677_v62  ;;  %v12683_v12 = vpop.f32.mrf.mxu1  ;;  %4209 = vperm.xlu2 %10985, %v3019_v16  }
 0x307   : > { %9572 = vmatmul.msk.bf16.gmra.mxu0 %vm1492_vm1, %v10795_v48  ;;  %17492 = vst [vmem:[#allocation208_spill] sm:$0xff] %v12683_v12  ;;  %v2596_v41 = vmax.f32 %v2056_v49, 0.0  ;;  %v4599_v49 = vadd.s32 160, %v12131_v60 }
 0x308   : > { %4289 = vperm.xlu0 %10983, %v3035_v39   ;;  %v17497_v39 = vpack.c.bf16 %v12221_v32, %v12218_v1  ;;  %v3033_v1 = vld [vmem:[%s11285_s0 + $0x7b8] sm:$0xff] }
 0x309   : > { %6887 = vmatpush.bf16.msrb.mxu1 %v17491_v61  ;;  %v12703_v50 = vmul.f32 %v12065_v55, %v2596_v41  ;;  %v3012_v41 = vld [vmem:[%s11285_s0 + $0x710] sm:$0xff] }
 0x30a   : > { %4189 = vperm.xlu1 %10984, %v3015_v37   ;;  %v12696_v15 = vpop.permute.xlu0 %4009  ;;  %v4600_v37 = vadd.s32 168, %v12131_v60 }
 0x30b   : > { %v12692_v20 = vpop.permute.xlu2 %4004  ;;  %v12694_v25 = vpop.permute.xlu1 %4119  ;;  %17495 = vst [vmem:[#allocation210_spill] sm:$0xff] %v12696_v15  ;;  %v3011_v15 = vld [vmem:[%s11285_s0 + $0x708] sm:$0xff] }
 0x30c   : > { %v2057_v30 = vpop.f32.mrf.mxu0  ;;  %17494 = vst [vmem:[#allocation209_spill] sm:$0xff] %v12692_v20 }
 0x30d   : > { %v2058_v48 = vadd.f32 %v12595_v52, %v2057_v30  ;;  %6888 = vmatpush.bf16.msrb.mxu1 %v17493_v42  ;;  %v12698_v16 = vpop.f32.mrf.mxu2  ;;  %v12712_v30 = vadd.s32 %v12147_v9, %v4599_v49  ;;  %v3032_v42 = vld [vmem:[%s11285_s0 + $0x7b0] sm:$0xff] }
 0x30e   : > { %17496 = vst [vmem:[#allocation211_spill] sm:$0xff] %v12698_v16 }
 0x30f   : > { %v2597_v61 = vmax.f32 %v2058_v48, 0.0  ;;  %17498 = vst [vmem:[#allocation212_spill] sm:$0xff] %v12712_v30  ;;  %v12715_v48 = vadd.s32 %v12147_v9, %v4600_v37  ;;  %v12721_v55 = vpop.f32.mrf.mxu1  ;;  %vm4983_vm5 = vcmp.eq.s32.totalorder %v12712_v30, %v12160_v26 }
 0x310   : > { %17500 = vst [vmem:[#allocation214_spill] sm:$0xff] %v12721_v55  ;;  %4274 = vperm.xlu0 %10983, %v3032_v42  }
 0x311   : > { %v12706_v0 = vmul.f32 %v12063_v14, %v2597_v61  ;;  %6889 = vmatpush.bf16.msrb.mxu1 %v17497_v39  ;;  %17499 = vst [vmem:[#allocation213_spill] sm:$0xff] %v12715_v48  ;;  %v3016_v14 = vld [vmem:[%s11285_s0 + $0x730] sm:$0xff]  ;;  %vm4999_vm6 = vcmp.eq.s32.totalorder %v12715_v48, %v12160_v26  ;;  %10211 = vmatmul.msk.bf16.gmra.mxu2 %vm10210_vm4, %v17402_v33  ;;  %vm10242_vm4 = vmpackc.low %vm4777_vm3, %vm4761_vm2 }
 0x312   : > { %v10796_v61 = vld [vmem:[%s11300_s12 + $0x150] sm:$0xff]  ;;  %4194 = vperm.xlu2 %10985, %v3016_v14   ;;  %4174 = vperm.xlu1 %10984, %v3012_v41   ;;  %vm10192_vm7 = vmpackc.low %vm4999_vm6, %vm4983_vm5  ;;  %v12743_v39 = vpop.permute.xlu0 %4094  ;;  %vm4824_vm5 = vcmp.eq.s32.totalorder %v12422_v34, %v12504_v11  ;;  %vm4840_vm6 = vcmp.eq.s32.totalorder %v12425_v3, %v12504_v11  ;;  %vm4825_vm3 = vcmp.eq.s32.totalorder %v12422_v34, %v12570_v27 }
 0x313   : > { %v12738_v49 = vpop.permute.xlu2 %4109  ;;  %v12740_v37 = vpop.permute.xlu1 %4104  ;;  %10193 = vmatmul.msk.bf16.gmra.mxu1 %vm10192_vm7, %v17402_v33  ;;  %17501 = vst [vmem:[#allocation215_spill] sm:$0xff] %v12743_v39  ;;  %10241 = vmatmul.msk.bf16.gmra.mxu3 %vm10240_vm10, %v17402_v33  ;;  %vm10214_vm7 = vmpackc.low %vm4840_vm6, %vm4824_vm5  ;;  %vm4841_vm5 = vcmp.eq.s32.totalorder %v12425_v3, %v12570_v27 }
 0x314   : > { %v2060_v32 = vpop.f32.mrf.mxu0 }
 0x315   : > { %v12747_v14 = vpop.f32.mrf.mxu2  ;;  %v2061_v41 = vadd.f32 %v12595_v52, %v2060_v32 }
 0x316   : > { %17502 = vst [vmem:[#allocation216_spill] sm:$0xff] %v12747_v14 }
 0x317   : > { %9573 = vmatmul.msk.bf16.gmra.mxu0 %vm1492_vm1, %v10796_v61  ;;  %v12750_v42 = vpop.f32.mrf.mxu1  ;;  %v2598_v55 = vmax.f32 %v2061_v41, 0.0 }
 0x318   : > { %17503 = vst [vmem:[#allocation217_spill] sm:$0xff] %v12750_v42  ;;  %4169 = vperm.xlu0 %10983, %v3011_v15   ;;  %v4602_v15 = vadd.s32 184, %v12131_v60 }
 0x31a   : > { %4299 = vperm.xlu2 %10985, %v3037_v4   ;;  %4279 = vperm.xlu1 %10984, %v3033_v1   ;;  %v12760_v32 = vpop.permute.xlu0 %4089  ;;  %v4601_v4 = vadd.s32 176, %v12131_v60  ;;  %v12767_v1 = vmul.f32 %v12047_v17, %v2598_v55  ;;  %v3030_v17 = vld [vmem:[%s11285_s0 + $0x7a0] sm:$0xff]  ;;  %v3028_v55 = vld [vmem:[%s11285_s0 + $0x790] sm:$0xff] }
 0x31b   : > { %v12756_v10 = vpop.permute.xlu2 %4084  ;;  %v12758_v61 = vpop.permute.xlu1 %4099  ;;  %17506 = vst [vmem:[#allocation220_spill] sm:$0xff] %v12760_v32  ;;  %v10797_v32 = vld [vmem:[%s11300_s12 + $0x158] sm:$0xff] }
 0x31c   : > { %v2062_v20 = vpop.f32.mrf.mxu0  ;;  %17504 = vst [vmem:[#allocation218_spill] sm:$0xff] %v12756_v10  ;;  %v12773_v41 = vadd.s32 %v12147_v9, %v4601_v4 }
 0x31d   : > { %v2063_v12 = vadd.f32 %v12595_v52, %v2062_v20  ;;  %17505 = vst [vmem:[#allocation219_spill] sm:$0xff] %v12758_v61  ;;  %v12762_v6 = vpop.f32.mrf.mxu2  ;;  %v12776_v61 = vadd.s32 %v12147_v9, %v4602_v15 }
 0x31e   : > { %17507 = vst [vmem:[#allocation221_spill] sm:$0xff] %v12762_v6  ;;  %v3034_v6 = vld [vmem:[%s11285_s0 + $0x7c0] sm:$0xff]  ;;  %vm5015_vm14 = vcmp.eq.s32.totalorder %v12773_v41, %v12160_v26 }
 0x31f   : > { %v2599_v42 = vmax.f32 %v2063_v12, 0.0  ;;  %17508 = vst [vmem:[#allocation222_spill] sm:$0xff] %v12773_v41  ;;  %v12782_v12 = vpop.f32.mrf.mxu1  ;;  %vm5031_vm15 = vcmp.eq.s32.totalorder %v12776_v61, %v12160_v26 }
 0x320   : > { %17509 = vst [vmem:[#allocation223_spill] sm:$0xff] %v12776_v61  ;;  %vm10194_vm0 = vmpackc.low %vm5031_vm15, %vm5015_vm14  ;;  %4254 = vperm.xlu0 %10983, %v3028_v55   ;;  %vm4856_vm14 = vcmp.eq.s32.totalorder %v12465_v18, %v12504_v11  ;;  %vm4872_vm15 = vcmp.eq.s32.totalorder %v12468_v5, %v12504_v11 }
 0x321   : > { %v12770_v20 = vmul.f32 %v12051_v47, %v2599_v42  ;;  %17510 = vst [vmem:[#allocation224_spill] sm:$0xff] %v12782_v12  ;;  %10213 = vmatmul.msk.bf16.gmra.mxu2 %vm10212_vm13, %v17402_v33  ;;  %v3013_v12 = vld [vmem:[%s11285_s0 + $0x718] sm:$0xff]  ;;  %vm10244_vm13 = vmpackc.low %vm4809_vm12, %vm4793_vm11 }
 0x322   : > { %4284 = vperm.xlu2 %10985, %v3034_v6   ;;  %4264 = vperm.xlu1 %10984, %v3030_v17   ;;  %v12804_v6 = vpop.permute.xlu0 %3904 }
 0x323   : > { %v12799_v4 = vpop.permute.xlu2 %3919  ;;  %v12801_v15 = vpop.permute.xlu1 %3914  ;;  %10195 = vmatmul.msk.bf16.gmra.mxu1 %vm10194_vm0, %v17402_v33  ;;  %17513 = vst [vmem:[#allocation227_spill] sm:$0xff] %v12804_v6  ;;  %10243 = vmatmul.msk.bf16.gmra.mxu3 %vm10242_vm4, %v17402_v33  ;;  %vm10216_vm0 = vmpackc.low %vm4872_vm15, %vm4856_vm14  ;;  %vm4857_vm14 = vcmp.eq.s32.totalorder %v12465_v18, %v12570_v27  ;;  %vm4873_vm15 = vcmp.eq.s32.totalorder %v12468_v5, %v12570_v27  ;;  %v17568_v18 = vld [vmem:[#allocation188_spill] sm:$0xff] }
 0x324   : > { %v2065_v42 = vpop.f32.mrf.mxu0  ;;  %17511 = vst [vmem:[#allocation225_spill] sm:$0xff] %v12799_v4  ;;  %v3027_v4 = vld [vmem:[%s11285_s0 + $0x788] sm:$0xff] }
 0x325   : > { %17512 = vst [vmem:[#allocation226_spill] sm:$0xff] %v12801_v15  ;;  %v12808_v17 = vpop.f32.mrf.mxu2  ;;  %v2066_v55 = vadd.f32 %v12595_v52, %v2065_v42 }
 0x326   : > { %17514 = vst [vmem:[#allocation228_spill] sm:$0xff] %v12808_v17  ;;  %v4603_v17 = vadd.s32 192, %v12131_v60 }
 0x327   : > { %9574 = vmatmul.msk.bf16.gmra.mxu0 %vm1492_vm1, %v10797_v32  ;;  %v12811_v47 = vpop.f32.mrf.mxu1  ;;  %v2600_v29 = vmax.f32 %v2066_v55, 0.0 }
 0x328   : > { %17515 = vst [vmem:[#allocation229_spill] sm:$0xff] %v12811_v47  ;;  %4249 = vperm.xlu0 %10983, %v3027_v4  }
 0x32a   : > { %4179 = vperm.xlu2 %10985, %v3013_v12   ;;  %4259 = vperm.xlu1 %10984, %v3029_v28   ;;  %v12821_v39 = vpop.permute.xlu0 %3899  ;;  %v4604_v28 = vadd.s32 200, %v12131_v60  ;;  %v12828_v12 = vmul.f32 %v12037_v21, %v2600_v29  ;;  %v10798_v21 = vld [vmem:[%s11300_s12 + $0x160] sm:$0xff] }
 0x32b   : > { %v12817_v10 = vpop.permute.xlu2 %3894  ;;  %v12819_v32 = vpop.permute.xlu1 %3909  ;;  %17518 = vst [vmem:[#allocation232_spill] sm:$0xff] %v12821_v39  ;;  %v3031_v39 = vld [vmem:[%s11285_s0 + $0x7a8] sm:$0xff] }
 0x32c   : > { %v2067_v15 = vpop.f32.mrf.mxu0  ;;  %17516 = vst [vmem:[#allocation230_spill] sm:$0xff] %v12817_v10  ;;  %v12837_v55 = vadd.s32 %v12147_v9, %v4604_v28  ;;  %v3010_v10 = vld [vmem:[%s11285_s0 + $0x700] sm:$0xff] }
 0x32d   : > { %v2068_v6 = vadd.f32 %v12595_v52, %v2067_v15  ;;  %17517 = vst [vmem:[#allocation231_spill] sm:$0xff] %v12819_v32  ;;  %v12823_v47 = vpop.f32.mrf.mxu2  ;;  %v12834_v15 = vadd.s32 %v12147_v9, %v4603_v17 }
 0x32e   : > { %17519 = vst [vmem:[#allocation233_spill] sm:$0xff] %v12823_v47  ;;  %vm5063_vm9 = vcmp.eq.s32.totalorder %v12837_v55, %v12160_v26  ;;  %v17550_v47 = vld [vmem:[#allocation51_spill] sm:$0xff] }
 0x32f   : > { %v2601_v42 = vmax.f32 %v2068_v6, 0.0  ;;  %17520 = vst [vmem:[#allocation234_spill] sm:$0xff] %v12834_v15  ;;  %v12843_v6 = vpop.f32.mrf.mxu1  ;;  %vm5047_vm8 = vcmp.eq.s32.totalorder %v12834_v15, %v12160_v26  ;;  %v12891_v15 = vadd.s32 %v12147_v9, %v4605_v40 }
 0x330   : > { %17521 = vst [vmem:[#allocation235_spill] sm:$0xff] %v12837_v55  ;;  %vm10196_vm10 = vmpackc.low %vm5063_vm9, %vm5047_vm8  ;;  %v17533_v55 = vld [vmem:[#allocation62_spill] sm:$0xff] }
 0x331   : > { %v12831_v4 = vmul.f32 %v12049_v54, %v2601_v42  ;;  %17522 = vst [vmem:[#allocation236_spill] sm:$0xff] %v12843_v6  ;;  %10215 = vmatmul.msk.bf16.gmra.mxu2 %vm10214_vm7, %v17402_v33  ;;  %vm5079_vm2 = vcmp.eq.s32.totalorder %v12891_v15, %v12160_v26  ;;  %vm10246_vm7 = vmpackc.low %vm4841_vm5, %vm4825_vm3 }
 0x332   : > { %4164 = vperm.xlu2 %10985, %v3010_v10   ;;  %v12865_v28 = vpop.permute.xlu0 %3874  ;;  %17534 = vst [vmem:[#allocation62_spill] sm:$0xff] %v12891_v15 }
 0x333   : > { %v12860_v17 = vpop.permute.xlu2 %3889  ;;  %v12862_v42 = vpop.permute.xlu1 %3884  ;;  %10197 = vmatmul.msk.bf16.gmra.mxu1 %vm10196_vm10, %v17402_v33  ;;  %17525 = vst [vmem:[#allocation239_spill] sm:$0xff] %v12865_v28  ;;  %10245 = vmatmul.msk.bf16.gmra.mxu3 %vm10244_vm13, %v17402_v33  ;;  %v17531_v28 = vld [vmem:[#allocation58_spill] sm:$0xff] }
 0x334   : > { %v12853_v29 = vpop.f32.mrf.mxu0  ;;  %17523 = vst [vmem:[#allocation237_spill] sm:$0xff] %v12860_v17  ;;  %v2406_v13 = vadd.f32 %v12595_v52, %v17531_v28 }
 0x335   : > { %17524 = vst [vmem:[#allocation238_spill] sm:$0xff] %v12862_v42  ;;  %v12869_v10 = vpop.f32.mrf.mxu2 }
 0x336   : > { %17526 = vst [vmem:[#allocation240_spill] sm:$0xff] %v12869_v10  ;;  %v4607_v10 = vadd.s32 224, %v12131_v60 }
 0x337   : > { %9575 = vmatmul.msk.bf16.gmra.mxu0 %vm1492_vm1, %v10798_v21  ;;  %v12871_v54 = vpop.f32.mrf.mxu1 }
 0x338   : > { %17527 = vst [vmem:[#allocation241_spill] sm:$0xff] %v12871_v54  ;;  %v4606_v54 = vadd.s32 216, %v12131_v60 }
 0x33a   : > { %4269 = vperm.xlu2 %10985, %v3031_v39   ;;  %v12880_v6 = vpop.permute.xlu0 %4239  ;;  %v2408_v39 = vadd.f32 %v12595_v52, %v17533_v55  ;;  %v12900_v28 = vadd.s32 %v12147_v9, %v4606_v54 }
 0x33b   : > { %v12876_v42 = vpop.permute.xlu2 %4234  ;;  %v12878_v17 = vpop.permute.xlu1 %3879  ;;  %17530 = vst [vmem:[#allocation244_spill] sm:$0xff] %v12880_v6  ;;  %v3026_v6 = vld [vmem:[%s11285_s0 + $0x780] sm:$0xff] }
 0x33c   : > { %v12874_v32 = vpop.f32.mrf.mxu0  ;;  %17528 = vst [vmem:[#allocation242_spill] sm:$0xff] %v12876_v42  ;;  %v2736_v42 = vmax.f32 %v2406_v13, 0.0  ;;  %vm5095_vm4 = vcmp.eq.s32.totalorder %v12900_v28, %v12160_v26  ;;  %v2737_v13 = vmax.f32 %v2408_v39, 0.0 }
 0x33d   : > { %17529 = vst [vmem:[#allocation243_spill] sm:$0xff] %v12878_v17  ;;  %v12884_v21 = vpop.f32.mrf.mxu2  ;;  %vm10198_vm6 = vmpackc.low %vm5095_vm4, %vm5079_vm2  ;;  %vm4920_vm2 = vcmp.eq.s32.totalorder %v12559_v58, %v12504_v11 }
 0x33e   : > { %17532 = vst [vmem:[#allocation58_spill] sm:$0xff] %v12884_v21  ;;  %v10799_v21 = vld [vmem:[%s11300_s12 + $0x168] sm:$0xff]  ;;  %v12930_v39 = vmul.f32 %v12456_v2, %v2737_v13  ;;  %v17548_v2 = vld [vmem:[#allocation50_spill] sm:$0xff] }
 0x33f   : > { %v12897_v17 = vpop.f32.mrf.mxu1  ;;  %17536 = vst [vmem:[#allocation246_spill] sm:$0xff] %v12900_v28  ;;  %v17545_v28 = vld [vmem:[#allocation54_spill] sm:$0xff]  ;;  %v2396_v13 = vadd.f32 %v12595_v52, %v17548_v2  ;;  %v12961_v2 = vadd.s32 %v12147_v9, %v4607_v10  ;;  %v17559_v10 = vld [vmem:[#allocation193_spill] sm:$0xff] }
 0x340   : > { %17535 = vst [vmem:[#allocation245_spill] sm:$0xff] %v12897_v17  ;;  %v12924_v17 = vmul.f32 %v12444_v31, %v2736_v42  ;;  %v2403_v15 = vadd.f32 %v12595_v52, %v17545_v28  ;;  %v4608_v28 = vadd.s32 232, %v12131_v60  ;;  %vm4904_vm9 = vcmp.eq.s32.totalorder %v17559_v10, %v12504_v11 }
 0x341   : > { %10217 = vmatmul.msk.bf16.gmra.mxu2 %vm10216_vm0, %v17402_v33  ;;  %17542 = vst [vmem:[#allocation252_spill] sm:$0xff] %v12930_v39  ;;  %v2446_v39 = vadd.f32 %v12595_v52, %v12098_v59  ;;  %vm5111_vm10 = vcmp.eq.s32.totalorder %v12961_v2, %v12160_v26  ;;  %vm10248_vm0 = vmpackc.low %vm4873_vm15, %vm4857_vm14 }
 0x342   : > { %4244 = vperm.xlu2 %10985, %v3026_v6   ;;  %v12920_v6 = vpop.permute.xlu0 %4224  ;;  %17540 = vst [vmem:[#allocation250_spill] sm:$0xff] %v12924_v17 }
 0x343   : > { %v12915_v55 = vpop.permute.xlu2 %3869  ;;  %v12917_v54 = vpop.permute.xlu1 %3864  ;;  %10199 = vmatmul.msk.bf16.gmra.mxu1 %vm10198_vm6, %v17402_v33  ;;  %17539 = vst [vmem:[#allocation249_spill] sm:$0xff] %v12920_v6  ;;  %10247 = vmatmul.msk.bf16.gmra.mxu3 %vm10246_vm7, %v17402_v33 }
 0x344   : > { %v12908_v40 = vpop.f32.mrf.mxu0  ;;  %17537 = vst [vmem:[#allocation247_spill] sm:$0xff] %v12915_v55 }
 0x345   : > { %17538 = vst [vmem:[#allocation248_spill] sm:$0xff] %v12917_v54  ;;  %v12926_v34 = vpop.f32.mrf.mxu2  ;;  %v17544_v54 = vld [vmem:[#allocation52_spill] sm:$0xff] }
 0x346   : > { %17541 = vst [vmem:[#allocation251_spill] sm:$0xff] %v12926_v34  ;;  %v2401_v3 = vadd.f32 %v12595_v52, %v17544_v54  ;;  %v2735_v54 = vmax.f32 %v2403_v15, 0.0 }
 0x347   : > { %9576 = vmatmul.msk.bf16.gmra.mxu0 %vm1492_vm1, %v10799_v21  ;;  %v12932_v55 = vpop.f32.mrf.mxu1  ;;  %v2398_v21 = vadd.f32 %v12595_v52, %v17550_v47  ;;  %17552 = vst [vmem:[#allocation254_spill] sm:$0xff] %v12961_v2 }
 0x348   : > { %17543 = vst [vmem:[#allocation253_spill] sm:$0xff] %v12932_v55  ;;  %v2734_v34 = vmax.f32 %v2401_v3, 0.0  ;;  %v12964_v3 = vadd.s32 %v12147_v9, %v4608_v28  ;;  %v12970_v47 = vmul.f32 %v12481_v8, %v2735_v54  ;;  %v17564_v54 = vld [vmem:[#allocation49_spill] sm:$0xff] }
 0x349   : > { %v2733_v59 = vmax.f32 %v2398_v21, 0.0  ;;  %v2393_v8 = vadd.f32 %v12595_v52, %v17564_v54 }
 0x34a   : > { %v12948_v55 = vpop.permute.xlu0 %3859  ;;  %17553 = vst [vmem:[#allocation255_spill] sm:$0xff] %v12964_v3  ;;  %vm5127_vm12 = vcmp.eq.s32.totalorder %v12964_v3, %v12160_v26  ;;  %v17569_v3 = vld [vmem:[#allocation189_spill] sm:$0xff] }
 0x34b   : > { %v12942_v42 = vpop.permute.xlu2 %3854  ;;  %v12944_v6 = vpop.permute.xlu1 %4229  ;;  %17549 = vst [vmem:[#allocation50_spill] sm:$0xff] %v12948_v55  ;;  %v2732_v55 = vmax.f32 %v2396_v13, 0.0  ;;  %v2752_v13 = vmax.f32 %v2446_v39, 0.0  ;;  %vm10200_vm13 = vmpackc.low %vm5127_vm12, %vm5111_vm10  ;;  %v17563_v39 = vld [vmem:[#allocation47_spill] sm:$0xff]  ;;  %v13012_v2 = vmul.f32 %v17569_v3, %v2733_v59  ;;  %v17577_v3 = vld [vmem:[#allocation108_spill] sm:$0xff]  ;;  %vm4968_vm12 = vcmp.eq.s32.totalorder %v12644_v19, %v12504_v11 }
 0x34c   : > { %v12940_v31 = vpop.f32.mrf.mxu0  ;;  %17546 = vst [vmem:[#allocation52_spill] sm:$0xff] %v12942_v42  ;;  %v2448_v42 = vadd.f32 %v12595_v52, %v12109_v53  ;;  %v17558_v53 = vld [vmem:[#allocation192_spill] sm:$0xff]  ;;  %v2441_v59 = vadd.f32 %v12595_v52, %v17577_v3 }
 0x34d   : > { %17547 = vst [vmem:[#allocation54_spill] sm:$0xff] %v12944_v6  ;;  %v12954_v17 = vpop.f32.mrf.mxu2  ;;  %v10800_v6 = vld [vmem:[%s11300_s12 + $0x170] sm:$0xff]  ;;  %vm4888_vm8 = vcmp.eq.s32.totalorder %v17558_v53, %v12504_v11  ;;  %v4544_v5 = vmul.f32 %v17568_v18, %v2752_v13  ;;  %v17578_v13 = vld [vmem:[#allocation194_spill] sm:$0xff]  ;;  %vm4889_vm4 = vcmp.eq.s32.totalorder %v17558_v53, %v12570_v27 }
 0x34e   : > { %17551 = vst [vmem:[#allocation51_spill] sm:$0xff] %v12954_v17  ;;  %v17556_v17 = vld [vmem:[#allocation185_spill] sm:$0xff]  ;;  %v2753_v28 = vmax.f32 %v2448_v42, 0.0  ;;  %vm10218_vm11 = vmpackc.low %vm4904_vm9, %vm4888_vm8  ;;  %v2391_v42 = vadd.f32 %v12595_v52, %v17563_v39  ;;  %v17571_v39 = vld [vmem:[#allocation190_spill] sm:$0xff]  ;;  %vm4905_vm8 = vcmp.eq.s32.totalorder %v17559_v10, %v12570_v27 }
 0x34f   : > { %v12966_v15 = vpop.f32.mrf.mxu1  ;;  %17555 = vst [vmem:[#allocation257_spill] sm:$0xff] %v12970_v47  ;;  %v12973_v14 = vmul.f32 %v17556_v17, %v2734_v34  ;;  %vm10250_vm10 = vmpackc.low %vm4905_vm8, %vm4889_vm4  ;;  %v17596_v10 = vld [vmem:[#allocation198_spill] sm:$0xff] }
 0x350   : > { %17554 = vst [vmem:[#allocation256_spill] sm:$0xff] %v12966_v15 }
 0x351   : > { %17557 = vst [vmem:[#allocation185_spill] sm:$0xff] %v12973_v14  ;;  %10219 = vmatmul.msk.bf16.gmra.mxu2 %vm10218_vm11, %v17402_v33  ;;  %v17565_v14 = vld [vmem:[#allocation186_spill] sm:$0xff]  ;;  %vm4952_vm11 = vcmp.eq.s32.totalorder %v12641_v23, %v12504_v11 }
 0x352   : > { %v12992_v21 = vpop.permute.xlu0 %4314  ;;  %v13004_v47 = vmul.f32 %v17565_v14, %v2732_v55  ;;  %17570 = vst [vmem:[#allocation186_spill] sm:$0xff] %v13012_v2  ;;  %v17582_v14 = vld [vmem:[#allocation45_spill] sm:$0xff]  ;;  %v17584_v2 = vld [vmem:[#allocation110_spill] sm:$0xff]  ;;  %vm10222_vm14 = vmpackc.low %vm4968_vm12, %vm4952_vm11  ;;  %vm4969_vm11 = vcmp.eq.s32.totalorder %v12644_v19, %v12570_v27 }
 0x353   : > { %v12987_v34 = vpop.permute.xlu2 %4219  ;;  %v12989_v17 = vpop.permute.xlu1 %4214  ;;  %17562 = vst [vmem:[#allocation260_spill] sm:$0xff] %v12992_v21  ;;  %10201 = vmatmul.msk.bf16.gmra.mxu1 %vm10200_vm13, %v17402_v33  ;;  %10249 = vmatmul.msk.bf16.gmra.mxu3 %vm10248_vm0, %v17402_v33  ;;  %v4545_v21 = vmul.f32 %v17571_v39, %v2753_v28  ;;  %v2443_v3 = vadd.f32 %v12595_v52, %v17584_v2  ;;  %v17673_v19 = vld [vmem:[#allocation187_spill] sm:$0xff] }
 0x354   : > { %v12975_v16 = vpop.f32.mrf.mxu0  ;;  %17560 = vst [vmem:[#allocation258_spill] sm:$0xff] %v12987_v34  ;;  %vm4921_vm0 = vcmp.eq.s32.totalorder %v12559_v58, %v12570_v27  ;;  %v17628_v58 = vld [vmem:[#allocation99_spill] sm:$0xff] }
 0x355   : > { %17561 = vst [vmem:[#allocation259_spill] sm:$0xff] %v12989_v17  ;;  %v13007_v15 = vpop.f32.mrf.mxu2  ;;  %v2731_v17 = vmax.f32 %v2393_v8, 0.0  ;;  %v13019_v55 = vpack.c.bf16 %v4545_v21, %v4544_v5  ;;  %v17580_v8 = vld [vmem:[#allocation195_spill] sm:$0xff]  ;;  %v4609_v5 = vadd.s32 240, %v12131_v60  ;;  %v4610_v21 = vadd.s32 248, %v12131_v60 }
 0x356   : > { %17566 = vst [vmem:[#allocation47_spill] sm:$0xff] %v13004_v47  ;;  %v2750_v60 = vmax.f32 %v2441_v59, 0.0  ;;  %v2751_v59 = vmax.f32 %v2443_v3, 0.0 }
 0x357   : > { %9577 = vmatmul.msk.bf16.gmra.mxu0 %vm1492_vm1, %v10800_v6  ;;  %17567 = vst [vmem:[#allocation49_spill] sm:$0xff] %v13007_v15  ;;  %v13015_v54 = vpop.f32.mrf.mxu1  ;;  %v2730_v6 = vmax.f32 %v2391_v42, 0.0  ;;  %v13030_v28 = vmul.f32 %v17578_v13, %v2731_v17  ;;  %v13050_v13 = vadd.s32 %v12147_v9, %v4609_v5 }
 0x358   : > { %17572 = vst [vmem:[#allocation188_spill] sm:$0xff] %v13015_v54  ;;  %v2386_v54 = vadd.f32 %v12595_v52, %v17582_v14  ;;  %v17588_v14 = vld [vmem:[#allocation203_spill] sm:$0xff] }
 0x359   : > { %17573 = vst [vmem:[#allocation189_spill] sm:$0xff] %v13019_v55  ;;  %v13033_v42 = vmul.f32 %v17580_v8, %v2730_v6  ;;  %v17583_v55 = vld [vmem:[#allocation46_spill] sm:$0xff]  ;;  %v13053_v8 = vadd.s32 %v12147_v9, %v4610_v21  ;;  %vm4936_vm3 = vcmp.eq.s32.totalorder %v17588_v14, %v12504_v11  ;;  %vm5143_vm6 = vcmp.eq.s32.totalorder %v13050_v13, %v12160_v26 }
 0x35a   : > { %v13025_v18 = vpop.permute.xlu0 %3849  ;;  %17579 = vst [vmem:[#allocation108_spill] sm:$0xff] %v13030_v28  ;;  %v2388_v47 = vadd.f32 %v12595_v52, %v17583_v55  ;;  %vm10220_vm5 = vmpackc.low %vm4936_vm3, %vm4920_vm2  ;;  %v2728_v9 = vmax.f32 %v2386_v54, 0.0  ;;  %vm4937_vm2 = vcmp.eq.s32.totalorder %v17588_v14, %v12570_v27 }
 0x35b   : > { %v13021_v15 = vpop.permute.xlu2 %3844  ;;  %v13023_v62 = vpop.permute.xlu1 %4319  ;;  %17576 = vst [vmem:[#allocation262_spill] sm:$0xff] %v13025_v18  ;;  %v10801_v18 = vld [vmem:[%s11300_s12 + $0x178] sm:$0xff]  ;;  %vm5159_vm7 = vcmp.eq.s32.totalorder %v13053_v8, %v12160_v26  ;;  %vm10252_vm4 = vmpackc.low %vm4937_vm2, %vm4921_vm0 }
 0x35c   : > { %v2082_v34 = vpop.f32.mrf.mxu0  ;;  %17574 = vst [vmem:[#allocation190_spill] sm:$0xff] %v13021_v15  ;;  %v2729_v55 = vmax.f32 %v2388_v47, 0.0  ;;  %vm10202_vm9 = vmpackc.low %vm5159_vm7, %vm5143_vm6  ;;  %v17593_v26 = vld [vmem:[#allocation106_spill] sm:$0xff]  ;;  %v17594_v47 = vld [vmem:[#allocation196_spill] sm:$0xff]  ;;  %v13087_v53 = vmul.f32 %v17596_v10, %v2728_v9  ;;  %vm5000_vm6 = vcmp.eq.s32.totalorder %v12715_v48, %v12504_v11 }
 0x35d   : > { %17575 = vst [vmem:[#allocation261_spill] sm:$0xff] %v13023_v62  ;;  %v13035_v39 = vpop.f32.mrf.mxu2  ;;  %v2438_v15 = vadd.f32 %v12595_v52, %v17593_v26  ;;  %v4542_v54 = vmul.f32 %v17594_v47, %v2750_v60  ;;  %v17601_v26 = vld [vmem:[#allocation43_spill] sm:$0xff]  ;;  %v2083_v60 = vadd.f32 %v12595_v52, %v2082_v34  ;;  %v17606_v34 = vld [vmem:[#allocation44_spill] sm:$0xff] }
 0x35e   : > { %17581 = vst [vmem:[#allocation194_spill] sm:$0xff] %v13033_v42  ;;  %v17592_v42 = vld [vmem:[#allocation105_spill] sm:$0xff] }
 0x35f   : > { %v13047_v6 = vpop.f32.mrf.mxu1  ;;  %17586 = vst [vmem:[#allocation45_spill] sm:$0xff] %v13050_v13  ;;  %v2436_v28 = vadd.f32 %v12595_v52, %v17592_v42  ;;  %v17599_v13 = vld [vmem:[#allocation200_spill] sm:$0xff] }
 0x360   : > { %17585 = vst [vmem:[#allocation195_spill] sm:$0xff] %v13047_v6 }
 0x361   : > { %17587 = vst [vmem:[#allocation46_spill] sm:$0xff] %v13053_v8  ;;  %10221 = vmatmul.msk.bf16.gmra.mxu2 %vm10220_vm5, %v17402_v33  ;;  %v17598_v8 = vld [vmem:[#allocation199_spill] sm:$0xff]  ;;  %vm4984_vm5 = vcmp.eq.s32.totalorder %v12712_v30, %v12504_v11 }
 0x362   : > { %v13073_v17 = vpop.permute.xlu0 %4304  ;;  %17597 = vst [vmem:[#allocation106_spill] sm:$0xff] %v13087_v53  ;;  %v4543_v42 = vmul.f32 %v17598_v8, %v2751_v59  ;;  %v2081_v8 = vadd.f32 %v12595_v52, %v12975_v16 }
 0x363   : > { %v13068_v5 = vpop.permute.xlu2 %4209  ;;  %17591 = vst [vmem:[#allocation264_spill] sm:$0xff] %v13073_v17  ;;  %10203 = vmatmul.msk.bf16.gmra.mxu1 %vm10202_vm9, %v17402_v33  ;;  %10251 = vmatmul.msk.bf16.gmra.mxu3 %vm10250_vm10, %v17402_v33  ;;  %v13091_v17 = vmul.f32 %v17599_v13, %v2729_v55  ;;  %vm10224_vm9 = vmpackc.low %vm5000_vm6, %vm4984_vm5  ;;  %vm4953_vm10 = vcmp.eq.s32.totalorder %v12641_v23, %v12570_v27 }
 0x364   : > { %v2085_v2 = vpop.f32.mrf.mxu0  ;;  %17589 = vst [vmem:[#allocation110_spill] sm:$0xff] %v13068_v5  ;;  %v13070_v21 = vpop.permute.xlu1 %4204  ;;  %v13100_v5 = vpack.c.bf16 %v4543_v42, %v4542_v54  ;;  %v2607_v54 = vmax.f32 %v2083_v60, 0.0  ;;  %v2606_v60 = vmax.f32 %v2081_v8, 0.0  ;;  %vm5001_vm5 = vcmp.eq.s32.totalorder %v12715_v48, %v12570_v27  ;;  %v17693_v48 = vld [vmem:[#allocation240_spill] sm:$0xff] }
 0x365   : > { %17590 = vst [vmem:[#allocation263_spill] sm:$0xff] %v13070_v21  ;;  %v13082_v3 = vpop.f32.mrf.mxu2  ;;  %v2086_v6 = vadd.f32 %v12595_v52, %v2085_v2  ;;  %v2749_v21 = vmax.f32 %v2438_v15, 0.0  ;;  %v2078_v15 = vadd.f32 %v12595_v52, %v12940_v31  ;;  %v2076_v31 = vadd.f32 %v12595_v52, %v12908_v40  ;;  %v17617_v40 = vld [vmem:[#allocation100_spill] sm:$0xff] }
 0x366   : > { %17595 = vst [vmem:[#allocation105_spill] sm:$0xff] %v13082_v3  ;;  %v2748_v3 = vmax.f32 %v2436_v28, 0.0  ;;  %v2383_v28 = vadd.f32 %v12595_v52, %v17606_v34  ;;  %v4399_v8 = vmul.f32 %v17617_v40, %v2607_v54 }
 0x367   : > { %9578 = vmatmul.msk.bf16.gmra.mxu0 %vm1492_vm1, %v10801_v18  ;;  %17600 = vst [vmem:[#allocation196_spill] sm:$0xff] %v13091_v17  ;;  %v13095_v18 = vadd.f32 %v12595_v52, %v17601_v26  ;;  %v13098_v47 = vpop.f32.mrf.mxu1  ;;  %v2608_v2 = vmax.f32 %v2086_v6, 0.0  ;;  %v17608_v6 = vld [vmem:[#allocation22_spill] sm:$0xff]  ;;  %v2604_v54 = vmax.f32 %v2076_v31, 0.0 }
 0x368   : > { %17602 = vst [vmem:[#allocation198_spill] sm:$0xff] %v13098_v47  ;;  %v4541_v10 = vmul.f32 %v17608_v6, %v2749_v21  ;;  %v17611_v17 = vld [vmem:[#allocation102_spill] sm:$0xff] }
 0x369   : > { %17603 = vst [vmem:[#allocation199_spill] sm:$0xff] %v13100_v5  ;;  %v2726_v16 = vmax.f32 %v13095_v18, 0.0  ;;  %v17610_v5 = vld [vmem:[#allocation98_spill] sm:$0xff]  ;;  %v2433_v34 = vadd.f32 %v12595_v52, %v17611_v17  ;;  %v2073_v17 = vadd.f32 %v12595_v52, %v12874_v32 }
 0x36a   : > { %v13115_v42 = vpop.permute.xlu0 %4199  ;;  %v2431_v53 = vadd.f32 %v12595_v52, %v17610_v5  ;;  %v2727_v5 = vmax.f32 %v2383_v28, 0.0  ;;  %v17620_v28 = vld [vmem:[#allocation126_spill] sm:$0xff] }
 0x36b   : > { %17607 = vst [vmem:[#allocation44_spill] sm:$0xff] %v13115_v42  ;;  %v17613_v42 = vld [vmem:[#allocation96_spill] sm:$0xff] }
 0x36c   : > { %v2087_v13 = vpop.f32.mrf.mxu0  ;;  %v13107_v55 = vpop.permute.xlu2 %4194  ;;  %v4400_v18 = vmul.f32 %v17613_v42, %v2608_v2  ;;  %v2071_v2 = vadd.f32 %v12595_v52, %v12853_v29  ;;  %v17621_v42 = vld [vmem:[#allocation97_spill] sm:$0xff] }
 0x36d   : > { %v2088_v9 = vadd.f32 %v12595_v52, %v2087_v13  ;;  %17604 = vst [vmem:[#allocation200_spill] sm:$0xff] %v13107_v55  ;;  %v13109_v59 = vpop.permute.xlu1 %4309  ;;  %v17609_v13 = vld [vmem:[#allocation205_spill] sm:$0xff] }
 0x36e   : > { %17605 = vst [vmem:[#allocation43_spill] sm:$0xff] %v13109_v59  ;;  %v4540_v47 = vmul.f32 %v17609_v13, %v2748_v3  ;;  %v13126_v59 = vpop.f32.mrf.mxu2  ;;  %v13133_v3 = vld [vmem:[%s11280_s20] sm:$0xff]  ;;  %v2605_v13 = vmax.f32 %v2078_v15, 0.0  ;;  %v2747_v15 = vmax.f32 %v2433_v34, 0.0  ;;  %v17624_v34 = vld [vmem:[#allocation101_spill] sm:$0xff] }
 0x36f   : > { %v2609_v26 = vmax.f32 %v2088_v9, 0.0  ;;  %17612 = vst [vmem:[#allocation22_spill] sm:$0xff] %v13126_v59  ;;  %v17614_v9 = vld [vmem:[#allocation95_spill] sm:$0xff]  ;;  %v13136_v6 = vperm.slane %v13133_v3, 3 }
 0x370   : > { %v13130_v21 = vpack.c.bf16 %v4541_v10, %v4540_v47  ;;  %17616 = vst [vmem:[#allocation98_spill] sm:$0xff] %v13133_v3  ;;  %v10802_v59 = vld [vmem:[%s11300_s12 + $0x180] sm:$0xff]  ;;  %v13146_v47 = vpop.f32.mrf.mxu1  ;;  %v17619_v10 = vld [vmem:[#allocation125_spill] sm:$0xff]  ;;  %v4397_v31 = vmul.f32 %v17624_v34, %v2605_v13 }
 0x371   : > { %v4401_v55 = vmul.f32 %v17614_v9, %v2609_v26  ;;  %17618 = vst [vmem:[#allocation102_spill] sm:$0xff] %v13146_v47  ;;  %vm4666_vm13 = vcmp.eq.s32.totalorder %v17619_v10, %v13136_v6  ;;  %vm4682_vm15 = vcmp.eq.s32.totalorder %v17620_v28, %v13136_v6  ;;  %v4398_v26 = vmul.f32 %v17621_v42, %v2606_v60  ;;  %v17623_v9 = vld [vmem:[#allocation41_spill] sm:$0xff]  ;;  %v17625_v60 = vld [vmem:[#allocation206_spill] sm:$0xff]  ;;  %v17631_v34 = vld [vmem:[#allocation103_spill] sm:$0xff] }
 0x372   : > { %17615 = vst [vmem:[#allocation205_spill] sm:$0xff] %v13130_v21  ;;  %vm10268_vm3 = vmpackc.low %vm4682_vm15, %vm4666_vm13  ;;  %v2378_v40 = vadd.f32 %v12595_v52, %v17623_v9  ;;  %10223 = vmatmul.msk.bf16.gmra.mxu2 %vm10222_vm14, %v17402_v33  ;;  %v13171_v42 = vmul.f32 %v17625_v60, %v2726_v16  ;;  %v2602_v9 = vmax.f32 %v2071_v2, 0.0  ;;  %v4396_v28 = vmul.f32 %v17628_v58, %v2604_v54  ;;  %v17647_v58 = vld [vmem:[#allocation36_spill] sm:$0xff] }
 0x373   : > { %v6526_v62 = vpack.c.bf16 %v4401_v55, %v4400_v18  ;;  %v2746_v55 = vmax.f32 %v2431_v53, 0.0  ;;  %v17622_v18 = vld [vmem:[#allocation38_spill] sm:$0xff]  ;;  %v2603_v53 = vmax.f32 %v2073_v17, 0.0  ;;  %10269 = vmatmul.msk.bf16.vlgmr.msrb.gmra.mxu1 %vm10268_vm3, %v17402_v33  ;;  %10253 = vmatmul.msk.bf16.gmra.mxu3 %vm10252_vm4, %v17402_v33  ;;  %v4539_v16 = vmul.f32 %v12626_v36, %v2747_v15  ;;  %vm10254_vm13 = vmpackc.low %vm4969_vm11, %vm4953_vm10 }
 0x374   : > { %v2090_v32 = vpop.f32.mrf.mxu0  ;;  %v2376_v29 = vadd.f32 %v12595_v52, %v17622_v18  ;;  %v13164_v21 = vpop.permute.xlu2 %4299  ;;  %17626 = vst [vmem:[#allocation96_spill] sm:$0xff] %v13171_v42  ;;  %v17635_v15 = vld [vmem:[#allocation90_spill] sm:$0xff]  ;;  %vm4698_vm7 = vcmp.eq.s32.totalorder %v12212_v56, %v13136_v6  ;;  %vm4714_vm8 = vcmp.eq.s32.totalorder %v12215_v57, %v13136_v6  ;;  %v17678_v56 = vld [vmem:[#allocation201_spill] sm:$0xff]  ;;  %vm5016_vm14 = vcmp.eq.s32.totalorder %v12773_v41, %v12504_v11  ;;  %v17706_v41 = vld [vmem:[#allocation220_spill] sm:$0xff] }
 0x375   : > { %6971 = vmatpush.bf16.msra.mxu2 %v6526_v62  ;;  %v13166_v47 = vpop.permute.xlu1 %4294  ;;  %v6525_v62 = vpack.c.bf16 %v4399_v8, %v4398_v26  ;;  %v13174_v18 = vpop.permute.xlu0 %4184  ;;  %v4538_v17 = vmul.f32 %v12622_v22, %v2746_v55  ;;  %v2725_v26 = vmax.f32 %v2378_v40, 0.0  ;;  %v2091_v2 = vadd.f32 %v12595_v52, %v2090_v32  ;;  %vm10270_vm12 = vmpackc.low %vm4714_vm8, %vm4698_vm7  ;;  %v17655_v42 = vld [vmem:[#allocation130_spill] sm:$0xff] }
 0x376   : > { %v13176_v14 = vpop.f32.mrf.mxu2  ;;  %v13185_v13 = vpop.f32.mrf.mxu3  ;;  %v2724_v8 = vmax.f32 %v2376_v29, 0.0  ;;  %v4395_v60 = vmul.f32 %v17631_v34, %v2603_v53  ;;  %v2426_v29 = vadd.f32 %v12595_v52, %v17635_v15  ;;  %v17640_v34 = vld [vmem:[#allocation70_spill] sm:$0xff]  ;;  %vm5032_vm15 = vcmp.eq.s32.totalorder %v12776_v61, %v12504_v11 }
 0x377   : > { %9579 = vmatmul.msk.bf16.gmra.mxu0 %vm1492_vm1, %v10802_v59  ;;  %17627 = vst [vmem:[#allocation95_spill] sm:$0xff] %v13176_v14  ;;  %v13182_v59 = vmul.f32 %v12624_v44, %v2727_v5  ;;  %v6524_v14 = vpack.c.bf16 %v4397_v31, %v4396_v28  ;;  %v13191_v54 = vpack.c.bf16 %v4539_v16, %v4538_v17  ;;  %v17634_v5 = vld [vmem:[#allocation104_spill] sm:$0xff]  ;;  %v2610_v32 = vmax.f32 %v2091_v2, 0.0  ;;  %v17646_v15 = vld [vmem:[#allocation78_spill] sm:$0xff]  ;;  %vm10226_vm0 = vmpackc.low %vm5032_vm15, %vm5016_vm14 }
 0x378   : > { %17630 = vst [vmem:[#allocation97_spill] sm:$0xff] %v13185_v13  ;;  %v13193_v22 = vpop.f32.mrf.mxu1  ;;  %v4394_v55 = vmul.f32 %v17634_v5, %v2602_v9  ;;  %v13202_v31 = vmul.f32 %v12668_v38, %v2725_v26  ;;  %v17638_v9 = vld [vmem:[#allocation66_spill] sm:$0xff]  ;;  %v17667_v13 = vld [vmem:[#allocation164_spill] sm:$0xff]  ;;  %vm4730_vm2 = vcmp.eq.s32.totalorder %v12270_v46, %v13136_v6  ;;  %vm4746_vm3 = vcmp.eq.s32.totalorder %v12273_v63, %v13136_v6  ;;  %v17697_v63 = vld [vmem:[#allocation251_spill] sm:$0xff] }
 0x379   : > { %6972 = vmatpush.bf16.msra.mxu2 %v6525_v62  ;;  %17629 = vst [vmem:[#allocation100_spill] sm:$0xff] %v13182_v59  ;;  %v13205_v62 = vmul.f32 %v12670_v7, %v2724_v8  ;;  %v17641_v38 = vld [vmem:[#allocation94_spill] sm:$0xff]  ;;  %v17651_v7 = vpack.c.bf16 %v12831_v4, %v12828_v12  ;;  %v17658_v59 = vld [vmem:[#allocation144_spill] sm:$0xff]  ;;  %vm4985_vm4 = vcmp.eq.s32.totalorder %v12712_v30, %v12570_v27  ;;  %vm10272_vm6 = vmpackc.low %vm4746_vm3, %vm4730_vm2 }
 0x37a   : > { %17632 = vst [vmem:[#allocation38_spill] sm:$0xff] %v13191_v54  ;;  %v6523_v53 = vpack.c.bf16 %v4395_v60, %v4394_v55  ;;  %v13219_v60 = vadd.f32 %v12595_v52, %v17640_v34  ;;  %v2428_v26 = vadd.f32 %v12595_v52, %v17641_v38  ;;  %v17642_v8 = vld [vmem:[#allocation42_spill] sm:$0xff]  ;;  %v2744_v34 = vmax.f32 %v2426_v29, 0.0  ;;  %v17653_v54 = vld [vmem:[#allocation120_spill] sm:$0xff]  ;;  %vm10256_vm7 = vmpackc.low %vm5001_vm5, %vm4985_vm4 }
 0x37b   : > { %17633 = vst [vmem:[#allocation41_spill] sm:$0xff] %v13193_v22  ;;  %v17645_v55 = vld [vmem:[#allocation74_spill] sm:$0xff]  ;;  %v13239_v38 = vmul.f32 %v17647_v58, %v2610_v32  ;;  %v13270_v32 = vadd.f32 %v12595_v52, %v17653_v54  ;;  %v17695_v30 = vld [vmem:[#allocation215_spill] sm:$0xff]  ;;  %v17698_v46 = vld [vmem:[#allocation49_spill] sm:$0xff] }
 0x37c   : > { %v2092_v44 = vpop.f32.mrf.mxu0  ;;  %v13199_v40 = vpop.permute.xlu2 %4284  ;;  %17636 = vst [vmem:[#allocation101_spill] sm:$0xff] %v13202_v31  ;;  %v17656_v4 = vld [vmem:[#allocation134_spill] sm:$0xff] }
 0x37d   : > { %v2093_v36 = vadd.f32 %v12595_v52, %v2092_v44  ;;  %6973 = vmatpush.bf16.msra.mxu2 %v6524_v14  ;;  %17637 = vst [vmem:[#allocation206_spill] sm:$0xff] %v13205_v62  ;;  %v13207_v17 = vpop.permute.xlu1 %4189  ;;  %v13211_v14 = vadd.f32 %v12595_v52, %v17638_v9  ;;  %v13215_v2 = vpop.permute.xlu0 %4289  ;;  %v13236_v9 = vadd.f32 %v12595_v52, %v17646_v15  ;;  %v2745_v15 = vmax.f32 %v2428_v26, 0.0  ;;  %v17654_v62 = vld [vmem:[#allocation124_spill] sm:$0xff] }
 0x37e   : > { %v13213_v16 = vpop.f32.mrf.mxu2  ;;  %v13228_v5 = vpop.f32.mrf.mxu3  ;;  %17648 = vst [vmem:[#allocation90_spill] sm:$0xff] %v13239_v38  ;;  %v13274_v31 = vadd.f32 %v12595_v52, %v17654_v62  ;;  %v13284_v26 = vadd.f32 %v12595_v52, %v17656_v4  ;;  %v4536_v62 = vmul.f32 %v12673_v35, %v2744_v34  ;;  %v13298_v4 = vadd.f32 %v12595_v52, %v17658_v59  ;;  %v17661_v34 = vld [vmem:[#allocation154_spill] sm:$0xff] }
 0x37f   : > { %v2611_v28 = vmax.f32 %v2093_v36, 0.0  ;;  %17639 = vst [vmem:[#allocation99_spill] sm:$0xff] %v13213_v16  ;;  %v13232_v36 = vadd.f32 %v12595_v52, %v17645_v55  ;;  %v13278_v55 = vadd.f32 %v12595_v52, %v17655_v42  ;;  %v13311_v42 = vadd.f32 %v12595_v52, %v17661_v34  ;;  %v17668_v34 = vld [vmem:[#allocation170_spill] sm:$0xff] }
 0x380   : > { %17644 = vst [vmem:[#allocation104_spill] sm:$0xff] %v13228_v5  ;;  %v17662_v59 = vpack.c.bf16 %v12770_v20, %v12767_v1  ;;  %v17664_v20 = vld [vmem:[#allocation160_spill] sm:$0xff]  ;;  %v17669_v1 = vld [vmem:[#allocation174_spill] sm:$0xff]  ;;  %v17703_v3 = vmax.f32 %v13236_v9, 0.0 }
 0x381   : > { %6974 = vmatpush.bf16.msra.mxu2 %v6523_v53  ;;  %v13226_v44 = vmul.f32 %v17642_v8, %v2611_v28  ;;  %v10803_v53 = vld [vmem:[%s11300_s12 + $0x188] sm:$0xff]  ;;  %v13246_v28 = vpop.f32.mrf.mxu1  ;;  %v17650_v8 = vld [vmem:[#allocation82_spill] sm:$0xff] }
 0x382   : > { %17649 = vst [vmem:[#allocation66_spill] sm:$0xff] %v13246_v28  ;;  %v13254_v29 = vadd.f32 %v12595_v52, %v17650_v8  ;;  %v17652_v8 = vld [vmem:[#allocation86_spill] sm:$0xff]  ;;  %10225 = vmatmul.msk.bf16.gmra.mxu2 %vm10224_vm9, %v17402_v33 }
 0x383   : > { %17643 = vst [vmem:[#allocation103_spill] sm:$0xff] %v13226_v44  ;;  %v2423_v22 = vadd.f32 %v12595_v52, %v17652_v8  ;;  %10271 = vmatmul.msk.bf16.gmra.mxu1 %vm10270_vm12, %v17402_v33  ;;  %10255 = vmatmul.msk.bf16.gmra.mxu3 %vm10254_vm13, %v17402_v33  ;;  %v4537_v8 = vmul.f32 %v12694_v25, %v2745_v15  ;;  %v13332_v25 = vld [vmem:[%s17071_s8] ss:$0 sm:$0xff]  ;;  %v17672_v44 = vld [vmem:[#allocation182_spill] sm:$0xff] }
 0x384   : > { %v2095_v58 = vpop.f32.mrf.mxu0  ;;  %v2742_v12 = vmax.f32 %v13254_v29, 0.0  ;;  %v13441_v23 = vadd.f32 %v13332_v25, %v12628_v45 }
 0x385   : > { %6975 = vmatpush.bf16.msra.mxu2 %v17651_v7  ;;  %v17657_v7 = vld [vmem:[#allocation140_spill] sm:$0xff]  ;;  %v2096_v29 = vadd.f32 %v12595_v52, %v2095_v58  ;;  %v2743_v5 = vmax.f32 %v2423_v22, 0.0  ;;  %v13325_v38 = vpop.permute.xlu0 %4274  ;;  %v13336_v22 = vadd.f32 %v13332_v25, %v17664_v20  ;;  %v13338_v58 = vpack.c.bf16 %v4537_v8, %v4536_v62  ;;  %v17674_v8 = vld [vmem:[#allocation191_spill] sm:$0xff] }
 0x386   : > { %v13288_v54 = vadd.f32 %v12595_v52, %v17657_v7  ;;  %v13300_v28 = vpop.f32.mrf.mxu2  ;;  %v13302_v7 = vpop.permute.xlu2 %4179  ;;  %v13371_v62 = vadd.f32 %v13332_v25, %v17673_v19  ;;  %v17675_v19 = vld [vmem:[#allocation197_spill] sm:$0xff] }
 0x387   : > { %9580 = vmatmul.msk.bf16.gmra.mxu0 %vm1492_vm1, %v10803_v53  ;;  %17659 = vst [vmem:[#allocation70_spill] sm:$0xff] %v13300_v28  ;;  %v17660_v53 = vld [vmem:[#allocation150_spill] sm:$0xff]  ;;  %v13318_v28 = vpop.permute.xlu1 %4174  ;;  %v13320_v16 = vpop.f32.mrf.mxu3  ;;  %v13385_v57 = vadd.f32 %v13332_v25, %v17675_v19 }
 0x388   : > { %v13307_v35 = vadd.f32 %v12595_v52, %v17660_v53  ;;  %17663 = vst [vmem:[#allocation94_spill] sm:$0xff] %v13320_v16  ;;  %v13345_v53 = vadd.f32 %v13332_v25, %v17667_v13  ;;  %v13349_v52 = vadd.f32 %v13332_v25, %v17668_v34  ;;  %v13353_v16 = vadd.f32 %v13332_v25, %v17669_v1 }
 0x389   : > { %6976 = vmatpush.bf16.msra.mxu2 %v17662_v59  ;;  %17665 = vst [vmem:[#allocation42_spill] sm:$0xff] %v13338_v58  ;;  %v13340_v15 = vpop.f32.mrf.mxu1  ;;  %v17670_v13 = vpack.c.bf16 %v12706_v0, %v12703_v50  ;;  %v17671_v58 = vld [vmem:[#allocation179_spill] sm:$0xff]  ;;  %v13367_v1 = vadd.f32 %v13332_v25, %v17672_v44  ;;  %v4535_v0 = vmul.f32 %v12738_v49, %v2743_v5  ;;  %v17680_v49 = vld [vmem:[#allocation40_spill] sm:$0xff] }
 0x38a   : > { %17666 = vst [vmem:[#allocation74_spill] sm:$0xff] %v13340_v15  ;;  %v2612_v15 = vmax.f32 %v2096_v29, 0.0  ;;  %v13363_v34 = vadd.f32 %v13332_v25, %v17671_v58  ;;  %v13375_v29 = vadd.f32 %v13332_v25, %v17674_v8  ;;  %v4534_v58 = vmul.f32 %v12740_v37, %v2742_v12  ;;  %v17688_v44 = vld [vmem:[#allocation207_spill] sm:$0xff] }
 0x38b   : > { %17676 = vst [vmem:[#allocation78_spill] sm:$0xff] %v13385_v57  ;;  %v17682_v37 = vpack.c.bf16 %v12636_v43, %v12633_v51  ;;  %v13414_v51 = vadd.f32 %v13332_v25, %v12610_v24  ;;  %v10804_v43 = vld [vmem:[%s11300_s12 + $0x190] sm:$0xff] }
 0x38c   : > { %v2097_v20 = vpop.f32.mrf.mxu0  ;;  %v13394_v5 = vmul.f32 %v17680_v49, %v2612_v15  ;;  %v13399_v12 = vpack.c.bf16 %v4535_v0, %v4534_v58  ;;  %v13445_v15 = vadd.f32 %v13332_v25, %v17688_v44  ;;  %v2521_v44 = vadd.f32 %v13332_v25, %v17697_v63  ;;  %v17704_v63 = vld [vmem:[#allocation219_spill] sm:$0xff]  ;;  %v17708_v57 = vld [vmem:[#allocation221_spill] sm:$0xff] }
 0x38d   : > { %v2098_v59 = vadd.f32 %v13332_v25, %v2097_v20  ;;  %6977 = vmatpush.bf16.msra.mxu2 %v17670_v13  ;;  %v17684_v20 = vld [vmem:[#allocation39_spill] sm:$0xff]  ;;  %v13431_v24 = vpop.permute.xlu0 %4169  ;;  %v4533_v61 = vmul.f32 %v17704_v63, %v17703_v3 }
 0x38e   : > { %v13387_v8 = vpop.f32.mrf.mxu2  ;;  %17681 = vst [vmem:[#allocation86_spill] sm:$0xff] %v13394_v5  ;;  %v13410_v49 = vpop.permute.xlu2 %4164 }
 0x38f   : > { %v2613_v50 = vmax.f32 %v2098_v59, 0.0  ;;  %17677 = vst [vmem:[#allocation36_spill] sm:$0xff] %v13387_v8  ;;  %v13391_v59 = vadd.f32 %v13332_v25, %v17678_v56  ;;  %v13404_v19 = vpop.f32.mrf.mxu3  ;;  %v13425_v0 = vpop.permute.xlu1 %4279  ;;  %v17689_v56 = vld [vmem:[#allocation211_spill] sm:$0xff] }
 0x390   : > { %17683 = vst [vmem:[#allocation120_spill] sm:$0xff] %v13399_v12  ;;  %v13449_v12 = vadd.f32 %v13332_v25, %v17689_v56  ;;  %v13467_v56 = vadd.f32 %v13332_v25, %v17693_v48  ;;  %v2526_v48 = vadd.f32 %v13332_v25, %v17698_v46  ;;  %v17705_v46 = vmax.f32 %v13219_v60, 0.0 }
 0x391   : > { %17679 = vst [vmem:[#allocation82_spill] sm:$0xff] %v13391_v59  ;;  %6978 = vmatpush.bf16.msra.mxu2 %v17682_v37  ;;  %v13402_v13 = vmul.f32 %v17684_v20, %v2613_v50  ;;  %v13421_v20 = vpop.f32.mrf.mxu1  ;;  %v17691_v37 = vld [vmem:[#allocation228_spill] sm:$0xff] }
 0x392   : > { %17686 = vst [vmem:[#allocation130_spill] sm:$0xff] %v13404_v19  ;;  %v13457_v50 = vadd.f32 %v13332_v25, %v17691_v37  ;;  %v17692_v19 = vld [vmem:[#allocation233_spill] sm:$0xff]  ;;  %10227 = vmatmul.msk.bf16.gmra.mxu2 %vm10226_vm0, %v17402_v33  ;;  %v17694_v37 = vmax.f32 %v13232_v36, 0.0  ;;  %v4531_v27 = vmul.f32 %v17706_v41, %v17705_v46  ;;  %v2780_v63 = vmax.f32 %v13467_v56, 0.0  ;;  %v17716_v56 = vld [vmem:[#allocation244_spill] sm:$0xff] }
 0x393   : > { %17685 = vst [vmem:[#allocation124_spill] sm:$0xff] %v13402_v13  ;;  %v13461_v45 = vadd.f32 %v13332_v25, %v17692_v19  ;;  %10273 = vmatmul.msk.bf16.gmra.mxu1 %vm10272_vm6, %v17402_v33  ;;  %v17696_v19 = vld [vmem:[#allocation58_spill] sm:$0xff]  ;;  %10257 = vmatmul.msk.bf16.gmra.mxu3 %vm10256_vm7, %v17402_v33  ;;  %v2784_v46 = vmax.f32 %v2526_v48, 0.0 }
 0x394   : > { %17687 = vst [vmem:[#allocation134_spill] sm:$0xff] %v13421_v20  ;;  %v2100_v58 = vpop.f32.mrf.mxu0  ;;  %v17690_v20 = vld [vmem:[#allocation216_spill] sm:$0xff]  ;;  %v4532_v5 = vmul.f32 %v17695_v30, %v17694_v37  ;;  %v13477_v13 = vadd.f32 %v13332_v25, %v17696_v19  ;;  %v17700_v30 = vld [vmem:[#allocation51_spill] sm:$0xff]  ;;  %v17701_v37 = vmax.f32 %v13211_v14, 0.0  ;;  %v17702_v19 = vld [vmem:[#allocation218_spill] sm:$0xff]  ;;  %v13506_v14 = vadd.f32 %v13332_v25, %v17708_v57 }
 0x395   : > { %v13453_v8 = vadd.f32 %v13332_v25, %v17690_v20  ;;  %v2101_v20 = vadd.f32 %v13332_v25, %v2100_v58  ;;  %v2528_v58 = vadd.f32 %v13332_v25, %v13035_v39  ;;  %v2523_v36 = vadd.f32 %v13332_v25, %v17700_v30 }
 0x396   : > { %v4530_v10 = vmul.f32 %v17702_v19, %v17701_v37  ;;  %v2778_v9 = vmax.f32 %v13457_v50, 0.0  ;;  %v13509_v3 = vpack.c.bf16 %v4533_v61, %v4532_v5  ;;  %v2779_v19 = vmax.f32 %v13461_v45, 0.0 }
 0x397   : > { %9581 = vmatmul.msk.bf16.gmra.mxu0 %vm1492_vm1, %v10804_v43  ;;  %v13485_v43 = vpop.f32.mrf.mxu2  ;;  %v13499_v39 = vpop.f32.mrf.mxu3  ;;  %v2614_v37 = vmax.f32 %v2101_v20, 0.0  ;;  %v2781_v30 = vmax.f32 %v13477_v13, 0.0  ;;  %v2782_v57 = vmax.f32 %v2521_v44, 0.0  ;;  %v17715_v45 = vmax.f32 %v13375_v29, 0.0  ;;  %v17719_v44 = vld [vmem:[#allocation249_spill] sm:$0xff] }
 0x398   : > { %17699 = vst [vmem:[#allocation140_spill] sm:$0xff] %v13485_v43  ;;  %v13511_v60 = vpack.c.bf16 %v4531_v27, %v4530_v10  ;;  %v2785_v43 = vmax.f32 %v2528_v58, 0.0  ;;  %v13519_v20 = vpop.permute.xlu2 %4269  ;;  %v13521_v61 = vpop.permute.xlu1 %4264  ;;  %v17712_v27 = vmax.f32 %v13371_v62, 0.0  ;;  %v17713_v10 = vld [vmem:[#allocation242_spill] sm:$0xff]  ;;  %v17718_v13 = vmax.f32 %v13363_v34, 0.0  ;;  %v17724_v62 = vld [vmem:[#allocation37_spill] sm:$0xff] }
 0x399   : > { %17707 = vst [vmem:[#allocation144_spill] sm:$0xff] %v13499_v39  ;;  %v13513_v41 = vpop.f32.mrf.mxu1  ;;  %v2783_v39 = vmax.f32 %v2523_v36, 0.0  ;;  %v13531_v48 = vmul.f32 %v17716_v56, %v17715_v45  ;;  %v17722_v36 = vld [vmem:[#allocation54_spill] sm:$0xff]  ;;  %v17725_v29 = vmax.f32 %v13353_v16, 0.0  ;;  %v17728_v34 = vmax.f32 %v13349_v52, 0.0  ;;  %v17729_v56 = vld [vmem:[#allocation259_spill] sm:$0xff] }
 0x39a   : > { %17709 = vst [vmem:[#allocation150_spill] sm:$0xff] %v13509_v3  ;;  %v13526_v5 = vmul.f32 %v17713_v10, %v17712_v27  ;;  %v13536_v58 = vmul.f32 %v17719_v44, %v17718_v13  ;;  %v13544_v3 = vmul.f32 %v17724_v62, %v2614_v37  ;;  %v17726_v10 = vld [vmem:[#allocation258_spill] sm:$0xff]  ;;  %v17733_v16 = vld [vmem:[#allocation261_spill] sm:$0xff]  ;;  %v17735_v62 = vmax.f32 %v13345_v53, 0.0  ;;  %v17741_v37 = vld [vmem:[#allocation264_spill] sm:$0xff] }
 0x39b   : > { %17710 = vst [vmem:[#allocation154_spill] sm:$0xff] %v13511_v60  ;;  %v4255_v60 = vpop.permute.xlu0 %4254  ;;  %v13549_v45 = vmul.f32 %v17726_v10, %v17725_v29  ;;  %v13554_v13 = vmul.f32 %v17729_v56, %v17728_v34  ;;  %v17736_v29 = vld [vmem:[#allocation110_spill] sm:$0xff]  ;;  %v17738_v34 = vmax.f32 %v13336_v22, 0.0  ;;  %v17739_v56 = vld [vmem:[#allocation263_spill] sm:$0xff]  ;;  %v17748_v22 = vmax.f32 %v13311_v42, 0.0 }
 0x39c   : > { %17711 = vst [vmem:[#allocation160_spill] sm:$0xff] %v13513_v41  ;;  %v2102_v59 = vpop.f32.mrf.mxu0  ;;  %v13573_v10 = vmul.f32 %v17736_v29, %v17735_v62  ;;  %v17746_v62 = vld [vmem:[#allocation43_spill] sm:$0xff]  ;;  %v13631_v42 = vmul.f32 %v13199_v40, %v2778_v9  ;;  %v2773_v40 = vmax.f32 %v13441_v23, 0.0  ;;  %v17765_v9 = vmax.f32 %v13278_v55, 0.0 }
 0x39d   : > { %v2103_v50 = vadd.f32 %v13332_v25, %v2102_v59  ;;  %17714 = vst [vmem:[#allocation164_spill] sm:$0xff] %v13526_v5  ;;  %v17721_v59 = vmax.f32 %v13367_v1, 0.0  ;;  %v13578_v44 = vmul.f32 %v17739_v56, %v17738_v34  ;;  %v13593_v29 = vmul.f32 %v17746_v62, %v2783_v39  ;;  %v17749_v34 = vld [vmem:[#allocation44_spill] sm:$0xff]  ;;  %v17752_v52 = vld [vmem:[#allocation235_spill] sm:$0xff]  ;;  %v17817_v5 = vld [vmem:[#allocation45_spill] sm:$0xff] }
 0x39e   : > { %17717 = vst [vmem:[#allocation170_spill] sm:$0xff] %v13531_v48  ;;  %v13598_v56 = vmul.f32 %v17749_v34, %v17748_v22  ;;  %vm5064_vm9 = vcmp.eq.s32.totalorder %v17752_v52, %v12504_v11  ;;  %v13617_v34 = vmul.f32 %v13164_v21, %v2781_v30  ;;  %v17818_v48 = vld [vmem:[#allocation46_spill] sm:$0xff] }
 0x39f   : > { %17720 = vst [vmem:[#allocation174_spill] sm:$0xff] %v13536_v58  ;;  %v13541_v41 = vmul.f32 %v17722_v36, %v17721_v59  ;;  %v2615_v27 = vmax.f32 %v2103_v50, 0.0  ;;  %v13556_v1 = vpop.f32.mrf.mxu2  ;;  %v17731_v50 = vld [vmem:[#allocation260_spill] sm:$0xff]  ;;  %v13566_v36 = vmul.f32 %v17733_v16, %v2785_v43  ;;  %v13581_v58 = vmul.f32 %v17741_v37, %v2782_v57  ;;  %v10805_v57 = vld [vmem:[%s11300_s12 + $0x198] sm:$0xff] }
 0x3a0   : > { %17727 = vst [vmem:[#allocation182_spill] sm:$0xff] %v13549_v45  ;;  %v13563_v59 = vmul.f32 %v17731_v50, %v2784_v46  ;;  %v13583_v46 = vpop.f32.mrf.mxu3  ;;  %v17743_v50 = vmax.f32 %v13307_v35, 0.0  ;;  %v17744_v16 = vld [vmem:[#allocation200_spill] sm:$0xff]  ;;  %v17751_v37 = vld [vmem:[#allocation234_spill] sm:$0xff]  ;;  %v13620_v43 = vmul.f32 %v13166_v47, %v2780_v63  ;;  %v2777_v35 = vmax.f32 %v13506_v14, 0.0 }
 0x3a1   : > { %17723 = vst [vmem:[#allocation179_spill] sm:$0xff] %v13541_v41  ;;  %vm5048_vm8 = vcmp.eq.s32.totalorder %v17751_v37, %v12504_v11  ;;  %v13610_v39 = vpop.f32.mrf.mxu1  ;;  %v17760_v47 = vmax.f32 %v13298_v4, 0.0  ;;  %v13642_v14 = vmul.f32 %v13215_v2, %v2779_v19  ;;  %v13654_v63 = vmul.f32 %v13318_v28, %v17765_v9  ;;  %v17769_v2 = vld [vmem:[#allocation155_spill] sm:$0xff]  ;;  %v17771_v28 = vld [vmem:[#allocation156_spill] sm:$0xff]  ;;  %v10808_v41 = vld [vmem:[%s11300_s12 + $0x1b0] sm:$0xff] }
 0x3a2   : > { %17730 = vst [vmem:[#allocation187_spill] sm:$0xff] %v13554_v13  ;;  %v13590_v53 = vmul.f32 %v17744_v16, %v17743_v50  ;;  %v17753_v50 = vld [vmem:[#allocation33_spill] sm:$0xff]  ;;  %vm10228_vm10 = vmpackc.low %vm5064_vm9, %vm5048_vm8  ;;  %vm4762_vm11 = vcmp.eq.s32.totalorder %v17769_v2, %v13136_v6  ;;  %vm4778_vm12 = vcmp.eq.s32.totalorder %v17771_v28, %v13136_v6 }
 0x3a3   : > { %17732 = vst [vmem:[#allocation191_spill] sm:$0xff] %v13563_v59  ;;  %v13608_v16 = vmul.f32 %v17753_v50, %v2615_v27  ;;  %v17757_v50 = vmax.f32 %v13288_v54, 0.0  ;;  %10229 = vmatmul.msk.bf16.gmra.mxu2 %vm10228_vm10, %v17402_v33  ;;  %v13639_v30 = vmul.f32 %v13207_v17, %v17760_v47  ;;  %v17763_v54 = vmax.f32 %v13284_v26, 0.0  ;;  %v4245_v26 = vpop.permute.xlu2 %4244  ;;  %vm10274_vm13 = vmpackc.low %vm4778_vm12, %vm4762_vm11  ;;  %v17832_v59 = vld [vmem:[#allocation193_spill] sm:$0xff] }
 0x3a4   : > { %17734 = vst [vmem:[#allocation197_spill] sm:$0xff] %v13566_v36  ;;  %v2105_v62 = vpop.f32.mrf.mxu0  ;;  %v17767_v17 = vmax.f32 %v13453_v8, 0.0  ;;  %v17772_v8 = vmax.f32 %v13270_v32, 0.0  ;;  %10275 = vmatmul.msk.bf16.gmra.mxu1 %vm10274_vm13, %v17402_v33 }
 0x3a5   : > { %17737 = vst [vmem:[#allocation201_spill] sm:$0xff] %v13573_v10 }
 0x3a6   : > { %17740 = vst [vmem:[#allocation40_spill] sm:$0xff] %v13578_v44  ;;  %v13628_v44 = vmul.f32 %v13174_v18, %v17757_v50  ;;  %v13647_v18 = vmul.f32 %v13302_v7, %v17763_v54  ;;  %v13659_v4 = vmul.f32 %v13325_v38, %v17767_v17  ;;  %v4260_v7 = vpop.permute.xlu1 %4259  ;;  %v13674_v38 = vmul.f32 %v13410_v49, %v17772_v8 }
 0x3a7   : > { %17742 = vst [vmem:[#allocation39_spill] sm:$0xff] %v13581_v58  ;;  %9582 = vmatmul.msk.bf16.gmra.mxu0 %vm1492_vm1, %v10805_v57  ;;  %v13663_v19 = vpop.f32.mrf.mxu2  ;;  %v4250_v57 = vpop.permute.xlu0 %4249  ;;  %v2106_v50 = vadd.f32 %v13332_v25, %v2105_v62  ;;  %v13680_v54 = vmul.f32 %v13425_v0, %v2777_v35  ;;  %v17775_v17 = vmax.f32 %v13274_v31, 0.0  ;;  %v17777_v49 = vmax.f32 %v13449_v12, 0.0  ;;  %v17829_v58 = vld [vmem:[#allocation126_spill] sm:$0xff] }
 0x3a8   : > { %17745 = vst [vmem:[#allocation207_spill] sm:$0xff] %v13590_v53  ;;  %v13682_v9 = vpop.f32.mrf.mxu3  ;;  %v17779_v8 = vmax.f32 %v13445_v15, 0.0  ;;  %v17781_v0 = vmax.f32 %v13414_v51, 0.0  ;;  %v17811_v53 = vld [vmem:[#allocation176_spill] sm:$0xff] }
 0x3a9   : > { %17747 = vst [vmem:[#allocation211_spill] sm:$0xff] %v13593_v29  ;;  %v13688_v32 = vmul.f32 %v13431_v24, %v17775_v17  ;;  %v13693_v62 = vmul.f32 %v13519_v20, %v17777_v49  ;;  %v13704_v23 = vpop.f32.mrf.mxu1  ;;  %v17784_v24 = vld [vmem:[#allocation78_spill] sm:$0xff]  ;;  %v13712_v20 = vmul.f32 %v4260_v7, %v2773_v40  ;;  %v2616_v40 = vmax.f32 %v2106_v50, 0.0 }
 0x3aa   : > { %17750 = vst [vmem:[#allocation216_spill] sm:$0xff] %v13598_v56  ;;  %v13698_v47 = vmul.f32 %v13521_v61, %v17779_v8  ;;  %v13702_v35 = vmul.f32 %v4255_v60, %v17781_v0  ;;  %v17785_v17 = vmax.f32 %v17784_v24, 0.0  ;;  %v17788_v49 = vld [vmem:[#allocation82_spill] sm:$0xff]  ;;  %v17791_v8 = vld [vmem:[#allocation204_spill] sm:$0xff] }
 0x3ab   : > { %17754 = vst [vmem:[#allocation228_spill] sm:$0xff] %v13610_v39  ;;  %v17789_v15 = vmax.f32 %v17788_v49, 0.0  ;;  %v17792_v0 = vld [vmem:[#allocation222_spill] sm:$0xff]  ;;  %vm5049_vm8 = vcmp.eq.s32.totalorder %v17751_v37, %v17791_v8  ;;  %vm5065_vm9 = vcmp.eq.s32.totalorder %v17752_v52, %v17791_v8  ;;  %v17837_v39 = vld [vmem:[#allocation27_spill] sm:$0xff] }
 0x3ac   : > { %17755 = vst [vmem:[#allocation233_spill] sm:$0xff] %v13617_v34  ;;  %v13710_v12 = vmul.f32 %v4245_v26, %v17785_v17  ;;  %v2107_v61 = vpop.f32.mrf.mxu0  ;;  %vm5017_vm14 = vcmp.eq.s32.totalorder %v17792_v0, %v17791_v8  ;;  %v17793_v26 = vld [vmem:[#allocation223_spill] sm:$0xff]  ;;  %v17796_v60 = vld [vmem:[#allocation34_spill] sm:$0xff]  ;;  %vm10260_vm10 = vmpackc.low %vm5065_vm9, %vm5049_vm8 }
 0x3ad   : > { %17756 = vst [vmem:[#allocation240_spill] sm:$0xff] %v13620_v43  ;;  %v13716_v22 = vmul.f32 %v4250_v57, %v17789_v15  ;;  %vm5033_vm15 = vcmp.eq.s32.totalorder %v17793_v26, %v17791_v8  ;;  %v2108_v7 = vadd.f32 %v13332_v25, %v2107_v61  ;;  %v17795_v15 = vld [vmem:[#allocation35_spill] sm:$0xff]  ;;  %v17797_v57 = vld [vmem:[#allocation62_spill] sm:$0xff]  ;;  %v17828_v34 = vld [vmem:[#allocation125_spill] sm:$0xff] }
 0x3ae   : > { %17758 = vst [vmem:[#allocation215_spill] sm:$0xff] %v13628_v44  ;;  %vm10258_vm0 = vmpackc.low %vm5033_vm15, %vm5017_vm14  ;;  %v13735_v51 = vmul.f32 %v17795_v15, %v2616_v40  ;;  %v10806_v61 = vld [vmem:[%s11300_s12 + $0x1a0] sm:$0xff]  ;;  %vm5080_vm2 = vcmp.eq.s32.totalorder %v17797_v57, %v12504_v11  ;;  %v17798_v24 = vld [vmem:[#allocation246_spill] sm:$0xff]  ;;  %vm4842_vm15 = vcmp.eq.s32.totalorder %v17811_v53, %v13136_v6 }
 0x3af   : > { %17759 = vst [vmem:[#allocation58_spill] sm:$0xff] %v13631_v42  ;;  %10259 = vmatmul.msk.bf16.gmra.mxu3 %vm10258_vm0, %v17402_v33  ;;  %v2617_v17 = vmax.f32 %v2108_v7, 0.0  ;;  %v13732_v49 = vpop.f32.mrf.mxu2  ;;  %vm5096_vm3 = vcmp.eq.s32.totalorder %v17798_v24, %v12504_v11  ;;  %v17801_v40 = vld [vmem:[#allocation166_spill] sm:$0xff] }
 0x3b0   : > { %17761 = vst [vmem:[#allocation251_spill] sm:$0xff] %v13639_v30  ;;  %v13740_v50 = vpop.f32.mrf.mxu3  ;;  %vm10230_vm4 = vmpackc.low %vm5096_vm3, %vm5080_vm2  ;;  %vm4810_vm6 = vcmp.eq.s32.totalorder %v17801_v40, %v13136_v6  ;;  %vm5081_vm2 = vcmp.eq.s32.totalorder %v17797_v57, %v17791_v8  ;;  %vm5097_vm3 = vcmp.eq.s32.totalorder %v17798_v24, %v17791_v8  ;;  %v10809_v42 = vld [vmem:[%s11300_s12 + $0x1b8] sm:$0xff] }
 0x3b1   : > { %17762 = vst [vmem:[#allocation49_spill] sm:$0xff] %v13642_v14  ;;  %v13738_v31 = vmul.f32 %v17796_v60, %v2617_v17  ;;  %v13749_v55 = vpop.f32.mrf.mxu1  ;;  %v17800_v60 = vld [vmem:[#allocation165_spill] sm:$0xff] }
 0x3b2   : > { %17764 = vst [vmem:[#allocation51_spill] sm:$0xff] %v13647_v18  ;;  %vm4794_vm5 = vcmp.eq.s32.totalorder %v17800_v60, %v13136_v6  ;;  %v17808_v18 = vld [vmem:[#allocation255_spill] sm:$0xff] }
 0x3b3   : > { %17766 = vst [vmem:[#allocation218_spill] sm:$0xff] %v13654_v63  ;;  %10231 = vmatmul.msk.bf16.gmra.mxu2 %vm10230_vm4, %v17402_v33  ;;  %vm10276_vm7 = vmpackc.low %vm4810_vm6, %vm4794_vm5  ;;  %v17807_v63 = vld [vmem:[#allocation254_spill] sm:$0xff]  ;;  %vm5128_vm12 = vcmp.eq.s32.totalorder %v17808_v18, %v12504_v11  ;;  %vm5144_vm5 = vcmp.eq.s32.totalorder %v17817_v5, %v12504_v11  ;;  %vm5160_vm6 = vcmp.eq.s32.totalorder %v17818_v48, %v12504_v11 }
 0x3b4   : > { %17768 = vst [vmem:[#allocation219_spill] sm:$0xff] %v13659_v4  ;;  %v13751_v21 = vpop.f32.mrf.mxu0  ;;  %10277 = vmatmul.msk.bf16.gmra.mxu1 %vm10276_vm7, %v17402_v33  ;;  %vm5112_vm11 = vcmp.eq.s32.totalorder %v17807_v63, %v12504_v11  ;;  %vm10262_vm4 = vmpackc.low %vm5097_vm3, %vm5081_vm2  ;;  %v17826_v4 = vld [vmem:[#allocation98_spill] sm:$0xff]  ;;  %vm4906_vm2 = vcmp.eq.s32.totalorder %v17832_v59, %v13136_v6 }
 0x3b5   : > { %17770 = vst [vmem:[#allocation220_spill] sm:$0xff] %v13663_v19  ;;  %vm10232_vm13 = vmpackc.low %vm5128_vm12, %vm5112_vm11  ;;  %vm5113_vm11 = vcmp.eq.s32.totalorder %v17807_v63, %v17791_v8  ;;  %vm5129_vm12 = vcmp.eq.s32.totalorder %v17808_v18, %v17791_v8 }
 0x3b6   : > { %17773 = vst [vmem:[#allocation221_spill] sm:$0xff] %v13674_v38  ;;  %vm10234_vm7 = vmpackc.low %vm5160_vm6, %vm5144_vm5  ;;  %vm5145_vm5 = vcmp.eq.s32.totalorder %v17817_v5, %v17791_v8  ;;  %vm5161_vm6 = vcmp.eq.s32.totalorder %v17818_v48, %v17791_v8 }
 0x3b7   : > { %17774 = vst [vmem:[#allocation242_spill] sm:$0xff] %v13680_v54  ;;  %9583 = vmatmul.msk.bf16.gmra.mxu0 %vm1492_vm1, %v10806_v61  ;;  %v13759_v17 = vpop.f32.mrf.mxu2  ;;  %v13836_v54 = vperm.slane %v17826_v4, 4 }
 0x3b8   : > { %17776 = vst [vmem:[#allocation244_spill] sm:$0xff] %v13688_v32  ;;  %v13765_v15 = vpop.f32.mrf.mxu3  ;;  %v10807_v32 = vld [vmem:[%s11300_s12 + $0x1a8] sm:$0xff] }
 0x3b9   : > { %17778 = vst [vmem:[#allocation249_spill] sm:$0xff] %v13693_v62  ;;  %v13768_v27 = vpop.f32.mrf.mxu1 }
 0x3ba   : > { %17780 = vst [vmem:[#allocation54_spill] sm:$0xff] %v13698_v47 }
 0x3bb   : > { %17782 = vst [vmem:[#allocation37_spill] sm:$0xff] %v13702_v35  ;;  %v17821_v35 = vld [vmem:[#allocation184_spill] sm:$0xff] }
 0x3bc   : > { %17783 = vst [vmem:[#allocation258_spill] sm:$0xff] %v13704_v23  ;;  %v13770_v7 = vpop.f32.mrf.mxu0  ;;  %vm4874_vm9 = vcmp.eq.s32.totalorder %v17821_v35, %v13136_v6 }
 0x3bd   : > { %17786 = vst [vmem:[#allocation259_spill] sm:$0xff] %v13710_v12 }
 0x3be   : > { %17787 = vst [vmem:[#allocation260_spill] sm:$0xff] %v13712_v20 }
 0x3bf   : > { %17790 = vst [vmem:[#allocation261_spill] sm:$0xff] %v13716_v22  ;;  %10261 = vmatmul.msk.bf16.gmra.mxu3 %vm10260_vm10, %v17402_v33  ;;  %v13773_v61 = vpop.f32.mrf.mxu2 }
 0x3c0   : > { %17794 = vst [vmem:[#allocation110_spill] sm:$0xff] %v13732_v49  ;;  %v13775_v38 = vpop.f32.mrf.mxu3 }
 0x3c1   : > { %17799 = vst [vmem:[#allocation263_spill] sm:$0xff] %v13749_v55  ;;  %v13782_v44 = vpop.f32.mrf.mxu1 }
 0x3c2   : > { %17802 = vst [vmem:[#allocation264_spill] sm:$0xff] %v13759_v17 }
 0x3c3   : > { %17803 = vst [vmem:[#allocation200_spill] sm:$0xff] %v13765_v15  ;;  %10233 = vmatmul.msk.bf16.gmra.mxu2 %vm10232_vm13, %v17402_v33  ;;  %vm10264_vm13 = vmpackc.low %vm5129_vm12, %vm5113_vm11 }
 0x3c4   : > { %17804 = vst [vmem:[#allocation43_spill] sm:$0xff] %v13768_v27  ;;  %v13784_v30 = vpop.f32.mrf.mxu0  ;;  %v17810_v27 = vld [vmem:[#allocation175_spill] sm:$0xff] }
 0x3c5   : > { %17805 = vst [vmem:[#allocation44_spill] sm:$0xff] %v13773_v61  ;;  %vm4826_vm14 = vcmp.eq.s32.totalorder %v17810_v27, %v13136_v6 }
 0x3c6   : > { %17806 = vst [vmem:[#allocation33_spill] sm:$0xff] %v13775_v38  ;;  %vm10278_vm0 = vmpackc.low %vm4842_vm15, %vm4826_vm14  ;;  %vm4667_vm14 = vcmp.eq.s32.totalorder %v17828_v34, %v13836_v54  ;;  %vm4683_vm15 = vcmp.eq.s32.totalorder %v17829_v58, %v13836_v54 }
 0x3c7   : > { %17809 = vst [vmem:[#allocation78_spill] sm:$0xff] %v13782_v44  ;;  %9584 = vmatmul.msk.bf16.gmra.mxu0 %vm1492_vm1, %v10807_v32  ;;  %v13792_v56 = vpop.f32.mrf.mxu2  ;;  %10279 = vmatmul.msk.bf16.gmra.mxu1 %vm10278_vm0, %v17402_v33  ;;  %vm10300_vm3 = vmpackc.low %vm4683_vm15, %vm4667_vm14  ;;  %v17836_v44 = vld [vmem:[#allocation20_spill] sm:$0xff] }
 0x3c8   : > { %17812 = vst [vmem:[#allocation82_spill] sm:$0xff] %v13792_v56  ;;  %v13799_v10 = vpop.f32.mrf.mxu3 }
 0x3c9   : > { %17813 = vst [vmem:[#allocation204_spill] sm:$0xff] %v13799_v10  ;;  %v13801_v13 = vpop.f32.mrf.mxu1 }
 0x3ca   : > { %17814 = vst [vmem:[#allocation35_spill] sm:$0xff] %v13801_v13  ;;  %v17820_v13 = vld [vmem:[#allocation183_spill] sm:$0xff] }
 0x3cb   : > { %vm4858_vm8 = vcmp.eq.s32.totalorder %v17820_v13, %v13136_v6 }
 0x3cc   : > { %v2117_v45 = vpop.f32.mrf.mxu0  ;;  %vm10280_vm10 = vmpackc.low %vm4874_vm9, %vm4858_vm8 }
 0x3cf   : > { %10263 = vmatmul.msk.bf16.gmra.mxu3 %vm10262_vm4, %v17402_v33  ;;  %v13804_v32 = vpop.f32.mrf.mxu2 }
 0x3d0   : > { %17815 = vst [vmem:[#allocation34_spill] sm:$0xff] %v13804_v32  ;;  %v13806_v23 = vpop.f32.mrf.mxu3 }
 0x3d1   : > { %17816 = vst [vmem:[#allocation265_spill] sm:$0xff] %v13806_v23  ;;  %v13813_v22 = vpop.f32.mrf.mxu1 }
 0x3d2   : > { %17819 = vst [vmem:[#allocation266_spill] sm:$0xff] %v13813_v22 }
 0x3d3   : > { %10235 = vmatmul.msk.bf16.gmra.mxu2 %vm10234_vm7, %v17402_v33  ;;  %vm10266_vm7 = vmpackc.low %vm5161_vm6, %vm5145_vm5 }
 0x3d4   : > { %v2120_v12 = vpop.f32.mrf.mxu0 }
 0x3d5   : > { %v2121_v61 = vadd.f32 %v13332_v25, %v2120_v12 }
 0x3d7   : > { %9585 = vmatmul.msk.bf16.gmra.mxu0 %vm1492_vm1, %v10808_v41  ;;  %v13825_v11 = vpop.f32.mrf.mxu2  ;;  %10281 = vmatmul.msk.bf16.gmra.mxu1 %vm10280_vm10, %v17402_v33  ;;  %v2622_v22 = vmax.f32 %v2121_v61, 0.0 }
 0x3d8   : > { %17822 = vst [vmem:[#allocation267_spill] sm:$0xff] %v13825_v11  ;;  %v13828_v20 = vpop.f32.mrf.mxu3  ;;  %v17839_v11 = vld [vmem:[#allocation29_spill] sm:$0xff] }
 0x3d9   : > { %17823 = vst [vmem:[#allocation268_spill] sm:$0xff] %v13828_v20  ;;  %v13830_v62 = vpop.f32.mrf.mxu1  ;;  %v17847_v20 = vld [vmem:[#allocation31_spill] sm:$0xff] }
 0x3da   : > { %17824 = vst [vmem:[#allocation269_spill] sm:$0xff] %v13830_v62  ;;  %v17831_v62 = vld [vmem:[#allocation192_spill] sm:$0xff] }
 0x3db   : > { %vm4890_vm0 = vcmp.eq.s32.totalorder %v17831_v62, %v13136_v6 }
 0x3dc   : > { %v2122_v47 = vpop.f32.mrf.mxu0  ;;  %vm10282_vm4 = vmpackc.low %vm4906_vm2, %vm4890_vm0 }
 0x3df   : > { %10265 = vmatmul.msk.bf16.gmra.mxu3 %vm10264_vm13, %v17402_v33  ;;  %v13833_v41 = vpop.f32.mrf.mxu2 }
 0x3e0   : > { %17825 = vst [vmem:[#allocation270_spill] sm:$0xff] %v13833_v41  ;;  %v13839_v14 = vpop.f32.mrf.mxu3 }
 0x3e1   : > { %17827 = vst [vmem:[#allocation98_spill] sm:$0xff] %v13839_v14  ;;  %v13845_v29 = vpop.f32.mrf.mxu1  ;;  %v2123_v14 = vadd.f32 %v13332_v25, %v2122_v47  ;;  %v2116_v47 = vadd.f32 %v13332_v25, %v13784_v30  ;;  %v17841_v30 = vld [vmem:[#allocation135_spill] sm:$0xff] }
 0x3e2   : > { %17830 = vst [vmem:[#allocation271_spill] sm:$0xff] %v13845_v29  ;;  %vm4699_vm8 = vcmp.eq.s32.totalorder %v17841_v30, %v13836_v54 }
 0x3e3   : > { %10301 = vmatmul.msk.bf16.vlgmr.msra.gmra.mxu2 %vm10300_vm3, %v17402_v33  ;;  %v2623_v49 = vmax.f32 %v2123_v14, 0.0 }
 0x3e4   : > { %v2125_v43 = vpop.f32.mrf.mxu0 }
 0x3e5   : > { %v2126_v36 = vadd.f32 %v13332_v25, %v2125_v43  ;;  %v2118_v43 = vadd.f32 %v13332_v25, %v2117_v45  ;;  %v4415_v45 = vmul.f32 %v17839_v11, %v2623_v49  ;;  %v2620_v49 = vmax.f32 %v2116_v47, 0.0  ;;  %v17849_v47 = vld [vmem:[#allocation32_spill] sm:$0xff] }
 0x3e7   : > { %9586 = vmatmul.msk.bf16.gmra.mxu0 %vm1492_vm1, %v10809_v42  ;;  %v13858_v41 = vpop.f32.mrf.mxu2  ;;  %10283 = vmatmul.msk.bf16.gmra.mxu1 %vm10282_vm4, %v17402_v33  ;;  %v2624_v38 = vmax.f32 %v2126_v36, 0.0  ;;  %v2113_v36 = vadd.f32 %v13332_v25, %v13770_v7  ;;  %v17845_v7 = vld [vmem:[#allocation30_spill] sm:$0xff]  ;;  %v4412_v56 = vmul.f32 %v17847_v20, %v2620_v49 }
 0x3e8   : > { %17833 = vst [vmem:[#allocation192_spill] sm:$0xff] %v13858_v41  ;;  %v13862_v32 = vpop.f32.mrf.mxu3  ;;  %v4414_v61 = vmul.f32 %v17845_v7, %v2622_v22 }
 0x3e9   : > { %17834 = vst [vmem:[#allocation193_spill] sm:$0xff] %v13862_v32  ;;  %v13864_v42 = vpop.f32.mrf.mxu1  ;;  %v4416_v55 = vmul.f32 %v17836_v44, %v2624_v38  ;;  %v10810_v32 = vld [vmem:[%s11300_s12 + $0x1c0] sm:$0xff]  ;;  %v17842_v44 = vld [vmem:[#allocation136_spill] sm:$0xff]  ;;  %v2619_v11 = vmax.f32 %v2113_v36, 0.0 }
 0x3ea   : > { %17835 = vst [vmem:[#allocation272_spill] sm:$0xff] %v13864_v42  ;;  %vm4715_vm9 = vcmp.eq.s32.totalorder %v17842_v44, %v13836_v54  ;;  %v17844_v38 = vld [vmem:[#allocation203_spill] sm:$0xff] }
 0x3eb   : > { %vm4938_vm11 = vcmp.eq.s32.totalorder %v17844_v38, %v13136_v6  ;;  %vm10302_vm12 = vmpackc.low %vm4715_vm9, %vm4699_vm8  ;;  %v4411_v36 = vmul.f32 %v17849_v47, %v2619_v11  ;;  %v10811_v11 = vld [vmem:[%s11300_s12 + $0x1c8] sm:$0xff]  ;;  %v17865_v47 = vld [vmem:[#allocation86_spill] sm:$0xff]  ;;  %vm4763_vm8 = vcmp.eq.s32.totalorder %v17769_v2, %v13836_v54  ;;  %vm4779_vm9 = vcmp.eq.s32.totalorder %v17771_v28, %v13836_v54 }
 0x3ec   : > { %v2127_v23 = vpop.f32.mrf.mxu0 }
 0x3ed   : > { %v2128_v8 = vadd.f32 %v13332_v25, %v2127_v23  ;;  %v2621_v23 = vmax.f32 %v2118_v43, 0.0  ;;  %v17846_v43 = vld [vmem:[#allocation25_spill] sm:$0xff] }
 0x3ef   : > { %10267 = vmatmul.msk.bf16.gmra.mxu3 %vm10266_vm7, %v17402_v33  ;;  %v2625_v29 = vmax.f32 %v2128_v8, 0.0  ;;  %v13874_v41 = vpop.f32.mrf.mxu2 }
 0x3f0   : > { %17838 = vst [vmem:[#allocation20_spill] sm:$0xff] %v13874_v41  ;;  %v13880_v14 = vpop.f32.mrf.mxu3  ;;  %v4413_v41 = vmul.f32 %v17846_v43, %v2621_v23  ;;  %v17851_v23 = vld [vmem:[#allocation28_spill] sm:$0xff]  ;;  %v17853_v43 = vld [vmem:[#allocation85_spill] sm:$0xff] }
 0x3f1   : > { %v4417_v42 = vmul.f32 %v17837_v39, %v2625_v29  ;;  %17840 = vst [vmem:[#allocation27_spill] sm:$0xff] %v13880_v14  ;;  %v13886_v29 = vpop.f32.mrf.mxu1  ;;  %v17843_v39 = vld [vmem:[#allocation202_spill] sm:$0xff] }
 0x3f2   : > { %vm4922_vm10 = vcmp.eq.s32.totalorder %v17843_v39, %v13136_v6  ;;  %v6532_v22 = vpack.c.bf16 %v4413_v41, %v4412_v56 }
 0x3f3   : > { %v6534_v12 = vpack.c.bf16 %v4417_v42, %v4416_v55  ;;  %v2111_v55 = vadd.f32 %v13332_v25, %v13751_v21  ;;  %10303 = vmatmul.msk.bf16.gmra.mxu2 %vm10302_vm12, %v17402_v33  ;;  %v6533_v42 = vpack.c.bf16 %v4415_v45, %v4414_v61  ;;  %vm10284_vm13 = vmpackc.low %vm4938_vm11, %vm4922_vm10  ;;  %v17852_v61 = vld [vmem:[#allocation83_spill] sm:$0xff] }
 0x3f4   : > { %v2130_v8 = vpop.f32.mrf.mxu0  ;;  %vm10306_vm12 = vmpackc.low %vm4779_vm9, %vm4763_vm8 }
 0x3f5   : > { %7060 = vmatpush.bf16.msrb.mxu3 %v6534_v12  ;;  %v2618_v14 = vmax.f32 %v2111_v55, 0.0  ;;  %v2131_v10 = vadd.f32 %v13332_v25, %v2130_v8 }
 0x3f7   : > { %9587 = vmatmul.msk.bf16.gmra.mxu0 %vm1492_vm1, %v10810_v32  ;;  %v13900_v21 = vpop.f32.mrf.mxu2  ;;  %10285 = vmatmul.msk.bf16.gmra.mxu1 %vm10284_vm13, %v17402_v33  ;;  %v4410_v55 = vmul.f32 %v17851_v23, %v2618_v14  ;;  %v2626_v7 = vmax.f32 %v2131_v10, 0.0  ;;  %v17858_v23 = vld [vmem:[#allocation21_spill] sm:$0xff] }
 0x3f8   : > { %17848 = vst [vmem:[#allocation29_spill] sm:$0xff] %v13900_v21  ;;  %v13904_v12 = vpop.f32.mrf.mxu3  ;;  %vm4954_vm0 = vcmp.eq.s32.totalorder %v17858_v23, %v13136_v6 }
 0x3f9   : > { %7061 = vmatpush.bf16.msrb.mxu3 %v6533_v42  ;;  %17850 = vst [vmem:[#allocation202_spill] sm:$0xff] %v13904_v12  ;;  %v13906_v45 = vpop.f32.mrf.mxu1  ;;  %v6531_v49 = vpack.c.bf16 %v4411_v36, %v4410_v55  ;;  %v13911_v42 = vmul.f32 %v17852_v61, %v2626_v7  ;;  %v17857_v36 = vld [vmem:[#allocation146_spill] sm:$0xff]  ;;  %v17860_v7 = vpack.c.bf16 %v13738_v31, %v13735_v51  ;;  %v13946_v31 = vperm.slane %v17826_v4, 5  ;;  %v17867_v4 = vld [vmem:[#allocation80_spill] sm:$0xff] }
 0x3fa   : > { %vm4747_vm15 = vcmp.eq.s32.totalorder %v17857_v36, %v13836_v54  ;;  %v17859_v55 = vld [vmem:[#allocation26_spill] sm:$0xff] }
 0x3fb   : > { %vm4970_vm2 = vcmp.eq.s32.totalorder %v17859_v55, %v13136_v6  ;;  %vm4668_vm5 = vcmp.eq.s32.totalorder %v17828_v34, %v13946_v31  ;;  %vm4684_vm6 = vcmp.eq.s32.totalorder %v17829_v58, %v13946_v31  ;;  %vm4748_vm9 = vcmp.eq.s32.totalorder %v17857_v36, %v13946_v31  ;;  %v17926_v36 = vld [vmem:[#allocation63_spill] sm:$0xff] }
 0x3fc   : > { %v2132_v32 = vpop.f32.mrf.mxu0  ;;  %vm10286_vm4 = vmpackc.low %vm4970_vm2, %vm4954_vm0  ;;  %vm4795_vm2 = vcmp.eq.s32.totalorder %v17800_v60, %v13836_v54 }
 0x3fd   : > { %v2133_v20 = vadd.f32 %v13332_v25, %v2132_v32  ;;  %7062 = vmatpush.bf16.msrb.mxu3 %v6532_v22  ;;  %v17856_v22 = vld [vmem:[#allocation145_spill] sm:$0xff]  ;;  %vm10332_vm7 = vmpackc.low %vm4684_vm6, %vm4668_vm5  ;;  %vm5034_vm5 = vcmp.eq.s32.totalorder %v17793_v26, %v13136_v6 }
 0x3fe   : > { %vm4731_vm14 = vcmp.eq.s32.totalorder %v17856_v22, %v13836_v54  ;;  %vm4732_vm8 = vcmp.eq.s32.totalorder %v17856_v22, %v13946_v31 }
 0x3ff   : > { %v2627_v8 = vmax.f32 %v2133_v20, 0.0  ;;  %v13916_v41 = vpop.f32.mrf.mxu2  ;;  %vm10304_vm3 = vmpackc.low %vm4747_vm15, %vm4731_vm14  ;;  %vm4700_vm14 = vcmp.eq.s32.totalorder %v17841_v30, %v13946_v31  ;;  %vm4716_vm15 = vcmp.eq.s32.totalorder %v17842_v44, %v13946_v31 }
 0x400   : > { %17854 = vst [vmem:[#allocation203_spill] sm:$0xff] %v13916_v41  ;;  %v13921_v14 = vpop.f32.mrf.mxu3  ;;  %v17868_v41 = vld [vmem:[#allocation79_spill] sm:$0xff]  ;;  %vm10334_vm0 = vmpackc.low %vm4716_vm15, %vm4700_vm14  ;;  %vm5066_vm14 = vcmp.eq.s32.totalorder %v17752_v52, %v13136_v6 }
 0x401   : > { %v13914_v56 = vmul.f32 %v17853_v43, %v2627_v8  ;;  %7063 = vmatpush.bf16.msrb.mxu3 %v6531_v49  ;;  %17855 = vst [vmem:[#allocation30_spill] sm:$0xff] %v13921_v14  ;;  %v13927_v32 = vpop.f32.mrf.mxu1  ;;  %v17861_v8 = vpack.c.bf16 %v13608_v16, %v13544_v3 }
 0x403   : > { %10305 = vmatmul.msk.bf16.gmra.mxu2 %vm10304_vm3, %v17402_v33  ;;  %vm4811_vm3 = vcmp.eq.s32.totalorder %v17801_v40, %v13836_v54 }
 0x404   : > { %v2135_v10 = vpop.f32.mrf.mxu0  ;;  %vm10308_vm6 = vmpackc.low %vm4811_vm3, %vm4795_vm2  ;;  %vm4764_vm2 = vcmp.eq.s32.totalorder %v17769_v2, %v13946_v31  ;;  %vm4780_vm3 = vcmp.eq.s32.totalorder %v17771_v28, %v13946_v31  ;;  %v10816_v2 = vld [vmem:[%s11300_s12 + $0x1f0] sm:$0xff] }
 0x405   : > { %7064 = vmatpush.bf16.msrb.mxu3 %v17860_v7  ;;  %v2136_v20 = vadd.f32 %v13332_v25, %v2135_v10  ;;  %v17864_v7 = vld [vmem:[#allocation124_spill] sm:$0xff] }
 0x406   : > { %v17866_v3 = vpack.c.bf16 %v17864_v7, %v17865_v47  ;;  %v10812_v47 = vld [vmem:[%s11300_s12 + $0x1d0] sm:$0xff] }
 0x407   : > { %9588 = vmatmul.msk.bf16.gmra.mxu0 %vm1492_vm1, %v10811_v11  ;;  %v13942_v49 = vpop.f32.mrf.mxu2  ;;  %10287 = vmatmul.msk.bf16.gmra.mxu1 %vm10286_vm4, %v17402_v33  ;;  %v2628_v11 = vmax.f32 %v2136_v20, 0.0  ;;  %v17869_v20 = vld [vmem:[#allocation103_spill] sm:$0xff]  ;;  %vm5018_vm4 = vcmp.eq.s32.totalorder %v17792_v0, %v13136_v6 }
 0x408   : > { %17862 = vst [vmem:[#allocation25_spill] sm:$0xff] %v13942_v49  ;;  %v13948_v51 = vpop.f32.mrf.mxu3  ;;  %v17870_v49 = vld [vmem:[#allocation90_spill] sm:$0xff] }
 0x409   : > { %7065 = vmatpush.bf16.msrb.mxu3 %v17861_v8  ;;  %17863 = vst [vmem:[#allocation31_spill] sm:$0xff] %v13948_v51  ;;  %v13950_v43 = vpop.f32.mrf.mxu1  ;;  %v13961_v8 = vmul.f32 %v17867_v4, %v2628_v11  ;;  %v17873_v11 = vld [vmem:[#allocation212_spill] sm:$0xff] }
 0x40a   : > { %vm4986_vm10 = vcmp.eq.s32.totalorder %v17873_v11, %v13136_v6 }
 0x40c   : > { %v2137_v61 = vpop.f32.mrf.mxu0 }
 0x40d   : > { %v2138_v10 = vadd.f32 %v13332_v25, %v2137_v61  ;;  %7066 = vmatpush.bf16.msrb.mxu3 %v17866_v3  ;;  %v17871_v61 = vpack.c.bf16 %v17869_v20, %v17870_v49  ;;  %v17874_v49 = vld [vmem:[#allocation213_spill] sm:$0xff] }
 0x40e   : > { %vm5002_vm11 = vcmp.eq.s32.totalorder %v17874_v49, %v13136_v6 }
 0x40f   : > { %v2629_v16 = vmax.f32 %v2138_v10, 0.0  ;;  %v13969_v51 = vpop.f32.mrf.mxu2  ;;  %vm10288_vm13 = vmpackc.low %vm5002_vm11, %vm4986_vm10  ;;  %vm4827_vm11 = vcmp.eq.s32.totalorder %v17810_v27, %v13836_v54 }
 0x410   : > { %17872 = vst [vmem:[#allocation32_spill] sm:$0xff] %v13969_v51  ;;  %v13985_v10 = vpop.f32.mrf.mxu3  ;;  %vm10336_vm10 = vmpackc.low %vm4748_vm9, %vm4732_vm8  ;;  %vm5098_vm8 = vcmp.eq.s32.totalorder %v17798_v24, %v13136_v6  ;;  %v17909_v24 = vld [vmem:[#allocation104_spill] sm:$0xff] }
 0x411   : > { %v13964_v14 = vmul.f32 %v17868_v41, %v2629_v16  ;;  %7067 = vmatpush.bf16.msrb.mxu3 %v17871_v61  ;;  %v13978_v41 = vpop.f32.mrf.mxu1  ;;  %17875 = vst [vmem:[#allocation28_spill] sm:$0xff] %v13985_v10 }
 0x413   : > { %10307 = vmatmul.msk.bf16.gmra.mxu2 %vm10306_vm12, %v17402_v33  ;;  %vm4843_vm12 = vcmp.eq.s32.totalorder %v17811_v53, %v13836_v54 }
 0x414   : > { %v2140_v3 = vpop.f32.mrf.mxu0  ;;  %10333 = vmatmul.msk.bf16.vlgmr.msrb.gmra.mxu3 %vm10332_vm7, %v17402_v33  ;;  %vm10290_vm7 = vmpackc.low %vm5034_vm5, %vm5018_vm4  ;;  %vm4859_vm5 = vcmp.eq.s32.totalorder %v17820_v13, %v13836_v54 }
 0x415   : > { %v2141_v16 = vadd.f32 %v13332_v25, %v2140_v3  ;;  %v17878_v3 = vld [vmem:[#allocation73_spill] sm:$0xff]  ;;  %vm10310_vm15 = vmpackc.low %vm4843_vm12, %vm4827_vm11  ;;  %vm4796_vm11 = vcmp.eq.s32.totalorder %v17800_v60, %v13946_v31  ;;  %vm4812_vm12 = vcmp.eq.s32.totalorder %v17801_v40, %v13946_v31 }
 0x416   : > { %vm10338_vm4 = vmpackc.low %vm4780_vm3, %vm4764_vm2  ;;  %vm5130_vm2 = vcmp.eq.s32.totalorder %v17808_v18, %v13136_v6 }
 0x417   : > { %9589 = vmatmul.msk.bf16.gmra.mxu0 %vm1492_vm1, %v10812_v47  ;;  %v13990_v4 = vpop.f32.mrf.mxu2  ;;  %10289 = vmatmul.msk.bf16.gmra.mxu1 %vm10288_vm13, %v17402_v33  ;;  %v2630_v61 = vmax.f32 %v2141_v16, 0.0  ;;  %vm5050_vm13 = vcmp.eq.s32.totalorder %v17751_v37, %v13136_v6 }
 0x418   : > { %17876 = vst [vmem:[#allocation83_spill] sm:$0xff] %v13990_v4  ;;  %v14000_v10 = vpop.f32.mrf.mxu3  ;;  %v17879_v4 = vld [vmem:[#allocation76_spill] sm:$0xff] }
 0x419   : > { %v13994_v51 = vpop.f32.mrf.mxu1  ;;  %17877 = vst [vmem:[#allocation85_spill] sm:$0xff] %v14000_v10  ;;  %v14003_v21 = vmul.f32 %v17878_v3, %v2630_v61 }
 0x41c   : > { %v2142_v20 = vpop.f32.mrf.mxu0 }
 0x41d   : > { %v2143_v7 = vadd.f32 %v13332_v25, %v2142_v20  ;;  %v10813_v20 = vld [vmem:[%s11300_s12 + $0x1d8] sm:$0xff] }
 0x41f   : > { %v2631_v47 = vmax.f32 %v2143_v7, 0.0  ;;  %v14008_v16 = vpop.f32.mrf.mxu2 }
 0x420   : > { %17880 = vst [vmem:[#allocation21_spill] sm:$0xff] %v14008_v16 }
 0x421   : > { %v14006_v12 = vmul.f32 %v17879_v4, %v2631_v47  ;;  %v14024_v7 = vpop.f32.mrf.mxu1  ;;  %v14029_v47 = vpop.f32.mrf.mxu3 }
 0x422   : > { %17882 = vst [vmem:[#allocation124_spill] sm:$0xff] %v14029_v47 }
 0x423   : > { %10309 = vmatmul.msk.bf16.gmra.mxu2 %vm10308_vm6, %v17402_v33  ;;  %vm4875_vm6 = vcmp.eq.s32.totalorder %v17821_v35, %v13836_v54 }
 0x424   : > { %v2145_v15 = vpop.f32.mrf.mxu0  ;;  %10335 = vmatmul.msk.bf16.gmra.mxu3 %vm10334_vm0, %v17402_v33  ;;  %vm10292_vm0 = vmpackc.low %vm5066_vm14, %vm5050_vm13  ;;  %vm4891_vm14 = vcmp.eq.s32.totalorder %v17831_v62, %v13836_v54 }
 0x425   : > { %v2146_v4 = vadd.f32 %v13332_v25, %v2145_v15  ;;  %v17883_v15 = vld [vmem:[#allocation67_spill] sm:$0xff]  ;;  %vm10312_vm9 = vmpackc.low %vm4875_vm6, %vm4859_vm5  ;;  %vm4828_vm5 = vcmp.eq.s32.totalorder %v17810_v27, %v13946_v31  ;;  %vm4844_vm6 = vcmp.eq.s32.totalorder %v17811_v53, %v13946_v31  ;;  %v17906_v27 = vld [vmem:[#allocation22_spill] sm:$0xff] }
 0x426   : > { %vm10340_vm13 = vmpackc.low %vm4812_vm12, %vm4796_vm11  ;;  %vm5162_vm11 = vcmp.eq.s32.totalorder %v17818_v48, %v13136_v6  ;;  %v17905_v53 = vld [vmem:[#allocation23_spill] sm:$0xff] }
 0x427   : > { %9590 = vmatmul.msk.bf16.gmra.mxu0 %vm1492_vm1, %v10813_v20  ;;  %v14027_v61 = vpop.f32.mrf.mxu2  ;;  %10291 = vmatmul.msk.bf16.gmra.mxu1 %vm10290_vm7, %v17402_v33  ;;  %v2632_v17 = vmax.f32 %v2146_v4, 0.0  ;;  %v10814_v4 = vld [vmem:[%s11300_s12 + $0x1e0] sm:$0xff]  ;;  %vm5082_vm7 = vcmp.eq.s32.totalorder %v17797_v57, %v13136_v6  ;;  %v6716_v18 = vadd.f32 %v17906_v27, %v17905_v53 }
 0x428   : > { %17881 = vst [vmem:[#allocation26_spill] sm:$0xff] %v14027_v61  ;;  %v17884_v61 = vld [vmem:[#allocation69_spill] sm:$0xff]  ;;  %v10818_v57 = vld [vmem:[%s11300_s12 + $0x200] sm:$0xff] }
 0x429   : > { %v14037_v10 = vpop.f32.mrf.mxu1  ;;  %v14040_v19 = vmul.f32 %v17883_v15, %v2632_v17 }
 0x42c   : > { %v2147_v3 = vpop.f32.mrf.mxu0 }
 0x42d   : > { %v2148_v16 = vadd.f32 %v13332_v25, %v2147_v3  ;;  %v10815_v3 = vld [vmem:[%s11300_s12 + $0x1e8] sm:$0xff] }
 0x42f   : > { %v2633_v20 = vmax.f32 %v2148_v16, 0.0  ;;  %v14045_v44 = vpop.f32.mrf.mxu2 }
 0x430   : > { %17885 = vst [vmem:[#allocation86_spill] sm:$0xff] %v14045_v44 }
 0x431   : > { %v14043_v47 = vmul.f32 %v17884_v61, %v2633_v20  ;;  %v14065_v17 = vpop.f32.mrf.mxu1 }
 0x432   : > { %v14050_v22 = vpop.f32.mrf.mxu3 }
 0x433   : > { %17886 = vst [vmem:[#allocation80_spill] sm:$0xff] %v14050_v22  ;;  %10311 = vmatmul.msk.bf16.gmra.mxu2 %vm10310_vm15, %v17402_v33  ;;  %vm4907_vm15 = vcmp.eq.s32.totalorder %v17832_v59, %v13836_v54 }
 0x434   : > { %v14052_v30 = vpop.f32.mrf.mxu0  ;;  %10337 = vmatmul.msk.bf16.gmra.mxu3 %vm10336_vm10, %v17402_v33  ;;  %vm10294_vm10 = vmpackc.low %vm5098_vm8, %vm5082_vm7  ;;  %vm4923_vm8 = vcmp.eq.s32.totalorder %v17843_v39, %v13836_v54 }
 0x435   : > { %vm10314_vm3 = vmpackc.low %vm4907_vm15, %vm4891_vm14  ;;  %vm4860_vm14 = vcmp.eq.s32.totalorder %v17820_v13, %v13946_v31  ;;  %vm4876_vm15 = vcmp.eq.s32.totalorder %v17821_v35, %v13946_v31 }
 0x436   : > { %vm10342_vm7 = vmpackc.low %vm4844_vm6, %vm4828_vm5  ;;  %vm4892_vm5 = vcmp.eq.s32.totalorder %v17831_v62, %v13946_v31  ;;  %vm4908_vm6 = vcmp.eq.s32.totalorder %v17832_v59, %v13946_v31 }
 0x437   : > { %9591 = vmatmul.msk.bf16.gmra.mxu0 %vm1492_vm1, %v10814_v4  ;;  %v14067_v16 = vpop.f32.mrf.mxu2  ;;  %10293 = vmatmul.msk.bf16.gmra.mxu1 %vm10292_vm0, %v17402_v33  ;;  %vm5114_vm0 = vcmp.eq.s32.totalorder %v17807_v63, %v13136_v6 }
 0x438   : > { %17887 = vst [vmem:[#allocation79_spill] sm:$0xff] %v14067_v16 }
 0x439   : > { %v14078_v15 = vpop.f32.mrf.mxu1 }
 0x43a   : > { %v14072_v20 = vpop.f32.mrf.mxu3  ;;  %17889 = vst [vmem:[#allocation90_spill] sm:$0xff] %v14078_v15 }
 0x43b   : > { %17888 = vst [vmem:[#allocation103_spill] sm:$0xff] %v14072_v20 }
 0x43c   : > { %v14070_v61 = vpop.f32.mrf.mxu0 }
 0x43f   : > { %v14080_v4 = vpop.f32.mrf.mxu2 }
 0x440   : > { %17890 = vst [vmem:[#allocation73_spill] sm:$0xff] %v14080_v4 }
 0x442   : > { %v14098_v20 = vpop.f32.mrf.mxu3 }
 0x443   : > { %10313 = vmatmul.msk.bf16.gmra.mxu2 %vm10312_vm9, %v17402_v33  ;;  %17892 = vst [vmem:[#allocation67_spill] sm:$0xff] %v14098_v20  ;;  %vm4939_vm9 = vcmp.eq.s32.totalorder %v17844_v38, %v13836_v54 }
 0x444   : > { %v14083_v44 = vpop.f32.mrf.mxu0  ;;  %10339 = vmatmul.msk.bf16.gmra.mxu3 %vm10338_vm4, %v17402_v33  ;;  %v14096_v4 = vpop.f32.mrf.mxu1  ;;  %vm10296_vm4 = vmpackc.low %vm5130_vm2, %vm5114_vm0  ;;  %vm4955_vm2 = vcmp.eq.s32.totalorder %v17858_v23, %v13836_v54 }
 0x445   : > { %17891 = vst [vmem:[#allocation76_spill] sm:$0xff] %v14096_v4  ;;  %vm10316_vm12 = vmpackc.low %vm4939_vm9, %vm4923_vm8  ;;  %vm4987_vm8 = vcmp.eq.s32.totalorder %v17873_v11, %v13836_v54  ;;  %vm5003_vm9 = vcmp.eq.s32.totalorder %v17874_v49, %v13836_v54 }
 0x446   : > { %vm10344_vm0 = vmpackc.low %vm4876_vm15, %vm4860_vm14  ;;  %vm4940_vm14 = vcmp.eq.s32.totalorder %v17844_v38, %v13946_v31 }
 0x447   : > { %9592 = vmatmul.msk.bf16.gmra.mxu0 %vm1492_vm1, %v10815_v3  ;;  %v14100_v15 = vpop.f32.mrf.mxu2  ;;  %10295 = vmatmul.msk.bf16.gmra.mxu1 %vm10294_vm10, %v17402_v33  ;;  %vm5146_vm10 = vcmp.eq.s32.totalorder %v17817_v5, %v13136_v6  ;;  %v17908_v5 = vld [vmem:[#allocation97_spill] sm:$0xff] }
 0x448   : > { %17893 = vst [vmem:[#allocation69_spill] sm:$0xff] %v14100_v15 }
 0x44a   : > { %v14111_v3 = vpop.f32.mrf.mxu3 }
 0x44b   : > { %17896 = vst [vmem:[#allocation275_spill] sm:$0xff] %v14111_v3 }
 0x44c   : > { %v2157_v16 = vpop.f32.mrf.mxu0  ;;  %v14107_v22 = vpop.f32.mrf.mxu1 }
 0x44d   : > { %17894 = vst [vmem:[#allocation273_spill] sm:$0xff] %v14107_v22 }
 0x44f   : > { %v14109_v28 = vpop.f32.mrf.mxu2 }
 0x450   : > { %17895 = vst [vmem:[#allocation274_spill] sm:$0xff] %v14109_v28 }
 0x452   : > { %v14130_v22 = vpop.f32.mrf.mxu3 }
 0x453   : > { %10315 = vmatmul.msk.bf16.gmra.mxu2 %vm10314_vm3, %v17402_v33  ;;  %17899 = vst [vmem:[#allocation278_spill] sm:$0xff] %v14130_v22  ;;  %vm4971_vm3 = vcmp.eq.s32.totalorder %v17859_v55, %v13836_v54 }
 0x454   : > { %v2160_v20 = vpop.f32.mrf.mxu0  ;;  %10341 = vmatmul.msk.bf16.gmra.mxu3 %vm10340_vm13, %v17402_v33  ;;  %v14125_v28 = vpop.f32.mrf.mxu1  ;;  %vm10298_vm13 = vmpackc.low %vm5162_vm11, %vm5146_vm10 }
 0x455   : > { %17897 = vst [vmem:[#allocation276_spill] sm:$0xff] %v14125_v28  ;;  %v2161_v53 = vadd.f32 %v13332_v25, %v2160_v20  ;;  %vm10320_vm10 = vmpackc.low %vm5003_vm9, %vm4987_vm8  ;;  %vm4972_vm8 = vcmp.eq.s32.totalorder %v17859_v55, %v13946_v31 }
 0x457   : > { %9593 = vmatmul.msk.bf16.gmra.mxu0 %vm1492_vm1, %v10816_v2  ;;  %v14127_v3 = vpop.f32.mrf.mxu2  ;;  %10297 = vmatmul.msk.bf16.gmra.mxu1 %vm10296_vm4, %v17402_v33  ;;  %v10817_v2 = vld [vmem:[%s11300_s12 + $0x1f8] sm:$0xff]  ;;  %vm10318_vm4 = vmpackc.low %vm4971_vm3, %vm4955_vm2  ;;  %vm5019_vm2 = vcmp.eq.s32.totalorder %v17792_v0, %v13836_v54  ;;  %vm5035_vm3 = vcmp.eq.s32.totalorder %v17793_v26, %v13836_v54 }
 0x458   : > { %17898 = vst [vmem:[#allocation277_spill] sm:$0xff] %v14127_v3  ;;  %v17903_v3 = vld [vmem:[#allocation19_spill] sm:$0xff] }
 0x45c   : > { %v2162_v15 = vpop.f32.mrf.mxu0  ;;  %v14136_v40 = vpop.f32.mrf.mxu1 }
 0x45d   : > { %17900 = vst [vmem:[#allocation279_spill] sm:$0xff] %v14136_v40  ;;  %v14150_v40 = vpop.f32.mrf.mxu3 }
 0x45e   : > { %17902 = vst [vmem:[#allocation281_spill] sm:$0xff] %v14150_v40  ;;  %v6805_v40 = vadd.f32 %v17909_v24, %v6716_v18 }
 0x45f   : > { %v14138_v60 = vpop.f32.mrf.mxu2 }
 0x460   : > { %17901 = vst [vmem:[#allocation280_spill] sm:$0xff] %v14138_v60  ;;  %v17904_v60 = vld [vmem:[#allocation105_spill] sm:$0xff] }
 0x461   : > { %v6714_v22 = vadd.f32 %v17904_v60, %v17903_v3  ;;  %v2163_v60 = vadd.f32 %v13332_v25, %v2162_v15  ;;  %v2638_v15 = vmax.f32 %v2161_v53, 0.0  ;;  %v17915_v53 = vld [vmem:[#allocation56_spill] sm:$0xff] }
 0x463   : > { %10317 = vmatmul.msk.bf16.gmra.mxu2 %vm10316_vm12, %v17402_v33  ;;  %v6803_v4 = vadd.f32 %v17908_v5, %v6714_v22  ;;  %v6894_v5 = vadd.f32 %v13906_v45, %v6805_v40  ;;  %v2639_v18 = vmax.f32 %v2163_v60, 0.0  ;;  %v17912_v40 = vld [vmem:[#allocation48_spill] sm:$0xff] }
 0x464   : > { %v2165_v28 = vpop.f32.mrf.mxu0  ;;  %10343 = vmatmul.msk.bf16.gmra.mxu3 %vm10342_vm7, %v17402_v33  ;;  %v14158_v63 = vpop.f32.mrf.mxu1  ;;  %vm10346_vm7 = vmpackc.low %vm4908_vm6, %vm4892_vm5 }
 0x465   : > { %17907 = vst [vmem:[#allocation19_spill] sm:$0xff] %v14158_v63  ;;  %v2166_v6 = vadd.f32 %v13332_v25, %v2165_v28  ;;  %v6892_v63 = vadd.f32 %v13886_v29, %v6803_v4  ;;  %v14181_v20 = vpop.f32.mrf.mxu3  ;;  %v17913_v4 = vld [vmem:[#allocation53_spill] sm:$0xff] }
 0x466   : > { %17911 = vst [vmem:[#allocation23_spill] sm:$0xff] %v14181_v20 }
 0x467   : > { %9594 = vmatmul.msk.bf16.gmra.mxu0 %vm1492_vm1, %v10817_v2  ;;  %v6980_v48 = vpop.f32.mrf.mxu2  ;;  %10299 = vmatmul.msk.bf16.gmra.mxu1 %vm10298_vm13, %v17402_v33  ;;  %v2640_v27 = vmax.f32 %v2166_v6, 0.0  ;;  %v14169_v2 = vld [vmem:[%s17071_s8] ss:$0 sm:$0xff]  ;;  %vm4924_vm13 = vcmp.eq.s32.totalorder %v17843_v39, %v13946_v31 }
 0x468   : > { %v2158_v25 = vadd.f32 %v14169_v2, %v2157_v16  ;;  %v2156_v29 = vadd.f32 %v14169_v2, %v14083_v44  ;;  %v14187_v35 = vadd.f32 %v6980_v48, %v6892_v63  ;;  %v2153_v60 = vadd.f32 %v14169_v2, %v14070_v61 }
 0x469   : > { %v4432_v45 = vmul.f32 %v17912_v40, %v2640_v27  ;;  %v2151_v48 = vadd.f32 %v14169_v2, %v14052_v30  ;;  %v4430_v61 = vmul.f32 %v17915_v53, %v2638_v15  ;;  %v17916_v27 = vld [vmem:[#allocation24_spill] sm:$0xff]  ;;  %v17922_v15 = vld [vmem:[#allocation57_spill] sm:$0xff] }
 0x46a   : > { %v2636_v63 = vmax.f32 %v2156_v29, 0.0  ;;  %v2635_v40 = vmax.f32 %v2153_v60, 0.0 }
 0x46b   : > { %v2634_v29 = vmax.f32 %v2151_v48, 0.0 }
 0x46c   : > { %v2167_v3 = vpop.f32.mrf.mxu0  ;;  %v14179_v22 = vpop.f32.mrf.mxu1 }
 0x46d   : > { %v2168_v28 = vadd.f32 %v14169_v2, %v2167_v3  ;;  %17910 = vst [vmem:[#allocation105_spill] sm:$0xff] %v14179_v22  ;;  %v17914_v22 = vld [vmem:[#allocation55_spill] sm:$0xff] }
 0x46e   : > { %v4431_v20 = vmul.f32 %v17914_v22, %v2639_v18  ;;  %v17918_v18 = vld [vmem:[#allocation208_spill] sm:$0xff] }
 0x46f   : > { %v2641_v24 = vmax.f32 %v2168_v28, 0.0  ;;  %v6982_v3 = vpop.f32.mrf.mxu2  ;;  %v2637_v28 = vmax.f32 %v2158_v25, 0.0 }
 0x470   : > { %v14189_v16 = vadd.f32 %v6982_v3, %v6894_v5  ;;  %v17917_v5 = vld [vmem:[#allocation95_spill] sm:$0xff] }
 0x471   : > { %v4433_v6 = vmul.f32 %v17913_v4, %v2641_v24  ;;  %v6719_v25 = vadd.f32 %v17917_v5, %v17916_v27  ;;  %v17919_v24 = vld [vmem:[#allocation99_spill] sm:$0xff]  ;;  %v14214_v27 = vpop.f32.mrf.mxu3  ;;  %v17924_v5 = vld [vmem:[#allocation94_spill] sm:$0xff] }
 0x472   : > { %v6721_v22 = vadd.f32 %v17919_v24, %v17918_v18  ;;  %17923 = vst [vmem:[#allocation97_spill] sm:$0xff] %v14214_v27  ;;  %v17925_v24 = vld [vmem:[#allocation130_spill] sm:$0xff] }
 0x473   : > { %v6542_v13 = vpack.c.bf16 %v4433_v6, %v4432_v45  ;;  %10319 = vmatmul.msk.bf16.gmra.mxu2 %vm10318_vm4, %v17402_v33  ;;  %v17920_v45 = vld [vmem:[#allocation60_spill] sm:$0xff]  ;;  %v6541_v6 = vpack.c.bf16 %v4431_v20, %v4430_v61  ;;  %v6808_v18 = vadd.f32 %v17924_v5, %v6719_v25  ;;  %vm10322_vm4 = vmpackc.low %vm5035_vm3, %vm5019_vm2  ;;  %vm5004_vm2 = vcmp.eq.s32.totalorder %v17874_v49, %v13946_v31 }
 0x474   : > { %v2170_v44 = vpop.f32.mrf.mxu0  ;;  %10345 = vmatmul.msk.bf16.gmra.mxu3 %vm10344_vm0, %v17402_v33  ;;  %v4429_v4 = vmul.f32 %v17920_v45, %v2637_v28  ;;  %v14210_v30 = vpop.f32.mrf.mxu1  ;;  %v6810_v60 = vadd.f32 %v17925_v24, %v6721_v22  ;;  %v4427_v28 = vmul.f32 %v17926_v36, %v2635_v40  ;;  %v17927_v20 = vld [vmem:[#allocation64_spill] sm:$0xff]  ;;  %v17934_v24 = vld [vmem:[#allocation70_spill] sm:$0xff]  ;;  %vm10348_vm0 = vmpackc.low %vm4940_vm14, %vm4924_vm13 }
 0x475   : > { %7149 = vmatpush.bf16.msra.mxu1 %v6542_v13  ;;  %17921 = vst [vmem:[#allocation22_spill] sm:$0xff] %v14210_v30  ;;  %v4428_v13 = vmul.f32 %v17922_v15, %v2636_v63  ;;  %v2171_v3 = vadd.f32 %v14169_v2, %v2170_v44  ;;  %v4426_v61 = vmul.f32 %v17927_v20, %v2634_v29  ;;  %v17929_v40 = vld [vmem:[#allocation180_spill] sm:$0xff] }
 0x476   : > { %v6897_v44 = vadd.f32 %v13927_v32, %v6808_v18  ;;  %v6899_v63 = vadd.f32 %v13950_v43, %v6810_v60 }
 0x477   : > { %9595 = vmatmul.msk.bf16.gmra.mxu0 %vm1492_vm1, %v10818_v57  ;;  %v6985_v53 = vpop.f32.mrf.mxu2  ;;  %v6540_v45 = vpack.c.bf16 %v4429_v4, %v4428_v13  ;;  %v2642_v30 = vmax.f32 %v2171_v3, 0.0  ;;  %v6539_v25 = vpack.c.bf16 %v4427_v28, %v4426_v61  ;;  %v10819_v13 = vld [vmem:[%s11300_s12 + $0x208] sm:$0xff]  ;;  %v17935_v28 = vld [vmem:[#allocation217_spill] sm:$0xff] }
 0x478   : > { %v14235_v43 = vadd.f32 %v6985_v53, %v6897_v44  ;;  %v17933_v53 = vld [vmem:[#allocation214_spill] sm:$0xff] }
 0x479   : > { %7150 = vmatpush.bf16.msra.mxu1 %v6541_v6  ;;  %v14230_v4 = vmul.f32 %v17929_v40, %v2642_v30  ;;  %v17930_v6 = vld [vmem:[#allocation181_spill] sm:$0xff]  ;;  %v14240_v3 = vpop.f32.mrf.mxu3  ;;  %v17932_v30 = vpack.c.bf16 %v14043_v47, %v14040_v19  ;;  %v6724_v60 = vadd.f32 %v17934_v24, %v17933_v53  ;;  %v17938_v47 = vld [vmem:[#allocation144_spill] sm:$0xff]  ;;  %v17944_v53 = vpack.c.bf16 %v13914_v56, %v13911_v42 }
 0x47a   : > { %17931 = vst [vmem:[#allocation48_spill] sm:$0xff] %v14240_v3  ;;  %v17945_v42 = vld [vmem:[#allocation224_spill] sm:$0xff] }
 0x47b   : > { %v6813_v44 = vadd.f32 %v17938_v47, %v6724_v60  ;;  %v17946_v56 = vld [vmem:[#allocation140_spill] sm:$0xff] }
 0x47c   : > { %v2172_v57 = vpop.f32.mrf.mxu0  ;;  %v14227_v22 = vpop.f32.mrf.mxu1  ;;  %v17978_v3 = vld [vmem:[#allocation268_spill] sm:$0xff] }
 0x47d   : > { %v2173_v48 = vadd.f32 %v14169_v2, %v2172_v57  ;;  %7151 = vmatpush.bf16.msra.mxu1 %v6540_v45  ;;  %17928 = vst [vmem:[#allocation104_spill] sm:$0xff] %v14227_v22  ;;  %v17936_v45 = vld [vmem:[#allocation36_spill] sm:$0xff]  ;;  %v17974_v22 = vld [vmem:[#allocation255_spill] sm:$0xff] }
 0x47e   : > { %v6726_v57 = vadd.f32 %v17936_v45, %v17935_v28  ;;  %v10820_v45 = vld [vmem:[%s11300_s12 + $0x210] sm:$0xff] }
 0x47f   : > { %v2643_v36 = vmax.f32 %v2173_v48, 0.0  ;;  %v6987_v32 = vpop.f32.mrf.mxu2  ;;  %v17937_v48 = vpack.c.bf16 %v14006_v12, %v14003_v21  ;;  %v6902_v12 = vadd.f32 %v13978_v41, %v6813_v44  ;;  %v17943_v41 = vld [vmem:[#allocation177_spill] sm:$0xff] }
 0x480   : > { %v14237_v15 = vadd.f32 %v6987_v32, %v6899_v63  ;;  %v6815_v63 = vadd.f32 %v13583_v46, %v6726_v57 }
 0x481   : > { %v14233_v29 = vmul.f32 %v17930_v6, %v2643_v36  ;;  %7152 = vmatpush.bf16.msra.mxu1 %v6539_v25  ;;  %v14267_v36 = vld [vmem:[%s11280_s20] sm:$0xff]  ;;  %v14276_v21 = vpop.f32.mrf.mxu3 }
 0x482   : > { %v14270_v25 = vperm.slane %v14267_v36, 6  ;;  %17940 = vst [vmem:[#allocation53_spill] sm:$0xff] %v14276_v21  ;;  %v6904_v46 = vadd.f32 %v13994_v51, %v6815_v63 }
 0x483   : > { %10321 = vmatmul.msk.bf16.gmra.mxu2 %vm10320_vm10, %v17402_v33 }
 0x484   : > { %v2175_v18 = vpop.f32.mrf.mxu0  ;;  %10347 = vmatmul.msk.bf16.gmra.mxu3 %vm10346_vm7, %v17402_v33  ;;  %v14258_v20 = vpop.f32.mrf.mxu1  ;;  %vm4669_vm11 = vcmp.eq.s32.totalorder %v17828_v34, %v14270_v25  ;;  %vm4685_vm12 = vcmp.eq.s32.totalorder %v17829_v58, %v14270_v25  ;;  %vm4956_vm7 = vcmp.eq.s32.totalorder %v17858_v23, %v13946_v31 }
 0x485   : > { %7153 = vmatpush.bf16.msra.mxu1 %v17932_v30  ;;  %v2176_v61 = vadd.f32 %v14169_v2, %v2175_v18  ;;  %vm10364_vm15 = vmpackc.low %vm4685_vm12, %vm4669_vm11  ;;  %vm5051_vm11 = vcmp.eq.s32.totalorder %v17751_v37, %v13836_v54  ;;  %vm5067_vm12 = vcmp.eq.s32.totalorder %v17752_v52, %v13836_v54 }
 0x486   : > { %vm10350_vm10 = vmpackc.low %vm4972_vm8, %vm4956_vm7 }
 0x487   : > { %9596 = vmatmul.msk.bf16.gmra.mxu0 %vm1492_vm1, %v10819_v13  ;;  %v6990_v19 = vpop.f32.mrf.mxu2  ;;  %v2644_v6 = vmax.f32 %v2176_v61, 0.0  ;;  %v17939_v13 = vpack.c.bf16 %v13964_v14, %v13961_v8  ;;  %v17942_v14 = vld [vmem:[#allocation178_spill] sm:$0xff]  ;;  %vm10324_vm13 = vmpackc.low %vm5067_vm12, %vm5051_vm11  ;;  %vm5036_vm11 = vcmp.eq.s32.totalorder %v17793_v26, %v13946_v31 }
 0x488   : > { %v14299_v60 = vadd.f32 %v6990_v19, %v6902_v12  ;;  %v17947_v19 = vld [vmem:[#allocation229_spill] sm:$0xff] }
 0x489   : > { %7154 = vmatpush.bf16.msra.mxu1 %v17937_v48  ;;  %v14291_v8 = vmul.f32 %v17942_v14, %v2644_v6  ;;  %v6729_v48 = vadd.f32 %v17946_v56, %v17945_v42  ;;  %v6731_v47 = vadd.f32 %v13556_v1, %v17947_v19  ;;  %v10821_v19 = vld [vmem:[%s11300_s12 + $0x218] sm:$0xff] }
 0x48b   : > { %v6820_v12 = vadd.f32 %v13740_v50, %v6731_v47  ;;  %v17950_v50 = vld [vmem:[#allocation171_spill] sm:$0xff]  ;;  %v17967_v47 = vld [vmem:[#allocation204_spill] sm:$0xff] }
 0x48c   : > { %v2177_v40 = vpop.f32.mrf.mxu0  ;;  %v14284_v30 = vpop.f32.mrf.mxu1 }
 0x48d   : > { %v2178_v32 = vadd.f32 %v14169_v2, %v2177_v40  ;;  %7155 = vmatpush.bf16.msra.mxu1 %v17939_v13  ;;  %17941 = vst [vmem:[#allocation55_spill] sm:$0xff] %v14284_v30  ;;  %v6818_v13 = vadd.f32 %v13682_v9, %v6729_v48 }
 0x48f   : > { %v2645_v18 = vmax.f32 %v2178_v32, 0.0  ;;  %v6992_v24 = vpop.f32.mrf.mxu2  ;;  %v6907_v14 = vadd.f32 %v14024_v7, %v6818_v13 }
 0x490   : > { %v14301_v28 = vadd.f32 %v6992_v24, %v6904_v46 }
 0x491   : > { %v14294_v51 = vmul.f32 %v17943_v41, %v2645_v18  ;;  %7156 = vmatpush.bf16.msra.mxu1 %v17944_v53  ;;  %v6909_v41 = vadd.f32 %v14037_v10, %v6820_v12  ;;  %v17949_v53 = vld [vmem:[#allocation136_spill] sm:$0xff]  ;;  %v17951_v10 = vld [vmem:[#allocation173_spill] sm:$0xff] }
 0x492   : > { %vm4717_vm6 = vcmp.eq.s32.totalorder %v17949_v53, %v14270_v25 }
 0x493   : > { %10323 = vmatmul.msk.bf16.gmra.mxu2 %vm10322_vm4, %v17402_v33 }
 0x494   : > { %v2180_v61 = vpop.f32.mrf.mxu0  ;;  %10365 = vmatmul.msk.bf16.vlgmr.msra.gmra.mxu1 %vm10364_vm15, %v17402_v33  ;;  %10349 = vmatmul.msk.bf16.gmra.mxu3 %vm10348_vm0, %v17402_v33  ;;  %v14322_v32 = vpop.f32.mrf.mxu1  ;;  %vm4988_vm0 = vcmp.eq.s32.totalorder %v17873_v11, %v13946_v31 }
 0x495   : > { %v2181_v40 = vadd.f32 %v14169_v2, %v2180_v61  ;;  %vm10352_vm4 = vmpackc.low %vm5004_vm2, %vm4988_vm0 }
 0x497   : > { %9597 = vmatmul.msk.bf16.gmra.mxu0 %vm1492_vm1, %v10820_v45  ;;  %v7069_v44 = vpop.f32.mrf.mxu3  ;;  %v6995_v6 = vpop.f32.mrf.mxu2  ;;  %v2646_v18 = vmax.f32 %v2181_v40, 0.0  ;;  %v17953_v40 = vld [vmem:[#allocation236_spill] sm:$0xff] }
 0x498   : > { %v14319_v63 = vadd.f32 %v7069_v44, %v14187_v35  ;;  %v17948_v35 = vld [vmem:[#allocation135_spill] sm:$0xff]  ;;  %v14346_v56 = vadd.f32 %v6995_v6, %v6907_v14  ;;  %v17954_v6 = vld [vmem:[#allocation220_spill] sm:$0xff] }
 0x499   : > { %vm4701_vm5 = vcmp.eq.s32.totalorder %v17948_v35, %v14270_v25  ;;  %v14341_v7 = vmul.f32 %v17950_v50, %v2646_v18  ;;  %v6734_v13 = vadd.f32 %v17954_v6, %v17953_v40  ;;  %v17955_v14 = vld [vmem:[#allocation200_spill] sm:$0xff] }
 0x49a   : > { %vm10366_vm9 = vmpackc.low %vm4717_vm6, %vm4701_vm5 }
 0x49c   : > { %v2182_v46 = vpop.f32.mrf.mxu0  ;;  %v14353_v44 = vpop.f32.mrf.mxu1 }
 0x49d   : > { %v2183_v1 = vadd.f32 %v14169_v2, %v2182_v46  ;;  %17952 = vst [vmem:[#allocation56_spill] sm:$0xff] %v14353_v44  ;;  %v17968_v44 = vld [vmem:[#allocation76_spill] sm:$0xff] }
 0x49f   : > { %v2647_v24 = vmax.f32 %v2183_v1, 0.0  ;;  %v7071_v45 = vpop.f32.mrf.mxu3  ;;  %v6997_v42 = vpop.f32.mrf.mxu2 }
 0x4a0   : > { %v14338_v9 = vadd.f32 %v7071_v45, %v14189_v16  ;;  %v14348_v48 = vadd.f32 %v6997_v42, %v6909_v41  ;;  %v6823_v41 = vadd.f32 %v17955_v14, %v6734_v13  ;;  %v17958_v13 = vld [vmem:[#allocation169_spill] sm:$0xff] }
 0x4a1   : > { %v14344_v61 = vmul.f32 %v17951_v10, %v2647_v24 }
 0x4a2   : > { %v6912_v42 = vadd.f32 %v14065_v17, %v6823_v41  ;;  %v17959_v17 = vld [vmem:[#allocation172_spill] sm:$0xff] }
 0x4a3   : > { %10325 = vmatmul.msk.bf16.gmra.mxu2 %vm10324_vm13, %v17402_v33 }
 0x4a4   : > { %v2185_v16 = vpop.f32.mrf.mxu0  ;;  %10367 = vmatmul.msk.bf16.gmra.mxu1 %vm10366_vm9, %v17402_v33  ;;  %10351 = vmatmul.msk.bf16.gmra.mxu3 %vm10350_vm10, %v17402_v33  ;;  %v14371_v10 = vpop.f32.mrf.mxu1  ;;  %vm5020_vm10 = vcmp.eq.s32.totalorder %v17792_v0, %v13946_v31 }
 0x4a5   : > { %v2186_v18 = vadd.f32 %v14169_v2, %v2185_v16  ;;  %vm10354_vm13 = vmpackc.low %vm5036_vm11, %vm5020_vm10 }
 0x4a7   : > { %9598 = vmatmul.msk.bf16.gmra.mxu0 %vm1492_vm1, %v10821_v19  ;;  %v7074_v12 = vpop.f32.mrf.mxu3  ;;  %v7000_v1 = vpop.f32.mrf.mxu2  ;;  %v2648_v45 = vmax.f32 %v2186_v18, 0.0  ;;  %v17956_v19 = vld [vmem:[#allocation145_spill] sm:$0xff] }
 0x4a8   : > { %v14366_v46 = vadd.f32 %v7074_v12, %v14235_v43  ;;  %vm4733_vm14 = vcmp.eq.s32.totalorder %v17956_v19, %v14270_v25  ;;  %v17957_v43 = vld [vmem:[#allocation146_spill] sm:$0xff]  ;;  %v14393_v41 = vadd.f32 %v7000_v1, %v6912_v42  ;;  %v17963_v1 = vld [vmem:[#allocation245_spill] sm:$0xff]  ;;  %v17964_v42 = vld [vmem:[#allocation264_spill] sm:$0xff] }
 0x4a9   : > { %vm4749_vm15 = vcmp.eq.s32.totalorder %v17957_v43, %v14270_v25  ;;  %v14386_v12 = vmul.f32 %v17958_v13, %v2648_v45  ;;  %v17962_v45 = vld [vmem:[#allocation246_spill] sm:$0xff] }
 0x4aa   : > { %vm10368_vm3 = vmpackc.low %vm4749_vm15, %vm4733_vm14  ;;  %vm5099_vm6 = vcmp.eq.s32.totalorder %v17962_v45, %v13836_v54  ;;  %vm5131_vm15 = vcmp.eq.s32.totalorder %v17974_v22, %v13836_v54 }
 0x4ac   : > { %v2187_v24 = vpop.f32.mrf.mxu0 }
 0x4ad   : > { %v2188_v50 = vadd.f32 %v14169_v2, %v2187_v24  ;;  %v10822_v24 = vld [vmem:[%s11300_s12 + $0x220] sm:$0xff] }
 0x4af   : > { %v2649_v40 = vmax.f32 %v2188_v50, 0.0  ;;  %v7076_v16 = vpop.f32.mrf.mxu3  ;;  %v14391_v14 = vpop.f32.mrf.mxu2 }
 0x4b0   : > { %v14383_v6 = vadd.f32 %v7076_v16, %v14237_v15  ;;  %17960 = vst [vmem:[#allocation24_spill] sm:$0xff] %v14391_v14  ;;  %v17961_v15 = vld [vmem:[#allocation62_spill] sm:$0xff]  ;;  %v14410_v16 = vpop.f32.mrf.mxu1 }
 0x4b1   : > { %v14389_v18 = vmul.f32 %v17959_v17, %v2649_v40  ;;  %vm5083_vm5 = vcmp.eq.s32.totalorder %v17961_v15, %v13836_v54  ;;  %v6739_v40 = vadd.f32 %v17964_v42, %v17963_v1  ;;  %17965 = vst [vmem:[#allocation95_spill] sm:$0xff] %v14410_v16  ;;  %v17969_v1 = vld [vmem:[#allocation155_spill] sm:$0xff]  ;;  %v17970_v42 = vld [vmem:[#allocation156_spill] sm:$0xff]  ;;  %v17973_v16 = vld [vmem:[#allocation254_spill] sm:$0xff] }
 0x4b2   : > { %vm10326_vm7 = vmpackc.low %vm5099_vm6, %vm5083_vm5  ;;  %vm4765_vm8 = vcmp.eq.s32.totalorder %v17969_v1, %v14270_v25  ;;  %vm4781_vm9 = vcmp.eq.s32.totalorder %v17970_v42, %v14270_v25  ;;  %vm5115_vm14 = vcmp.eq.s32.totalorder %v17973_v16, %v13836_v54  ;;  %v17980_v42 = vld [vmem:[#allocation276_spill] sm:$0xff]  ;;  %vm5068_vm5 = vcmp.eq.s32.totalorder %v17752_v52, %v13946_v31  ;;  %v17991_v52 = vld [vmem:[#allocation193_spill] sm:$0xff] }
 0x4b3   : > { %10327 = vmatmul.msk.bf16.gmra.mxu2 %vm10326_vm7, %v17402_v33  ;;  %v6828_v50 = vadd.f32 %v17967_v47, %v6739_v40  ;;  %vm10370_vm12 = vmpackc.low %vm4781_vm9, %vm4765_vm8  ;;  %v10823_v40 = vld [vmem:[%s11300_s12 + $0x228] sm:$0xff] }
 0x4b4   : > { %v14398_v5 = vpop.f32.mrf.mxu0  ;;  %10369 = vmatmul.msk.bf16.gmra.mxu1 %vm10368_vm3, %v17402_v33  ;;  %10353 = vmatmul.msk.bf16.gmra.mxu3 %vm10352_vm4, %v17402_v33  ;;  %vm10328_vm0 = vmpackc.low %vm5131_vm15, %vm5115_vm14  ;;  %vm5052_vm4 = vcmp.eq.s32.totalorder %v17751_v37, %v13946_v31  ;;  %vm5100_vm14 = vcmp.eq.s32.totalorder %v17962_v45, %v13946_v31 }
 0x4b5   : > { %v6917_v30 = vadd.f32 %v17968_v44, %v6828_v50  ;;  %vm10356_vm7 = vmpackc.low %vm5068_vm5, %vm5052_vm4  ;;  %vm5116_vm4 = vcmp.eq.s32.totalorder %v17973_v16, %v13946_v31  ;;  %vm5132_vm5 = vcmp.eq.s32.totalorder %v17974_v22, %v13946_v31  ;;  %v18010_v16 = vld [vmem:[#allocation162_spill] sm:$0xff] }
 0x4b7   : > { %9599 = vmatmul.msk.bf16.gmra.mxu0 %vm1492_vm1, %v10822_v24  ;;  %v7079_v13 = vpop.f32.mrf.mxu3  ;;  %v7005_v57 = vpop.f32.mrf.mxu2 }
 0x4b8   : > { %v14413_v17 = vadd.f32 %v7079_v13, %v14299_v60  ;;  %v14432_v44 = vpop.f32.mrf.mxu1  ;;  %v14434_v50 = vadd.f32 %v7005_v57, %v6917_v30 }
 0x4ba   : > { %17966 = vst [vmem:[#allocation208_spill] sm:$0xff] %v14413_v17 }
 0x4bc   : > { %v14416_v27 = vpop.f32.mrf.mxu0 }
 0x4bf   : > { %v7081_v24 = vpop.f32.mrf.mxu3  ;;  %v14430_v47 = vpop.f32.mrf.mxu2 }
 0x4c0   : > { %v14428_v60 = vadd.f32 %v7081_v24, %v14301_v28  ;;  %17972 = vst [vmem:[#allocation60_spill] sm:$0xff] %v14430_v47  ;;  %v17975_v28 = vld [vmem:[#allocation256_spill] sm:$0xff]  ;;  %v17976_v24 = vld [vmem:[#allocation82_spill] sm:$0xff]  ;;  %v14453_v26 = vpop.f32.mrf.mxu1 }
 0x4c1   : > { %v6744_v47 = vadd.f32 %v17976_v24, %v17975_v28  ;;  %17979 = vst [vmem:[#allocation94_spill] sm:$0xff] %v14453_v26  ;;  %v17982_v28 = vld [vmem:[#allocation166_spill] sm:$0xff]  ;;  %v17985_v24 = vld [vmem:[#allocation45_spill] sm:$0xff] }
 0x4c2   : > { %17971 = vst [vmem:[#allocation99_spill] sm:$0xff] %v14428_v60  ;;  %v17981_v60 = vld [vmem:[#allocation165_spill] sm:$0xff]  ;;  %vm4813_vm3 = vcmp.eq.s32.totalorder %v17982_v28, %v14270_v25  ;;  %vm5147_vm8 = vcmp.eq.s32.totalorder %v17985_v24, %v13836_v54 }
 0x4c3   : > { %10329 = vmatmul.msk.bf16.gmra.mxu2 %vm10328_vm0, %v17402_v33  ;;  %v6833_v21 = vadd.f32 %v17978_v3, %v6744_v47  ;;  %vm4797_vm2 = vcmp.eq.s32.totalorder %v17981_v60, %v14270_v25  ;;  %v17992_v60 = vld [vmem:[#allocation19_spill] sm:$0xff] }
 0x4c4   : > { %v14437_v13 = vpop.f32.mrf.mxu0  ;;  %10371 = vmatmul.msk.bf16.gmra.mxu1 %vm10370_vm12, %v17402_v33  ;;  %10355 = vmatmul.msk.bf16.gmra.mxu3 %vm10354_vm13, %v17402_v33  ;;  %vm10372_vm6 = vmpackc.low %vm4813_vm3, %vm4797_vm2  ;;  %vm5084_vm13 = vcmp.eq.s32.totalorder %v17961_v15, %v13946_v31  ;;  %v18002_v15 = vld [vmem:[#allocation202_spill] sm:$0xff] }
 0x4c5   : > { %v6922_v1 = vadd.f32 %v17980_v42, %v6833_v21  ;;  %v10824_v42 = vld [vmem:[%s11300_s12 + $0x230] sm:$0xff]  ;;  %vm10358_vm0 = vmpackc.low %vm5100_vm14, %vm5084_vm13 }
 0x4c7   : > { %9600 = vmatmul.msk.bf16.gmra.mxu0 %vm1492_vm1, %v10823_v40  ;;  %v7084_v30 = vpop.f32.mrf.mxu3  ;;  %v7010_v14 = vpop.f32.mrf.mxu2 }
 0x4c8   : > { %v14450_v57 = vadd.f32 %v7084_v30, %v14346_v56  ;;  %v14469_v21 = vadd.f32 %v7010_v14, %v6922_v1  ;;  %v17986_v30 = vld [vmem:[#allocation46_spill] sm:$0xff]  ;;  %v14477_v26 = vpop.f32.mrf.mxu1 }
 0x4c9   : > { %vm5163_vm9 = vcmp.eq.s32.totalorder %v17986_v30, %v13836_v54  ;;  %17987 = vst [vmem:[#allocation64_spill] sm:$0xff] %v14477_v26 }
 0x4ca   : > { %17977 = vst [vmem:[#allocation57_spill] sm:$0xff] %v14450_v57  ;;  %vm10330_vm10 = vmpackc.low %vm5163_vm9, %vm5147_vm8  ;;  %v17993_v57 = vld [vmem:[#allocation175_spill] sm:$0xff]  ;;  %vm4893_vm8 = vcmp.eq.s32.totalorder %v17831_v62, %v14270_v25  ;;  %vm4909_vm9 = vcmp.eq.s32.totalorder %v17832_v59, %v14270_v25 }
 0x4cb   : > { %vm4829_vm11 = vcmp.eq.s32.totalorder %v17993_v57, %v14270_v25 }
 0x4cc   : > { %v2197_v0 = vpop.f32.mrf.mxu0 }
 0x4cf   : > { %v7086_v40 = vpop.f32.mrf.mxu3  ;;  %v14467_v56 = vpop.f32.mrf.mxu2 }
 0x4d0   : > { %v14465_v3 = vadd.f32 %v7086_v40, %v14348_v48  ;;  %17984 = vst [vmem:[#allocation63_spill] sm:$0xff] %v14467_v56  ;;  %v17988_v48 = vld [vmem:[#allocation195_spill] sm:$0xff] }
 0x4d1   : > { %v17989_v40 = vld [vmem:[#allocation267_spill] sm:$0xff] }
 0x4d2   : > { %17983 = vst [vmem:[#allocation130_spill] sm:$0xff] %v14465_v3  ;;  %v6749_v14 = vadd.f32 %v17989_v40, %v17988_v48  ;;  %v17994_v48 = vld [vmem:[#allocation176_spill] sm:$0xff]  ;;  %v14493_v40 = vpop.f32.mrf.mxu1 }
 0x4d3   : > { %10331 = vmatmul.msk.bf16.gmra.mxu2 %vm10330_vm10, %v17402_v33  ;;  %vm4845_vm12 = vcmp.eq.s32.totalorder %v17994_v48, %v14270_v25  ;;  %17995 = vst [vmem:[#allocation181_spill] sm:$0xff] %v14493_v40  ;;  %vm5148_vm10 = vcmp.eq.s32.totalorder %v17985_v24, %v13946_v31 }
 0x4d4   : > { %v2200_v47 = vpop.f32.mrf.mxu0  ;;  %10373 = vmatmul.msk.bf16.gmra.mxu1 %vm10372_vm6, %v17402_v33  ;;  %10357 = vmatmul.msk.bf16.gmra.mxu3 %vm10356_vm7, %v17402_v33  ;;  %v6838_v37 = vadd.f32 %v17991_v52, %v6749_v14  ;;  %vm10374_vm15 = vmpackc.low %vm4845_vm12, %vm4829_vm11  ;;  %v17998_v14 = vld [vmem:[#allocation102_spill] sm:$0xff]  ;;  %vm5164_vm11 = vcmp.eq.s32.totalorder %v17986_v30, %v13946_v31  ;;  %v18024_v31 = vpack.c.bf16 %v14389_v18, %v14386_v12  ;;  %v14609_v12 = vperm.slane %v14267_v36, 7 }
 0x4d5   : > { %v2201_v26 = vadd.f32 %v14169_v2, %v2200_v47  ;;  %v18007_v47 = vld [vmem:[#allocation158_spill] sm:$0xff]  ;;  %vm10360_vm7 = vmpackc.low %vm5132_vm5, %vm5116_vm4 }
 0x4d6   : > { %v6927_v3 = vadd.f32 %v17992_v60, %v6838_v37  ;;  %vm10378_vm12 = vmpackc.low %vm4909_vm9, %vm4893_vm8  ;;  %vm4670_vm14 = vcmp.eq.s32.totalorder %v17828_v34, %v14609_v12  ;;  %vm4702_vm5 = vcmp.eq.s32.totalorder %v17948_v35, %v14609_v12  ;;  %vm4973_vm8 = vcmp.eq.s32.totalorder %v17859_v55, %v14270_v25 }
 0x4d7   : > { %9601 = vmatmul.msk.bf16.gmra.mxu0 %vm1492_vm1, %v10824_v42  ;;  %v7089_v1 = vpop.f32.mrf.mxu3  ;;  %v7015_v54 = vpop.f32.mrf.mxu2  ;;  %vm10362_vm13 = vmpackc.low %vm5164_vm11, %vm5148_vm10  ;;  %vm4734_vm11 = vcmp.eq.s32.totalorder %v17956_v19, %v14609_v12 }
 0x4d8   : > { %v14485_v56 = vadd.f32 %v7089_v1, %v14393_v41  ;;  %v14503_v37 = vadd.f32 %v7015_v54, %v6927_v3  ;;  %v10825_v41 = vld [vmem:[%s11300_s12 + $0x238] sm:$0xff]  ;;  %v17999_v1 = vld [vmem:[#allocation192_spill] sm:$0xff] }
 0x4d9   : > { %v6754_v40 = vadd.f32 %v17999_v1, %v17998_v14  ;;  %v18003_v1 = vld [vmem:[#allocation22_spill] sm:$0xff] }
 0x4da   : > { %17990 = vst [vmem:[#allocation180_spill] sm:$0xff] %v14485_v56  ;;  %v14515_v54 = vpop.f32.mrf.mxu1 }
 0x4db   : > { %18001 = vst [vmem:[#allocation36_spill] sm:$0xff] %v14515_v54  ;;  %v6843_v48 = vadd.f32 %v18002_v15, %v6754_v40  ;;  %v18008_v40 = vld [vmem:[#allocation157_spill] sm:$0xff] }
 0x4dc   : > { %v2202_v28 = vpop.f32.mrf.mxu0 }
 0x4dd   : > { %v2203_v57 = vadd.f32 %v14169_v2, %v2202_v28 }
 0x4df   : > { %v14495_v42 = vpop.f32.mrf.mxu3  ;;  %v14501_v52 = vpop.f32.mrf.mxu2 }
 0x4e0   : > { %17996 = vst [vmem:[#allocation214_spill] sm:$0xff] %v14495_v42 }
 0x4e1   : > { %17997 = vst [vmem:[#allocation70_spill] sm:$0xff] %v14501_v52 }
 0x4e4   : > { %v2205_v60 = vpop.f32.mrf.mxu0  ;;  %10375 = vmatmul.msk.bf16.gmra.mxu1 %vm10374_vm15, %v17402_v33  ;;  %10359 = vmatmul.msk.bf16.gmra.mxu3 %vm10358_vm0, %v17402_v33  ;;  %vm4686_vm15 = vcmp.eq.s32.totalorder %v17829_v58, %v14609_v12  ;;  %vm4925_vm0 = vcmp.eq.s32.totalorder %v17843_v39, %v14270_v25 }
 0x4e5   : > { %v2206_v52 = vadd.f32 %v14169_v2, %v2205_v60  ;;  %v18005_v60 = vld [vmem:[#allocation184_spill] sm:$0xff] }
 0x4e6   : > { %vm4877_vm3 = vcmp.eq.s32.totalorder %v18005_v60, %v14270_v25 }
 0x4e7   : > { %9602 = vmatmul.msk.bf16.gmra.mxu0 %vm1492_vm1, %v10825_v41  ;;  %v7094_v42 = vpop.f32.mrf.mxu3  ;;  %v7020_v3 = vpop.f32.mrf.mxu2  ;;  %v2656_v17 = vmax.f32 %v2206_v52, 0.0  ;;  %v2198_v41 = vadd.f32 %v14169_v2, %v2197_v0  ;;  %v2196_v0 = vadd.f32 %v14169_v2, %v14437_v13 }
 0x4e8   : > { %v14512_v45 = vadd.f32 %v7094_v42, %v14434_v50  ;;  %v6932_v50 = vadd.f32 %v18003_v1, %v6843_v48  ;;  %v18004_v42 = vld [vmem:[#allocation183_spill] sm:$0xff]  ;;  %v14545_v13 = vpop.f32.mrf.mxu1 }
 0x4e9   : > { %vm4861_vm2 = vcmp.eq.s32.totalorder %v18004_v42, %v14270_v25  ;;  %v4448_v48 = vmul.f32 %v18007_v47, %v2656_v17  ;;  %v10826_v42 = vld [vmem:[%s11300_s12 + $0x240] sm:$0xff]  ;;  %18011 = vst [vmem:[#allocation177_spill] sm:$0xff] %v14545_v13  ;;  %v2191_v17 = vadd.f32 %v14169_v2, %v14398_v5 }
 0x4ea   : > { %18000 = vst [vmem:[#allocation217_spill] sm:$0xff] %v14512_v45  ;;  %v2655_v45 = vmax.f32 %v2203_v57, 0.0  ;;  %vm10376_vm6 = vmpackc.low %vm4877_vm3, %vm4861_vm2  ;;  %v14539_v57 = vadd.f32 %v7020_v3, %v6932_v50  ;;  %v18012_v3 = vld [vmem:[#allocation159_spill] sm:$0xff]  ;;  %vm4941_vm2 = vcmp.eq.s32.totalorder %v17844_v38, %v14270_v25 }
 0x4eb   : > { %v2650_v5 = vmax.f32 %v2191_v17, 0.0  ;;  %vm10396_vm3 = vmpackc.low %vm4686_vm15, %vm4670_vm14  ;;  %vm5005_vm14 = vcmp.eq.s32.totalorder %v17874_v49, %v14270_v25 }
 0x4ec   : > { %v2207_v56 = vpop.f32.mrf.mxu0  ;;  %v4447_v22 = vmul.f32 %v18010_v16, %v2655_v45  ;;  %v18015_v16 = vld [vmem:[#allocation163_spill] sm:$0xff]  ;;  %vm10380_vm4 = vmpackc.low %vm4941_vm2, %vm4925_vm0 }
 0x4ed   : > { %v2208_v14 = vadd.f32 %v14169_v2, %v2207_v56  ;;  %v2654_v56 = vmax.f32 %v2201_v26, 0.0 }
 0x4ef   : > { %v2657_v15 = vmax.f32 %v2208_v14, 0.0  ;;  %v14527_v28 = vpop.f32.mrf.mxu3  ;;  %v14537_v1 = vpop.f32.mrf.mxu2  ;;  %v2193_v14 = vadd.f32 %v14169_v2, %v14416_v27  ;;  %v4446_v50 = vmul.f32 %v18012_v3, %v2654_v56  ;;  %v18013_v27 = vld [vmem:[#allocation66_spill] sm:$0xff]  ;;  %v18017_v3 = vld [vmem:[#allocation31_spill] sm:$0xff] }
 0x4f0   : > { %18006 = vst [vmem:[#allocation144_spill] sm:$0xff] %v14527_v28  ;;  %v2653_v28 = vmax.f32 %v2198_v41, 0.0  ;;  %v18014_v41 = vld [vmem:[#allocation29_spill] sm:$0xff] }
 0x4f1   : > { %v4449_v52 = vmul.f32 %v18008_v40, %v2657_v15  ;;  %18009 = vst [vmem:[#allocation178_spill] sm:$0xff] %v14537_v1  ;;  %v2652_v15 = vmax.f32 %v2196_v0, 0.0  ;;  %v6759_v47 = vadd.f32 %v18014_v41, %v18013_v27  ;;  %v2651_v45 = vmax.f32 %v2193_v14, 0.0  ;;  %v18016_v0 = vld [vmem:[#allocation161_spill] sm:$0xff]  ;;  %v18018_v27 = vld [vmem:[#allocation167_spill] sm:$0xff] }
 0x4f2   : > { %v6549_v40 = vpack.c.bf16 %v4447_v22, %v4446_v50 }
 0x4f3   : > { %v6550_v60 = vpack.c.bf16 %v4449_v52, %v4448_v48  ;;  %v4445_v48 = vmul.f32 %v18015_v16, %v2653_v28  ;;  %v4444_v1 = vmul.f32 %v18016_v0, %v2652_v15  ;;  %v6848_v54 = vadd.f32 %v18017_v3, %v6759_v47  ;;  %v18019_v16 = vld [vmem:[#allocation168_spill] sm:$0xff]  ;;  %v18021_v47 = vld [vmem:[#allocation91_spill] sm:$0xff]  ;;  %v18026_v3 = vld [vmem:[#allocation25_spill] sm:$0xff] }
 0x4f4   : > { %v2210_v26 = vpop.f32.mrf.mxu0  ;;  %10377 = vmatmul.msk.bf16.gmra.mxu1 %vm10376_vm6, %v17402_v33  ;;  %10361 = vmatmul.msk.bf16.gmra.mxu3 %vm10360_vm7, %v17402_v33  ;;  %v4443_v14 = vmul.f32 %v18018_v27, %v2651_v45  ;;  %vm4718_vm6 = vcmp.eq.s32.totalorder %v17949_v53, %v14609_v12  ;;  %vm4957_vm7 = vcmp.eq.s32.totalorder %v17858_v23, %v14270_v25 }
 0x4f5   : > { %7238 = vmatpush.bf16.msrb.mxu2 %v6550_v60  ;;  %v2211_v60 = vadd.f32 %v14169_v2, %v2210_v26  ;;  %v6548_v41 = vpack.c.bf16 %v4445_v48, %v4444_v1  ;;  %v6937_v17 = vadd.f32 %v14258_v20, %v6848_v54  ;;  %v18022_v20 = vld [vmem:[#allocation93_spill] sm:$0xff]  ;;  %vm10398_vm9 = vmpackc.low %vm4718_vm6, %vm4702_vm5 }
 0x4f6   : > { %vm10382_vm10 = vmpackc.low %vm4973_vm8, %vm4957_vm7 }
 0x4f7   : > { %9603 = vmatmul.msk.bf16.gmra.mxu0 %vm1492_vm1, %v10826_v42  ;;  %v7099_v52 = vpop.f32.mrf.mxu3  ;;  %v7025_v56 = vpop.f32.mrf.mxu2  ;;  %v4442_v42 = vmul.f32 %v18019_v16, %v2650_v5  ;;  %v2658_v22 = vmax.f32 %v2211_v60, 0.0  ;;  %v18025_v60 = vld [vmem:[#allocation134_spill] sm:$0xff]  ;;  %v18027_v16 = vpack.c.bf16 %v14344_v61, %v14341_v7  ;;  %v18053_v5 = vld [vmem:[#allocation99_spill] sm:$0xff] }
 0x4f8   : > { %v14557_v13 = vadd.f32 %v7099_v52, %v14469_v21  ;;  %v14565_v21 = vpop.f32.mrf.mxu1  ;;  %v10827_v52 = vld [vmem:[%s11300_s12 + $0x248] sm:$0xff]  ;;  %v6764_v27 = vadd.f32 %v18026_v3, %v18025_v60  ;;  %v10828_v60 = vld [vmem:[%s11300_s12 + $0x250] sm:$0xff] }
 0x4f9   : > { %7239 = vmatpush.bf16.msrb.mxu2 %v6549_v40  ;;  %v6547_v1 = vpack.c.bf16 %v4443_v14, %v4442_v42  ;;  %v14579_v45 = vmul.f32 %v18021_v47, %v2658_v22  ;;  %v14586_v40 = vadd.f32 %v7025_v56, %v6937_v17  ;;  %v18028_v42 = vld [vmem:[#allocation85_spill] sm:$0xff] }
 0x4fa   : > { %v6853_v22 = vadd.f32 %v18028_v42, %v6764_v27 }
 0x4fc   : > { %v2212_v28 = vpop.f32.mrf.mxu0  ;;  %v6942_v36 = vadd.f32 %v14322_v32, %v6853_v22  ;;  %v18037_v22 = vld [vmem:[#allocation80_spill] sm:$0xff] }
 0x4fd   : > { %v2213_v50 = vadd.f32 %v14169_v2, %v2212_v28  ;;  %7240 = vmatpush.bf16.msrb.mxu2 %v6548_v41 }
 0x4ff   : > { %v2659_v26 = vmax.f32 %v2213_v50, 0.0  ;;  %v14572_v15 = vpop.f32.mrf.mxu3  ;;  %v14584_v48 = vpop.f32.mrf.mxu2 }
 0x500   : > { %18020 = vst [vmem:[#allocation224_spill] sm:$0xff] %v14572_v15  ;;  %v14599_v56 = vpop.f32.mrf.mxu1  ;;  %v18068_v15 = vld [vmem:[#allocation69_spill] sm:$0xff] }
 0x501   : > { %v14582_v54 = vmul.f32 %v18022_v20, %v2659_v26  ;;  %7241 = vmatpush.bf16.msrb.mxu2 %v6547_v1  ;;  %18023 = vst [vmem:[#allocation140_spill] sm:$0xff] %v14584_v48  ;;  %v18032_v1 = vld [vmem:[#allocation92_spill] sm:$0xff]  ;;  %v18033_v20 = vpack.c.bf16 %v14233_v29, %v14230_v4  ;;  %v18036_v29 = vld [vmem:[#allocation83_spill] sm:$0xff] }
 0x502   : > { %v18035_v4 = vld [vmem:[#allocation228_spill] sm:$0xff] }
 0x503   : > { %v10831_v48 = vld [vmem:[%s11300_s12 + $0x268] sm:$0xff] }
 0x504   : > { %v2215_v0 = vpop.f32.mrf.mxu0  ;;  %10379 = vmatmul.msk.bf16.gmra.mxu1 %vm10378_vm12, %v17402_v33  ;;  %10363 = vmatmul.msk.bf16.gmra.mxu3 %vm10362_vm13, %v17402_v33  ;;  %vm4750_vm12 = vcmp.eq.s32.totalorder %v17957_v43, %v14609_v12  ;;  %vm4989_vm13 = vcmp.eq.s32.totalorder %v17873_v11, %v14270_v25 }
 0x505   : > { %7242 = vmatpush.bf16.msrb.mxu2 %v18024_v31  ;;  %v2216_v28 = vadd.f32 %v14169_v2, %v2215_v0  ;;  %vm10400_vm15 = vmpackc.low %vm4750_vm12, %vm4734_vm11 }
 0x506   : > { %vm10384_vm0 = vmpackc.low %vm5005_vm14, %vm4989_vm13 }
 0x507   : > { %9604 = vmatmul.msk.bf16.gmra.mxu0 %vm1492_vm1, %v10827_v52  ;;  %v7104_v14 = vpop.f32.mrf.mxu3  ;;  %v7030_v18 = vpop.f32.mrf.mxu2  ;;  %v2660_v17 = vmax.f32 %v2216_v28, 0.0 }
 0x508   : > { %v14602_v41 = vadd.f32 %v7104_v14, %v14503_v37  ;;  %v18029_v37 = vpack.c.bf16 %v14294_v51, %v14291_v8  ;;  %v18031_v8 = vld [vmem:[#allocation89_spill] sm:$0xff]  ;;  %v14638_v0 = vadd.f32 %v7030_v18, %v6942_v36  ;;  %v6769_v14 = vadd.f32 %v18036_v29, %v18035_v4  ;;  %v10829_v29 = vld [vmem:[%s11300_s12 + $0x258] sm:$0xff] }
 0x509   : > { %7243 = vmatpush.bf16.msrb.mxu2 %v18027_v16  ;;  %v14628_v51 = vmul.f32 %v18031_v8, %v2660_v17  ;;  %v18039_v8 = vld [vmem:[#allocation88_spill] sm:$0xff] }
 0x50c   : > { %v2217_v50 = vpop.f32.mrf.mxu0 }
 0x50d   : > { %v2218_v26 = vadd.f32 %v14169_v2, %v2217_v50  ;;  %7244 = vmatpush.bf16.msrb.mxu2 %v18029_v37  ;;  %v6858_v50 = vadd.f32 %v18037_v22, %v6769_v14 }
 0x50f   : > { %v2661_v7 = vmax.f32 %v2218_v26, 0.0  ;;  %v14625_v61 = vpop.f32.mrf.mxu3  ;;  %v14636_v32 = vpop.f32.mrf.mxu2 }
 0x510   : > { %18030 = vst [vmem:[#allocation229_spill] sm:$0xff] %v14625_v61  ;;  %v18067_v61 = vld [vmem:[#allocation266_spill] sm:$0xff] }
 0x511   : > { %v14631_v47 = vmul.f32 %v18032_v1, %v2661_v7  ;;  %7245 = vmatpush.bf16.msrb.mxu2 %v18033_v20  ;;  %18034 = vst [vmem:[#allocation171_spill] sm:$0xff] %v14636_v32  ;;  %v7158_v52 = vpop.f32.mrf.mxu1  ;;  %v6947_v7 = vadd.f32 %v14371_v10, %v6858_v50  ;;  %v18040_v20 = vld [vmem:[#allocation87_spill] sm:$0xff]  ;;  %v18063_v32 = vld [vmem:[#allocation57_spill] sm:$0xff] }
 0x512   : > { %v14641_v31 = vadd.f32 %v7158_v52, %v14319_v63 }
 0x514   : > { %v2220_v27 = vpop.f32.mrf.mxu0  ;;  %10397 = vmatmul.msk.bf16.vlgmr.msrb.gmra.mxu2 %vm10396_vm3, %v17402_v33  ;;  %10381 = vmatmul.msk.bf16.gmra.mxu1 %vm10380_vm4, %v17402_v33 }
 0x515   : > { %v2221_v16 = vadd.f32 %v14169_v2, %v2220_v27 }
 0x517   : > { %9605 = vmatmul.msk.bf16.gmra.mxu0 %vm1492_vm1, %v10828_v60  ;;  %v7109_v28 = vpop.f32.mrf.mxu3  ;;  %v7035_v18 = vpop.f32.mrf.mxu2  ;;  %v2662_v37 = vmax.f32 %v2221_v16, 0.0  ;;  %v18042_v16 = vld [vmem:[#allocation263_spill] sm:$0xff] }
 0x518   : > { %v14653_v42 = vadd.f32 %v7109_v28, %v14539_v57  ;;  %v14679_v10 = vadd.f32 %v7035_v18, %v6947_v7 }
 0x519   : > { %v7160_v63 = vpop.f32.mrf.mxu1  ;;  %v14672_v1 = vmul.f32 %v18039_v8, %v2662_v37 }
 0x51a   : > { %v14657_v17 = vadd.f32 %v7160_v63, %v14338_v9  ;;  %v18043_v63 = vld [vmem:[#allocation26_spill] sm:$0xff] }
 0x51b   : > { %v6774_v22 = vadd.f32 %v18043_v63, %v18042_v16  ;;  %v18047_v16 = vld [vmem:[#allocation84_spill] sm:$0xff] }
 0x51c   : > { %v2222_v26 = vpop.f32.mrf.mxu0 }
 0x51d   : > { %v2223_v36 = vadd.f32 %v14169_v2, %v2222_v26 }
 0x51f   : > { %v2663_v9 = vmax.f32 %v2223_v36, 0.0  ;;  %v14669_v57 = vpop.f32.mrf.mxu3  ;;  %v14677_v60 = vpop.f32.mrf.mxu2  ;;  %v18044_v36 = vld [vmem:[#allocation67_spill] sm:$0xff] }
 0x520   : > { %18038 = vst [vmem:[#allocation173_spill] sm:$0xff] %v14669_v57  ;;  %v6863_v7 = vadd.f32 %v18044_v36, %v6774_v22  ;;  %v10830_v36 = vld [vmem:[%s11300_s12 + $0x260] sm:$0xff]  ;;  %v18066_v57 = vld [vmem:[#allocation53_spill] sm:$0xff] }
 0x521   : > { %v14675_v52 = vmul.f32 %v18040_v20, %v2663_v9  ;;  %18041 = vst [vmem:[#allocation236_spill] sm:$0xff] %v14677_v60  ;;  %v7163_v27 = vpop.f32.mrf.mxu1 }
 0x522   : > { %v14682_v4 = vadd.f32 %v7163_v27, %v14366_v46 }
 0x524   : > { %v2225_v28 = vpop.f32.mrf.mxu0  ;;  %10399 = vmatmul.msk.bf16.gmra.mxu2 %vm10398_vm9, %v17402_v33  ;;  %10383 = vmatmul.msk.bf16.gmra.mxu1 %vm10382_vm10, %v17402_v33 }
 0x525   : > { %v2226_v18 = vadd.f32 %v14169_v2, %v2225_v28 }
 0x527   : > { %9606 = vmatmul.msk.bf16.gmra.mxu0 %vm1492_vm1, %v10829_v29  ;;  %v7114_v50 = vpop.f32.mrf.mxu3  ;;  %v7040_v26 = vpop.f32.mrf.mxu2  ;;  %v2664_v20 = vmax.f32 %v2226_v18, 0.0  ;;  %v6952_v29 = vadd.f32 %v14432_v44, %v6863_v7  ;;  %v18049_v18 = vld [vmem:[#allocation208_spill] sm:$0xff]  ;;  %v18055_v7 = vld [vmem:[#allocation155_spill] sm:$0xff] }
 0x528   : > { %v14694_v37 = vadd.f32 %v7114_v50, %v14586_v40  ;;  %vm4766_vm2 = vcmp.eq.s32.totalorder %v18055_v7, %v14609_v12  ;;  %v10834_v7 = vld [vmem:[%s11300_s12 + $0x280] sm:$0xff] }
 0x529   : > { %v7165_v46 = vpop.f32.mrf.mxu1  ;;  %v14720_v44 = vadd.f32 %v7040_v26, %v6952_v29 }
 0x52a   : > { %v14698_v9 = vadd.f32 %v7165_v46, %v14383_v6 }
 0x52c   : > { %v2227_v8 = vpop.f32.mrf.mxu0 }
 0x52d   : > { %v2228_v27 = vadd.f32 %v14169_v2, %v2227_v8  ;;  %v18046_v2 = vld [vmem:[#allocation81_spill] sm:$0xff] }
 0x52e   : > { %v14713_v28 = vmul.f32 %v18046_v2, %v2664_v20  ;;  %v18050_v20 = vld [vmem:[#allocation78_spill] sm:$0xff] }
 0x52f   : > { %v2665_v6 = vmax.f32 %v2228_v27, 0.0  ;;  %v14710_v40 = vpop.f32.mrf.mxu3  ;;  %v14718_v22 = vpop.f32.mrf.mxu2  ;;  %v18051_v27 = vld [vmem:[#allocation79_spill] sm:$0xff] }
 0x530   : > { %18045 = vst [vmem:[#allocation220_spill] sm:$0xff] %v14710_v40 }
 0x531   : > { %v14716_v63 = vmul.f32 %v18047_v16, %v2665_v6  ;;  %18048 = vst [vmem:[#allocation200_spill] sm:$0xff] %v14718_v22  ;;  %v7168_v50 = vpop.f32.mrf.mxu1  ;;  %v6779_v6 = vadd.f32 %v18051_v27, %v18050_v20  ;;  %v18056_v20 = vld [vmem:[#allocation156_spill] sm:$0xff]  ;;  %v18058_v22 = vld [vmem:[#allocation222_spill] sm:$0xff] }
 0x532   : > { %v14723_v46 = vadd.f32 %v7168_v50, %v18049_v18  ;;  %v18052_v50 = vld [vmem:[#allocation278_spill] sm:$0xff]  ;;  %vm4782_vm3 = vcmp.eq.s32.totalorder %v18056_v20, %v14609_v12  ;;  %vm5021_vm4 = vcmp.eq.s32.totalorder %v18058_v22, %v14270_v25 }
 0x533   : > { %v6868_v18 = vadd.f32 %v18052_v50, %v6779_v6  ;;  %vm10402_vm6 = vmpackc.low %vm4782_vm3, %vm4766_vm2 }
 0x534   : > { %v14728_v8 = vpop.f32.mrf.mxu0  ;;  %10401 = vmatmul.msk.bf16.gmra.mxu2 %vm10400_vm15, %v17402_v33  ;;  %10385 = vmatmul.msk.bf16.gmra.mxu1 %vm10384_vm0, %v17402_v33 }
 0x537   : > { %9607 = vmatmul.msk.bf16.gmra.mxu0 %vm1492_vm1, %v10830_v36  ;;  %v7119_v26 = vpop.f32.mrf.mxu3  ;;  %v7045_v29 = vpop.f32.mrf.mxu2  ;;  %v18057_v36 = vld [vmem:[#allocation64_spill] sm:$0xff] }
 0x538   : > { %v14736_v16 = vadd.f32 %v7119_v26, %v14638_v0  ;;  %v6957_v27 = vadd.f32 %v18057_v36, %v6868_v18  ;;  %v18059_v0 = vld [vmem:[#allocation223_spill] sm:$0xff]  ;;  %v18062_v26 = vld [vmem:[#allocation280_spill] sm:$0xff] }
 0x539   : > { %v7170_v2 = vpop.f32.mrf.mxu1  ;;  %vm5037_vm5 = vcmp.eq.s32.totalorder %v18059_v0, %v14270_v25 }
 0x53a   : > { %v14740_v3 = vadd.f32 %v7170_v2, %v18053_v5  ;;  %v18061_v5 = vld [vmem:[#allocation272_spill] sm:$0xff]  ;;  %vm10386_vm7 = vmpackc.low %vm5037_vm5, %vm5021_vm4  ;;  %v7046_v60 = vadd.f32 %v7045_v29, %v6957_v27 }
 0x53b   : > { %v6791_v2 = vadd.f32 %v18062_v26, %v18061_v5  ;;  %v6784_v5 = vadd.f32 %v18068_v15, %v18067_v61  ;;  %v18075_v15 = vld [vmem:[#allocation166_spill] sm:$0xff] }
 0x53c   : > { %18054 = vst [vmem:[#allocation169_spill] sm:$0xff] %v14740_v3  ;;  %v14742_v14 = vpop.f32.mrf.mxu0  ;;  %vm4814_vm9 = vcmp.eq.s32.totalorder %v18075_v15, %v14609_v12 }
 0x53f   : > { %v14753_v6 = vpop.f32.mrf.mxu3  ;;  %v14761_v18 = vpop.f32.mrf.mxu2 }
 0x540   : > { %18060 = vst [vmem:[#allocation172_spill] sm:$0xff] %v14753_v6  ;;  %v6880_v6 = vadd.f32 %v18066_v57, %v6791_v2  ;;  %v18074_v2 = vld [vmem:[#allocation165_spill] sm:$0xff] }
 0x541   : > { %v7173_v50 = vpop.f32.mrf.mxu1  ;;  %18065 = vst [vmem:[#allocation264_spill] sm:$0xff] %v14761_v18  ;;  %vm4798_vm8 = vcmp.eq.s32.totalorder %v18074_v2, %v14609_v12 }
 0x542   : > { %v14758_v40 = vadd.f32 %v7173_v50, %v18063_v32  ;;  %v14772_v32 = vadd.f32 %v14599_v56, %v6880_v6  ;;  %v18071_v50 = vld [vmem:[#allocation23_spill] sm:$0xff]  ;;  %v18076_v56 = vld [vmem:[#allocation36_spill] sm:$0xff]  ;;  %v18077_v6 = vld [vmem:[#allocation234_spill] sm:$0xff] }
 0x543   : > { %v6873_v18 = vadd.f32 %v18071_v50, %v6784_v5  ;;  %vm5053_vm10 = vcmp.eq.s32.totalorder %v18077_v6, %v14270_v25  ;;  %vm10404_vm12 = vmpackc.low %vm4814_vm9, %vm4798_vm8  ;;  %v18089_v6 = vld [vmem:[#allocation176_spill] sm:$0xff] }
 0x544   : > { %18064 = vst [vmem:[#allocation245_spill] sm:$0xff] %v14758_v40  ;;  %v14763_v36 = vpop.f32.mrf.mxu0  ;;  %10403 = vmatmul.msk.bf16.gmra.mxu2 %vm10402_vm6, %v17402_v33  ;;  %10387 = vmatmul.msk.bf16.gmra.mxu1 %vm10386_vm7, %v17402_v33  ;;  %v18072_v40 = vld [vmem:[#allocation130_spill] sm:$0xff]  ;;  %vm4846_vm15 = vcmp.eq.s32.totalorder %v18089_v6, %v14609_v12 }
 0x545   : > { %18069 = vst [vmem:[#allocation204_spill] sm:$0xff] %v14772_v32  ;;  %v6962_v61 = vadd.f32 %v18076_v56, %v6873_v18  ;;  %v10832_v32 = vld [vmem:[%s11300_s12 + $0x270] sm:$0xff]  ;;  %v18082_v18 = vld [vmem:[#allocation271_spill] sm:$0xff]  ;;  %v10833_v6 = vld [vmem:[%s11300_s12 + $0x278] sm:$0xff] }
 0x546   : > { %v18083_v56 = vld [vmem:[#allocation277_spill] sm:$0xff] }
 0x547   : > { %9608 = vmatmul.msk.bf16.gmra.mxu0 %vm1492_vm1, %v10831_v48  ;;  %v7124_v29 = vpop.f32.mrf.mxu3  ;;  %v7050_v48 = vpop.f32.mrf.mxu2  ;;  %v6789_v15 = vadd.f32 %v18083_v56, %v18082_v18  ;;  %v18090_v18 = vld [vmem:[#allocation62_spill] sm:$0xff] }
 0x548   : > { %v14775_v26 = vadd.f32 %v7124_v29, %v14679_v10  ;;  %v18078_v10 = vld [vmem:[#allocation235_spill] sm:$0xff]  ;;  %v14792_v29 = vadd.f32 %v7050_v48, %v6962_v61  ;;  %v18087_v61 = vld [vmem:[#allocation48_spill] sm:$0xff]  ;;  %vm5085_vm0 = vcmp.eq.s32.totalorder %v18090_v18, %v14270_v25  ;;  %v18091_v56 = vld [vmem:[#allocation246_spill] sm:$0xff] }
 0x549   : > { %v7175_v27 = vpop.f32.mrf.mxu1  ;;  %vm5069_vm11 = vcmp.eq.s32.totalorder %v18078_v10, %v14270_v25  ;;  %vm5101_vm2 = vcmp.eq.s32.totalorder %v18091_v56, %v14270_v25 }
 0x54a   : > { %18070 = vst [vmem:[#allocation76_spill] sm:$0xff] %v14775_v26  ;;  %v14779_v3 = vadd.f32 %v7175_v27, %v18072_v40  ;;  %vm10388_vm13 = vmpackc.low %vm5069_vm11, %vm5053_vm10  ;;  %v18080_v27 = vld [vmem:[#allocation180_spill] sm:$0xff]  ;;  %vm4894_vm11 = vcmp.eq.s32.totalorder %v17831_v62, %v14609_v12 }
 0x54b   : > { %vm10390_vm4 = vmpackc.low %vm5101_vm2, %vm5085_vm0  ;;  %v18098_v26 = vld [vmem:[#allocation184_spill] sm:$0xff]  ;;  %vm4926_vm2 = vcmp.eq.s32.totalorder %v17843_v39, %v14609_v12 }
 0x54c   : > { %18073 = vst [vmem:[#allocation256_spill] sm:$0xff] %v14779_v3  ;;  %v2237_v57 = vpop.f32.mrf.mxu0  ;;  %vm4878_vm6 = vcmp.eq.s32.totalorder %v18098_v26, %v14609_v12 }
 0x54f   : > { %v14790_v5 = vpop.f32.mrf.mxu3  ;;  %v14803_v2 = vpop.f32.mrf.mxu2 }
 0x550   : > { %18079 = vst [vmem:[#allocation82_spill] sm:$0xff] %v14790_v5 }
 0x551   : > { %v7178_v40 = vpop.f32.mrf.mxu1  ;;  %18084 = vst [vmem:[#allocation276_spill] sm:$0xff] %v14803_v2  ;;  %v18093_v2 = vld [vmem:[#allocation217_spill] sm:$0xff] }
 0x552   : > { %v14795_v50 = vadd.f32 %v7178_v40, %v18080_v27  ;;  %v6878_v40 = vadd.f32 %v18087_v61, %v6789_v15 }
 0x554   : > { %18081 = vst [vmem:[#allocation268_spill] sm:$0xff] %v14795_v50  ;;  %v2240_v3 = vpop.f32.mrf.mxu0  ;;  %10405 = vmatmul.msk.bf16.gmra.mxu2 %vm10404_vm12, %v17402_v33  ;;  %10389 = vmatmul.msk.bf16.gmra.mxu1 %vm10388_vm13, %v17402_v33  ;;  %v18088_v50 = vld [vmem:[#allocation175_spill] sm:$0xff]  ;;  %vm4910_vm12 = vcmp.eq.s32.totalorder %v17832_v59, %v14609_v12  ;;  %vm5149_vm13 = vcmp.eq.s32.totalorder %v17985_v24, %v14270_v25 }
 0x555   : > { %vm4830_vm14 = vcmp.eq.s32.totalorder %v18088_v50, %v14609_v12 }
 0x556   : > { %vm10406_vm3 = vmpackc.low %vm4846_vm15, %vm4830_vm14  ;;  %vm5165_vm14 = vcmp.eq.s32.totalorder %v17986_v30, %v14270_v25 }
 0x557   : > { %9609 = vmatmul.msk.bf16.gmra.mxu0 %vm1492_vm1, %v10832_v32  ;;  %v7129_v5 = vpop.f32.mrf.mxu3  ;;  %v6967_v32 = vadd.f32 %v14565_v21, %v6878_v40  ;;  %v14834_v40 = vld [vmem:[%s17071_s8] ss:$0 sm:$0xff]  ;;  %vm10410_vm15 = vmpackc.low %vm4910_vm12, %vm4894_vm11 }
 0x558   : > { %v14808_v48 = vadd.f32 %v7129_v5, %v14720_v44  ;;  %v7055_v5 = vpop.f32.mrf.mxu2  ;;  %v2238_v18 = vadd.f32 %v14834_v40, %v2237_v57  ;;  %v2236_v57 = vadd.f32 %v14834_v40, %v14763_v36  ;;  %v2233_v26 = vadd.f32 %v14834_v40, %v14742_v14  ;;  %vm10394_vm0 = vmpackc.low %vm5165_vm14, %vm5149_vm13 }
 0x559   : > { %v14805_v10 = vpop.f32.mrf.mxu1  ;;  %v14822_v61 = vadd.f32 %v7055_v5, %v6967_v32  ;;  %vm4990_vm14 = vcmp.eq.s32.totalorder %v17873_v11, %v14609_v12 }
 0x55a   : > { %18085 = vst [vmem:[#allocation45_spill] sm:$0xff] %v14805_v10 }
 0x55b   : > { %18086 = vst [vmem:[#allocation195_spill] sm:$0xff] %v14808_v48  ;;  %v18097_v48 = vld [vmem:[#allocation183_spill] sm:$0xff] }
 0x55c   : > { %v2242_v27 = vpop.f32.mrf.mxu0  ;;  %vm4862_vm5 = vcmp.eq.s32.totalorder %v18097_v48, %v14609_v12  ;;  %v18103_v48 = vld [vmem:[#allocation61_spill] sm:$0xff] }
 0x55d   : > { %vm10408_vm9 = vmpackc.low %vm4878_vm6, %vm4862_vm5 }
 0x55f   : > { %v14820_v44 = vpop.f32.mrf.mxu3 }
 0x560   : > { %18092 = vst [vmem:[#allocation267_spill] sm:$0xff] %v14820_v44 }
 0x561   : > { %v7183_v15 = vpop.f32.mrf.mxu1 }
 0x562   : > { %v14825_v10 = vadd.f32 %v7183_v15, %v18093_v2  ;;  %v2243_v15 = vadd.f32 %v14834_v40, %v2242_v27  ;;  %v18100_v27 = vld [vmem:[#allocation255_spill] sm:$0xff] }
 0x563   : > { %vm5133_vm8 = vcmp.eq.s32.totalorder %v18100_v27, %v14270_v25  ;;  %v2669_v27 = vmax.f32 %v2238_v18, 0.0 }
 0x564   : > { %18094 = vst [vmem:[#allocation193_spill] sm:$0xff] %v14825_v10  ;;  %v2245_v50 = vpop.f32.mrf.mxu0  ;;  %10407 = vmatmul.msk.bf16.gmra.mxu2 %vm10406_vm3, %v17402_v33  ;;  %10391 = vmatmul.msk.bf16.gmra.mxu1 %vm10390_vm4, %v17402_v33  ;;  %v2241_v10 = vadd.f32 %v14834_v40, %v2240_v3  ;;  %vm4942_vm3 = vcmp.eq.s32.totalorder %v17844_v38, %v14609_v12 }
 0x565   : > { %v2246_v32 = vadd.f32 %v14834_v40, %v2245_v50  ;;  %v2671_v50 = vmax.f32 %v2243_v15, 0.0  ;;  %vm10412_vm6 = vmpackc.low %vm4942_vm3, %vm4926_vm2 }
 0x567   : > { %9610 = vmatmul.msk.bf16.gmra.mxu0 %vm1492_vm1, %v10833_v6  ;;  %v7134_v21 = vpop.f32.mrf.mxu3  ;;  %v2672_v56 = vmax.f32 %v2246_v32, 0.0 }
 0x568   : > { %v14839_v2 = vadd.f32 %v7134_v21, %v7046_v60  ;;  %v18099_v60 = vld [vmem:[#allocation254_spill] sm:$0xff]  ;;  %v18102_v21 = vld [vmem:[#allocation59_spill] sm:$0xff] }
 0x569   : > { %v14837_v5 = vpop.f32.mrf.mxu1  ;;  %vm5117_vm7 = vcmp.eq.s32.totalorder %v18099_v60, %v14270_v25  ;;  %v4464_v32 = vmul.f32 %v18102_v21, %v2672_v56  ;;  %v18104_v60 = vld [vmem:[#allocation68_spill] sm:$0xff]  ;;  %v18105_v56 = vld [vmem:[#allocation65_spill] sm:$0xff]  ;;  %v18106_v21 = vld [vmem:[#allocation71_spill] sm:$0xff] }
 0x56a   : > { %18095 = vst [vmem:[#allocation19_spill] sm:$0xff] %v14837_v5  ;;  %vm10392_vm10 = vmpackc.low %vm5133_vm8, %vm5117_vm7  ;;  %v4461_v14 = vmul.f32 %v18106_v21, %v2669_v27  ;;  %v18110_v27 = vld [vmem:[#allocation75_spill] sm:$0xff]  ;;  %vm4958_vm8 = vcmp.eq.s32.totalorder %v17858_v23, %v14609_v12  ;;  %v10839_v25 = vld [vmem:[%s11300_s12 + $0x2a8] sm:$0xff] }
 0x56b   : > { %18096 = vst [vmem:[#allocation102_spill] sm:$0xff] %v14839_v2 }
 0x56c   : > { %v2247_v44 = vpop.f32.mrf.mxu0 }
 0x56d   : > { %v2248_v6 = vadd.f32 %v14834_v40, %v2247_v44  ;;  %v2670_v44 = vmax.f32 %v2241_v10, 0.0  ;;  %v2231_v10 = vadd.f32 %v14834_v40, %v14728_v8 }
 0x56f   : > { %v2673_v5 = vmax.f32 %v2248_v6, 0.0  ;;  %v14853_v3 = vpop.f32.mrf.mxu3 }
 0x570   : > { %18101 = vst [vmem:[#allocation192_spill] sm:$0xff] %v14853_v3  ;;  %v4463_v3 = vmul.f32 %v18104_v60, %v2671_v50  ;;  %v2666_v50 = vmax.f32 %v2231_v10, 0.0  ;;  %v18107_v60 = vld [vmem:[#allocation72_spill] sm:$0xff] }
 0x571   : > { %v4465_v2 = vmul.f32 %v18103_v48, %v2673_v5  ;;  %v7188_v15 = vpop.f32.mrf.mxu1  ;;  %v2668_v48 = vmax.f32 %v2236_v57, 0.0  ;;  %v4462_v5 = vmul.f32 %v18105_v56, %v2670_v44 }
 0x572   : > { %v14860_v6 = vadd.f32 %v7188_v15, %v14557_v13  ;;  %v2667_v13 = vmax.f32 %v2233_v26, 0.0  ;;  %v4458_v21 = vmul.f32 %v18110_v27, %v2666_v50  ;;  %v10835_v50 = vld [vmem:[%s11300_s12 + $0x288] sm:$0xff] }
 0x573   : > { %v6558_v20 = vpack.c.bf16 %v4465_v2, %v4464_v32  ;;  %v6557_v18 = vpack.c.bf16 %v4463_v3, %v4462_v5  ;;  %v4460_v32 = vmul.f32 %v18107_v60, %v2668_v48  ;;  %v18112_v48 = vld [vmem:[#allocation141_spill] sm:$0xff] }
 0x574   : > { %v2250_v36 = vpop.f32.mrf.mxu0  ;;  %10409 = vmatmul.msk.bf16.gmra.mxu2 %vm10408_vm9, %v17402_v33  ;;  %10393 = vmatmul.msk.bf16.gmra.mxu1 %vm10392_vm10, %v17402_v33  ;;  %vm4974_vm9 = vcmp.eq.s32.totalorder %v17859_v55, %v14609_v12 }
 0x575   : > { %7327 = vmatpush.bf16.msra.mxu3 %v6558_v20  ;;  %v2251_v15 = vadd.f32 %v14834_v40, %v2250_v36  ;;  %v18109_v20 = vld [vmem:[#allocation77_spill] sm:$0xff]  ;;  %v6556_v26 = vpack.c.bf16 %v4461_v14, %v4460_v32  ;;  %v18114_v32 = vpack.c.bf16 %v14716_v63, %v14713_v28  ;;  %vm10414_vm12 = vmpackc.low %vm4974_vm9, %vm4958_vm8 }
 0x576   : > { %v4459_v44 = vmul.f32 %v18109_v20, %v2667_v13  ;;  %v18113_v13 = vld [vmem:[#allocation143_spill] sm:$0xff] }
 0x577   : > { %9611 = vmatmul.msk.bf16.gmra.mxu0 %vm1492_vm1, %v10834_v7  ;;  %v7139_v2 = vpop.f32.mrf.mxu3  ;;  %v2674_v7 = vmax.f32 %v2251_v15, 0.0  ;;  %v14912_v15 = vld [vmem:[%s11280_s20 + $0x8] sm:$0xff] }
 0x578   : > { %v14878_v57 = vadd.f32 %v7139_v2, %v14792_v29  ;;  %v6555_v29 = vpack.c.bf16 %v4459_v44, %v4458_v21  ;;  %v18115_v44 = vpack.c.bf16 %v14675_v52, %v14672_v1  ;;  %v14924_v28 = vperm.slane %v14912_v15, 0  ;;  %v14938_v52 = vpop.f32.mrf.mxu2 }
 0x579   : > { %7328 = vmatpush.bf16.msra.mxu3 %v6557_v18  ;;  %v14875_v8 = vpop.f32.mrf.mxu1  ;;  %v14894_v5 = vmul.f32 %v18112_v48, %v2674_v7  ;;  %v18117_v7 = vpack.c.bf16 %v14631_v47, %v14628_v51  ;;  %18118 = vst [vmem:[#allocation157_spill] sm:$0xff] %v14938_v52  ;;  %v18120_v51 = vld [vmem:[#allocation137_spill] sm:$0xff] }
 0x57a   : > { %18108 = vst [vmem:[#allocation202_spill] sm:$0xff] %v14875_v8  ;;  %vm4671_vm4 = vcmp.eq.s32.totalorder %v17828_v34, %v14924_v28  ;;  %vm4687_vm5 = vcmp.eq.s32.totalorder %v17829_v58, %v14924_v28  ;;  %vm4703_vm10 = vcmp.eq.s32.totalorder %v17948_v35, %v14924_v28  ;;  %vm4719_vm11 = vcmp.eq.s32.totalorder %v17949_v53, %v14924_v28 }
 0x57b   : > { %vm10428_vm7 = vmpackc.low %vm4687_vm5, %vm4671_vm4  ;;  %vm4751_vm2 = vcmp.eq.s32.totalorder %v17957_v43, %v14924_v28  ;;  %vm5022_vm5 = vcmp.eq.s32.totalorder %v18058_v22, %v14609_v12 }
 0x57c   : > { %v2252_v56 = vpop.f32.mrf.mxu0  ;;  %vm10430_vm13 = vmpackc.low %vm4719_vm11, %vm4703_vm10 }
 0x57d   : > { %v2253_v3 = vadd.f32 %v14834_v40, %v2252_v56  ;;  %7329 = vmatpush.bf16.msra.mxu3 %v6556_v26 }
 0x57f   : > { %v2675_v36 = vmax.f32 %v2253_v3, 0.0  ;;  %v14891_v10 = vpop.f32.mrf.mxu3 }
 0x580   : > { %18111 = vst [vmem:[#allocation22_spill] sm:$0xff] %v14891_v10  ;;  %v18138_v10 = vld [vmem:[#allocation234_spill] sm:$0xff] }
 0x581   : > { %v14897_v14 = vmul.f32 %v18113_v13, %v2675_v36  ;;  %7330 = vmatpush.bf16.msra.mxu3 %v6555_v29  ;;  %v7193_v18 = vpop.f32.mrf.mxu1  ;;  %v18121_v36 = vpack.c.bf16 %v14582_v54, %v14579_v45  ;;  %v10836_v13 = vld [vmem:[%s11300_s12 + $0x290] sm:$0xff]  ;;  %vm5054_vm11 = vcmp.eq.s32.totalorder %v18138_v10, %v14609_v12 }
 0x582   : > { %v14900_v2 = vadd.f32 %v7193_v18, %v14602_v41 }
 0x584   : > { %v2255_v60 = vpop.f32.mrf.mxu0  ;;  %10411 = vmatmul.msk.bf16.gmra.mxu2 %vm10410_vm15, %v17402_v33  ;;  %10395 = vmatmul.msk.bf16.gmra.mxu1 %vm10394_vm0, %v17402_v33  ;;  %vm5006_vm15 = vcmp.eq.s32.totalorder %v17874_v49, %v14609_v12  ;;  %vm4735_vm0 = vcmp.eq.s32.totalorder %v17956_v19, %v14924_v28 }
 0x585   : > { %7331 = vmatpush.bf16.msra.mxu3 %v18114_v32  ;;  %v2256_v20 = vadd.f32 %v14834_v40, %v2255_v60  ;;  %vm10416_vm3 = vmpackc.low %vm5006_vm15, %vm4990_vm14 }
 0x586   : > { %vm10432_vm4 = vmpackc.low %vm4751_vm2, %vm4735_vm0 }
 0x587   : > { %9612 = vmatmul.msk.bf16.gmra.mxu0 %vm1492_vm1, %v10835_v50  ;;  %v7144_v41 = vpop.f32.mrf.mxu3  ;;  %v2676_v27 = vmax.f32 %v2256_v20, 0.0 }
 0x588   : > { %v14921_v56 = vadd.f32 %v7144_v41, %v14822_v61  ;;  %v18119_v61 = vld [vmem:[#allocation138_spill] sm:$0xff] }
 0x589   : > { %7332 = vmatpush.bf16.msra.mxu3 %v18115_v44  ;;  %v14918_v26 = vpop.f32.mrf.mxu1  ;;  %v14941_v3 = vmul.f32 %v18119_v61, %v2676_v27  ;;  %v18123_v27 = vld [vmem:[#allocation129_spill] sm:$0xff] }
 0x58a   : > { %18116 = vst [vmem:[#allocation158_spill] sm:$0xff] %v14918_v26  ;;  %v10840_v26 = vld [vmem:[%s11300_s12 + $0x2b0] sm:$0xff] }
 0x58c   : > { %v2257_v63 = vpop.f32.mrf.mxu0 }
 0x58d   : > { %v2258_v21 = vadd.f32 %v14834_v40, %v2257_v63  ;;  %7333 = vmatpush.bf16.msra.mxu3 %v18117_v7  ;;  %v18124_v7 = vld [vmem:[#allocation132_spill] sm:$0xff] }
 0x58f   : > { %v2677_v1 = vmax.f32 %v2258_v21, 0.0 }
 0x591   : > { %v14944_v47 = vmul.f32 %v18120_v51, %v2677_v1  ;;  %7334 = vmatpush.bf16.msra.mxu3 %v18121_v36  ;;  %v7198_v29 = vpop.f32.mrf.mxu1  ;;  %v10837_v36 = vld [vmem:[%s11300_s12 + $0x298] sm:$0xff] }
 0x592   : > { %v14950_v48 = vadd.f32 %v7198_v29, %v14653_v42 }
 0x594   : > { %v2260_v50 = vpop.f32.mrf.mxu0  ;;  %10413 = vmatmul.msk.bf16.gmra.mxu2 %vm10412_vm6, %v17402_v33  ;;  %10429 = vmatmul.msk.bf16.vlgmr.msra.gmra.mxu3 %vm10428_vm7, %v17402_v33  ;;  %vm5038_vm6 = vcmp.eq.s32.totalorder %v18059_v0, %v14609_v12  ;;  %v18166_v0 = vld [vmem:[#allocation111_spill] sm:$0xff] }
 0x595   : > { %v2261_v54 = vadd.f32 %v14834_v40, %v2260_v50  ;;  %vm10418_vm9 = vmpackc.low %vm5038_vm6, %vm5022_vm5 }
 0x597   : > { %9613 = vmatmul.msk.bf16.gmra.mxu0 %vm1492_vm1, %v10836_v13  ;;  %v7247_v60 = vpop.f32.mrf.mxu2  ;;  %v2678_v41 = vmax.f32 %v2261_v54, 0.0 }
 0x598   : > { %v14959_v45 = vadd.f32 %v7247_v60, %v14641_v31 }
 0x599   : > { %v14962_v32 = vpop.f32.mrf.mxu1  ;;  %v14977_v21 = vmul.f32 %v18123_v27, %v2678_v41 }
 0x59a   : > { %18122 = vst [vmem:[#allocation162_spill] sm:$0xff] %v14962_v32 }
 0x59c   : > { %v2262_v42 = vpop.f32.mrf.mxu0 }
 0x59d   : > { %v2263_v20 = vadd.f32 %v14834_v40, %v2262_v42 }
 0x59f   : > { %v2679_v31 = vmax.f32 %v2263_v20, 0.0  ;;  %v7249_v44 = vpop.f32.mrf.mxu2 }
 0x5a0   : > { %v14974_v63 = vadd.f32 %v7249_v44, %v14657_v17  ;;  %v18126_v44 = vld [vmem:[#allocation121_spill] sm:$0xff] }
 0x5a1   : > { %v14980_v1 = vmul.f32 %v18124_v7, %v2679_v31  ;;  %v7203_v61 = vpop.f32.mrf.mxu1  ;;  %v18127_v7 = vld [vmem:[#allocation123_spill] sm:$0xff] }
 0x5a2   : > { %v14983_v51 = vadd.f32 %v7203_v61, %v14694_v37 }
 0x5a4   : > { %v2265_v13 = vpop.f32.mrf.mxu0  ;;  %10415 = vmatmul.msk.bf16.gmra.mxu2 %vm10414_vm12, %v17402_v33  ;;  %10431 = vmatmul.msk.bf16.gmra.mxu3 %vm10430_vm13, %v17402_v33 }
 0x5a5   : > { %v2266_v60 = vadd.f32 %v14834_v40, %v2265_v13 }
 0x5a7   : > { %9614 = vmatmul.msk.bf16.gmra.mxu0 %vm1492_vm1, %v10837_v36  ;;  %v7252_v17 = vpop.f32.mrf.mxu2  ;;  %v2680_v42 = vmax.f32 %v2266_v60, 0.0  ;;  %v18135_v60 = vld [vmem:[#allocation245_spill] sm:$0xff] }
 0x5a8   : > { %v14992_v50 = vadd.f32 %v7252_v17, %v14682_v4  ;;  %v10838_v17 = vld [vmem:[%s11300_s12 + $0x2a0] sm:$0xff] }
 0x5a9   : > { %v14995_v54 = vpop.f32.mrf.mxu1  ;;  %v15010_v27 = vmul.f32 %v18126_v44, %v2680_v42 }
 0x5aa   : > { %18125 = vst [vmem:[#allocation159_spill] sm:$0xff] %v14995_v54  ;;  %v18142_v54 = vld [vmem:[#allocation256_spill] sm:$0xff] }
 0x5ac   : > { %v2267_v37 = vpop.f32.mrf.mxu0 }
 0x5ad   : > { %v2268_v41 = vadd.f32 %v14834_v40, %v2267_v37 }
 0x5af   : > { %v2681_v4 = vmax.f32 %v2268_v41, 0.0  ;;  %v7254_v20 = vpop.f32.mrf.mxu2 }
 0x5b0   : > { %v15007_v31 = vadd.f32 %v7254_v20, %v14698_v9  ;;  %v18130_v20 = vld [vmem:[#allocation156_spill] sm:$0xff] }
 0x5b1   : > { %v15013_v61 = vmul.f32 %v18127_v7, %v2681_v4  ;;  %v7208_v36 = vpop.f32.mrf.mxu1  ;;  %v18129_v4 = vld [vmem:[#allocation155_spill] sm:$0xff]  ;;  %vm4783_vm8 = vcmp.eq.s32.totalorder %v18130_v20, %v14924_v28  ;;  %v18131_v7 = vld [vmem:[#allocation169_spill] sm:$0xff] }
 0x5b2   : > { %v15016_v13 = vadd.f32 %v7208_v36, %v14736_v16  ;;  %vm4767_vm7 = vcmp.eq.s32.totalorder %v18129_v4, %v14924_v28 }
 0x5b3   : > { %vm10434_vm10 = vmpackc.low %vm4783_vm8, %vm4767_vm7 }
 0x5b4   : > { %v15021_v37 = vpop.f32.mrf.mxu0  ;;  %10417 = vmatmul.msk.bf16.gmra.mxu2 %vm10416_vm3, %v17402_v33  ;;  %10433 = vmatmul.msk.bf16.gmra.mxu3 %vm10432_vm4, %v17402_v33 }
 0x5b7   : > { %9615 = vmatmul.msk.bf16.gmra.mxu0 %vm1492_vm1, %v10838_v17  ;;  %v7257_v9 = vpop.f32.mrf.mxu2  ;;  %v18133_v17 = vld [vmem:[#allocation76_spill] sm:$0xff] }
 0x5b8   : > { %v15027_v42 = vadd.f32 %v7257_v9, %v14723_v46 }
 0x5b9   : > { %v15029_v41 = vpop.f32.mrf.mxu1 }
 0x5ba   : > { %18128 = vst [vmem:[#allocation66_spill] sm:$0xff] %v15029_v41  ;;  %v18141_v41 = vld [vmem:[#allocation166_spill] sm:$0xff] }
 0x5bb   : > { %vm4815_vm14 = vcmp.eq.s32.totalorder %v18141_v41, %v14924_v28 }
 0x5bc   : > { %v15031_v16 = vpop.f32.mrf.mxu0 }
 0x5bf   : > { %v7259_v44 = vpop.f32.mrf.mxu2 }
 0x5c0   : > { %v15042_v46 = vadd.f32 %v7259_v44, %v18131_v7 }
 0x5c1   : > { %v7213_v36 = vpop.f32.mrf.mxu1 }
 0x5c2   : > { %18132 = vst [vmem:[#allocation29_spill] sm:$0xff] %v15042_v46  ;;  %v15045_v9 = vadd.f32 %v7213_v36, %v18133_v17  ;;  %v18139_v36 = vld [vmem:[#allocation235_spill] sm:$0xff]  ;;  %v18140_v17 = vld [vmem:[#allocation165_spill] sm:$0xff] }
 0x5c3   : > { %vm5070_vm12 = vcmp.eq.s32.totalorder %v18139_v36, %v14609_v12  ;;  %vm4799_vm13 = vcmp.eq.s32.totalorder %v18140_v17, %v14924_v28  ;;  %v18146_v17 = vld [vmem:[#allocation268_spill] sm:$0xff] }
 0x5c4   : > { %18134 = vst [vmem:[#allocation163_spill] sm:$0xff] %v15045_v9  ;;  %v2275_v18 = vpop.f32.mrf.mxu0  ;;  %10419 = vmatmul.msk.bf16.gmra.mxu2 %vm10418_vm9, %v17402_v33  ;;  %10435 = vmatmul.msk.bf16.gmra.mxu3 %vm10434_vm10, %v17402_v33  ;;  %vm10420_vm15 = vmpackc.low %vm5070_vm12, %vm5054_vm11 }
 0x5c5   : > { %vm10436_vm0 = vmpackc.low %vm4815_vm14, %vm4799_vm13  ;;  %vm5150_vm14 = vcmp.eq.s32.totalorder %v17985_v24, %v14609_v12 }
 0x5c7   : > { %9616 = vmatmul.msk.bf16.gmra.mxu0 %vm1492_vm1, %v10839_v25  ;;  %v7262_v29 = vpop.f32.mrf.mxu2 }
 0x5c8   : > { %v15052_v52 = vadd.f32 %v7262_v29, %v18135_v60  ;;  %v18144_v60 = vld [vmem:[#allocation195_spill] sm:$0xff] }
 0x5c9   : > { %v15054_v44 = vpop.f32.mrf.mxu1 }
 0x5ca   : > { %18136 = vst [vmem:[#allocation161_spill] sm:$0xff] %v15052_v52 }
 0x5cb   : > { %18137 = vst [vmem:[#allocation31_spill] sm:$0xff] %v15054_v44 }
 0x5cc   : > { %v2277_v7 = vpop.f32.mrf.mxu0 }
 0x5cf   : > { %v7264_v25 = vpop.f32.mrf.mxu2 }
 0x5d0   : > { %v15065_v32 = vadd.f32 %v7264_v25, %v18142_v54 }
 0x5d1   : > { %v7218_v29 = vpop.f32.mrf.mxu1 }
 0x5d2   : > { %18143 = vst [vmem:[#allocation167_spill] sm:$0xff] %v15065_v32  ;;  %v15068_v44 = vadd.f32 %v7218_v29, %v18144_v60  ;;  %v18149_v32 = vld [vmem:[#allocation62_spill] sm:$0xff]  ;;  %v18151_v60 = vld [vmem:[#allocation175_spill] sm:$0xff] }
 0x5d3   : > { %vm5086_vm2 = vcmp.eq.s32.totalorder %v18149_v32, %v14609_v12  ;;  %v18150_v29 = vld [vmem:[#allocation246_spill] sm:$0xff]  ;;  %vm4831_vm4 = vcmp.eq.s32.totalorder %v18151_v60, %v14924_v28 }
 0x5d4   : > { %18145 = vst [vmem:[#allocation168_spill] sm:$0xff] %v15068_v44  ;;  %v2280_v8 = vpop.f32.mrf.mxu0  ;;  %10421 = vmatmul.msk.bf16.gmra.mxu2 %vm10420_vm15, %v17402_v33  ;;  %10437 = vmatmul.msk.bf16.gmra.mxu3 %vm10436_vm0, %v17402_v33  ;;  %vm5102_vm3 = vcmp.eq.s32.totalorder %v18150_v29, %v14609_v12  ;;  %v18152_v44 = vld [vmem:[#allocation176_spill] sm:$0xff]  ;;  %v18156_v29 = vld [vmem:[#allocation193_spill] sm:$0xff]  ;;  %vm5166_vm15 = vcmp.eq.s32.totalorder %v17986_v30, %v14609_v12 }
 0x5d5   : > { %vm4847_vm5 = vcmp.eq.s32.totalorder %v18152_v44, %v14924_v28  ;;  %vm10422_vm6 = vmpackc.low %vm5102_vm3, %vm5086_vm2  ;;  %vm4895_vm0 = vcmp.eq.s32.totalorder %v17831_v62, %v14924_v28  ;;  %vm4911_vm2 = vcmp.eq.s32.totalorder %v17832_v59, %v14924_v28 }
 0x5d6   : > { %vm10438_vm7 = vmpackc.low %vm4847_vm5, %vm4831_vm4  ;;  %vm4927_vm5 = vcmp.eq.s32.totalorder %v17843_v39, %v14924_v28 }
 0x5d7   : > { %9617 = vmatmul.msk.bf16.gmra.mxu0 %vm1492_vm1, %v10840_v26  ;;  %v7267_v41 = vpop.f32.mrf.mxu2  ;;  %vm10426_vm3 = vmpackc.low %vm5166_vm15, %vm5150_vm14 }
 0x5d8   : > { %v15075_v36 = vadd.f32 %v7267_v41, %v18146_v17  ;;  %v18154_v17 = vld [vmem:[#allocation102_spill] sm:$0xff]  ;;  %vm10442_vm4 = vmpackc.low %vm4911_vm2, %vm4895_vm0  ;;  %vm4991_vm2 = vcmp.eq.s32.totalorder %v17873_v11, %v14924_v28 }
 0x5d9   : > { %v15077_v54 = vpop.f32.mrf.mxu1 }
 0x5da   : > { %18147 = vst [vmem:[#allocation91_spill] sm:$0xff] %v15075_v36  ;;  %v10841_v36 = vld [vmem:[%s11300_s12 + $0x2b8] sm:$0xff] }
 0x5db   : > { %18148 = vst [vmem:[#allocation93_spill] sm:$0xff] %v15077_v54 }
 0x5dc   : > { %v2282_v25 = vpop.f32.mrf.mxu0 }
 0x5dd   : > { %v2283_v52 = vadd.f32 %v14834_v40, %v2282_v25  ;;  %v2278_v25 = vadd.f32 %v14834_v40, %v2277_v7 }
 0x5df   : > { %v15087_v26 = vpop.f32.mrf.mxu2  ;;  %v2685_v4 = vmax.f32 %v2278_v25, 0.0  ;;  %v18168_v25 = vld [vmem:[#allocation115_spill] sm:$0xff] }
 0x5e0   : > { %18153 = vst [vmem:[#allocation134_spill] sm:$0xff] %v15087_v26 }
 0x5e1   : > { %v7223_v41 = vpop.f32.mrf.mxu1 }
 0x5e2   : > { %v15090_v54 = vadd.f32 %v7223_v41, %v18154_v17  ;;  %v18159_v17 = vld [vmem:[#allocation254_spill] sm:$0xff] }
 0x5e3   : > { %vm5118_vm8 = vcmp.eq.s32.totalorder %v18159_v17, %v14609_v12 }
 0x5e4   : > { %18155 = vst [vmem:[#allocation25_spill] sm:$0xff] %v15090_v54  ;;  %v2285_v10 = vpop.f32.mrf.mxu0  ;;  %10423 = vmatmul.msk.bf16.gmra.mxu2 %vm10422_vm6, %v17402_v33  ;;  %10439 = vmatmul.msk.bf16.gmra.mxu3 %vm10438_vm7, %v17402_v33  ;;  %v2281_v54 = vadd.f32 %v14834_v40, %v2280_v8  ;;  %v2276_v8 = vadd.f32 %v14834_v40, %v2275_v18 }
 0x5e5   : > { %v2286_v26 = vadd.f32 %v14834_v40, %v2285_v10  ;;  %v18162_v10 = vld [vmem:[#allocation184_spill] sm:$0xff]  ;;  %v2271_v18 = vadd.f32 %v14834_v40, %v15021_v37  ;;  %v18169_v37 = vld [vmem:[#allocation113_spill] sm:$0xff]  ;;  %vm4943_vm6 = vcmp.eq.s32.totalorder %v17844_v38, %v14924_v28 }
 0x5e6   : > { %vm4879_vm11 = vcmp.eq.s32.totalorder %v18162_v10, %v14924_v28 }
 0x5e7   : > { %9618 = vmatmul.msk.bf16.gmra.mxu0 %vm1492_vm1, %v10841_v36  ;;  %v7272_v60 = vpop.f32.mrf.mxu2  ;;  %v2688_v9 = vmax.f32 %v2286_v26, 0.0  ;;  %v18160_v36 = vld [vmem:[#allocation255_spill] sm:$0xff]  ;;  %v2686_v26 = vmax.f32 %v2281_v54, 0.0 }
 0x5e8   : > { %v15097_v32 = vadd.f32 %v7272_v60, %v18156_v29  ;;  %vm5134_vm9 = vcmp.eq.s32.totalorder %v18160_v36, %v14609_v12  ;;  %v18161_v29 = vld [vmem:[#allocation183_spill] sm:$0xff]  ;;  %v2687_v60 = vmax.f32 %v2283_v52, 0.0  ;;  %v18165_v36 = vld [vmem:[#allocation109_spill] sm:$0xff] }
 0x5e9   : > { %v15100_v44 = vpop.f32.mrf.mxu1  ;;  %vm4863_vm10 = vcmp.eq.s32.totalorder %v18161_v29, %v14924_v28  ;;  %vm10424_vm12 = vmpackc.low %vm5134_vm9, %vm5118_vm8  ;;  %v2273_v29 = vadd.f32 %v14834_v40, %v15031_v16 }
 0x5ea   : > { %18157 = vst [vmem:[#allocation85_spill] sm:$0xff] %v15097_v32  ;;  %vm10440_vm13 = vmpackc.low %vm4879_vm11, %vm4863_vm10  ;;  %v4479_v7 = vmul.f32 %v18166_v0, %v2687_v60  ;;  %v4477_v0 = vmul.f32 %v18168_v25, %v2685_v4  ;;  %vm4959_vm11 = vcmp.eq.s32.totalorder %v17858_v23, %v14924_v28 }
 0x5eb   : > { %18158 = vst [vmem:[#allocation89_spill] sm:$0xff] %v15100_v44  ;;  %vm10444_vm9 = vmpackc.low %vm4943_vm6, %vm4927_vm5 }
 0x5ec   : > { %v2287_v41 = vpop.f32.mrf.mxu0 }
 0x5ed   : > { %v2288_v46 = vadd.f32 %v14834_v40, %v2287_v41  ;;  %v18164_v41 = vld [vmem:[#allocation107_spill] sm:$0xff] }
 0x5ee   : > { %v4480_v32 = vmul.f32 %v18164_v41, %v2688_v9  ;;  %v2684_v9 = vmax.f32 %v2276_v8, 0.0 }
 0x5ef   : > { %v2689_v44 = vmax.f32 %v2288_v46, 0.0  ;;  %v15114_v17 = vpop.f32.mrf.mxu2  ;;  %v10842_v46 = vld [vmem:[%s11300_s12 + $0x2c0] sm:$0xff] }
 0x5f0   : > { %18163 = vst [vmem:[#allocation92_spill] sm:$0xff] %v15114_v17  ;;  %v4476_v60 = vmul.f32 %v18169_v37, %v2684_v9  ;;  %v18174_v9 = vld [vmem:[#allocation190_spill] sm:$0xff] }
 0x5f1   : > { %v4481_v20 = vmul.f32 %v18165_v36, %v2689_v44  ;;  %v7228_v10 = vpop.f32.mrf.mxu1  ;;  %v18167_v44 = vld [vmem:[#allocation112_spill] sm:$0xff]  ;;  %v2683_v36 = vmax.f32 %v2273_v29, 0.0 }
 0x5f2   : > { %v15124_v17 = vadd.f32 %v7228_v10, %v14878_v57  ;;  %v4478_v16 = vmul.f32 %v18167_v44, %v2686_v26  ;;  %v18171_v26 = vld [vmem:[#allocation117_spill] sm:$0xff]  ;;  %v6564_v29 = vpack.c.bf16 %v4477_v0, %v4476_v60  ;;  %v18172_v44 = vld [vmem:[#allocation118_spill] sm:$0xff]  ;;  %v18176_v60 = vpack.c.bf16 %v15013_v61, %v15010_v27 }
 0x5f3   : > { %v6566_v52 = vpack.c.bf16 %v4481_v20, %v4480_v32  ;;  %v2682_v20 = vmax.f32 %v2271_v18, 0.0  ;;  %v18178_v61 = vpack.c.bf16 %v14944_v47, %v14941_v3  ;;  %v18181_v3 = vld [vmem:[#allocation52_spill] sm:$0xff] }
 0x5f4   : > { %v2290_v54 = vpop.f32.mrf.mxu0  ;;  %10425 = vmatmul.msk.bf16.gmra.mxu2 %vm10424_vm12, %v17402_v33  ;;  %10441 = vmatmul.msk.bf16.gmra.mxu3 %vm10440_vm13, %v17402_v33  ;;  %v6565_v57 = vpack.c.bf16 %v4479_v7, %v4478_v16  ;;  %vm4975_vm12 = vcmp.eq.s32.totalorder %v17859_v55, %v14924_v28 }
 0x5f5   : > { %7416 = vmatpush.bf16.msrb.mxu1 %v6566_v52  ;;  %v2291_v41 = vadd.f32 %v14834_v40, %v2290_v54  ;;  %v4475_v52 = vmul.f32 %v18171_v26, %v2683_v36  ;;  %v4474_v4 = vmul.f32 %v18172_v44, %v2682_v20  ;;  %v18175_v36 = vld [vmem:[#allocation262_spill] sm:$0xff]  ;;  %vm10446_vm15 = vmpackc.low %vm4975_vm12, %vm4959_vm11 }
 0x5f7   : > { %9619 = vmatmul.msk.bf16.gmra.mxu0 %vm1492_vm1, %v10842_v46  ;;  %v7277_v32 = vpop.f32.mrf.mxu2  ;;  %v2690_v46 = vmax.f32 %v2291_v41, 0.0  ;;  %v6563_v54 = vpack.c.bf16 %v4475_v52, %v4474_v4  ;;  %v18177_v52 = vpack.c.bf16 %v14980_v1, %v14977_v21  ;;  %v15193_v21 = vpop.f32.mrf.mxu3 }
 0x5f8   : > { %v15134_v10 = vadd.f32 %v7277_v32, %v14860_v6  ;;  %v10843_v32 = vld [vmem:[%s11300_s12 + $0x2c8] sm:$0xff]  ;;  %18179 = vst [vmem:[#allocation80_spill] sm:$0xff] %v15193_v21 }
 0x5f9   : > { %7417 = vmatpush.bf16.msrb.mxu1 %v6565_v57  ;;  %v15138_v8 = vpop.f32.mrf.mxu1  ;;  %v15154_v16 = vmul.f32 %v18174_v9, %v2690_v46 }
 0x5fa   : > { %18170 = vst [vmem:[#allocation228_spill] sm:$0xff] %v15138_v8  ;;  %v18222_v8 = vld [vmem:[#allocation235_spill] sm:$0xff] }
 0x5fc   : > { %v2292_v25 = vpop.f32.mrf.mxu0 }
 0x5fd   : > { %v2293_v7 = vadd.f32 %v14834_v40, %v2292_v25  ;;  %7418 = vmatpush.bf16.msrb.mxu1 %v6564_v29  ;;  %v15179_v29 = vperm.slane %v14912_v15, 1  ;;  %v18182_v25 = vld [vmem:[#allocation50_spill] sm:$0xff] }
 0x5ff   : > { %v2691_v6 = vmax.f32 %v2293_v7, 0.0  ;;  %v15151_v18 = vpop.f32.mrf.mxu2  ;;  %vm4672_vm7 = vcmp.eq.s32.totalorder %v17828_v34, %v15179_v29  ;;  %vm4688_vm8 = vcmp.eq.s32.totalorder %v17829_v58, %v15179_v29  ;;  %v18183_v7 = vpack.c.bf16 %v14897_v14, %v14894_v5 }
 0x600   : > { %18173 = vst [vmem:[#allocation83_spill] sm:$0xff] %v15151_v18  ;;  %vm10460_vm10 = vmpackc.low %vm4688_vm8, %vm4672_vm7  ;;  %vm4704_vm13 = vcmp.eq.s32.totalorder %v17948_v35, %v15179_v29  ;;  %vm4720_vm14 = vcmp.eq.s32.totalorder %v17949_v53, %v15179_v29  ;;  %vm4752_vm5 = vcmp.eq.s32.totalorder %v17957_v43, %v15179_v29  ;;  %vm5023_vm8 = vcmp.eq.s32.totalorder %v18058_v22, %v14924_v28  ;;  %v10850_v22 = vld [vmem:[%s11300_s12 + $0x300] sm:$0xff] }
 0x601   : > { %v15157_v0 = vmul.f32 %v18175_v36, %v2691_v6  ;;  %7419 = vmatpush.bf16.msrb.mxu1 %v6563_v54  ;;  %v7233_v12 = vpop.f32.mrf.mxu1  ;;  %v18184_v6 = vld [vmem:[#allocation252_spill] sm:$0xff]  ;;  %v18185_v54 = vld [vmem:[#allocation250_spill] sm:$0xff]  ;;  %v10844_v36 = vld [vmem:[%s11300_s12 + $0x2d0] sm:$0xff] }
 0x602   : > { %v15161_v57 = vadd.f32 %v7233_v12, %v14921_v56  ;;  %v18186_v9 = vpack.c.bf16 %v18184_v6, %v18185_v54  ;;  %vm10462_vm0 = vmpackc.low %vm4720_vm14, %vm4704_vm13  ;;  %v18217_v12 = vld [vmem:[#allocation163_spill] sm:$0xff] }
 0x604   : > { %v2295_v37 = vpop.f32.mrf.mxu0  ;;  %10427 = vmatmul.msk.bf16.gmra.mxu2 %vm10426_vm3, %v17402_v33  ;;  %10443 = vmatmul.msk.bf16.gmra.mxu3 %vm10442_vm4, %v17402_v33  ;;  %vm5007_vm3 = vcmp.eq.s32.totalorder %v17874_v49, %v14924_v28  ;;  %vm4736_vm4 = vcmp.eq.s32.totalorder %v17956_v19, %v15179_v29 }
 0x605   : > { %7420 = vmatpush.bf16.msrb.mxu1 %v18176_v60  ;;  %v2296_v56 = vadd.f32 %v14834_v40, %v2295_v37  ;;  %v18187_v37 = vld [vmem:[#allocation257_spill] sm:$0xff]  ;;  %vm10448_vm6 = vmpackc.low %vm5007_vm3, %vm4991_vm2 }
 0x606   : > { %v18188_v60 = vld [vmem:[#allocation185_spill] sm:$0xff]  ;;  %vm10464_vm7 = vmpackc.low %vm4752_vm5, %vm4736_vm4 }
 0x607   : > { %9620 = vmatmul.msk.bf16.gmra.mxu0 %vm1492_vm1, %v10843_v32  ;;  %v7282_v41 = vpop.f32.mrf.mxu2  ;;  %v2692_v4 = vmax.f32 %v2296_v56, 0.0 }
 0x608   : > { %v15172_v26 = vadd.f32 %v7282_v41, %v14900_v2  ;;  %v18189_v41 = vpack.c.bf16 %v18187_v37, %v18188_v60  ;;  %v18198_v60 = vld [vmem:[#allocation247_spill] sm:$0xff] }
 0x609   : > { %7421 = vmatpush.bf16.msrb.mxu1 %v18177_v52  ;;  %v15198_v47 = vmul.f32 %v18181_v3, %v2692_v4  ;;  %v18190_v4 = vld [vmem:[#allocation186_spill] sm:$0xff] }
 0x60c   : > { %v2297_v44 = vpop.f32.mrf.mxu0 }
 0x60d   : > { %v2298_v27 = vadd.f32 %v14834_v40, %v2297_v44  ;;  %7422 = vmatpush.bf16.msrb.mxu1 %v18178_v61 }
 0x60f   : > { %v2693_v2 = vmax.f32 %v2298_v27, 0.0  ;;  %v15195_v1 = vpop.f32.mrf.mxu2  ;;  %v18191_v27 = vld [vmem:[#allocation47_spill] sm:$0xff] }
 0x610   : > { %18180 = vst [vmem:[#allocation88_spill] sm:$0xff] %v15195_v1  ;;  %v18192_v61 = vpack.c.bf16 %v18190_v4, %v18191_v27  ;;  %v10845_v4 = vld [vmem:[%s11300_s12 + $0x2d8] sm:$0xff] }
 0x611   : > { %v15201_v46 = vmul.f32 %v18182_v25, %v2693_v2  ;;  %7423 = vmatpush.bf16.msrb.mxu1 %v18183_v7 }
 0x614   : > { %v2300_v32 = vpop.f32.mrf.mxu0  ;;  %10445 = vmatmul.msk.bf16.gmra.mxu3 %vm10444_vm9, %v17402_v33  ;;  %10461 = vmatmul.msk.bf16.vlgmr.msrb.gmra.mxu1 %vm10460_vm10, %v17402_v33 }
 0x615   : > { %7683 = vmatpush.bf16.msra.mxu1 %v18186_v9  ;;  %v2301_v44 = vadd.f32 %v14834_v40, %v2300_v32  ;;  %v18197_v32 = vld [vmem:[#allocation248_spill] sm:$0xff] }
 0x617   : > { %9621 = vmatmul.msk.bf16.gmra.mxu0 %vm1492_vm1, %v10844_v36  ;;  %v7287_v5 = vpop.f32.mrf.mxu2  ;;  %v7336_v14 = vpop.f32.mrf.mxu3  ;;  %v2694_v3 = vmax.f32 %v2301_v44, 0.0 }
 0x618   : > { %v15219_v56 = vadd.f32 %v7287_v5, %v14950_v48  ;;  %v15222_v52 = vadd.f32 %v7336_v14, %v14959_v45  ;;  %v18193_v48 = vld [vmem:[#allocation108_spill] sm:$0xff]  ;;  %v18194_v45 = vld [vmem:[#allocation194_spill] sm:$0xff] }
 0x619   : > { %7684 = vmatpush.bf16.msra.mxu1 %v18189_v41  ;;  %v18195_v7 = vpack.c.bf16 %v18193_v48, %v18194_v45  ;;  %v15246_v37 = vmul.f32 %v18197_v32, %v2694_v3  ;;  %v18199_v5 = vld [vmem:[#allocation196_spill] sm:$0xff]  ;;  %v18200_v14 = vld [vmem:[#allocation106_spill] sm:$0xff] }
 0x61a   : > { %v18201_v44 = vpack.c.bf16 %v18199_v5, %v18200_v14  ;;  %v18206_v32 = vld [vmem:[#allocation206_spill] sm:$0xff] }
 0x61c   : > { %v2302_v2 = vpop.f32.mrf.mxu0 }
 0x61d   : > { %7685 = vmatpush.bf16.msra.mxu1 %v18192_v61  ;;  %v2303_v25 = vadd.f32 %v14834_v40, %v2302_v2  ;;  %v18203_v2 = vld [vmem:[#allocation96_spill] sm:$0xff] }
 0x61f   : > { %v2695_v6 = vmax.f32 %v2303_v25, 0.0  ;;  %v15240_v54 = vpop.f32.mrf.mxu2  ;;  %v7338_v9 = vpop.f32.mrf.mxu3 }
 0x620   : > { %18196 = vst [vmem:[#allocation87_spill] sm:$0xff] %v15240_v54  ;;  %v15243_v36 = vadd.f32 %v7338_v9, %v14974_v63  ;;  %v18202_v63 = vld [vmem:[#allocation100_spill] sm:$0xff]  ;;  %v18205_v9 = vld [vmem:[#allocation101_spill] sm:$0xff] }
 0x621   : > { %7686 = vmatpush.bf16.msra.mxu1 %v18195_v7  ;;  %v15249_v41 = vmul.f32 %v18198_v60, %v2695_v6  ;;  %v18204_v3 = vpack.c.bf16 %v18202_v63, %v18203_v2  ;;  %v18207_v60 = vpack.c.bf16 %v18205_v9, %v18206_v32  ;;  %v18209_v63 = vld [vmem:[#allocation239_spill] sm:$0xff] }
 0x624   : > { %v2305_v61 = vpop.f32.mrf.mxu0  ;;  %10447 = vmatmul.msk.bf16.gmra.mxu3 %vm10446_vm15, %v17402_v33  ;;  %10463 = vmatmul.msk.bf16.gmra.mxu1 %vm10462_vm0, %v17402_v33  ;;  %vm5071_vm15 = vcmp.eq.s32.totalorder %v18222_v8, %v14924_v28 }
 0x625   : > { %7687 = vmatpush.bf16.msra.mxu1 %v18201_v44  ;;  %v2306_v6 = vadd.f32 %v14834_v40, %v2305_v61 }
 0x627   : > { %9622 = vmatmul.msk.bf16.gmra.mxu0 %vm1492_vm1, %v10845_v4  ;;  %v7292_v25 = vpop.f32.mrf.mxu2  ;;  %v7341_v48 = vpop.f32.mrf.mxu3  ;;  %v2696_v14 = vmax.f32 %v2306_v6, 0.0  ;;  %v18219_v6 = vld [vmem:[#allocation161_spill] sm:$0xff] }
 0x628   : > { %v15264_v45 = vadd.f32 %v7292_v25, %v14983_v51  ;;  %v15267_v7 = vadd.f32 %v7341_v48, %v14992_v50  ;;  %v10846_v48 = vld [vmem:[%s11300_s12 + $0x2e0] sm:$0xff] }
 0x629   : > { %7688 = vmatpush.bf16.msra.mxu1 %v18204_v3  ;;  %v15288_v2 = vmul.f32 %v18209_v63, %v2696_v14  ;;  %v18210_v3 = vld [vmem:[#allocation243_spill] sm:$0xff] }
 0x62c   : > { %v2307_v5 = vpop.f32.mrf.mxu0 }
 0x62d   : > { %7689 = vmatpush.bf16.msra.mxu1 %v18207_v60  ;;  %v2308_v44 = vadd.f32 %v14834_v40, %v2307_v5 }
 0x62f   : > { %v2697_v51 = vmax.f32 %v2308_v44, 0.0  ;;  %v15282_v50 = vpop.f32.mrf.mxu2  ;;  %v7343_v4 = vpop.f32.mrf.mxu3  ;;  %v18211_v44 = vld [vmem:[#allocation223_spill] sm:$0xff] }
 0x630   : > { %18208 = vst [vmem:[#allocation263_spill] sm:$0xff] %v15282_v50  ;;  %v15285_v61 = vadd.f32 %v7343_v4, %v15007_v31  ;;  %vm5039_vm9 = vcmp.eq.s32.totalorder %v18211_v44, %v14924_v28  ;;  %v18213_v4 = vld [vmem:[#allocation156_spill] sm:$0xff]  ;;  %v18243_v44 = vld [vmem:[#allocation255_spill] sm:$0xff] }
 0x631   : > { %v15291_v25 = vmul.f32 %v18210_v3, %v2697_v51  ;;  %v18212_v51 = vld [vmem:[#allocation155_spill] sm:$0xff]  ;;  %vm4784_vm11 = vcmp.eq.s32.totalorder %v18213_v4, %v15179_v29  ;;  %v18215_v3 = vld [vmem:[#allocation29_spill] sm:$0xff]  ;;  %vm10450_vm12 = vmpackc.low %vm5039_vm9, %vm5023_vm8 }
 0x632   : > { %vm4768_vm10 = vcmp.eq.s32.totalorder %v18212_v51, %v15179_v29 }
 0x633   : > { %vm10466_vm13 = vmpackc.low %vm4784_vm11, %vm4768_vm10 }
 0x634   : > { %v15296_v9 = vpop.f32.mrf.mxu0  ;;  %10449 = vmatmul.msk.bf16.gmra.mxu3 %vm10448_vm6, %v17402_v33  ;;  %10465 = vmatmul.msk.bf16.gmra.mxu1 %vm10464_vm7, %v17402_v33 }
 0x637   : > { %9623 = vmatmul.msk.bf16.gmra.mxu0 %vm1492_vm1, %v10846_v48  ;;  %v7297_v31 = vpop.f32.mrf.mxu2  ;;  %v7346_v32 = vpop.f32.mrf.mxu3  ;;  %v10847_v48 = vld [vmem:[%s11300_s12 + $0x2e8] sm:$0xff] }
 0x638   : > { %v15302_v60 = vadd.f32 %v7297_v31, %v15016_v13  ;;  %v15305_v5 = vadd.f32 %v7346_v32, %v15027_v42 }
 0x63c   : > { %v15307_v14 = vpop.f32.mrf.mxu0 }
 0x63f   : > { %v15317_v63 = vpop.f32.mrf.mxu2  ;;  %v7348_v13 = vpop.f32.mrf.mxu3 }
 0x640   : > { %18214 = vst [vmem:[#allocation26_spill] sm:$0xff] %v15317_v63  ;;  %v15320_v42 = vadd.f32 %v7348_v13, %v18215_v3  ;;  %v18221_v3 = vld [vmem:[#allocation234_spill] sm:$0xff]  ;;  %v18223_v63 = vld [vmem:[#allocation165_spill] sm:$0xff] }
 0x641   : > { %vm5055_vm14 = vcmp.eq.s32.totalorder %v18221_v3, %v14924_v28  ;;  %vm4800_vm0 = vcmp.eq.s32.totalorder %v18223_v63, %v15179_v29  ;;  %v18233_v3 = vld [vmem:[#allocation246_spill] sm:$0xff] }
 0x642   : > { %18216 = vst [vmem:[#allocation67_spill] sm:$0xff] %v15320_v42  ;;  %vm10452_vm3 = vmpackc.low %vm5071_vm15, %vm5055_vm14  ;;  %vm5103_vm6 = vcmp.eq.s32.totalorder %v18233_v3, %v14924_v28 }
 0x644   : > { %v2315_v31 = vpop.f32.mrf.mxu0  ;;  %10451 = vmatmul.msk.bf16.gmra.mxu3 %vm10450_vm12, %v17402_v33  ;;  %10467 = vmatmul.msk.bf16.gmra.mxu1 %vm10466_vm13, %v17402_v33  ;;  %vm5135_vm12 = vcmp.eq.s32.totalorder %v18243_v44, %v14924_v28  ;;  %v18248_v44 = vld [vmem:[#allocation226_spill] sm:$0xff] }
 0x647   : > { %9624 = vmatmul.msk.bf16.gmra.mxu0 %vm1492_vm1, %v10847_v48  ;;  %v7302_v32 = vpop.f32.mrf.mxu2  ;;  %v7351_v20 = vpop.f32.mrf.mxu3  ;;  %v18224_v48 = vld [vmem:[#allocation166_spill] sm:$0xff] }
 0x648   : > { %v15327_v27 = vadd.f32 %v7302_v32, %v18217_v12  ;;  %v15330_v21 = vadd.f32 %v7351_v20, %v18219_v6  ;;  %vm4816_vm2 = vcmp.eq.s32.totalorder %v18224_v48, %v15179_v29  ;;  %v18226_v32 = vld [vmem:[#allocation167_spill] sm:$0xff]  ;;  %v10848_v20 = vld [vmem:[%s11300_s12 + $0x2f0] sm:$0xff]  ;;  %v18228_v48 = vld [vmem:[#allocation168_spill] sm:$0xff] }
 0x649   : > { %vm10468_vm4 = vmpackc.low %vm4816_vm2, %vm4800_vm0  ;;  %vm5167_vm2 = vcmp.eq.s32.totalorder %v17986_v30, %v14924_v28 }
 0x64a   : > { %18218 = vst [vmem:[#allocation81_spill] sm:$0xff] %v15327_v27 }
 0x64b   : > { %18220 = vst [vmem:[#allocation84_spill] sm:$0xff] %v15330_v21  ;;  %v18242_v21 = vld [vmem:[#allocation254_spill] sm:$0xff] }
 0x64c   : > { %v2317_v13 = vpop.f32.mrf.mxu0  ;;  %vm5119_vm11 = vcmp.eq.s32.totalorder %v18242_v21, %v14924_v28 }
 0x64d   : > { %vm10456_vm15 = vmpackc.low %vm5135_vm12, %vm5119_vm11 }
 0x64f   : > { %v15340_v50 = vpop.f32.mrf.mxu2  ;;  %v7353_v12 = vpop.f32.mrf.mxu3 }
 0x650   : > { %18225 = vst [vmem:[#allocation208_spill] sm:$0xff] %v15340_v50  ;;  %v15343_v54 = vadd.f32 %v7353_v12, %v18226_v32  ;;  %v18230_v50 = vld [vmem:[#allocation91_spill] sm:$0xff]  ;;  %v18232_v32 = vld [vmem:[#allocation62_spill] sm:$0xff] }
 0x651   : > { %vm5087_vm5 = vcmp.eq.s32.totalorder %v18232_v32, %v14924_v28 }
 0x652   : > { %18227 = vst [vmem:[#allocation78_spill] sm:$0xff] %v15343_v54  ;;  %v18234_v54 = vld [vmem:[#allocation175_spill] sm:$0xff]  ;;  %vm10454_vm9 = vmpackc.low %vm5103_vm6, %vm5087_vm5 }
 0x653   : > { %vm4832_vm7 = vcmp.eq.s32.totalorder %v18234_v54, %v15179_v29  ;;  %v18238_v54 = vld [vmem:[#allocation25_spill] sm:$0xff] }
 0x654   : > { %v2320_v6 = vpop.f32.mrf.mxu0  ;;  %10453 = vmatmul.msk.bf16.gmra.mxu3 %vm10452_vm3, %v17402_v33  ;;  %10469 = vmatmul.msk.bf16.gmra.mxu1 %vm10468_vm4, %v17402_v33  ;;  %vm4896_vm3 = vcmp.eq.s32.totalorder %v17831_v62, %v15179_v29  ;;  %vm4912_vm4 = vcmp.eq.s32.totalorder %v17832_v59, %v15179_v29 }
 0x655   : > { %v2321_v4 = vadd.f32 %v14834_v40, %v2320_v6  ;;  %vm10474_vm6 = vmpackc.low %vm4912_vm4, %vm4896_vm3  ;;  %vm4992_vm3 = vcmp.eq.s32.totalorder %v17873_v11, %v15179_v29  ;;  %vm5008_vm4 = vcmp.eq.s32.totalorder %v17874_v49, %v15179_v29  ;;  %v18312_v49 = vld [vmem:[#allocation45_spill] sm:$0xff] }
 0x657   : > { %9625 = vmatmul.msk.bf16.gmra.mxu0 %vm1492_vm1, %v10848_v20  ;;  %v7307_v1 = vpop.f32.mrf.mxu2  ;;  %v7356_v18 = vpop.f32.mrf.mxu3  ;;  %v18235_v20 = vld [vmem:[#allocation176_spill] sm:$0xff] }
 0x658   : > { %v15350_v63 = vadd.f32 %v7307_v1, %v18228_v48  ;;  %v15353_v8 = vadd.f32 %v7356_v18, %v18230_v50  ;;  %vm4848_vm8 = vcmp.eq.s32.totalorder %v18235_v20, %v15179_v29  ;;  %v10849_v18 = vld [vmem:[%s11300_s12 + $0x2f8] sm:$0xff]  ;;  %v18240_v20 = vld [vmem:[#allocation85_spill] sm:$0xff] }
 0x659   : > { %vm10470_vm10 = vmpackc.low %vm4848_vm8, %vm4832_vm7  ;;  %vm4928_vm7 = vcmp.eq.s32.totalorder %v17843_v39, %v15179_v29  ;;  %vm4944_vm8 = vcmp.eq.s32.totalorder %v17844_v38, %v15179_v29 }
 0x65a   : > { %18229 = vst [vmem:[#allocation79_spill] sm:$0xff] %v15350_v63  ;;  %vm10476_vm11 = vmpackc.low %vm4944_vm8, %vm4928_vm7 }
 0x65b   : > { %18231 = vst [vmem:[#allocation278_spill] sm:$0xff] %v15353_v8  ;;  %vm10480_vm7 = vmpackc.low %vm5008_vm4, %vm4992_vm3 }
 0x65c   : > { %v2322_v12 = vpop.f32.mrf.mxu0 }
 0x65f   : > { %v15363_v27 = vpop.f32.mrf.mxu2  ;;  %v15365_v1 = vpop.f32.mrf.mxu3 }
 0x660   : > { %18236 = vst [vmem:[#allocation99_spill] sm:$0xff] %v15363_v27 }
 0x661   : > { %18237 = vst [vmem:[#allocation64_spill] sm:$0xff] %v15365_v1  ;;  %v2323_v1 = vadd.f32 %v14834_v40, %v2322_v12  ;;  %v2318_v12 = vadd.f32 %v14834_v40, %v2317_v13  ;;  %v18250_v13 = vld [vmem:[#allocation231_spill] sm:$0xff] }
 0x664   : > { %v2325_v50 = vpop.f32.mrf.mxu0  ;;  %10455 = vmatmul.msk.bf16.gmra.mxu3 %vm10454_vm9, %v17402_v33  ;;  %10471 = vmatmul.msk.bf16.gmra.mxu1 %vm10470_vm10, %v17402_v33 }
 0x665   : > { %v2326_v27 = vadd.f32 %v14834_v40, %v2325_v50 }
 0x667   : > { %9626 = vmatmul.msk.bf16.gmra.mxu0 %vm1492_vm1, %v10849_v18  ;;  %v7312_v48 = vpop.f32.mrf.mxu2  ;;  %v7361_v3 = vpop.f32.mrf.mxu3  ;;  %v2704_v51 = vmax.f32 %v2326_v27, 0.0  ;;  %v2702_v27 = vmax.f32 %v2321_v4, 0.0 }
 0x668   : > { %v15372_v32 = vadd.f32 %v7312_v48, %v18238_v54  ;;  %v15375_v63 = vadd.f32 %v7361_v3, %v18240_v20  ;;  %v18244_v54 = vld [vmem:[#allocation183_spill] sm:$0xff]  ;;  %v18245_v3 = vld [vmem:[#allocation184_spill] sm:$0xff]  ;;  %v2703_v20 = vmax.f32 %v2323_v1, 0.0 }
 0x669   : > { %vm4864_vm13 = vcmp.eq.s32.totalorder %v18244_v54, %v15179_v29  ;;  %vm4880_vm14 = vcmp.eq.s32.totalorder %v18245_v3, %v15179_v29  ;;  %v4496_v21 = vmul.f32 %v18248_v44, %v2704_v51  ;;  %v2313_v3 = vadd.f32 %v14834_v40, %v15307_v14  ;;  %v18251_v51 = vld [vmem:[#allocation227_spill] sm:$0xff] }
 0x66a   : > { %18239 = vst [vmem:[#allocation272_spill] sm:$0xff] %v15372_v32  ;;  %v18249_v32 = vld [vmem:[#allocation225_spill] sm:$0xff]  ;;  %vm10472_vm0 = vmpackc.low %vm4880_vm14, %vm4864_vm13  ;;  %v4495_v1 = vmul.f32 %v18250_v13, %v2703_v20  ;;  %v4494_v4 = vmul.f32 %v18251_v51, %v2702_v27  ;;  %v18253_v13 = vld [vmem:[#allocation230_spill] sm:$0xff]  ;;  %vm4960_vm13 = vcmp.eq.s32.totalorder %v17858_v23, %v15179_v29  ;;  %vm4976_vm14 = vcmp.eq.s32.totalorder %v17859_v55, %v15179_v29 }
 0x66b   : > { %18241 = vst [vmem:[#allocation280_spill] sm:$0xff] %v15375_v63  ;;  %v2701_v63 = vmax.f32 %v2318_v12, 0.0  ;;  %v18255_v51 = vld [vmem:[#allocation238_spill] sm:$0xff] }
 0x66c   : > { %v2327_v8 = vpop.f32.mrf.mxu0 }
 0x66d   : > { %v2328_v18 = vadd.f32 %v14834_v40, %v2327_v8  ;;  %v2316_v8 = vadd.f32 %v14834_v40, %v2315_v31  ;;  %v2699_v31 = vmax.f32 %v2313_v3, 0.0  ;;  %v18254_v3 = vld [vmem:[#allocation237_spill] sm:$0xff] }
 0x66f   : > { %v2705_v50 = vmax.f32 %v2328_v18, 0.0  ;;  %v15390_v48 = vpop.f32.mrf.mxu2  ;;  %v15392_v6 = vpop.f32.mrf.mxu3  ;;  %v2700_v44 = vmax.f32 %v2316_v8, 0.0 }
 0x670   : > { %18246 = vst [vmem:[#allocation57_spill] sm:$0xff] %v15390_v48  ;;  %v2311_v48 = vadd.f32 %v14834_v40, %v15296_v9 }
 0x671   : > { %18247 = vst [vmem:[#allocation53_spill] sm:$0xff] %v15392_v6  ;;  %v4497_v54 = vmul.f32 %v18249_v32, %v2705_v50  ;;  %v18252_v32 = vld [vmem:[#allocation232_spill] sm:$0xff]  ;;  %v4492_v8 = vmul.f32 %v18253_v13, %v2700_v44  ;;  %v18257_v44 = vld [vmem:[#allocation151_spill] sm:$0xff] }
 0x672   : > { %v4493_v14 = vmul.f32 %v18252_v32, %v2701_v63  ;;  %v2698_v20 = vmax.f32 %v2311_v48, 0.0 }
 0x673   : > { %v6574_v18 = vpack.c.bf16 %v4497_v54, %v4496_v21  ;;  %v6573_v54 = vpack.c.bf16 %v4495_v1, %v4494_v4 }
 0x674   : > { %v2330_v6 = vpop.f32.mrf.mxu0  ;;  %10457 = vmatmul.msk.bf16.gmra.mxu3 %vm10456_vm15, %v17402_v33  ;;  %10473 = vmatmul.msk.bf16.gmra.mxu1 %vm10472_vm0, %v17402_v33  ;;  %v6572_v63 = vpack.c.bf16 %v4493_v14, %v4492_v8  ;;  %v15450_v8 = vpop.f32.mrf.mxu1 }
 0x675   : > { %7505 = vmatpush.bf16.msra.mxu2 %v6574_v18  ;;  %v2331_v27 = vadd.f32 %v14834_v40, %v2330_v6  ;;  %v4491_v18 = vmul.f32 %v18254_v3, %v2699_v31  ;;  %v18258_v31 = vld [vmem:[#allocation153_spill] sm:$0xff]  ;;  %18260 = vst [vmem:[#allocation69_spill] sm:$0xff] %v15450_v8  ;;  %v18261_v3 = vpack.c.bf16 %v15249_v41, %v15246_v37  ;;  %v18289_v8 = vld [vmem:[#allocation156_spill] sm:$0xff] }
 0x676   : > { %v18263_v37 = vld [vmem:[#allocation149_spill] sm:$0xff] }
 0x677   : > { %9627 = vmatmul.msk.bf16.gmra.mxu0 %vm1492_vm1, %v10850_v22  ;;  %v7317_v12 = vpop.f32.mrf.mxu2  ;;  %v7366_v21 = vpop.f32.mrf.mxu3  ;;  %v4490_v22 = vmul.f32 %v18255_v51, %v2698_v20  ;;  %v2706_v42 = vmax.f32 %v2331_v27, 0.0  ;;  %vm5151_vm1 = vcmp.eq.s32.totalorder %v17985_v24, %v14924_v28  ;;  %v18288_v28 = vld [vmem:[#allocation155_spill] sm:$0xff] }
 0x678   : > { %v15409_v9 = vadd.f32 %v7317_v12, %v15124_v17  ;;  %v15412_v50 = vadd.f32 %v7366_v21, %v15134_v10  ;;  %vm10458_vm5 = vmpackc.low %vm5167_vm2, %vm5151_vm1  ;;  %v18259_v21 = vpack.c.bf16 %v15291_v25, %v15288_v2 }
 0x679   : > { %7506 = vmatpush.bf16.msra.mxu2 %v6573_v54  ;;  %v6571_v1 = vpack.c.bf16 %v4491_v18, %v4490_v22  ;;  %v15432_v4 = vmul.f32 %v18257_v44, %v2706_v42  ;;  %v15457_v18 = vperm.slane %v14912_v15, 2  ;;  %v18265_v22 = vpack.c.bf16 %v15157_v0, %v15154_v16  ;;  %v18267_v44 = vld [vmem:[#allocation199_spill] sm:$0xff]  ;;  %vm10478_vm1 = vmpackc.low %vm4976_vm14, %vm4960_vm13 }
 0x67b   : > { %vm4673_vm9 = vcmp.eq.s32.totalorder %v17828_v34, %v15457_v18  ;;  %vm4689_vm10 = vcmp.eq.s32.totalorder %v17829_v58, %v15457_v18  ;;  %vm4705_vm15 = vcmp.eq.s32.totalorder %v17948_v35, %v15457_v18  ;;  %vm4721_vm0 = vcmp.eq.s32.totalorder %v17949_v53, %v15457_v18 }
 0x67c   : > { %v2332_v32 = vpop.f32.mrf.mxu0  ;;  %vm10492_vm12 = vmpackc.low %vm4689_vm10, %vm4673_vm9 }
 0x67d   : > { %v2333_v48 = vadd.f32 %v14834_v40, %v2332_v32  ;;  %7507 = vmatpush.bf16.msra.mxu2 %v6572_v63  ;;  %v18262_v63 = vpack.c.bf16 %v15201_v46, %v15198_v47  ;;  %v18264_v47 = vld [vmem:[#allocation152_spill] sm:$0xff]  ;;  %vm10494_vm2 = vmpackc.low %vm4721_vm0, %vm4705_vm15 }
 0x67f   : > { %v2707_v17 = vmax.f32 %v2333_v48, 0.0  ;;  %v15427_v10 = vpop.f32.mrf.mxu2  ;;  %v15429_v6 = vpop.f32.mrf.mxu3  ;;  %v18266_v48 = vld [vmem:[#allocation189_spill] sm:$0xff] }
 0x680   : > { %18256 = vst [vmem:[#allocation266_spill] sm:$0xff] %v15427_v10  ;;  %v18293_v10 = vld [vmem:[#allocation241_spill] sm:$0xff] }
 0x681   : > { %v15435_v14 = vmul.f32 %v18258_v31, %v2707_v17  ;;  %7508 = vmatpush.bf16.msra.mxu2 %v6571_v1 }
 0x684   : > { %v2335_v12 = vpop.f32.mrf.mxu0  ;;  %10459 = vmatmul.msk.bf16.gmra.mxu3 %vm10458_vm5, %v17402_v33  ;;  %10475 = vmatmul.msk.bf16.gmra.mxu1 %vm10474_vm6, %v17402_v33  ;;  %vm4737_vm5 = vcmp.eq.s32.totalorder %v17956_v19, %v15457_v18  ;;  %vm4753_vm6 = vcmp.eq.s32.totalorder %v17957_v43, %v15457_v18  ;;  %v18298_v43 = vld [vmem:[#allocation78_spill] sm:$0xff] }
 0x685   : > { %7509 = vmatpush.bf16.msra.mxu2 %v18259_v21  ;;  %v2336_v27 = vadd.f32 %v14834_v40, %v2335_v12  ;;  %v18268_v21 = vld [vmem:[#allocation205_spill] sm:$0xff]  ;;  %vm10496_vm8 = vmpackc.low %vm4753_vm6, %vm4737_vm5 }
 0x687   : > { %v7322_v54 = vpop.f32.mrf.mxu2  ;;  %v7371_v42 = vpop.f32.mrf.mxu3  ;;  %v2708_v25 = vmax.f32 %v2336_v27, 0.0 }
 0x688   : > { %v15445_v20 = vadd.f32 %v7322_v54, %v15161_v57  ;;  %v15448_v13 = vadd.f32 %v7371_v42, %v15172_v26  ;;  %v15462_v57 = vld [vmem:[%s17071_s8] ss:$0 sm:$0xff] }
 0x689   : > { %7510 = vmatpush.bf16.msra.mxu2 %v18261_v3  ;;  %v15479_v41 = vmul.f32 %v18263_v37, %v2708_v25 }
 0x68c   : > { %v2337_v2 = vpop.f32.mrf.mxu0 }
 0x68d   : > { %v2338_v26 = vadd.f32 %v15462_v57, %v2337_v2  ;;  %7511 = vmatpush.bf16.msra.mxu2 %v18262_v63  ;;  %v18270_v2 = vld [vmem:[#allocation148_spill] sm:$0xff] }
 0x68f   : > { %v2709_v40 = vmax.f32 %v2338_v26, 0.0  ;;  %v15476_v15 = vpop.f32.mrf.mxu3  ;;  %v18271_v26 = vld [vmem:[#allocation147_spill] sm:$0xff] }
 0x691   : > { %v15482_v46 = vmul.f32 %v18264_v47, %v2709_v40  ;;  %v7425_v51 = vpop.f32.mrf.mxu1  ;;  %7512 = vmatpush.bf16.msra.mxu2 %v18265_v22  ;;  %v18273_v47 = vld [vmem:[#allocation42_spill] sm:$0xff] }
 0x692   : > { %v15488_v32 = vadd.f32 %v7425_v51, %v15222_v52 }
 0x694   : > { %v2340_v1 = vpop.f32.mrf.mxu0  ;;  %10477 = vmatmul.msk.bf16.gmra.mxu1 %vm10476_vm11, %v17402_v33  ;;  %10493 = vmatmul.msk.bf16.vlgmr.msra.gmra.mxu2 %vm10492_vm12, %v17402_v33  ;;  %vm4769_vm11 = vcmp.eq.s32.totalorder %v18288_v28, %v15457_v18  ;;  %vm4785_vm12 = vcmp.eq.s32.totalorder %v18289_v8, %v15457_v18 }
 0x695   : > { %7772 = vmatpush.bf16.msrb.mxu2 %v18266_v48  ;;  %v2341_v0 = vadd.f32 %v15462_v57, %v2340_v1  ;;  %v18274_v1 = vld [vmem:[#allocation120_spill] sm:$0xff]  ;;  %vm10498_vm14 = vmpackc.low %vm4785_vm12, %vm4769_vm11 }
 0x697   : > { %v7376_v31 = vpop.f32.mrf.mxu3  ;;  %v2710_v42 = vmax.f32 %v2341_v0, 0.0 }
 0x698   : > { %v15497_v16 = vadd.f32 %v7376_v31, %v15219_v56  ;;  %v18269_v56 = vld [vmem:[#allocation38_spill] sm:$0xff] }
 0x699   : > { %7773 = vmatpush.bf16.msrb.mxu2 %v18267_v44  ;;  %v7427_v52 = vpop.f32.mrf.mxu1  ;;  %v15517_v25 = vmul.f32 %v18270_v2, %v2710_v42  ;;  %v18277_v42 = vld [vmem:[#allocation150_spill] sm:$0xff] }
 0x69a   : > { %v15501_v12 = vadd.f32 %v7427_v52, %v15243_v36 }
 0x69c   : > { %v2342_v54 = vpop.f32.mrf.mxu0 }
 0x69d   : > { %7774 = vmatpush.bf16.msrb.mxu2 %v18268_v21  ;;  %v2343_v27 = vadd.f32 %v15462_v57, %v2342_v54 }
 0x69f   : > { %v2711_v36 = vmax.f32 %v2343_v27, 0.0  ;;  %v15514_v3 = vpop.f32.mrf.mxu3 }
 0x6a1   : > { %7775 = vmatpush.bf16.msrb.mxu2 %v18269_v56  ;;  %v15520_v63 = vmul.f32 %v18271_v26, %v2711_v36  ;;  %v7430_v40 = vpop.f32.mrf.mxu1 }
 0x6a2   : > { %v15523_v37 = vadd.f32 %v7430_v40, %v15267_v7  ;;  %v18280_v40 = vld [vmem:[#allocation139_spill] sm:$0xff] }
 0x6a4   : > { %18272 = vst [vmem:[#allocation23_spill] sm:$0xff] %v15523_v37  ;;  %v2345_v22 = vpop.f32.mrf.mxu0  ;;  %10479 = vmatmul.msk.bf16.gmra.mxu1 %vm10478_vm1, %v17402_v33  ;;  %10495 = vmatmul.msk.bf16.gmra.mxu2 %vm10494_vm2, %v17402_v33  ;;  %v18315_v37 = vld [vmem:[#allocation64_spill] sm:$0xff] }
 0x6a5   : > { %7776 = vmatpush.bf16.msrb.mxu2 %v18273_v47  ;;  %v2346_v52 = vadd.f32 %v15462_v57, %v2345_v22 }
 0x6a7   : > { %v7381_v31 = vpop.f32.mrf.mxu3  ;;  %v2712_v36 = vmax.f32 %v2346_v52, 0.0 }
 0x6a8   : > { %v15532_v0 = vadd.f32 %v7381_v31, %v15264_v45  ;;  %v18278_v45 = vld [vmem:[#allocation154_spill] sm:$0xff] }
 0x6a9   : > { %7777 = vmatpush.bf16.msrb.mxu2 %v18274_v1  ;;  %v7432_v7 = vpop.f32.mrf.mxu1  ;;  %v15552_v22 = vmul.f32 %v18280_v40, %v2712_v36  ;;  %v18281_v31 = vld [vmem:[#allocation142_spill] sm:$0xff]  ;;  %v18284_v40 = vld [vmem:[#allocation67_spill] sm:$0xff]  ;;  %v18334_v1 = vld [vmem:[#allocation53_spill] sm:$0xff] }
 0x6aa   : > { %18275 = vst [vmem:[#allocation130_spill] sm:$0xff] %v15532_v0  ;;  %v15536_v54 = vadd.f32 %v7432_v7, %v15285_v61 }
 0x6ac   : > { %18276 = vst [vmem:[#allocation36_spill] sm:$0xff] %v15536_v54  ;;  %v2347_v27 = vpop.f32.mrf.mxu0 }
 0x6ad   : > { %7778 = vmatpush.bf16.msrb.mxu2 %v18277_v42  ;;  %v2348_v2 = vadd.f32 %v15462_v57, %v2347_v27 }
 0x6af   : > { %v2713_v61 = vmax.f32 %v2348_v2, 0.0  ;;  %v15549_v26 = vpop.f32.mrf.mxu3 }
 0x6b0   : > { %18279 = vst [vmem:[#allocation180_spill] sm:$0xff] %v15549_v26  ;;  %v18321_v26 = vld [vmem:[#allocation246_spill] sm:$0xff] }
 0x6b1   : > { %7779 = vmatpush.bf16.msrb.mxu2 %v18278_v45  ;;  %v15555_v52 = vmul.f32 %v18281_v31, %v2713_v61  ;;  %v7435_v7 = vpop.f32.mrf.mxu1  ;;  %v18303_v45 = vld [vmem:[#allocation165_spill] sm:$0xff]  ;;  %vm5104_vm6 = vcmp.eq.s32.totalorder %v18321_v26, %v15179_v29  ;;  %v18331_v26 = vld [vmem:[#allocation19_spill] sm:$0xff] }
 0x6b2   : > { %v15558_v27 = vadd.f32 %v7435_v7, %v15305_v5  ;;  %v18286_v5 = vld [vmem:[#allocation222_spill] sm:$0xff]  ;;  %v18287_v7 = vld [vmem:[#allocation223_spill] sm:$0xff]  ;;  %vm4801_vm1 = vcmp.eq.s32.totalorder %v18303_v45, %v15457_v18 }
 0x6b3   : > { %vm5024_vm9 = vcmp.eq.s32.totalorder %v18286_v5, %v15179_v29  ;;  %vm5040_vm10 = vcmp.eq.s32.totalorder %v18287_v7, %v15179_v29  ;;  %v18295_v7 = vld [vmem:[#allocation33_spill] sm:$0xff] }
 0x6b4   : > { %18282 = vst [vmem:[#allocation271_spill] sm:$0xff] %v15558_v27  ;;  %v15562_v17 = vpop.f32.mrf.mxu0  ;;  %10481 = vmatmul.msk.bf16.gmra.mxu1 %vm10480_vm7, %v17402_v33  ;;  %10497 = vmatmul.msk.bf16.gmra.mxu2 %vm10496_vm8, %v17402_v33  ;;  %vm10482_vm13 = vmpackc.low %vm5040_vm10, %vm5024_vm9 }
 0x6b7   : > { %v7386_v2 = vpop.f32.mrf.mxu3 }
 0x6b8   : > { %v15567_v36 = vadd.f32 %v7386_v2, %v15302_v60 }
 0x6b9   : > { %v7437_v61 = vpop.f32.mrf.mxu1 }
 0x6ba   : > { %18283 = vst [vmem:[#allocation277_spill] sm:$0xff] %v15567_v36  ;;  %v15570_v31 = vadd.f32 %v7437_v61, %v18284_v40  ;;  %v18291_v61 = vld [vmem:[#allocation84_spill] sm:$0xff]  ;;  %v18296_v36 = vld [vmem:[#allocation81_spill] sm:$0xff] }
 0x6bc   : > { %18285 = vst [vmem:[#allocation48_spill] sm:$0xff] %v15570_v31  ;;  %v15572_v51 = vpop.f32.mrf.mxu0  ;;  %v18294_v31 = vld [vmem:[#allocation110_spill] sm:$0xff] }
 0x6bd   : > { %v6736_v5 = vadd.f32 %v18294_v31, %v18293_v10  ;;  %v18301_v10 = vld [vmem:[#allocation234_spill] sm:$0xff]  ;;  %v18302_v31 = vld [vmem:[#allocation235_spill] sm:$0xff] }
 0x6be   : > { %vm5056_vm15 = vcmp.eq.s32.totalorder %v18301_v10, %v15179_v29  ;;  %vm5072_vm0 = vcmp.eq.s32.totalorder %v18302_v31, %v15179_v29  ;;  %v18310_v10 = vld [vmem:[#allocation253_spill] sm:$0xff]  ;;  %v18311_v31 = vld [vmem:[#allocation44_spill] sm:$0xff] }
 0x6bf   : > { %v15582_v60 = vpop.f32.mrf.mxu3  ;;  %v6825_v8 = vadd.f32 %v18295_v7, %v6736_v5  ;;  %v18304_v5 = vld [vmem:[#allocation166_spill] sm:$0xff]  ;;  %vm10484_vm3 = vmpackc.low %vm5072_vm0, %vm5056_vm15 }
 0x6c0   : > { %18290 = vst [vmem:[#allocation217_spill] sm:$0xff] %v15582_v60  ;;  %vm4817_vm2 = vcmp.eq.s32.totalorder %v18304_v5, %v15457_v18  ;;  %v18313_v5 = vld [vmem:[#allocation134_spill] sm:$0xff] }
 0x6c1   : > { %v7440_v2 = vpop.f32.mrf.mxu1  ;;  %vm10500_vm4 = vmpackc.low %vm4817_vm2, %vm4801_vm1  ;;  %vm5152_vm1 = vcmp.eq.s32.totalorder %v17985_v24, %v15179_v29  ;;  %vm5168_vm2 = vcmp.eq.s32.totalorder %v17986_v30, %v15179_v29 }
 0x6c2   : > { %v15585_v40 = vadd.f32 %v7440_v2, %v18291_v61  ;;  %v18300_v2 = vld [vmem:[#allocation90_spill] sm:$0xff] }
 0x6c3   : > { %v6914_v61 = vadd.f32 %v18300_v2, %v6825_v8  ;;  %v18307_v8 = vld [vmem:[#allocation214_spill] sm:$0xff] }
 0x6c4   : > { %18292 = vst [vmem:[#allocation59_spill] sm:$0xff] %v15585_v40  ;;  %v15589_v27 = vpop.f32.mrf.mxu0  ;;  %10483 = vmatmul.msk.bf16.gmra.mxu1 %vm10482_vm13, %v17402_v33  ;;  %10499 = vmatmul.msk.bf16.gmra.mxu2 %vm10498_vm14, %v17402_v33  ;;  %v18308_v2 = vld [vmem:[#allocation278_spill] sm:$0xff] }
 0x6c7   : > { %v7391_v28 = vpop.f32.mrf.mxu3 }
 0x6c8   : > { %v15595_v60 = vadd.f32 %v7391_v28, %v18296_v36  ;;  %v18306_v36 = vld [vmem:[#allocation24_spill] sm:$0xff] }
 0x6c9   : > { %v7442_v54 = vpop.f32.mrf.mxu1 }
 0x6ca   : > { %18297 = vst [vmem:[#allocation61_spill] sm:$0xff] %v15595_v60  ;;  %v15598_v19 = vadd.f32 %v7442_v54, %v18298_v43  ;;  %v7003_v43 = vadd.f32 %v18306_v36, %v6914_v61  ;;  %v6741_v60 = vadd.f32 %v18311_v31, %v18310_v10  ;;  %v18319_v10 = vld [vmem:[#allocation273_spill] sm:$0xff] }
 0x6cc   : > { %18299 = vst [vmem:[#allocation68_spill] sm:$0xff] %v15598_v19  ;;  %v2357_v40 = vpop.f32.mrf.mxu0  ;;  %v7092_v7 = vadd.f32 %v18307_v8, %v7003_v43  ;;  %v18316_v8 = vld [vmem:[#allocation79_spill] sm:$0xff] }
 0x6ce   : > { %v7181_v45 = vadd.f32 %v18312_v49, %v7092_v7  ;;  %v18320_v7 = vld [vmem:[#allocation62_spill] sm:$0xff] }
 0x6cf   : > { %v15609_v28 = vpop.f32.mrf.mxu3  ;;  %vm5088_vm5 = vcmp.eq.s32.totalorder %v18320_v7, %v15179_v29 }
 0x6d0   : > { %18305 = vst [vmem:[#allocation65_spill] sm:$0xff] %v15609_v28  ;;  %v7270_v61 = vadd.f32 %v18313_v5, %v7181_v45  ;;  %v18314_v28 = vld [vmem:[#allocation265_spill] sm:$0xff]  ;;  %v18322_v45 = vld [vmem:[#allocation175_spill] sm:$0xff]  ;;  %v18325_v5 = vld [vmem:[#allocation60_spill] sm:$0xff] }
 0x6d1   : > { %v7445_v54 = vpop.f32.mrf.mxu1  ;;  %v6830_v42 = vadd.f32 %v18314_v28, %v6741_v60  ;;  %vm4833_vm7 = vcmp.eq.s32.totalorder %v18322_v45, %v15457_v18  ;;  %vm10486_vm9 = vmpackc.low %vm5104_vm6, %vm5088_vm5 }
 0x6d2   : > { %v15614_v19 = vadd.f32 %v7445_v54, %v18308_v2  ;;  %v7359_v43 = vadd.f32 %v18315_v37, %v7270_v61  ;;  %v18323_v37 = vld [vmem:[#allocation176_spill] sm:$0xff]  ;;  %vm10490_vm5 = vmpackc.low %vm5168_vm2, %vm5152_vm1  ;;  %vm4977_vm1 = vcmp.eq.s32.totalorder %v17859_v55, %v15457_v18 }
 0x6d3   : > { %v6919_v49 = vadd.f32 %v18319_v10, %v6830_v42  ;;  %vm4849_vm8 = vcmp.eq.s32.totalorder %v18323_v37, %v15457_v18  ;;  %v18326_v42 = vld [vmem:[#allocation144_spill] sm:$0xff]  ;;  %v18330_v10 = vld [vmem:[#allocation34_spill] sm:$0xff] }
 0x6d4   : > { %18309 = vst [vmem:[#allocation71_spill] sm:$0xff] %v15614_v19  ;;  %v2360_v11 = vpop.f32.mrf.mxu0  ;;  %10485 = vmatmul.msk.bf16.gmra.mxu1 %vm10484_vm3, %v17402_v33  ;;  %10501 = vmatmul.msk.bf16.gmra.mxu2 %vm10500_vm4, %v17402_v33  ;;  %vm10502_vm10 = vmpackc.low %vm4849_vm8, %vm4833_vm7  ;;  %v18332_v37 = vld [vmem:[#allocation92_spill] sm:$0xff]  ;;  %vm4897_vm3 = vcmp.eq.s32.totalorder %v17831_v62, %v15457_v18  ;;  %vm4913_vm4 = vcmp.eq.s32.totalorder %v17832_v59, %v15457_v18 }
 0x6d5   : > { %v7008_v28 = vadd.f32 %v18325_v5, %v6919_v49  ;;  %vm10506_vm6 = vmpackc.low %vm4913_vm4, %vm4897_vm3  ;;  %vm4929_vm7 = vcmp.eq.s32.totalorder %v17843_v39, %v15457_v18  ;;  %vm4945_vm8 = vcmp.eq.s32.totalorder %v17844_v38, %v15457_v18 }
 0x6d7   : > { %v7396_v36 = vpop.f32.mrf.mxu3 }
 0x6d8   : > { %v15625_v54 = vadd.f32 %v7396_v36, %v18316_v8  ;;  %v7097_v36 = vadd.f32 %v18326_v42, %v7008_v28  ;;  %v18335_v42 = vld [vmem:[#allocation272_spill] sm:$0xff] }
 0x6d9   : > { %v7447_v2 = vpop.f32.mrf.mxu1 }
 0x6da   : > { %18317 = vst [vmem:[#allocation72_spill] sm:$0xff] %v15625_v54  ;;  %v15627_v19 = vadd.f32 %v7447_v2, %v7359_v43  ;;  %v18327_v43 = vld [vmem:[#allocation280_spill] sm:$0xff]  ;;  %v7186_v45 = vadd.f32 %v18331_v26, %v7097_v36  ;;  %v18338_v36 = vld [vmem:[#allocation279_spill] sm:$0xff] }
 0x6db   : > { %v18329_v2 = vld [vmem:[#allocation188_spill] sm:$0xff] }
 0x6dc   : > { %18318 = vst [vmem:[#allocation77_spill] sm:$0xff] %v15627_v19  ;;  %v2362_v31 = vpop.f32.mrf.mxu0  ;;  %v6746_v19 = vadd.f32 %v18330_v10, %v18329_v2  ;;  %v7275_v49 = vadd.f32 %v18332_v37, %v7186_v45  ;;  %v18339_v45 = vld [vmem:[#allocation254_spill] sm:$0xff] }
 0x6dd   : > { %v2363_v26 = vadd.f32 %v15462_v57, %v2362_v31  ;;  %vm5120_vm11 = vcmp.eq.s32.totalorder %v18339_v45, %v15179_v29  ;;  %v18350_v45 = vld [vmem:[#allocation122_spill] sm:$0xff] }
 0x6de   : > { %v7364_v28 = vadd.f32 %v18334_v1, %v7275_v49  ;;  %v18342_v49 = vld [vmem:[#allocation184_spill] sm:$0xff] }
 0x6df   : > { %v15638_v60 = vpop.f32.mrf.mxu3  ;;  %vm4881_vm14 = vcmp.eq.s32.totalorder %v18342_v49, %v15457_v18  ;;  %v2719_v31 = vmax.f32 %v2363_v26, 0.0 }
 0x6e0   : > { %18324 = vst [vmem:[#allocation75_spill] sm:$0xff] %v15638_v60  ;;  %v18333_v60 = vld [vmem:[#allocation98_spill] sm:$0xff] }
 0x6e1   : > { %v7450_v61 = vpop.f32.mrf.mxu1  ;;  %v6835_v54 = vadd.f32 %v18333_v60, %v6746_v19  ;;  %v2361_v19 = vadd.f32 %v15462_v57, %v2360_v11  ;;  %v18340_v60 = vld [vmem:[#allocation255_spill] sm:$0xff] }
 0x6e2   : > { %v15643_v8 = vadd.f32 %v7450_v61, %v18327_v43  ;;  %vm5136_vm12 = vcmp.eq.s32.totalorder %v18340_v60, %v15179_v29  ;;  %v18365_v29 = vld [vmem:[#allocation229_spill] sm:$0xff] }
 0x6e3   : > { %vm15675_vm15 = vmpackc.low %vm5136_vm12, %vm5120_vm11 }
 0x6e4   : > { %18328 = vst [vmem:[#allocation141_spill] sm:$0xff] %v15643_v8  ;;  %v2365_v7 = vpop.f32.mrf.mxu0  ;;  %10487 = vmatmul.msk.bf16.gmra.mxu1 %vm10486_vm9, %v17402_v33  ;;  %10503 = vmatmul.msk.bf16.gmra.mxu2 %vm10502_vm10, %v17402_v33  ;;  %v6924_v8 = vadd.f32 %v18338_v36, %v6835_v54  ;;  %v2358_v54 = vadd.f32 %v15462_v57, %v2357_v40  ;;  %v18347_v36 = vld [vmem:[#allocation114_spill] sm:$0xff]  ;;  %v18349_v40 = vld [vmem:[#allocation224_spill] sm:$0xff] }
 0x6e5   : > { %v2366_v43 = vadd.f32 %v15462_v57, %v2365_v7  ;;  %v18341_v7 = vld [vmem:[#allocation183_spill] sm:$0xff] }
 0x6e6   : > { %vm4865_vm13 = vcmp.eq.s32.totalorder %v18341_v7, %v15457_v18  ;;  %v18348_v7 = vld [vmem:[#allocation116_spill] sm:$0xff] }
 0x6e7   : > { %v7401_v5 = vpop.f32.mrf.mxu3  ;;  %v2720_v37 = vmax.f32 %v2366_v43, 0.0  ;;  %vm10504_vm0 = vmpackc.low %vm4881_vm14, %vm4865_vm13 }
 0x6e8   : > { %v15654_v61 = vadd.f32 %v7401_v5, %v18335_v42  ;;  %v18344_v42 = vld [vmem:[#allocation63_spill] sm:$0xff]  ;;  %vm10508_vm13 = vmpackc.low %vm4945_vm8, %vm4929_vm7 }
 0x6e9   : > { %v7452_v2 = vpop.f32.mrf.mxu1  ;;  %v7013_v11 = vadd.f32 %v18344_v42, %v6924_v8  ;;  %v2353_v8 = vadd.f32 %v15462_v57, %v15572_v51  ;;  %v2717_v42 = vmax.f32 %v2358_v54, 0.0  ;;  %v18354_v51 = vld [vmem:[#allocation119_spill] sm:$0xff] }
 0x6ea   : > { %18336 = vst [vmem:[#allocation143_spill] sm:$0xff] %v15654_v61  ;;  %v15657_v10 = vadd.f32 %v7452_v2, %v7364_v28  ;;  %v2718_v2 = vmax.f32 %v2361_v19, 0.0  ;;  %v18352_v19 = vld [vmem:[#allocation270_spill] sm:$0xff]  ;;  %v18356_v54 = vld [vmem:[#allocation127_spill] sm:$0xff] }
 0x6eb   : > { %v7102_v26 = vadd.f32 %v18349_v40, %v7013_v11 }
 0x6ec   : > { %18337 = vst [vmem:[#allocation138_spill] sm:$0xff] %v15657_v10  ;;  %v2367_v47 = vpop.f32.mrf.mxu0  ;;  %v4512_v10 = vmul.f32 %v18347_v36, %v2720_v37  ;;  %v18353_v37 = vld [vmem:[#allocation202_spill] sm:$0xff] }
 0x6ed   : > { %v2368_v1 = vadd.f32 %v15462_v57, %v2367_v47  ;;  %v2356_v47 = vadd.f32 %v15462_v57, %v15589_v27  ;;  %v18351_v27 = vld [vmem:[#allocation198_spill] sm:$0xff]  ;;  %v7191_v36 = vadd.f32 %v18353_v37, %v7102_v26  ;;  %v18357_v26 = vld [vmem:[#allocation27_spill] sm:$0xff]  ;;  %v18358_v37 = vld [vmem:[#allocation128_spill] sm:$0xff] }
 0x6ee   : > { %v6751_v0 = vadd.f32 %v18352_v19, %v18351_v27 }
 0x6ef   : > { %v2721_v5 = vmax.f32 %v2368_v1, 0.0  ;;  %v15672_v28 = vpop.f32.mrf.mxu3 }
 0x6f0   : > { %18343 = vst [vmem:[#allocation137_spill] sm:$0xff] %v15672_v28  ;;  %v4511_v28 = vmul.f32 %v18350_v45, %v2719_v31  ;;  %v4509_v31 = vmul.f32 %v18356_v54, %v2717_v42 }
 0x6f1   : > { %v4513_v49 = vmul.f32 %v18348_v7, %v2721_v5  ;;  %v7455_v60 = vpop.f32.mrf.mxu1  ;;  %v2351_v7 = vadd.f32 %v15462_v57, %v15562_v17  ;;  %v6840_v17 = vadd.f32 %v18357_v26, %v6751_v0  ;;  %v18361_v0 = vld [vmem:[#allocation131_spill] sm:$0xff] }
 0x6f2   : > { %v15685_v1 = vadd.f32 %v7455_v60, %v15412_v50  ;;  %v2716_v50 = vmax.f32 %v2356_v47, 0.0  ;;  %v4510_v60 = vmul.f32 %v18354_v51, %v2718_v2 }
 0x6f3   : > { %v6582_v61 = vpack.c.bf16 %v4513_v49, %v4512_v10  ;;  %v18355_v10 = vld [vmem:[#allocation83_spill] sm:$0xff]  ;;  %v2715_v49 = vmax.f32 %v2353_v8, 0.0  ;;  %v2714_v19 = vmax.f32 %v2351_v7, 0.0  ;;  %v18359_v8 = vld [vmem:[#allocation133_spill] sm:$0xff] }
 0x6f4   : > { %v2370_v5 = vpop.f32.mrf.mxu0  ;;  %10489 = vmatmul.msk.bf16.gmra.mxu1 %vm15675_vm15, %v17402_v33  ;;  %10505 = vmatmul.msk.bf16.gmra.mxu2 %vm10504_vm0, %v17402_v33  ;;  %v7280_v45 = vadd.f32 %v18355_v10, %v7191_v36  ;;  %v6581_v40 = vpack.c.bf16 %v4511_v28, %v4510_v60  ;;  %v4508_v47 = vmul.f32 %v18358_v37, %v2716_v50  ;;  %v18360_v28 = vld [vmem:[#allocation105_spill] sm:$0xff] }
 0x6f5   : > { %7594 = vmatpush.bf16.msrb.mxu3 %v6582_v61  ;;  %v2371_v2 = vadd.f32 %v15462_v57, %v2370_v5  ;;  %v4507_v42 = vmul.f32 %v18359_v8, %v2715_v49  ;;  %v6929_v60 = vadd.f32 %v18360_v28, %v6840_v17  ;;  %v4506_v10 = vmul.f32 %v18361_v0, %v2714_v19  ;;  %v18362_v49 = vld [vmem:[#allocation70_spill] sm:$0xff]  ;;  %v18366_v37 = vld [vmem:[#allocation41_spill] sm:$0xff] }
 0x6f6   : > { %v7369_v27 = vadd.f32 %v15429_v6, %v7280_v45  ;;  %v6580_v51 = vpack.c.bf16 %v4509_v31, %v4508_v47  ;;  %v18367_v47 = vld [vmem:[#allocation20_spill] sm:$0xff]  ;;  %vm4961_vm0 = vcmp.eq.s32.totalorder %v17858_v23, %v15457_v18 }
 0x6f7   : > { %v7406_v11 = vpop.f32.mrf.mxu3  ;;  %v2722_v7 = vmax.f32 %v2371_v2, 0.0  ;;  %v6579_v45 = vpack.c.bf16 %v4507_v42, %v4506_v10  ;;  %v7018_v54 = vadd.f32 %v18362_v49, %v6929_v60  ;;  %v6756_v2 = vadd.f32 %v18367_v47, %v18366_v37  ;;  %v18372_v60 = vld [vmem:[#allocation191_spill] sm:$0xff]  ;;  %v18386_v47 = vld [vmem:[#allocation173_spill] sm:$0xff] }
 0x6f8   : > { %v15705_v43 = vadd.f32 %v7406_v11, %v15409_v9  ;;  %v18364_v11 = vld [vmem:[#allocation210_spill] sm:$0xff]  ;;  %v18369_v42 = vpack.c.bf16 %v15555_v52, %v15552_v22  ;;  %v18375_v22 = vpack.c.bf16 %v15520_v63, %v15517_v25  ;;  %v18376_v49 = vld [vmem:[#allocation211_spill] sm:$0xff]  ;;  %v18380_v25 = vpack.c.bf16 %v15482_v46, %v15479_v41  ;;  %v18381_v63 = vld [vmem:[#allocation233_spill] sm:$0xff] }
 0x6f9   : > { %v7457_v61 = vpop.f32.mrf.mxu1  ;;  %7595 = vmatpush.bf16.msrb.mxu3 %v6581_v40  ;;  %v7107_v17 = vadd.f32 %v18365_v29, %v7018_v54  ;;  %v18377_v54 = vld [vmem:[#allocation39_spill] sm:$0xff]  ;;  %v18384_v41 = vld [vmem:[#allocation178_spill] sm:$0xff]  ;;  %v18385_v37 = vpack.c.bf16 %v15435_v14, %v15432_v4 }
 0x6fa   : > { %v15709_v36 = vadd.f32 %v7457_v61, %v7369_v27  ;;  %v18368_v61 = vld [vmem:[#allocation158_spill] sm:$0xff]  ;;  %v18393_v4 = vld [vmem:[#allocation87_spill] sm:$0xff] }
 0x6fb   : > { %v7196_v8 = vadd.f32 %v18368_v61, %v7107_v17  ;;  %v15781_v17 = vpop.f32.mrf.mxu2 }
 0x6fc   : > { %v2372_v6 = vpop.f32.mrf.mxu0 }
 0x6fd   : > { %v2373_v9 = vadd.f32 %v15462_v57, %v2372_v6  ;;  %7596 = vmatpush.bf16.msrb.mxu3 %v6580_v51  ;;  %v18363_v57 = vld [vmem:[#allocation209_spill] sm:$0xff]  ;;  %v18370_v51 = vld [vmem:[#allocation88_spill] sm:$0xff]  ;;  %v18374_v6 = vld [vmem:[#allocation30_spill] sm:$0xff] }
 0x6fe   : > { %v4514_v31 = vmul.f32 %v18363_v57, %v2722_v7  ;;  %v7285_v28 = vadd.f32 %v18370_v51, %v7196_v8  ;;  %v6845_v7 = vadd.f32 %v18374_v6, %v6756_v2  ;;  %v18378_v57 = vpack.c.bf16 %v18376_v49, %v18377_v54  ;;  %v18387_v8 = vld [vmem:[#allocation49_spill] sm:$0xff] }
 0x6ff   : > { %v2723_v5 = vmax.f32 %v2373_v9, 0.0  ;;  %v15723_v50 = vpop.f32.mrf.mxu3 }
 0x700   : > { %v7374_v9 = vadd.f32 %v15476_v15, %v7285_v28  ;;  %v18390_v28 = vld [vmem:[#allocation74_spill] sm:$0xff] }
 0x701   : > { %v4515_v40 = vmul.f32 %v18364_v11, %v2723_v5  ;;  %v7460_v26 = vpop.f32.mrf.mxu1  ;;  %7597 = vmatpush.bf16.msrb.mxu3 %v6579_v45 }
 0x702   : > { %v15730_v27 = vadd.f32 %v7460_v26, %v15448_v13  ;;  %v18371_v13 = vld [vmem:[#allocation197_spill] sm:$0xff]  ;;  %v18382_v26 = vld [vmem:[#allocation240_spill] sm:$0xff] }
 0x703   : > { %v6583_v19 = vpack.c.bf16 %v4515_v40, %v4514_v31  ;;  %v18373_v0 = vpack.c.bf16 %v18371_v13, %v18372_v60  ;;  %v15758_v31 = vld [vmem:[%s11280_s20 + $0x8] sm:$0xff]  ;;  %v18383_v29 = vpack.c.bf16 %v18381_v63, %v18382_v26  ;;  %v18391_v13 = vld [vmem:[#allocation203_spill] sm:$0xff] }
 0x704   : > { %10491 = vmatmul.msk.bf16.gmra.mxu1 %vm10490_vm5, %v17402_v33  ;;  %10507 = vmatmul.msk.bf16.gmra.mxu2 %vm10506_vm6, %v17402_v33  ;;  %v15761_v11 = vperm.slane %v15758_v31, 3  ;;  %v15764_v15 = vperm.slane %v15758_v31, 4  ;;  %v6761_v60 = vadd.f32 %v18391_v13, %v18390_v28  ;;  %vm10510_vm6 = vmpackc.low %vm4977_vm1, %vm4961_vm0  ;;  %v18412_v13 = vld [vmem:[#allocation160_spill] sm:$0xff] }
 0x705   : > { %7598 = vmatpush.bf16.msrb.mxu3 %v18369_v42  ;;  %7690 = vmatpush.bf16.msra.mxu1 %v6583_v19  ;;  %v18388_v42 = vld [vmem:[#allocation58_spill] sm:$0xff] }
 0x706   : > { %vm4674_vm9 = vcmp.eq.s32.totalorder %v17828_v34, %v15761_v11  ;;  %vm4690_vm10 = vcmp.eq.s32.totalorder %v17829_v58, %v15761_v11  ;;  %vm4675_vm11 = vcmp.eq.s32.totalorder %v17828_v34, %v15764_v15  ;;  %vm4691_vm12 = vcmp.eq.s32.totalorder %v17829_v58, %v15764_v15 }
 0x707   : > { %v7411_v10 = vpop.f32.mrf.mxu3  ;;  %vm10524_vm14 = vmpackc.low %vm4690_vm10, %vm4674_vm9  ;;  %v18389_v51 = vpack.c.bf16 %v18387_v8, %v18388_v42  ;;  %vm4706_vm2 = vcmp.eq.s32.totalorder %v17948_v35, %v15761_v11  ;;  %vm4722_vm3 = vcmp.eq.s32.totalorder %v17949_v53, %v15761_v11  ;;  %vm4707_vm4 = vcmp.eq.s32.totalorder %v17948_v35, %v15764_v15  ;;  %v18408_v8 = vld [vmem:[#allocation42_spill] sm:$0xff]  ;;  %v18409_v42 = vld [vmem:[#allocation261_spill] sm:$0xff] }
 0x708   : > { %v15747_v5 = vadd.f32 %v7411_v10, %v15445_v20  ;;  %v18379_v20 = vld [vmem:[#allocation104_spill] sm:$0xff]  ;;  %vm10556_vm15 = vmpackc.low %vm4691_vm12, %vm4675_vm11  ;;  %vm4723_vm5 = vcmp.eq.s32.totalorder %v17949_v53, %v15764_v15  ;;  %v18497_v53 = vld [vmem:[#allocation246_spill] sm:$0xff] }
 0x709   : > { %7950 = vmatpush.bf16.msrb.mxu1 %v18373_v0  ;;  %v7462_v45 = vpop.f32.mrf.mxu1  ;;  %7599 = vmatpush.bf16.msrb.mxu3 %v18375_v22  ;;  %v6934_v40 = vadd.f32 %v18379_v20, %v6845_v7  ;;  %v18392_v0 = vld [vmem:[#allocation162_spill] sm:$0xff]  ;;  %v18398_v20 = vld [vmem:[#allocation249_spill] sm:$0xff]  ;;  %vm10526_vm7 = vmpackc.low %vm4722_vm3, %vm4706_vm2 }
 0x70a   : > { %v15752_v52 = vadd.f32 %v7462_v45, %v7374_v9  ;;  %v18397_v9 = vld [vmem:[#allocation28_spill] sm:$0xff]  ;;  %vm10558_vm8 = vmpackc.low %vm4723_vm5, %vm4707_vm4  ;;  %v18506_v35 = vld [vmem:[#allocation269_spill] sm:$0xff] }
 0x70b   : > { %v7023_v46 = vadd.f32 %v18384_v41, %v6934_v40  ;;  %v6850_v45 = vadd.f32 %v18397_v9, %v6761_v60  ;;  %v18399_v40 = vld [vmem:[#allocation54_spill] sm:$0xff]  ;;  %v18413_v60 = vld [vmem:[#allocation32_spill] sm:$0xff] }
 0x70c   : > { %v18418_v9 = vld [vmem:[#allocation180_spill] sm:$0xff] }
 0x70d   : > { %7951 = vmatpush.bf16.msrb.mxu1 %v18378_v57  ;;  %7600 = vmatpush.bf16.msrb.mxu3 %v18380_v25  ;;  %v7112_v2 = vadd.f32 %v18386_v47, %v7023_v46  ;;  %v18401_v25 = vld [vmem:[#allocation55_spill] sm:$0xff]  ;;  %v18407_v47 = vld [vmem:[#allocation130_spill] sm:$0xff] }
 0x70e   : > { %v6939_v63 = vadd.f32 %v18401_v25, %v6850_v45  ;;  %v18421_v25 = vld [vmem:[#allocation56_spill] sm:$0xff] }
 0x70f   : > { %v7201_v10 = vadd.f32 %v18392_v0, %v7112_v2  ;;  %v6766_v0 = vadd.f32 %v18413_v60, %v18412_v13  ;;  %v18432_v13 = vld [vmem:[#allocation172_spill] sm:$0xff] }
 0x711   : > { %7952 = vmatpush.bf16.msrb.mxu1 %v18383_v29  ;;  %v7465_v19 = vpop.f32.mrf.mxu1  ;;  %7601 = vmatpush.bf16.msrb.mxu3 %v18385_v37  ;;  %v7290_v14 = vadd.f32 %v18393_v4, %v7201_v10  ;;  %v18405_v29 = vld [vmem:[#allocation140_spill] sm:$0xff]  ;;  %v18415_v4 = vld [vmem:[#allocation263_spill] sm:$0xff] }
 0x712   : > { %v15793_v61 = vadd.f32 %v7465_v19, %v15497_v16  ;;  %v18395_v16 = vld [vmem:[#allocation219_spill] sm:$0xff]  ;;  %v7028_v41 = vadd.f32 %v18405_v29, %v6939_v63  ;;  %v18406_v19 = vld [vmem:[#allocation220_spill] sm:$0xff]  ;;  %v18426_v29 = vld [vmem:[#allocation146_spill] sm:$0xff] }
 0x713   : > { %v7379_v22 = vadd.f32 %v15514_v3, %v7290_v14  ;;  %v18403_v3 = vld [vmem:[#allocation37_spill] sm:$0xff]  ;;  %vm4754_vm12 = vcmp.eq.s32.totalorder %v18426_v29, %v15761_v11 }
 0x714   : > { %10509 = vmatmul.msk.bf16.gmra.mxu2 %vm10508_vm13, %v17402_v33  ;;  %10525 = vmatmul.msk.bf16.vlgmr.msrb.gmra.mxu3 %vm10524_vm14, %v17402_v33  ;;  %v7117_v37 = vadd.f32 %v18406_v19, %v7028_v41  ;;  %v18428_v19 = vld [vmem:[#allocation164_spill] sm:$0xff]  ;;  %vm4755_vm14 = vcmp.eq.s32.totalorder %v18426_v29, %v15764_v15 }
 0x715   : > { %10888 = vmatpush.bf16.msra.mxu3 %v18266_v48  ;;  %7953 = vmatpush.bf16.msrb.mxu1 %v18389_v51  ;;  %v18394_v48 = vld [vmem:[#allocation242_spill] sm:$0xff]  ;;  %v18410_v51 = vld [vmem:[#allocation259_spill] sm:$0xff] }
 0x716   : > { %10557 = vmatmul.msk.bf16.vlgmr.msra.gmra.mxu1 %vm10556_vm15, %v17402_v33  ;;  %v18396_v6 = vpack.c.bf16 %v18394_v48, %v18395_v16  ;;  %v18411_v28 = vpack.c.bf16 %v18409_v42, %v18410_v51  ;;  %v18416_v48 = vld [vmem:[#allocation120_spill] sm:$0xff] }
 0x717   : > { %v7514_v7 = vpop.f32.mrf.mxu2  ;;  %v18431_v42 = vld [vmem:[#allocation36_spill] sm:$0xff] }
 0x718   : > { %v15813_v49 = vadd.f32 %v7514_v7, %v15488_v32  ;;  %v18402_v32 = vld [vmem:[#allocation260_spill] sm:$0xff] }
 0x719   : > { %10889 = vmatpush.bf16.msra.mxu3 %v18267_v44  ;;  %7954 = vmatpush.bf16.msrb.mxu1 %v18396_v6  ;;  %v7467_v54 = vpop.f32.mrf.mxu1  ;;  %v18400_v44 = vpack.c.bf16 %v18398_v20, %v18399_v40  ;;  %v18404_v26 = vpack.c.bf16 %v18402_v32, %v18403_v3  ;;  %v18417_v6 = vld [vmem:[#allocation124_spill] sm:$0xff]  ;;  %v18423_v3 = vld [vmem:[#allocation213_spill] sm:$0xff] }
 0x71a   : > { %v15815_v57 = vadd.f32 %v7467_v54, %v7379_v22  ;;  %v6855_v7 = vadd.f32 %v18417_v6, %v6766_v0  ;;  %v18419_v22 = vld [vmem:[#allocation23_spill] sm:$0xff]  ;;  %v18422_v32 = vld [vmem:[#allocation212_spill] sm:$0xff]  ;;  %vm5009_vm10 = vcmp.eq.s32.totalorder %v18423_v3, %v15457_v18  ;;  %v18433_v0 = vld [vmem:[#allocation277_spill] sm:$0xff] }
 0x71b   : > { %vm4993_vm9 = vcmp.eq.s32.totalorder %v18422_v32, %v15457_v18 }
 0x71c   : > { %v6944_v63 = vadd.f32 %v18421_v25, %v6855_v7  ;;  %vm10512_vm15 = vmpackc.low %vm5009_vm10, %vm4993_vm9  ;;  %v18439_v7 = vld [vmem:[#allocation66_spill] sm:$0xff]  ;;  %v18442_v25 = vld [vmem:[#allocation187_spill] sm:$0xff] }
 0x71d   : > { %10890 = vmatpush.bf16.msra.mxu3 %v18268_v21  ;;  %7955 = vmatpush.bf16.msrb.mxu1 %v18400_v44  ;;  %v18420_v44 = vld [vmem:[#allocation150_spill] sm:$0xff] }
 0x71f   : > { %v7516_v21 = vpop.f32.mrf.mxu2 }
 0x721   : > { %10891 = vmatpush.bf16.msra.mxu3 %v18269_v56  ;;  %7956 = vmatpush.bf16.msrb.mxu1 %v18404_v26  ;;  %v15840_v56 = vadd.f32 %v7516_v21, %v15501_v12  ;;  %v7470_v46 = vpop.f32.mrf.mxu1  ;;  %v18414_v12 = vld [vmem:[#allocation159_spill] sm:$0xff]  ;;  %v18424_v26 = vld [vmem:[#allocation154_spill] sm:$0xff]  ;;  %v18425_v21 = vld [vmem:[#allocation145_spill] sm:$0xff] }
 0x722   : > { %v15844_v2 = vadd.f32 %v7470_v46, %v18407_v47  ;;  %v7206_v10 = vadd.f32 %v18414_v12, %v7117_v37  ;;  %vm4738_vm11 = vcmp.eq.s32.totalorder %v18425_v21, %v15761_v11  ;;  %v18427_v46 = vld [vmem:[#allocation170_spill] sm:$0xff]  ;;  %vm4739_vm13 = vcmp.eq.s32.totalorder %v18425_v21, %v15764_v15  ;;  %v18430_v47 = vld [vmem:[#allocation171_spill] sm:$0xff] }
 0x723   : > { %v18429_v37 = vpack.c.bf16 %v18427_v46, %v18428_v19  ;;  %vm10528_vm0 = vmpackc.low %vm4754_vm12, %vm4738_vm11  ;;  %v18445_v46 = vld [vmem:[#allocation217_spill] sm:$0xff] }
 0x724   : > { %10511 = vmatmul.msk.bf16.gmra.mxu2 %vm10510_vm6, %v17402_v33  ;;  %10527 = vmatmul.msk.bf16.gmra.mxu3 %vm10526_vm7, %v17402_v33  ;;  %v7295_v14 = vadd.f32 %v18415_v4, %v7206_v10  ;;  %vm10560_vm1 = vmpackc.low %vm4755_vm14, %vm4739_vm13  ;;  %v18434_v10 = vld [vmem:[#allocation179_spill] sm:$0xff]  ;;  %v18435_v4 = vld [vmem:[#allocation174_spill] sm:$0xff] }
 0x725   : > { %10892 = vmatpush.bf16.msra.mxu3 %v18408_v8  ;;  %7957 = vmatpush.bf16.msrb.mxu1 %v18411_v28  ;;  %v7033_v8 = vadd.f32 %v18430_v47, %v6944_v63 }
 0x726   : > { %10559 = vmatmul.msk.bf16.gmra.mxu1 %vm10558_vm8, %v17402_v33  ;;  %v7384_v45 = vadd.f32 %v18418_v9, %v7295_v14  ;;  %v18436_v14 = vpack.c.bf16 %v18434_v10, %v18435_v4  ;;  %v18451_v4 = vld [vmem:[#allocation222_spill] sm:$0xff] }
 0x727   : > { %v7519_v16 = vpop.f32.mrf.mxu2  ;;  %v7122_v60 = vadd.f32 %v18432_v13, %v7033_v8  ;;  %v18448_v13 = vld [vmem:[#allocation40_spill] sm:$0xff]  ;;  %vm5025_vm2 = vcmp.eq.s32.totalorder %v18451_v4, %v15457_v18 }
 0x728   : > { %v15861_v54 = vadd.f32 %v7519_v16, %v18419_v22  ;;  %v18438_v16 = vld [vmem:[#allocation21_spill] sm:$0xff] }
 0x729   : > { %10893 = vmatpush.bf16.msra.mxu3 %v18416_v48  ;;  %v7472_v20 = vpop.f32.mrf.mxu1  ;;  %v18437_v48 = vld [vmem:[#allocation258_spill] sm:$0xff]  ;;  %v7211_v9 = vadd.f32 %v18439_v7, %v7122_v60  ;;  %v18455_v7 = vld [vmem:[#allocation216_spill] sm:$0xff] }
 0x72a   : > { %v15863_v40 = vadd.f32 %v7472_v20, %v7384_v45  ;;  %v6771_v6 = vadd.f32 %v18438_v16, %v18437_v48  ;;  %v18440_v45 = vld [vmem:[#allocation26_spill] sm:$0xff]  ;;  %v18453_v48 = vld [vmem:[#allocation155_spill] sm:$0xff]  ;;  %v18454_v16 = vld [vmem:[#allocation156_spill] sm:$0xff] }
 0x72b   : > { %v7300_v22 = vadd.f32 %v18440_v45, %v7211_v9  ;;  %vm4770_vm4 = vcmp.eq.s32.totalorder %v18453_v48, %v15761_v11  ;;  %vm4786_vm5 = vcmp.eq.s32.totalorder %v18454_v16, %v15761_v11  ;;  %v18456_v9 = vld [vmem:[#allocation207_spill] sm:$0xff]  ;;  %vm4771_vm6 = vcmp.eq.s32.totalorder %v18453_v48, %v15764_v15  ;;  %v18479_v48 = vld [vmem:[#allocation234_spill] sm:$0xff] }
 0x72c   : > { %v18457_v45 = vpack.c.bf16 %v18455_v7, %v18456_v9  ;;  %vm4787_vm7 = vcmp.eq.s32.totalorder %v18454_v16, %v15764_v15  ;;  %vm10530_vm9 = vmpackc.low %vm4786_vm5, %vm4770_vm4  ;;  %vm5057_vm11 = vcmp.eq.s32.totalorder %v18479_v48, %v15457_v18  ;;  %vm5105_vm5 = vcmp.eq.s32.totalorder %v18497_v53, %v15457_v18  ;;  %v18508_v53 = vld [vmem:[#allocation89_spill] sm:$0xff] }
 0x72d   : > { %10894 = vmatpush.bf16.msra.mxu3 %v18420_v44  ;;  %v18441_v44 = vld [vmem:[#allocation182_spill] sm:$0xff]  ;;  %v7389_v19 = vadd.f32 %v18445_v46, %v7300_v22  ;;  %v18458_v22 = vld [vmem:[#allocation236_spill] sm:$0xff]  ;;  %v18461_v46 = vld [vmem:[#allocation61_spill] sm:$0xff] }
 0x72e   : > { %v18443_v63 = vpack.c.bf16 %v18441_v44, %v18442_v25  ;;  %v18459_v44 = vld [vmem:[#allocation48_spill] sm:$0xff]  ;;  %vm10562_vm10 = vmpackc.low %vm4787_vm7, %vm4771_vm6 }
 0x72f   : > { %v7521_v41 = vpop.f32.mrf.mxu2 }
 0x730   : > { %v15885_v51 = vadd.f32 %v7521_v41, %v18431_v42 }
 0x731   : > { %10895 = vmatpush.bf16.msra.mxu3 %v18424_v26  ;;  %v7475_v28 = vpop.f32.mrf.mxu1  ;;  %v18444_v26 = vld [vmem:[#allocation103_spill] sm:$0xff] }
 0x732   : > { %v15889_v12 = vadd.f32 %v7475_v28, %v18433_v0  ;;  %v6860_v41 = vadd.f32 %v18444_v26, %v6771_v6  ;;  %v18447_v28 = vld [vmem:[#allocation201_spill] sm:$0xff]  ;;  %v18450_v0 = vld [vmem:[#allocation95_spill] sm:$0xff]  ;;  %v18460_v26 = vld [vmem:[#allocation82_spill] sm:$0xff] }
 0x733   : > { %v18449_v60 = vpack.c.bf16 %v18447_v28, %v18448_v13  ;;  %v18465_v13 = vld [vmem:[#allocation43_spill] sm:$0xff] }
 0x734   : > { %10513 = vmatmul.msk.bf16.gmra.mxu2 %vm10512_vm15, %v17402_v33  ;;  %10529 = vmatmul.msk.bf16.gmra.mxu3 %vm10528_vm0, %v17402_v33  ;;  %v6949_v10 = vadd.f32 %v18450_v0, %v6860_v41 }
 0x735   : > { %7861 = vmatpush.bf16.msrb.mxu3 %v18429_v37  ;;  %v18446_v37 = vld [vmem:[#allocation271_spill] sm:$0xff] }
 0x736   : > { %10561 = vmatmul.msk.bf16.gmra.mxu1 %vm10560_vm1, %v17402_v33 }
 0x737   : > { %v7524_v20 = vpop.f32.mrf.mxu2 }
 0x738   : > { %v15907_v47 = vadd.f32 %v7524_v20, %v18446_v37  ;;  %v7038_v20 = vadd.f32 %v18458_v22, %v6949_v10  ;;  %v18462_v37 = vld [vmem:[#allocation251_spill] sm:$0xff] }
 0x739   : > { %7862 = vmatpush.bf16.msrb.mxu3 %v18436_v14  ;;  %v7477_v8 = vpop.f32.mrf.mxu1  ;;  %v18452_v14 = vld [vmem:[#allocation223_spill] sm:$0xff] }
 0x73a   : > { %v15909_v42 = vadd.f32 %v7477_v8, %v7389_v19  ;;  %vm5041_vm3 = vcmp.eq.s32.totalorder %v18452_v14, %v15457_v18  ;;  %v7127_v41 = vadd.f32 %v18460_v26, %v7038_v20  ;;  %v18463_v8 = vld [vmem:[#allocation215_spill] sm:$0xff]  ;;  %v18470_v20 = vld [vmem:[#allocation218_spill] sm:$0xff] }
 0x73b   : > { %vm10514_vm8 = vmpackc.low %vm5041_vm3, %vm5025_vm2  ;;  %v18464_v28 = vpack.c.bf16 %v18462_v37, %v18463_v8  ;;  %v18467_v10 = vld [vmem:[#allocation31_spill] sm:$0xff] }
 0x73c   : > { %v7216_v7 = vadd.f32 %v18467_v10, %v7127_v41  ;;  %v18469_v22 = vld [vmem:[#allocation51_spill] sm:$0xff]  ;;  %v18476_v10 = vld [vmem:[#allocation221_spill] sm:$0xff] }
 0x73d   : > { %7863 = vmatpush.bf16.msrb.mxu3 %v18443_v63  ;;  %v18474_v8 = vld [vmem:[#allocation59_spill] sm:$0xff] }
 0x73f   : > { %v7526_v6 = vpop.f32.mrf.mxu2 }
 0x740   : > { %v15932_v25 = vadd.f32 %v7526_v6, %v18459_v44  ;;  %v18468_v6 = vld [vmem:[#allocation208_spill] sm:$0xff]  ;;  %v18471_v44 = vpack.c.bf16 %v18469_v22, %v18470_v20  ;;  %v18480_v22 = vld [vmem:[#allocation235_spill] sm:$0xff] }
 0x741   : > { %7864 = vmatpush.bf16.msrb.mxu3 %v18449_v60  ;;  %v7480_v63 = vpop.f32.mrf.mxu1  ;;  %v18466_v60 = vld [vmem:[#allocation86_spill] sm:$0xff]  ;;  %v7305_v9 = vadd.f32 %v18468_v6, %v7216_v7  ;;  %vm5073_vm12 = vcmp.eq.s32.totalorder %v18480_v22, %v15457_v18 }
 0x742   : > { %v15936_v19 = vadd.f32 %v7480_v63, %v18461_v46  ;;  %v6776_v0 = vadd.f32 %v18466_v60, %v18465_v13  ;;  %v18472_v63 = vld [vmem:[#allocation275_spill] sm:$0xff]  ;;  %v18473_v46 = vld [vmem:[#allocation65_spill] sm:$0xff]  ;;  %v18475_v60 = vld [vmem:[#allocation244_spill] sm:$0xff] }
 0x743   : > { %v7394_v37 = vadd.f32 %v18473_v46, %v7305_v9  ;;  %v18477_v16 = vpack.c.bf16 %v18475_v60, %v18476_v10  ;;  %v18478_v7 = vld [vmem:[#allocation94_spill] sm:$0xff]  ;;  %vm10516_vm1 = vmpackc.low %vm5073_vm12, %vm5057_vm11  ;;  %v18485_v46 = vld [vmem:[#allocation267_spill] sm:$0xff] }
 0x744   : > { %10515 = vmatmul.msk.bf16.gmra.mxu2 %vm10514_vm8, %v17402_v33  ;;  %10531 = vmatmul.msk.bf16.gmra.mxu3 %vm10530_vm9, %v17402_v33  ;;  %v6865_v26 = vadd.f32 %v18472_v63, %v6776_v0  ;;  %v18481_v0 = vld [vmem:[#allocation165_spill] sm:$0xff]  ;;  %v18482_v9 = vld [vmem:[#allocation166_spill] sm:$0xff]  ;;  %v18487_v60 = vld [vmem:[#allocation35_spill] sm:$0xff] }
 0x745   : > { %7865 = vmatpush.bf16.msrb.mxu3 %v18457_v45  ;;  %vm4802_vm13 = vcmp.eq.s32.totalorder %v18481_v0, %v15761_v11  ;;  %vm4818_vm14 = vcmp.eq.s32.totalorder %v18482_v9, %v15761_v11  ;;  %vm4803_vm15 = vcmp.eq.s32.totalorder %v18481_v0, %v15764_v15  ;;  %vm4819_vm0 = vcmp.eq.s32.totalorder %v18482_v9, %v15764_v15  ;;  %v18488_v10 = vld [vmem:[#allocation73_spill] sm:$0xff] }
 0x746   : > { %10563 = vmatmul.msk.bf16.gmra.mxu1 %vm10562_vm10, %v17402_v33  ;;  %v6954_v6 = vadd.f32 %v18478_v7, %v6865_v26  ;;  %vm10532_vm2 = vmpackc.low %vm4818_vm14, %vm4802_vm13  ;;  %v6781_v7 = vadd.f32 %v18488_v10, %v18487_v60  ;;  %v18489_v0 = vld [vmem:[#allocation93_spill] sm:$0xff]  ;;  %v18496_v10 = vld [vmem:[#allocation62_spill] sm:$0xff] }
 0x747   : > { %v7529_v45 = vpop.f32.mrf.mxu2  ;;  %vm10564_vm3 = vmpackc.low %vm4819_vm0, %vm4803_vm15  ;;  %vm5089_vm4 = vcmp.eq.s32.totalorder %v18496_v10, %v15457_v18 }
 0x748   : > { %vm10518_vm10 = vmpackc.low %vm5105_vm5, %vm5089_vm4 }
 0x749   : > { %7866 = vmatpush.bf16.msrb.mxu3 %v18464_v28  ;;  %v15954_v28 = vadd.f32 %v7529_v45, %v18474_v8  ;;  %v7482_v41 = vpop.f32.mrf.mxu1  ;;  %v18486_v8 = vld [vmem:[#allocation72_spill] sm:$0xff] }
 0x74a   : > { %v15956_v13 = vadd.f32 %v7482_v41, %v7394_v37 }
 0x74d   : > { %7867 = vmatpush.bf16.msrb.mxu3 %v18471_v44  ;;  %v18484_v44 = vld [vmem:[#allocation68_spill] sm:$0xff] }
 0x74f   : > { %v7531_v45 = vpop.f32.mrf.mxu2 }
 0x750   : > { %v15976_v63 = vadd.f32 %v7531_v45, %v18484_v44  ;;  %v18491_v44 = vld [vmem:[#allocation281_spill] sm:$0xff] }
 0x751   : > { %7868 = vmatpush.bf16.msrb.mxu3 %v18477_v16  ;;  %v18483_v16 = vld [vmem:[#allocation200_spill] sm:$0xff]  ;;  %v7485_v26 = vpop.f32.mrf.mxu1 }
 0x752   : > { %v7043_v20 = vadd.f32 %v18483_v16, %v6954_v6  ;;  %v15980_v41 = vadd.f32 %v7485_v26, %v18486_v8  ;;  %v18490_v6 = vld [vmem:[#allocation99_spill] sm:$0xff] }
 0x753   : > { %v18493_v8 = vld [vmem:[#allocation71_spill] sm:$0xff] }
 0x754   : > { %v7132_v37 = vadd.f32 %v18485_v46, %v7043_v20  ;;  %10517 = vmatmul.msk.bf16.gmra.mxu2 %vm10516_vm1, %v17402_v33  ;;  %10533 = vmatmul.msk.bf16.gmra.mxu3 %vm10532_vm2, %v17402_v33  ;;  %v6870_v20 = vadd.f32 %v18491_v44, %v6781_v7  ;;  %v18492_v46 = vld [vmem:[#allocation75_spill] sm:$0xff]  ;;  %v18499_v7 = vld [vmem:[#allocation176_spill] sm:$0xff] }
 0x755   : > { %vm4850_vm7 = vcmp.eq.s32.totalorder %v18499_v7, %v15761_v11  ;;  %vm4851_vm9 = vcmp.eq.s32.totalorder %v18499_v7, %v15764_v15 }
 0x756   : > { %v7221_v29 = vadd.f32 %v18489_v0, %v7132_v37  ;;  %10565 = vmatmul.msk.bf16.gmra.mxu1 %vm10564_vm3, %v17402_v33  ;;  %v18495_v0 = vld [vmem:[#allocation181_spill] sm:$0xff] }
 0x757   : > { %v7534_v16 = vpop.f32.mrf.mxu2  ;;  %v6959_v37 = vadd.f32 %v18495_v0, %v6870_v20 }
 0x758   : > { %v7310_v45 = vadd.f32 %v18490_v6, %v7221_v29  ;;  %v15992_v9 = vadd.f32 %v7534_v16, %v18493_v8  ;;  %v18498_v29 = vld [vmem:[#allocation175_spill] sm:$0xff]  ;;  %v18501_v16 = vld [vmem:[#allocation77_spill] sm:$0xff] }
 0x759   : > { %v7487_v21 = vpop.f32.mrf.mxu1  ;;  %vm4834_vm6 = vcmp.eq.s32.totalorder %v18498_v29, %v15761_v11  ;;  %vm4835_vm8 = vcmp.eq.s32.totalorder %v18498_v29, %v15764_v15  ;;  %v18504_v8 = vld [vmem:[#allocation143_spill] sm:$0xff] }
 0x75a   : > { %v7399_v26 = vadd.f32 %v18492_v46, %v7310_v45  ;;  %vm10534_vm11 = vmpackc.low %vm4850_vm7, %vm4834_vm6  ;;  %v18503_v46 = vld [vmem:[#allocation192_spill] sm:$0xff]  ;;  %vm5153_vm6 = vcmp.eq.s32.totalorder %v17985_v24, %v15457_v18  ;;  %vm5169_vm7 = vcmp.eq.s32.totalorder %v17986_v30, %v15457_v18 }
 0x75b   : > { %vm10566_vm12 = vmpackc.low %vm4851_vm9, %vm4835_vm8  ;;  %vm4898_vm8 = vcmp.eq.s32.totalorder %v17831_v62, %v15761_v11  ;;  %vm4914_vm9 = vcmp.eq.s32.totalorder %v17832_v59, %v15761_v11 }
 0x75c   : > { %v15994_v60 = vadd.f32 %v7487_v21, %v7399_v26  ;;  %v18500_v21 = vld [vmem:[#allocation264_spill] sm:$0xff] }
 0x75d   : > { %v7048_v45 = vadd.f32 %v18500_v21, %v6959_v37  ;;  %v18509_v37 = vld [vmem:[#allocation57_spill] sm:$0xff] }
 0x75e   : > { %18494 = vst [vmem:[#allocation129_spill] sm:$0xff] %v15994_v60  ;;  %v18507_v60 = vld [vmem:[#allocation274_spill] sm:$0xff] }
 0x75f   : > { %v7536_v6 = vpop.f32.mrf.mxu2  ;;  %v7137_v26 = vadd.f32 %v18503_v46, %v7048_v45  ;;  %v6786_v29 = vadd.f32 %v18507_v60, %v18506_v35  ;;  %v18511_v46 = vld [vmem:[#allocation137_spill] sm:$0xff] }
 0x760   : > { %v16011_v44 = vadd.f32 %v7536_v6, %v18501_v16  ;;  %v18510_v16 = vld [vmem:[#allocation97_spill] sm:$0xff] }
 0x761   : > { %v7490_v20 = vpop.f32.mrf.mxu1  ;;  %v7226_v10 = vadd.f32 %v18508_v53, %v7137_v26  ;;  %v6875_v45 = vadd.f32 %v18510_v16, %v6786_v29  ;;  %v18514_v53 = vld [vmem:[#allocation177_spill] sm:$0xff]  ;;  %v18515_v26 = vld [vmem:[#allocation254_spill] sm:$0xff]  ;;  %v18518_v29 = vld [vmem:[#allocation184_spill] sm:$0xff] }
 0x762   : > { %18502 = vst [vmem:[#allocation132_spill] sm:$0xff] %v16011_v44  ;;  %v16015_v0 = vadd.f32 %v7490_v20, %v18504_v8  ;;  %v18512_v8 = vld [vmem:[#allocation141_spill] sm:$0xff]  ;;  %vm5121_vm13 = vcmp.eq.s32.totalorder %v18515_v26, %v15457_v18  ;;  %v18516_v44 = vld [vmem:[#allocation255_spill] sm:$0xff]  ;;  %vm4882_vm0 = vcmp.eq.s32.totalorder %v18518_v29, %v15761_v11  ;;  %vm4883_vm2 = vcmp.eq.s32.totalorder %v18518_v29, %v15764_v15 }
 0x763   : > { %v7315_v6 = vadd.f32 %v18509_v37, %v7226_v10  ;;  %v6964_v60 = vadd.f32 %v18514_v53, %v6875_v45  ;;  %vm5137_vm14 = vcmp.eq.s32.totalorder %v18516_v44, %v15457_v18  ;;  %v18517_v10 = vld [vmem:[#allocation183_spill] sm:$0xff]  ;;  %v18522_v53 = vld [vmem:[#allocation228_spill] sm:$0xff] }
 0x764   : > { %18505 = vst [vmem:[#allocation121_spill] sm:$0xff] %v16015_v0  ;;  %10519 = vmatmul.msk.bf16.gmra.mxu2 %vm10518_vm10, %v17402_v33  ;;  %10535 = vmatmul.msk.bf16.gmra.mxu3 %vm10534_vm11, %v17402_v33  ;;  %vm4866_vm15 = vcmp.eq.s32.totalorder %v18517_v10, %v15761_v11  ;;  %vm4867_vm1 = vcmp.eq.s32.totalorder %v18517_v10, %v15764_v15  ;;  %vm10520_vm3 = vmpackc.low %vm5137_vm14, %vm5121_vm13 }
 0x765   : > { %v7404_v20 = vadd.f32 %v18511_v46, %v7315_v6  ;;  %vm10536_vm4 = vmpackc.low %vm4882_vm0, %vm4866_vm15  ;;  %v18521_v46 = vld [vmem:[#allocation22_spill] sm:$0xff]  ;;  %vm4899_vm10 = vcmp.eq.s32.totalorder %v17831_v62, %v15764_v15  ;;  %vm4915_vm11 = vcmp.eq.s32.totalorder %v17832_v59, %v15764_v15  ;;  %vm4930_vm15 = vcmp.eq.s32.totalorder %v17843_v39, %v15761_v11 }
 0x766   : > { %10567 = vmatmul.msk.bf16.gmra.mxu1 %vm10566_vm12, %v17402_v33  ;;  %vm10568_vm5 = vmpackc.low %vm4883_vm2, %vm4867_vm1  ;;  %vm4946_vm0 = vcmp.eq.s32.totalorder %v17844_v38, %v15761_v11 }
 0x767   : > { %v7539_v21 = vpop.f32.mrf.mxu2  ;;  %vm10522_vm12 = vmpackc.low %vm5169_vm7, %vm5153_vm6 }
 0x768   : > { %v16027_v7 = vadd.f32 %v7539_v21, %v18512_v8  ;;  %v18520_v21 = vld [vmem:[#allocation138_spill] sm:$0xff]  ;;  %vm10538_vm13 = vmpackc.low %vm4914_vm9, %vm4898_vm8  ;;  %vm4962_vm8 = vcmp.eq.s32.totalorder %v17858_v23, %v15761_v11  ;;  %vm4978_vm9 = vcmp.eq.s32.totalorder %v17859_v55, %v15761_v11 }
 0x769   : > { %v7492_v0 = vpop.f32.mrf.mxu1  ;;  %vm10570_vm14 = vmpackc.low %vm4915_vm11, %vm4899_vm10  ;;  %vm4963_vm10 = vcmp.eq.s32.totalorder %v17858_v23, %v15764_v15  ;;  %vm4979_vm11 = vcmp.eq.s32.totalorder %v17859_v55, %v15764_v15 }
 0x76a   : > { %v16029_v35 = vadd.f32 %v7492_v0, %v7404_v20  ;;  %v18519_v0 = vld [vmem:[#allocation276_spill] sm:$0xff] }
 0x76b   : > { %v7053_v6 = vadd.f32 %v18519_v0, %v6964_v60  ;;  %v18523_v60 = vld [vmem:[#allocation266_spill] sm:$0xff] }
 0x76c   : > { %18513 = vst [vmem:[#allocation123_spill] sm:$0xff] %v16029_v35 }
 0x76d   : > { %v7142_v20 = vadd.f32 %v18521_v46, %v7053_v6 }
 0x76f   : > { %v7541_v37 = vpop.f32.mrf.mxu2  ;;  %v7231_v35 = vadd.f32 %v18522_v53, %v7142_v20  ;;  %v18526_v20 = vld [vmem:[#allocation80_spill] sm:$0xff] }
 0x770   : > { %v16046_v16 = vadd.f32 %v7541_v37, %v18520_v21 }
 0x771   : > { %v7495_v45 = vpop.f32.mrf.mxu1  ;;  %v7320_v37 = vadd.f32 %v18523_v60, %v7231_v35 }
 0x772   : > { %v16050_v8 = vadd.f32 %v7495_v45, %v15705_v43 }
 0x773   : > { %v7409_v21 = vadd.f32 %v15723_v50, %v7320_v37  ;;  %v18525_v50 = vld [vmem:[#allocation157_spill] sm:$0xff] }
 0x774   : > { %10521 = vmatmul.msk.bf16.gmra.mxu2 %vm10520_vm3, %v17402_v33  ;;  %10537 = vmatmul.msk.bf16.gmra.mxu3 %vm10536_vm4, %v17402_v33  ;;  %v18527_v37 = vld [vmem:[#allocation69_spill] sm:$0xff]  ;;  %vm4931_vm3 = vcmp.eq.s32.totalorder %v17843_v39, %v15764_v15  ;;  %vm4947_vm4 = vcmp.eq.s32.totalorder %v17844_v38, %v15764_v15 }
 0x775   : > { %vm10572_vm7 = vmpackc.low %vm4947_vm4, %vm4931_vm3  ;;  %vm5026_vm4 = vcmp.eq.s32.totalorder %v18451_v4, %v15761_v11 }
 0x776   : > { %10569 = vmatmul.msk.bf16.gmra.mxu1 %vm10568_vm5, %v17402_v33  ;;  %vm10540_vm5 = vmpackc.low %vm4946_vm0, %vm4930_vm15  ;;  %vm5010_vm15 = vcmp.eq.s32.totalorder %v18423_v3, %v15761_v11  ;;  %vm4995_vm0 = vcmp.eq.s32.totalorder %v18422_v32, %v15764_v15 }
 0x777   : > { %v7544_v0 = vpop.f32.mrf.mxu2 }
 0x778   : > { %v16059_v29 = vadd.f32 %v7544_v0, %v15685_v1  ;;  %v18524_v1 = vld [vmem:[#allocation204_spill] sm:$0xff] }
 0x779   : > { %v7497_v6 = vpop.f32.mrf.mxu1  ;;  %v7058_v45 = vadd.f32 %v18525_v50, %v18524_v1 }
 0x77a   : > { %v16061_v43 = vadd.f32 %v7497_v6, %v7409_v21  ;;  %v7413_v21 = vpop.f32.mrf.mxu3 }
 0x77b   : > { %v7147_v53 = vadd.f32 %v18526_v20, %v7058_v45  ;;  %v16095_v45 = vperm.slane %v15758_v31, 5 }
 0x77d   : > { %v7236_v0 = vadd.f32 %v18527_v37, %v7147_v53  ;;  %vm4676_vm1 = vcmp.eq.s32.totalorder %v17828_v34, %v16095_v45  ;;  %vm4692_vm2 = vcmp.eq.s32.totalorder %v17829_v58, %v16095_v45 }
 0x77e   : > { %vm10588_vm6 = vmpackc.low %vm4692_vm2, %vm4676_vm1  ;;  %vm5011_vm1 = vcmp.eq.s32.totalorder %v18423_v3, %v15764_v15 }
 0x77f   : > { %v7546_v35 = vpop.f32.mrf.mxu2  ;;  %vm10576_vm3 = vmpackc.low %vm5011_vm1, %vm4995_vm0 }
 0x780   : > { %v16078_v46 = vadd.f32 %v7546_v35, %v15709_v36  ;;  %v7325_v36 = vadd.f32 %v15781_v17, %v7236_v0 }
 0x781   : > { %v7500_v18 = vpop.f32.mrf.mxu1 }
 0x782   : > { %v16082_v60 = vadd.f32 %v7500_v18, %v15747_v5  ;;  %v7414_v35 = vadd.f32 %v7413_v21, %v7325_v36 }
 0x784   : > { %10523 = vmatmul.msk.bf16.gmra.mxu2 %vm10522_vm12, %v17402_v33  ;;  %10539 = vmatmul.msk.bf16.gmra.mxu3 %vm10538_vm13, %v17402_v33  ;;  %vm10542_vm12 = vmpackc.low %vm4978_vm9, %vm4962_vm8 }
 0x785   : > { %vm10574_vm13 = vmpackc.low %vm4979_vm11, %vm4963_vm10  ;;  %vm5058_vm10 = vcmp.eq.s32.totalorder %v18479_v48, %v15761_v11  ;;  %vm5074_vm11 = vcmp.eq.s32.totalorder %v18480_v22, %v15761_v11 }
 0x786   : > { %10571 = vmatmul.msk.bf16.gmra.mxu1 %vm10570_vm14, %v17402_v33  ;;  %vm4994_vm14 = vcmp.eq.s32.totalorder %v18422_v32, %v15761_v11 }
 0x787   : > { %v7549_v6 = vpop.f32.mrf.mxu2  ;;  %vm10544_vm2 = vmpackc.low %vm5010_vm15, %vm4994_vm14 }
 0x788   : > { %v16090_v1 = vadd.f32 %v7549_v6, %v15730_v27  ;;  %vm10548_vm14 = vmpackc.low %vm5074_vm11, %vm5058_vm10 }
 0x789   : > { %v7502_v50 = vpop.f32.mrf.mxu1 }
 0x78a   : > { %v16092_v5 = vadd.f32 %v7502_v50, %v7414_v35 }
 0x78f   : > { %v7551_v27 = vpop.f32.mrf.mxu2 }
 0x790   : > { %v16110_v31 = vadd.f32 %v7551_v27, %v15752_v52 }
 0x793   : > { %v7692_v17 = vpop.f32.mrf.mxu1 }
 0x794   : > { %10541 = vmatmul.msk.bf16.gmra.mxu3 %vm10540_vm5, %v17402_v33  ;;  %10589 = vmatmul.msk.bf16.vlgmr.msrb.gmra.mxu2 %vm10588_vm6, %v17402_v33  ;;  %vm5042_vm5 = vcmp.eq.s32.totalorder %v18452_v14, %v15761_v11  ;;  %vm5027_vm6 = vcmp.eq.s32.totalorder %v18451_v4, %v15764_v15 }
 0x795   : > { %vm10546_vm8 = vmpackc.low %vm5042_vm5, %vm5026_vm4 }
 0x796   : > { %10573 = vmatmul.msk.bf16.gmra.mxu1 %vm10572_vm7, %v17402_v33  ;;  %vm5043_vm7 = vcmp.eq.s32.totalorder %v18452_v14, %v15764_v15 }
 0x797   : > { %v7554_v18 = vpop.f32.mrf.mxu2  ;;  %v7603_v20 = vpop.f32.mrf.mxu3  ;;  %vm10578_vm9 = vmpackc.low %vm5043_vm7, %vm5027_vm6  ;;  %vm5122_vm6 = vcmp.eq.s32.totalorder %v18515_v26, %v15761_v11  ;;  %vm5138_vm7 = vcmp.eq.s32.totalorder %v18516_v44, %v15761_v11 }
 0x798   : > { %v16116_v53 = vadd.f32 %v7554_v18, %v15793_v61  ;;  %v7604_v37 = vadd.f32 %v7603_v20, %v15813_v49  ;;  %vm10552_vm10 = vmpackc.low %vm5138_vm7, %vm5122_vm6 }
 0x79a   : > { %v16119_v0 = vadd.f32 %v7692_v17, %v7604_v37 }
 0x79b   : > { %v7694_v52 = vpop.f32.mrf.mxu1 }
 0x79c   : > { %18528 = vst [vmem:[#allocation169_spill] sm:$0xff] %v16119_v0 }
 0x79f   : > { %v7556_v21 = vpop.f32.mrf.mxu2  ;;  %v7605_v36 = vpop.f32.mrf.mxu3 }
 0x7a0   : > { %v16130_v61 = vadd.f32 %v7556_v21, %v15815_v57  ;;  %v7606_v49 = vadd.f32 %v7605_v36, %v15840_v56 }
 0x7a2   : > { %v16133_v6 = vadd.f32 %v7694_v52, %v7606_v49 }
 0x7a3   : > { %v7697_v35 = vpop.f32.mrf.mxu1 }
 0x7a4   : > { %18529 = vst [vmem:[#allocation76_spill] sm:$0xff] %v16133_v6  ;;  %10543 = vmatmul.msk.bf16.gmra.mxu3 %vm10542_vm12, %v17402_v33  ;;  %vm5059_vm12 = vcmp.eq.s32.totalorder %v18479_v48, %v15764_v15 }
 0x7a6   : > { %10575 = vmatmul.msk.bf16.gmra.mxu1 %vm10574_vm13, %v17402_v33  ;;  %vm5075_vm13 = vcmp.eq.s32.totalorder %v18480_v22, %v15764_v15 }
 0x7a7   : > { %v7559_v50 = vpop.f32.mrf.mxu2  ;;  %v7608_v27 = vpop.f32.mrf.mxu3  ;;  %vm10580_vm15 = vmpackc.low %vm5075_vm13, %vm5059_vm12  ;;  %vm5154_vm12 = vcmp.eq.s32.totalorder %v17985_v24, %v15761_v11  ;;  %vm5170_vm13 = vcmp.eq.s32.totalorder %v17986_v30, %v15761_v11 }
 0x7a8   : > { %v16138_v17 = vadd.f32 %v7559_v50, %v15844_v2  ;;  %v7609_v18 = vadd.f32 %v7608_v27, %v15861_v54 }
 0x7aa   : > { %v16141_v57 = vadd.f32 %v7697_v35, %v7609_v18 }
 0x7ab   : > { %v7699_v20 = vpop.f32.mrf.mxu1 }
 0x7af   : > { %v7561_v56 = vpop.f32.mrf.mxu2  ;;  %v7610_v37 = vpop.f32.mrf.mxu3 }
 0x7b0   : > { %v16152_v2 = vadd.f32 %v7561_v56, %v15863_v40  ;;  %v7611_v54 = vadd.f32 %v7610_v37, %v15885_v51 }
 0x7b2   : > { %v16155_v52 = vadd.f32 %v7699_v20, %v7611_v54 }
 0x7b3   : > { %v7702_v21 = vpop.f32.mrf.mxu1 }
 0x7b4   : > { %10545 = vmatmul.msk.bf16.gmra.mxu3 %vm10544_vm2, %v17402_v33 }
 0x7b6   : > { %10577 = vmatmul.msk.bf16.gmra.mxu1 %vm10576_vm3, %v17402_v33 }
 0x7b7   : > { %v7564_v36 = vpop.f32.mrf.mxu2  ;;  %v7613_v49 = vpop.f32.mrf.mxu3 }
 0x7b8   : > { %v16160_v35 = vadd.f32 %v7564_v36, %v15889_v12  ;;  %v7614_v50 = vadd.f32 %v7613_v49, %v15907_v47 }
 0x7ba   : > { %v16163_v40 = vadd.f32 %v7702_v21, %v7614_v50 }
 0x7bb   : > { %v7704_v27 = vpop.f32.mrf.mxu1 }
 0x7bf   : > { %v7566_v51 = vpop.f32.mrf.mxu2  ;;  %v7615_v18 = vpop.f32.mrf.mxu3 }
 0x7c0   : > { %v16174_v12 = vadd.f32 %v7566_v51, %v15909_v42  ;;  %v7616_v47 = vadd.f32 %v7615_v18, %v15932_v25 }
 0x7c2   : > { %v16177_v20 = vadd.f32 %v7704_v27, %v7616_v47 }
 0x7c3   : > { %v7707_v56 = vpop.f32.mrf.mxu1 }
 0x7c4   : > { %10547 = vmatmul.msk.bf16.gmra.mxu3 %vm10546_vm8, %v17402_v33  ;;  %vm5123_vm8 = vcmp.eq.s32.totalorder %v18515_v26, %v15764_v15 }
 0x7c6   : > { %10579 = vmatmul.msk.bf16.gmra.mxu1 %vm10578_vm9, %v17402_v33  ;;  %vm5139_vm9 = vcmp.eq.s32.totalorder %v18516_v44, %v15764_v15 }
 0x7c7   : > { %v7569_v37 = vpop.f32.mrf.mxu2  ;;  %v7618_v54 = vpop.f32.mrf.mxu3  ;;  %vm10584_vm11 = vmpackc.low %vm5139_vm9, %vm5123_vm8 }
 0x7c8   : > { %v16182_v21 = vadd.f32 %v7569_v37, %v15936_v19  ;;  %v7619_v36 = vadd.f32 %v7618_v54, %v15954_v28 }
 0x7ca   : > { %v16185_v42 = vadd.f32 %v7707_v56, %v7619_v36  ;;  %v18531_v36 = vld [vmem:[#allocation246_spill] sm:$0xff] }
 0x7cb   : > { %v7709_v49 = vpop.f32.mrf.mxu1  ;;  %vm5106_vm1 = vcmp.eq.s32.totalorder %v18531_v36, %v15761_v11  ;;  %vm5107_vm3 = vcmp.eq.s32.totalorder %v18531_v36, %v15764_v15 }
 0x7cf   : > { %v7571_v25 = vpop.f32.mrf.mxu2  ;;  %v7620_v50 = vpop.f32.mrf.mxu3 }
 0x7d0   : > { %v16196_v19 = vadd.f32 %v7571_v25, %v15956_v13  ;;  %v7621_v28 = vadd.f32 %v7620_v50, %v15976_v63  ;;  %v18530_v63 = vld [vmem:[#allocation62_spill] sm:$0xff]  ;;  %v18533_v50 = vld [vmem:[#allocation132_spill] sm:$0xff] }
 0x7d1   : > { %vm5090_vm0 = vcmp.eq.s32.totalorder %v18530_v63, %v15761_v11  ;;  %vm5091_vm2 = vcmp.eq.s32.totalorder %v18530_v63, %v15764_v15 }
 0x7d2   : > { %v16199_v27 = vadd.f32 %v7709_v49, %v7621_v28  ;;  %vm10550_vm4 = vmpackc.low %vm5106_vm1, %vm5090_vm0 }
 0x7d3   : > { %v7712_v51 = vpop.f32.mrf.mxu1  ;;  %vm10582_vm5 = vmpackc.low %vm5107_vm3, %vm5091_vm2 }
 0x7d4   : > { %10549 = vmatmul.msk.bf16.gmra.mxu3 %vm10548_vm14, %v17402_v33  ;;  %vm5155_vm14 = vcmp.eq.s32.totalorder %v17985_v24, %v15764_v15  ;;  %vm10554_vm0 = vmpackc.low %vm5170_vm13, %vm5154_vm12 }
 0x7d6   : > { %10581 = vmatmul.msk.bf16.gmra.mxu1 %vm10580_vm15, %v17402_v33  ;;  %vm5171_vm15 = vcmp.eq.s32.totalorder %v17986_v30, %v15764_v15 }
 0x7d7   : > { %v7574_v18 = vpop.f32.mrf.mxu2  ;;  %v7623_v47 = vpop.f32.mrf.mxu3  ;;  %vm10586_vm1 = vmpackc.low %vm5171_vm15, %vm5155_vm14 }
 0x7d8   : > { %v16204_v56 = vadd.f32 %v7574_v18, %v15980_v41  ;;  %v7624_v37 = vadd.f32 %v7623_v47, %v15992_v9  ;;  %v18532_v41 = vld [vmem:[#allocation129_spill] sm:$0xff] }
 0x7da   : > { %v16207_v13 = vadd.f32 %v7712_v51, %v7624_v37  ;;  %v18534_v37 = vld [vmem:[#allocation121_spill] sm:$0xff] }
 0x7db   : > { %v16209_v54 = vpop.f32.mrf.mxu1 }
 0x7df   : > { %v7576_v49 = vpop.f32.mrf.mxu2  ;;  %v7625_v25 = vpop.f32.mrf.mxu3 }
 0x7e0   : > { %v16220_v9 = vadd.f32 %v7576_v49, %v18532_v41  ;;  %v16223_v28 = vadd.f32 %v7625_v25, %v18533_v50  ;;  %v18535_v50 = vld [vmem:[#allocation123_spill] sm:$0xff] }
 0x7e3   : > { %v7717_v51 = vpop.f32.mrf.mxu1 }
 0x7e4   : > { %10551 = vmatmul.msk.bf16.gmra.mxu3 %vm10550_vm4, %v17402_v33 }
 0x7e6   : > { %10583 = vmatmul.msk.bf16.gmra.mxu1 %vm10582_vm5, %v17402_v33 }
 0x7e7   : > { %v7579_v18 = vpop.f32.mrf.mxu2  ;;  %v7628_v47 = vpop.f32.mrf.mxu3 }
 0x7e8   : > { %v16228_v6 = vadd.f32 %v7579_v18, %v18534_v37  ;;  %v7629_v0 = vadd.f32 %v7628_v47, %v16027_v7 }
 0x7ea   : > { %v16231_v58 = vadd.f32 %v7717_v51, %v7629_v0 }
 0x7eb   : > { %v16233_v49 = vpop.f32.mrf.mxu1 }
 0x7ef   : > { %v7581_v25 = vpop.f32.mrf.mxu2  ;;  %v7630_v41 = vpop.f32.mrf.mxu3 }
 0x7f0   : > { %v16244_v7 = vadd.f32 %v7581_v25, %v18535_v50  ;;  %v16247_v0 = vadd.f32 %v7630_v41, %v16046_v16 }
 0x7f3   : > { %v7722_v51 = vpop.f32.mrf.mxu1 }
 0x7f4   : > { %10553 = vmatmul.msk.bf16.gmra.mxu3 %vm10552_vm10, %v17402_v33 }
 0x7f6   : > { %10585 = vmatmul.msk.bf16.gmra.mxu1 %vm10584_vm11, %v17402_v33 }
 0x7f7   : > { %v7584_v18 = vpop.f32.mrf.mxu2  ;;  %v7633_v47 = vpop.f32.mrf.mxu3 }
 0x7f8   : > { %v16252_v37 = vadd.f32 %v7584_v18, %v16050_v8  ;;  %v7634_v34 = vadd.f32 %v7633_v47, %v16059_v29  ;;  %v18538_v47 = vld [vmem:[#allocation136_spill] sm:$0xff] }
 0x7f9   : > { %vm4724_vm3 = vcmp.eq.s32.totalorder %v18538_v47, %v16095_v45 }
 0x7fa   : > { %v16255_v44 = vadd.f32 %v7722_v51, %v7634_v34 }
 0x7fb   : > { %v16257_v25 = vpop.f32.mrf.mxu1 }
 0x7ff   : > { %v7586_v16 = vpop.f32.mrf.mxu2  ;;  %v7635_v41 = vpop.f32.mrf.mxu3 }
 0x800   : > { %v16268_v29 = vadd.f32 %v7586_v16, %v16061_v43  ;;  %v16271_v34 = vadd.f32 %v7635_v41, %v16078_v46  ;;  %v18537_v46 = vld [vmem:[#allocation135_spill] sm:$0xff] }
 0x801   : > { %vm4708_vm2 = vcmp.eq.s32.totalorder %v18537_v46, %v16095_v45 }
 0x802   : > { %vm10590_vm4 = vmpackc.low %vm4724_vm3, %vm4708_vm2 }
 0x803   : > { %v7727_v8 = vpop.f32.mrf.mxu1 }
 0x804   : > { %10555 = vmatmul.msk.bf16.gmra.mxu3 %vm10554_vm0, %v17402_v33 }
 0x806   : > { %10587 = vmatmul.msk.bf16.gmra.mxu1 %vm10586_vm1, %v17402_v33  ;;  %vm4868_vm1 = vcmp.eq.s32.totalorder %v18517_v10, %v16095_v45 }
 0x807   : > { %v7589_v11 = vpop.f32.mrf.mxu2  ;;  %v7638_v50 = vpop.f32.mrf.mxu3 }
 0x808   : > { %v16276_v51 = vadd.f32 %v7589_v11, %v16082_v60  ;;  %v7639_v15 = vadd.f32 %v7638_v50, %v16090_v1 }
 0x80a   : > { %v16279_v18 = vadd.f32 %v7727_v8, %v7639_v15 }
 0x80b   : > { %v16281_v43 = vpop.f32.mrf.mxu1 }
 0x80c   : > { %18536 = vst [vmem:[#allocation245_spill] sm:$0xff] %v16281_v43  ;;  %v18542_v43 = vld [vmem:[#allocation145_spill] sm:$0xff] }
 0x80d   : > { %vm4740_vm5 = vcmp.eq.s32.totalorder %v18542_v43, %v16095_v45 }
 0x80f   : > { %v7591_v16 = vpop.f32.mrf.mxu2  ;;  %v7640_v41 = vpop.f32.mrf.mxu3 }
 0x810   : > { %v16288_v30 = vadd.f32 %v7591_v16, %v16092_v5  ;;  %v16291_v60 = vadd.f32 %v7640_v41, %v16110_v31  ;;  %v18543_v5 = vld [vmem:[#allocation146_spill] sm:$0xff] }
 0x811   : > { %vm4756_vm6 = vcmp.eq.s32.totalorder %v18543_v5, %v16095_v45 }
 0x812   : > { %18539 = vst [vmem:[#allocation256_spill] sm:$0xff] %v16291_v60  ;;  %vm10592_vm7 = vmpackc.low %vm4756_vm6, %vm4740_vm5  ;;  %vm4916_vm5 = vcmp.eq.s32.totalorder %v17832_v59, %v16095_v45 }
 0x813   : > { %v7732_v1 = vpop.f32.mrf.mxu1 }
 0x814   : > { %10591 = vmatmul.msk.bf16.vlgmr.msra.gmra.mxu3 %vm10590_vm4, %v17402_v33  ;;  %vm4900_vm4 = vcmp.eq.s32.totalorder %v17831_v62, %v16095_v45 }
 0x815   : > { %vm10602_vm6 = vmpackc.low %vm4916_vm5, %vm4900_vm4  ;;  %vm5076_vm4 = vcmp.eq.s32.totalorder %v18480_v22, %v16095_v45 }
 0x817   : > { %v7643_v8 = vpop.f32.mrf.mxu3 }
 0x818   : > { %v7644_v11 = vadd.f32 %v7643_v8, %v16116_v53 }
 0x81a   : > { %v16295_v50 = vadd.f32 %v7732_v1, %v7644_v11  ;;  %v18547_v11 = vld [vmem:[#allocation155_spill] sm:$0xff] }
 0x81b   : > { %v16297_v15 = vpop.f32.mrf.mxu1  ;;  %vm4772_vm8 = vcmp.eq.s32.totalorder %v18547_v11, %v16095_v45 }
 0x81c   : > { %18540 = vst [vmem:[#allocation195_spill] sm:$0xff] %v16295_v50 }
 0x81d   : > { %18541 = vst [vmem:[#allocation268_spill] sm:$0xff] %v16297_v15  ;;  %v18548_v15 = vld [vmem:[#allocation156_spill] sm:$0xff] }
 0x81e   : > { %vm4788_vm9 = vcmp.eq.s32.totalorder %v18548_v15, %v16095_v45 }
 0x81f   : > { %v7645_v16 = vpop.f32.mrf.mxu3  ;;  %vm10594_vm10 = vmpackc.low %vm4788_vm9, %vm4772_vm8  ;;  %vm4948_vm8 = vcmp.eq.s32.totalorder %v17844_v38, %v16095_v45 }
 0x820   : > { %v16304_v31 = vadd.f32 %v7645_v16, %v16130_v61 }
 0x822   : > { %18544 = vst [vmem:[#allocation102_spill] sm:$0xff] %v16304_v31 }
 0x823   : > { %v7737_v41 = vpop.f32.mrf.mxu1 }
 0x824   : > { %10593 = vmatmul.msk.bf16.gmra.mxu3 %vm10592_vm7, %v17402_v33  ;;  %vm4932_vm7 = vcmp.eq.s32.totalorder %v17843_v39, %v16095_v45 }
 0x825   : > { %vm10604_vm9 = vmpackc.low %vm4948_vm8, %vm4932_vm7  ;;  %vm5108_vm7 = vcmp.eq.s32.totalorder %v18531_v36, %v16095_v45 }
 0x827   : > { %v7648_v60 = vpop.f32.mrf.mxu3 }
 0x828   : > { %v7649_v53 = vadd.f32 %v7648_v60, %v16138_v17 }
 0x82a   : > { %v16308_v1 = vadd.f32 %v7737_v41, %v7649_v53  ;;  %v18552_v53 = vld [vmem:[#allocation165_spill] sm:$0xff] }
 0x82b   : > { %v16310_v8 = vpop.f32.mrf.mxu1  ;;  %vm4804_vm11 = vcmp.eq.s32.totalorder %v18552_v53, %v16095_v45 }
 0x82c   : > { %18545 = vst [vmem:[#allocation193_spill] sm:$0xff] %v16308_v1 }
 0x82d   : > { %18546 = vst [vmem:[#allocation107_spill] sm:$0xff] %v16310_v8  ;;  %v18553_v8 = vld [vmem:[#allocation166_spill] sm:$0xff] }
 0x82e   : > { %vm4820_vm12 = vcmp.eq.s32.totalorder %v18553_v8, %v16095_v45 }
 0x82f   : > { %v7650_v50 = vpop.f32.mrf.mxu3  ;;  %vm10596_vm13 = vmpackc.low %vm4820_vm12, %vm4804_vm11  ;;  %vm4980_vm11 = vcmp.eq.s32.totalorder %v17859_v55, %v16095_v45 }
 0x830   : > { %v16317_v61 = vadd.f32 %v7650_v50, %v16152_v2 }
 0x832   : > { %18549 = vst [vmem:[#allocation109_spill] sm:$0xff] %v16317_v61 }
 0x833   : > { %v7742_v16 = vpop.f32.mrf.mxu1 }
 0x834   : > { %10595 = vmatmul.msk.bf16.gmra.mxu3 %vm10594_vm10, %v17402_v33  ;;  %vm4964_vm10 = vcmp.eq.s32.totalorder %v17858_v23, %v16095_v45 }
 0x835   : > { %vm10606_vm12 = vmpackc.low %vm4980_vm11, %vm4964_vm10 }
 0x837   : > { %v7653_v31 = vpop.f32.mrf.mxu3 }
 0x838   : > { %v7654_v17 = vadd.f32 %v7653_v31, %v16160_v35 }
 0x83a   : > { %v16321_v60 = vadd.f32 %v7742_v16, %v7654_v17  ;;  %v18556_v17 = vld [vmem:[#allocation175_spill] sm:$0xff] }
 0x83b   : > { %v16323_v41 = vpop.f32.mrf.mxu1  ;;  %vm4836_vm14 = vcmp.eq.s32.totalorder %v18556_v17, %v16095_v45 }
 0x83c   : > { %18550 = vst [vmem:[#allocation111_spill] sm:$0xff] %v16321_v60 }
 0x83d   : > { %18551 = vst [vmem:[#allocation112_spill] sm:$0xff] %v16323_v41  ;;  %v18557_v41 = vld [vmem:[#allocation176_spill] sm:$0xff] }
 0x83e   : > { %vm4852_vm15 = vcmp.eq.s32.totalorder %v18557_v41, %v16095_v45 }
 0x83f   : > { %v7655_v1 = vpop.f32.mrf.mxu3  ;;  %vm10598_vm0 = vmpackc.low %vm4852_vm15, %vm4836_vm14  ;;  %vm5012_vm14 = vcmp.eq.s32.totalorder %v18423_v3, %v16095_v45 }
 0x840   : > { %v16330_v2 = vadd.f32 %v7655_v1, %v16174_v12 }
 0x842   : > { %18554 = vst [vmem:[#allocation115_spill] sm:$0xff] %v16330_v2 }
 0x843   : > { %v7747_v50 = vpop.f32.mrf.mxu1 }
 0x844   : > { %10597 = vmatmul.msk.bf16.gmra.mxu3 %vm10596_vm13, %v17402_v33  ;;  %vm4996_vm13 = vcmp.eq.s32.totalorder %v18422_v32, %v16095_v45 }
 0x845   : > { %vm10608_vm15 = vmpackc.low %vm5012_vm14, %vm4996_vm13 }
 0x847   : > { %v7658_v61 = vpop.f32.mrf.mxu3 }
 0x848   : > { %v7659_v35 = vadd.f32 %v7658_v61, %v16182_v21 }
 0x84a   : > { %v16334_v31 = vadd.f32 %v7747_v50, %v7659_v35  ;;  %v18560_v35 = vld [vmem:[#allocation184_spill] sm:$0xff] }
 0x84b   : > { %v16336_v16 = vpop.f32.mrf.mxu1  ;;  %vm4884_vm2 = vcmp.eq.s32.totalorder %v18560_v35, %v16095_v45 }
 0x84c   : > { %18555 = vst [vmem:[#allocation113_spill] sm:$0xff] %v16336_v16  ;;  %vm10600_vm3 = vmpackc.low %vm4884_vm2, %vm4868_vm1  ;;  %vm5044_vm1 = vcmp.eq.s32.totalorder %v18452_v14, %v16095_v45 }
 0x84f   : > { %v7660_v60 = vpop.f32.mrf.mxu3 }
 0x850   : > { %v16343_v12 = vadd.f32 %v7660_v60, %v16196_v19 }
 0x852   : > { %18558 = vst [vmem:[#allocation117_spill] sm:$0xff] %v16343_v12 }
 0x853   : > { %v7752_v1 = vpop.f32.mrf.mxu1 }
 0x854   : > { %10599 = vmatmul.msk.bf16.gmra.mxu3 %vm10598_vm0, %v17402_v33  ;;  %vm5028_vm0 = vcmp.eq.s32.totalorder %v18451_v4, %v16095_v45 }
 0x855   : > { %vm10610_vm2 = vmpackc.low %vm5044_vm1, %vm5028_vm0 }
 0x857   : > { %v7663_v2 = vpop.f32.mrf.mxu3 }
 0x858   : > { %v7664_v21 = vadd.f32 %v7663_v2, %v16204_v56 }
 0x85a   : > { %v16347_v61 = vadd.f32 %v7752_v1, %v7664_v21 }
 0x85b   : > { %v16349_v50 = vpop.f32.mrf.mxu1 }
 0x85c   : > { %18559 = vst [vmem:[#allocation118_spill] sm:$0xff] %v16349_v50 }
 0x85f   : > { %v7665_v16 = vpop.f32.mrf.mxu3 }
 0x860   : > { %v16356_v19 = vadd.f32 %v7665_v16, %v16220_v9 }
 0x863   : > { %v7757_v60 = vpop.f32.mrf.mxu1 }
 0x864   : > { %10601 = vmatmul.msk.bf16.gmra.mxu3 %vm10600_vm3, %v17402_v33  ;;  %vm5060_vm3 = vcmp.eq.s32.totalorder %v18479_v48, %v16095_v45 }
 0x865   : > { %vm10612_vm5 = vmpackc.low %vm5076_vm4, %vm5060_vm3 }
 0x867   : > { %v7668_v12 = vpop.f32.mrf.mxu3 }
 0x868   : > { %v7669_v56 = vadd.f32 %v7668_v12, %v16228_v6 }
 0x86a   : > { %v16360_v2 = vadd.f32 %v7757_v60, %v7669_v56 }
 0x86b   : > { %v16362_v1 = vpop.f32.mrf.mxu1 }
 0x86c   : > { %18561 = vst [vmem:[#allocation190_spill] sm:$0xff] %v16362_v1 }
 0x86f   : > { %v7670_v21 = vpop.f32.mrf.mxu3 }
 0x870   : > { %v16369_v9 = vadd.f32 %v7670_v21, %v16244_v7 }
 0x873   : > { %v7762_v16 = vpop.f32.mrf.mxu1 }
 0x874   : > { %10603 = vmatmul.msk.bf16.gmra.mxu3 %vm10602_vm6, %v17402_v33  ;;  %vm5092_vm6 = vcmp.eq.s32.totalorder %v18530_v63, %v16095_v45 }
 0x875   : > { %vm10614_vm8 = vmpackc.low %vm5108_vm7, %vm5092_vm6 }
 0x877   : > { %v7673_v50 = vpop.f32.mrf.mxu3 }
 0x878   : > { %v7674_v6 = vadd.f32 %v7673_v50, %v16252_v37 }
 0x87a   : > { %v16373_v12 = vadd.f32 %v7762_v16, %v7674_v6 }
 0x87b   : > { %v16375_v60 = vpop.f32.mrf.mxu1 }
 0x87f   : > { %v7675_v56 = vpop.f32.mrf.mxu3 }
 0x880   : > { %v16382_v7 = vadd.f32 %v7675_v56, %v16268_v29 }
 0x883   : > { %v7767_v1 = vpop.f32.mrf.mxu1 }
 0x884   : > { %10605 = vmatmul.msk.bf16.gmra.mxu3 %vm10604_vm9, %v17402_v33  ;;  %vm5124_vm9 = vcmp.eq.s32.totalorder %v18515_v26, %v16095_v45 }
 0x887   : > { %v7678_v21 = vpop.f32.mrf.mxu3 }
 0x888   : > { %v7679_v37 = vadd.f32 %v7678_v21, %v16276_v51 }
 0x88a   : > { %v16386_v50 = vadd.f32 %v7767_v1, %v7679_v37 }
 0x88f   : > { %v7680_v16 = vpop.f32.mrf.mxu3 }
 0x890   : > { %v16393_v6 = vadd.f32 %v7680_v16, %v16288_v30 }
 0x894   : > { %10607 = vmatmul.msk.bf16.gmra.mxu3 %vm10606_vm12, %v17402_v33 }
 0x897   : > { %v7786_v29 = vpop.f32.mrf.mxu3 }
 0x898   : > { %v16397_v56 = vadd.f32 %v7786_v29, %v16141_v57 }
 0x89f   : > { %v7788_v51 = vpop.f32.mrf.mxu3 }
 0x8a0   : > { %v16404_v1 = vadd.f32 %v7788_v51, %v16155_v52 }
 0x8a4   : > { %10609 = vmatmul.msk.bf16.gmra.mxu3 %vm10608_vm15, %v17402_v33  ;;  %vm5156_vm15 = vcmp.eq.s32.totalorder %v17985_v24, %v16095_v45 }
 0x8a7   : > { %v7791_v30 = vpop.f32.mrf.mxu3 }
 0x8a8   : > { %v16408_v21 = vadd.f32 %v7791_v30, %v16163_v40 }
 0x8af   : > { %v7793_v57 = vpop.f32.mrf.mxu3 }
 0x8b0   : > { %v16415_v37 = vadd.f32 %v7793_v57, %v16177_v20 }
 0x8b4   : > { %10611 = vmatmul.msk.bf16.gmra.mxu3 %vm10610_vm2, %v17402_v33 }
 0x8b7   : > { %v7796_v52 = vpop.f32.mrf.mxu3 }
 0x8b8   : > { %v16419_v16 = vadd.f32 %v7796_v52, %v16185_v42  ;;  %v7715_v42 = vadd.f32 %v16209_v54, %v16223_v28  ;;  %v7720_v52 = vadd.f32 %v16233_v49, %v16247_v0  ;;  %v18562_v54 = vld [vmem:[#allocation255_spill] sm:$0xff]  ;;  %v18565_v49 = vld [vmem:[#allocation126_spill] sm:$0xff] }
 0x8b9   : > { %vm5140_vm10 = vcmp.eq.s32.totalorder %v18562_v54, %v16095_v45 }
 0x8ba   : > { %vm10616_vm11 = vmpackc.low %vm5140_vm10, %vm5124_vm9 }
 0x8bf   : > { %v7798_v40 = vpop.f32.mrf.mxu3 }
 0x8c0   : > { %v16426_v29 = vadd.f32 %v7798_v40, %v16199_v27 }
 0x8c4   : > { %10613 = vmatmul.msk.bf16.gmra.mxu3 %vm10612_vm5, %v17402_v33 }
 0x8c7   : > { %v7801_v20 = vpop.f32.mrf.mxu3 }
 0x8c8   : > { %v16430_v51 = vadd.f32 %v7801_v20, %v16207_v13  ;;  %v10996_v20 = vld [vmem:[%s11280_s20 + $0x8] sm:$0xff] }
 0x8cf   : > { %v7803_v30 = vpop.f32.mrf.mxu3 }
 0x8d0   : > { %v16438_v27 = vadd.f32 %v7803_v30, %v7715_v42  ;;  %v16453_v42 = vperm.slane %v10996_v20, 7 }
 0x8d2   : > { %vm4694_vm13 = vcmp.eq.s32.totalorder %v18565_v49, %v16453_v42  ;;  %vm4710_vm2 = vcmp.eq.s32.totalorder %v18537_v46, %v16453_v42  ;;  %vm4726_vm3 = vcmp.eq.s32.totalorder %v18538_v47, %v16453_v42  ;;  %vm4758_vm9 = vcmp.eq.s32.totalorder %v18543_v5, %v16453_v42 }
 0x8d3   : > { %vm10654_vm4 = vmpackc.low %vm4726_vm3, %vm4710_vm2 }
 0x8d4   : > { %10615 = vmatmul.msk.bf16.gmra.mxu3 %vm10614_vm8, %v17402_v33  ;;  %vm4742_vm8 = vcmp.eq.s32.totalorder %v18542_v43, %v16453_v42 }
 0x8d5   : > { %vm10656_vm10 = vmpackc.low %vm4758_vm9, %vm4742_vm8 }
 0x8d7   : > { %v7806_v57 = vpop.f32.mrf.mxu3 }
 0x8d8   : > { %v16442_v13 = vadd.f32 %v7806_v57, %v16231_v58  ;;  %v18564_v58 = vld [vmem:[#allocation125_spill] sm:$0xff]  ;;  %v7725_v57 = vadd.f32 %v16257_v25, %v16271_v34  ;;  %v18568_v34 = vld [vmem:[#allocation256_spill] sm:$0xff] }
 0x8d9   : > { %vm4678_vm12 = vcmp.eq.s32.totalorder %v18564_v58, %v16453_v42 }
 0x8da   : > { %vm10652_vm14 = vmpackc.low %vm4694_vm13, %vm4678_vm12 }
 0x8db   : > { %10653 = vmatmul.msk.bf16.vlgmr.msrb.gmra.mxu1 %vm10652_vm14, %v17402_v33  ;;  %vm4774_vm14 = vcmp.eq.s32.totalorder %v18547_v11, %v16453_v42 }
 0x8df   : > { %v7808_v28 = vpop.f32.mrf.mxu3 }
 0x8e0   : > { %v16450_v40 = vadd.f32 %v7808_v28, %v7720_v52  ;;  %v18566_v52 = vld [vmem:[#allocation46_spill] sm:$0xff] }
 0x8e1   : > { %vm5172_vm0 = vcmp.eq.s32.totalorder %v18566_v52, %v16095_v45  ;;  %v16481_v45 = vperm.slane %v10996_v20, 6  ;;  %v18570_v20 = vld [vmem:[#allocation195_spill] sm:$0xff] }
 0x8e2   : > { %18563 = vst [vmem:[#allocation262_spill] sm:$0xff] %v16450_v40  ;;  %vm10618_vm1 = vmpackc.low %vm5172_vm0, %vm5156_vm15  ;;  %vm4790_vm15 = vcmp.eq.s32.totalorder %v18548_v15, %v16453_v42 }
 0x8e3   : > { %vm4677_vm5 = vcmp.eq.s32.totalorder %v18564_v58, %v16481_v45  ;;  %vm4693_vm6 = vcmp.eq.s32.totalorder %v18565_v49, %v16481_v45  ;;  %v18571_v49 = vld [vmem:[#allocation102_spill] sm:$0xff]  ;;  %vm4725_vm12 = vcmp.eq.s32.totalorder %v18538_v47, %v16481_v45  ;;  %vm10658_vm0 = vmpackc.low %vm4790_vm15, %vm4774_vm14  ;;  %v18574_v47 = vld [vmem:[#allocation109_spill] sm:$0xff]  ;;  %vm4757_vm2 = vcmp.eq.s32.totalorder %v18543_v5, %v16481_v45 }
 0x8e4   : > { %10617 = vmatmul.msk.bf16.gmra.mxu3 %vm10616_vm11, %v17402_v33  ;;  %vm10620_vm7 = vmpackc.low %vm4693_vm6, %vm4677_vm5  ;;  %vm4709_vm11 = vcmp.eq.s32.totalorder %v18537_v46, %v16481_v45  ;;  %v18573_v46 = vld [vmem:[#allocation193_spill] sm:$0xff]  ;;  %vm4822_vm5 = vcmp.eq.s32.totalorder %v18553_v8, %v16453_v42  ;;  %v18577_v5 = vld [vmem:[#allocation115_spill] sm:$0xff]  ;;  %vm4789_vm8 = vcmp.eq.s32.totalorder %v18548_v15, %v16481_v45  ;;  %vm4821_vm14 = vcmp.eq.s32.totalorder %v18553_v8, %v16481_v45 }
 0x8e5   : > { %vm10622_vm13 = vmpackc.low %vm4725_vm12, %vm4709_vm11  ;;  %vm4854_vm11 = vcmp.eq.s32.totalorder %v18557_v41, %v16453_v42  ;;  %v18579_v15 = vld [vmem:[#allocation117_spill] sm:$0xff]  ;;  %v18581_v8 = vld [vmem:[#allocation118_spill] sm:$0xff] }
 0x8e7   : > { %v7811_v0 = vpop.f32.mrf.mxu3 }
 0x8e8   : > { %v16462_v30 = vadd.f32 %v7811_v0, %v16255_v44  ;;  %v18569_v0 = vld [vmem:[#allocation245_spill] sm:$0xff] }
 0x8eb   : > { %10655 = vmatmul.msk.bf16.gmra.mxu1 %vm10654_vm4, %v17402_v33  ;;  %vm4806_vm4 = vcmp.eq.s32.totalorder %v18552_v53, %v16453_v42 }
 0x8ec   : > { %vm10660_vm6 = vmpackc.low %vm4822_vm5, %vm4806_vm4  ;;  %vm4853_vm4 = vcmp.eq.s32.totalorder %v18557_v41, %v16481_v45  ;;  %v7769_v41 = vpop.f32.mrf.mxu1 }
 0x8ef   : > { %v7813_v28 = vpop.f32.mrf.mxu3 }
 0x8f0   : > { %v16470_v40 = vadd.f32 %v7813_v28, %v7725_v57  ;;  %v7730_v57 = vadd.f32 %v18569_v0, %v18568_v34 }
 0x8f2   : > { %18567 = vst [vmem:[#allocation52_spill] sm:$0xff] %v16470_v40 }
 0x8f4   : > { %10619 = vmatmul.msk.bf16.gmra.mxu3 %vm10618_vm1, %v17402_v33  ;;  %vm4741_vm1 = vcmp.eq.s32.totalorder %v18542_v43, %v16481_v45  ;;  %v18576_v43 = vld [vmem:[#allocation111_spill] sm:$0xff] }
 0x8f5   : > { %vm10624_vm3 = vmpackc.low %vm4757_vm2, %vm4741_vm1  ;;  %vm4886_vm1 = vcmp.eq.s32.totalorder %v18560_v35, %v16453_v42 }
 0x8f7   : > { %v7816_v44 = vpop.f32.mrf.mxu3 }
 0x8f8   : > { %v16479_v25 = vadd.f32 %v7816_v44, %v16279_v18  ;;  %v18572_v44 = vld [vmem:[#allocation268_spill] sm:$0xff] }
 0x8f9   : > { %v7735_v34 = vadd.f32 %v18572_v44, %v18571_v49 }
 0x8fb   : > { %10657 = vmatmul.msk.bf16.gmra.mxu1 %vm10656_vm10, %v17402_v33  ;;  %vm4838_vm10 = vcmp.eq.s32.totalorder %v18556_v17, %v16453_v42 }
 0x8fc   : > { %vm10662_vm12 = vmpackc.low %vm4854_vm11, %vm4838_vm10  ;;  %vm4885_vm10 = vcmp.eq.s32.totalorder %v18560_v35, %v16481_v45 }
 0x8ff   : > { %v7818_v28 = vpop.f32.mrf.mxu3 }
 0x900   : > { %v16489_v40 = vadd.f32 %v7818_v28, %v7730_v57 }
 0x904   : > { %10621 = vmatmul.msk.bf16.vlgmr.msrb.gmra.mxu3 %vm10620_vm7, %v17402_v33  ;;  %vm4773_vm7 = vcmp.eq.s32.totalorder %v18547_v11, %v16481_v45 }
 0x905   : > { %vm10626_vm9 = vmpackc.low %vm4789_vm8, %vm4773_vm7  ;;  %vm4918_vm7 = vcmp.eq.s32.totalorder %v17832_v59, %v16453_v42 }
 0x907   : > { %v7821_v18 = vpop.f32.mrf.mxu3 }
 0x908   : > { %v16498_v58 = vadd.f32 %v7821_v18, %v18570_v20  ;;  %v18575_v20 = vld [vmem:[#allocation107_spill] sm:$0xff] }
 0x909   : > { %v7740_v49 = vadd.f32 %v18575_v20, %v18574_v47 }
 0x90b   : > { %10659 = vmatmul.msk.bf16.gmra.mxu1 %vm10658_vm0, %v17402_v33  ;;  %vm4870_vm0 = vcmp.eq.s32.totalorder %v18517_v10, %v16453_v42 }
 0x90c   : > { %vm10664_vm2 = vmpackc.low %vm4886_vm1, %vm4870_vm0  ;;  %vm4917_vm0 = vcmp.eq.s32.totalorder %v17832_v59, %v16481_v45 }
 0x90f   : > { %v7823_v0 = vpop.f32.mrf.mxu3 }
 0x910   : > { %v16506_v57 = vadd.f32 %v7823_v0, %v7735_v34 }
 0x914   : > { %10623 = vmatmul.msk.bf16.gmra.mxu3 %vm10622_vm13, %v17402_v33  ;;  %vm4805_vm13 = vcmp.eq.s32.totalorder %v18552_v53, %v16481_v45 }
 0x915   : > { %vm10628_vm15 = vmpackc.low %vm4821_vm14, %vm4805_vm13  ;;  %vm4950_vm13 = vcmp.eq.s32.totalorder %v17844_v38, %v16453_v42 }
 0x917   : > { %v7826_v28 = vpop.f32.mrf.mxu3 }
 0x918   : > { %v16515_v18 = vadd.f32 %v7826_v28, %v18573_v46  ;;  %v18578_v46 = vld [vmem:[#allocation112_spill] sm:$0xff] }
 0x919   : > { %v7745_v47 = vadd.f32 %v18578_v46, %v18577_v5 }
 0x91b   : > { %10661 = vmatmul.msk.bf16.gmra.mxu1 %vm10660_vm6, %v17402_v33  ;;  %vm4902_vm6 = vcmp.eq.s32.totalorder %v17831_v62, %v16453_v42 }
 0x91c   : > { %vm10666_vm8 = vmpackc.low %vm4918_vm7, %vm4902_vm6  ;;  %vm4949_vm6 = vcmp.eq.s32.totalorder %v17844_v38, %v16481_v45 }
 0x91f   : > { %v7828_v44 = vpop.f32.mrf.mxu3 }
 0x920   : > { %v16523_v34 = vadd.f32 %v7828_v44, %v7740_v49 }
 0x924   : > { %10625 = vmatmul.msk.bf16.gmra.mxu3 %vm10624_vm3, %v17402_v33  ;;  %vm4837_vm3 = vcmp.eq.s32.totalorder %v18556_v17, %v16481_v45 }
 0x925   : > { %vm10630_vm5 = vmpackc.low %vm4853_vm4, %vm4837_vm3  ;;  %vm4982_vm3 = vcmp.eq.s32.totalorder %v17859_v55, %v16453_v42 }
 0x927   : > { %v7831_v0 = vpop.f32.mrf.mxu3 }
 0x928   : > { %v16532_v28 = vadd.f32 %v7831_v0, %v18576_v43  ;;  %v18580_v0 = vld [vmem:[#allocation113_spill] sm:$0xff] }
 0x929   : > { %v7750_v43 = vadd.f32 %v18580_v0, %v18579_v15 }
 0x92b   : > { %10663 = vmatmul.msk.bf16.gmra.mxu1 %vm10662_vm12, %v17402_v33  ;;  %vm4934_vm12 = vcmp.eq.s32.totalorder %v17843_v39, %v16453_v42 }
 0x92c   : > { %vm10668_vm14 = vmpackc.low %vm4950_vm13, %vm4934_vm12  ;;  %vm4981_vm12 = vcmp.eq.s32.totalorder %v17859_v55, %v16481_v45 }
 0x92f   : > { %v7833_v20 = vpop.f32.mrf.mxu3 }
 0x930   : > { %v16540_v49 = vadd.f32 %v7833_v20, %v7745_v47  ;;  %v7755_v47 = vadd.f32 %v18581_v8, %v16356_v19  ;;  %v18582_v19 = vld [vmem:[#allocation190_spill] sm:$0xff] }
 0x931   : > { %v7760_v15 = vadd.f32 %v18582_v19, %v16369_v9  ;;  %v7765_v9 = vadd.f32 %v16375_v60, %v16382_v7  ;;  %v7770_v60 = vadd.f32 %v7769_v41, %v16393_v6  ;;  %v6455_v41 = vld [vmem:[#allocation2 + $0xb0] sm:$0xff] }
 0x934   : > { %10627 = vmatmul.msk.bf16.gmra.mxu3 %vm10626_vm9, %v17402_v33  ;;  %vm4869_vm9 = vcmp.eq.s32.totalorder %v18517_v10, %v16481_v45 }
 0x935   : > { %vm10632_vm11 = vmpackc.low %vm4885_vm10, %vm4869_vm9  ;;  %vm5014_vm9 = vcmp.eq.s32.totalorder %v18423_v3, %v16453_v42 }
 0x937   : > { %v7836_v44 = vpop.f32.mrf.mxu3 }
 0x938   : > { %v16549_v11 = vadd.f32 %v7836_v44, %v16334_v31 }
 0x93b   : > { %10665 = vmatmul.msk.bf16.gmra.mxu1 %vm10664_vm2, %v17402_v33  ;;  %vm4966_vm2 = vcmp.eq.s32.totalorder %v17858_v23, %v16453_v42 }
 0x93c   : > { %vm10670_vm4 = vmpackc.low %vm4982_vm3, %vm4966_vm2  ;;  %vm5013_vm2 = vcmp.eq.s32.totalorder %v18423_v3, %v16481_v45 }
 0x93f   : > { %v7838_v5 = vpop.f32.mrf.mxu3 }
 0x940   : > { %v16557_v46 = vadd.f32 %v7838_v5, %v7750_v43 }
 0x944   : > { %10629 = vmatmul.msk.bf16.gmra.mxu3 %vm10628_vm15, %v17402_v33  ;;  %vm4901_vm15 = vcmp.eq.s32.totalorder %v17831_v62, %v16481_v45 }
 0x945   : > { %vm10634_vm1 = vmpackc.low %vm4917_vm0, %vm4901_vm15  ;;  %vm5046_vm15 = vcmp.eq.s32.totalorder %v18452_v14, %v16453_v42 }
 0x947   : > { %v7841_v31 = vpop.f32.mrf.mxu3 }
 0x948   : > { %v16566_v53 = vadd.f32 %v7841_v31, %v16347_v61 }
 0x94b   : > { %10667 = vmatmul.msk.bf16.gmra.mxu1 %vm10666_vm8, %v17402_v33  ;;  %vm4998_vm8 = vcmp.eq.s32.totalorder %v18422_v32, %v16453_v42 }
 0x94c   : > { %vm10672_vm10 = vmpackc.low %vm5014_vm9, %vm4998_vm8  ;;  %vm5045_vm8 = vcmp.eq.s32.totalorder %v18452_v14, %v16481_v45 }
 0x94f   : > { %v7843_v20 = vpop.f32.mrf.mxu3 }
 0x950   : > { %v16574_v44 = vadd.f32 %v7843_v20, %v7755_v47 }
 0x954   : > { %10631 = vmatmul.msk.bf16.gmra.mxu3 %vm10630_vm5, %v17402_v33  ;;  %vm4933_vm5 = vcmp.eq.s32.totalorder %v17843_v39, %v16481_v45 }
 0x955   : > { %vm10636_vm7 = vmpackc.low %vm4949_vm6, %vm4933_vm5  ;;  %vm5078_vm5 = vcmp.eq.s32.totalorder %v18480_v22, %v16453_v42 }
 0x957   : > { %v7846_v61 = vpop.f32.mrf.mxu3 }
 0x958   : > { %v16583_v17 = vadd.f32 %v7846_v61, %v16360_v2  ;;  %v7959_v5 = vpop.f32.mrf.mxu1  ;;  %v7781_v61 = vpop.f32.mrf.mxu2 }
 0x95b   : > { %10669 = vmatmul.msk.bf16.gmra.mxu1 %vm10668_vm14, %v17402_v33  ;;  %vm5030_vm14 = vcmp.eq.s32.totalorder %v18451_v4, %v16453_v42 }
 0x95c   : > { %vm10674_vm0 = vmpackc.low %vm5046_vm15, %vm5030_vm14  ;;  %vm5077_vm14 = vcmp.eq.s32.totalorder %v18480_v22, %v16481_v45 }
 0x95f   : > { %v7848_v0 = vpop.f32.mrf.mxu3 }
 0x960   : > { %v16591_v43 = vadd.f32 %v7848_v0, %v7760_v15  ;;  %v7961_v35 = vpop.f32.mrf.mxu1  ;;  %v7783_v0 = vpop.f32.mrf.mxu2 }
 0x964   : > { %10633 = vmatmul.msk.bf16.gmra.mxu3 %vm10632_vm11, %v17402_v33  ;;  %vm4965_vm11 = vcmp.eq.s32.totalorder %v17858_v23, %v16481_v45 }
 0x965   : > { %vm10638_vm13 = vmpackc.low %vm4981_vm12, %vm4965_vm11  ;;  %vm5110_vm11 = vcmp.eq.s32.totalorder %v18531_v36, %v16453_v42 }
 0x967   : > { %v7851_v10 = vpop.f32.mrf.mxu3 }
 0x968   : > { %v16600_v2 = vadd.f32 %v7851_v10, %v16373_v12  ;;  %v7964_v47 = vpop.f32.mrf.mxu1 }
 0x96b   : > { %10671 = vmatmul.msk.bf16.gmra.mxu1 %vm10670_vm4, %v17402_v33  ;;  %vm5062_vm4 = vcmp.eq.s32.totalorder %v18479_v48, %v16453_v42 }
 0x96c   : > { %vm10676_vm6 = vmpackc.low %vm5078_vm5, %vm5062_vm4  ;;  %vm5109_vm4 = vcmp.eq.s32.totalorder %v18531_v36, %v16481_v45 }
 0x96f   : > { %v7853_v31 = vpop.f32.mrf.mxu3 }
 0x970   : > { %v16608_v8 = vadd.f32 %v7853_v31, %v7765_v9  ;;  %v7966_v59 = vpop.f32.mrf.mxu1  ;;  %v18584_v31 = vld [vmem:[#allocation76_spill] sm:$0xff] }
 0x974   : > { %10635 = vmatmul.msk.bf16.gmra.mxu3 %vm10634_vm1, %v17402_v33  ;;  %vm4997_vm1 = vcmp.eq.s32.totalorder %v18422_v32, %v16481_v45 }
 0x975   : > { %vm10640_vm3 = vmpackc.low %vm5013_vm2, %vm4997_vm1  ;;  %vm5142_vm1 = vcmp.eq.s32.totalorder %v18562_v54, %v16453_v42 }
 0x977   : > { %v7856_v12 = vpop.f32.mrf.mxu3 }
 0x978   : > { %v16617_v62 = vadd.f32 %v7856_v12, %v16386_v50  ;;  %v7969_v19 = vpop.f32.mrf.mxu1  ;;  %v18583_v50 = vld [vmem:[#allocation169_spill] sm:$0xff]  ;;  %v7784_v12 = vadd.f32 %v7783_v0, %v18584_v31 }
 0x979   : > { %v7782_v6 = vadd.f32 %v7781_v61, %v18583_v50  ;;  %v6456_v61 = vld [vmem:[#allocation2] sm:$0xff] }
 0x97b   : > { %10673 = vmatmul.msk.bf16.gmra.mxu1 %vm10672_vm10, %v17402_v33  ;;  %vm5094_vm10 = vcmp.eq.s32.totalorder %v18530_v63, %v16453_v42 }
 0x97c   : > { %vm10678_vm12 = vmpackc.low %vm5110_vm11, %vm5094_vm10  ;;  %vm5141_vm10 = vcmp.eq.s32.totalorder %v18562_v54, %v16481_v45 }
 0x97f   : > { %v7858_v7 = vpop.f32.mrf.mxu3 }
 0x980   : > { %v16624_v20 = vadd.f32 %v7858_v7, %v7770_v60  ;;  %v7971_v10 = vpop.f32.mrf.mxu1 }
 0x984   : > { %10637 = vmatmul.msk.bf16.gmra.mxu3 %vm10636_vm7, %v17402_v33  ;;  %vm5029_vm7 = vcmp.eq.s32.totalorder %v18451_v4, %v16481_v45 }
 0x985   : > { %vm10642_vm9 = vmpackc.low %vm5045_vm8, %vm5029_vm7  ;;  %vm5174_vm7 = vcmp.eq.s32.totalorder %v18566_v52, %v16453_v42 }
 0x987   : > { %v7870_v39 = vpop.f32.mrf.mxu3 }
 0x988   : > { %v7871_v38 = vadd.f32 %v7870_v39, %v7782_v6  ;;  %v7974_v6 = vpop.f32.mrf.mxu1 }
 0x98a   : > { %v7960_v15 = vadd.f32 %v7959_v5, %v7871_v38  ;;  %v6457_v5 = vld [vmem:[#allocation2 + $0xd8] sm:$0xff] }
 0x98b   : > { %10675 = vmatmul.msk.bf16.gmra.mxu1 %vm10674_vm0, %v17402_v33  ;;  %vm5126_vm0 = vcmp.eq.s32.totalorder %v18515_v26, %v16453_v42 }
 0x98c   : > { %v8039_v9 = vadd.f32 %v7960_v15, %v6455_v41  ;;  %vm10680_vm2 = vmpackc.low %vm5142_vm1, %vm5126_vm0 }
 0x98e   : > { %8071 = vst [vmem:[#allocation2 + $0xb0] sm:$0xff] %v8039_v9  ;;  %v6458_v9 = vld [vmem:[#allocation2 + $0x18] sm:$0xff] }
 0x98f   : > { %v7872_v60 = vpop.f32.mrf.mxu3 }
 0x990   : > { %v7873_v7 = vadd.f32 %v7872_v60, %v7784_v12 }
 0x992   : > { %v7962_v50 = vadd.f32 %v7961_v35, %v7873_v7  ;;  %v7976_v35 = vpop.f32.mrf.mxu1 }
 0x994   : > { %v8040_v39 = vadd.f32 %v7962_v50, %v6456_v61  ;;  %10639 = vmatmul.msk.bf16.gmra.mxu3 %vm10638_vm13, %v17402_v33  ;;  %v6460_v50 = vld [vmem:[#allocation2 + $0x68] sm:$0xff]  ;;  %vm5061_vm13 = vcmp.eq.s32.totalorder %v18479_v48, %v16481_v45 }
 0x995   : > { %vm10644_vm15 = vmpackc.low %vm5077_vm14, %vm5061_vm13  ;;  %vm5173_vm13 = vcmp.eq.s32.totalorder %v18566_v52, %v16481_v45 }
 0x996   : > { %8072 = vst [vmem:[#allocation2] sm:$0xff] %v8040_v39 }
 0x997   : > { %v7875_v23 = vpop.f32.mrf.mxu3 }
 0x998   : > { %v7876_v55 = vadd.f32 %v7875_v23, %v16397_v56  ;;  %v6459_v56 = vld [vmem:[#allocation2 + $0x50] sm:$0xff] }
 0x99a   : > { %v7965_v38 = vadd.f32 %v7964_v47, %v7876_v55  ;;  %v7979_v12 = vpop.f32.mrf.mxu1 }
 0x99b   : > { %10677 = vmatmul.msk.bf16.gmra.mxu1 %vm10676_vm6, %v17402_v33  ;;  %vm5158_vm6 = vcmp.eq.s32.totalorder %v17985_v24, %v16453_v42  ;;  %v18585_v42 = vld [vmem:[#allocation262_spill] sm:$0xff] }
 0x99c   : > { %v8041_v41 = vadd.f32 %v7965_v38, %v6457_v5  ;;  %vm10682_vm8 = vmpackc.low %vm5174_vm7, %vm5158_vm6 }
 0x99e   : > { %8073 = vst [vmem:[#allocation2 + $0xd8] sm:$0xff] %v8041_v41  ;;  %v6462_v41 = vld [vmem:[#allocation2 + $0x48] sm:$0xff] }
 0x99f   : > { %v7877_v15 = vpop.f32.mrf.mxu3 }
 0x9a0   : > { %v7878_v0 = vadd.f32 %v7877_v15, %v16404_v1 }
 0x9a2   : > { %v7967_v31 = vadd.f32 %v7966_v59, %v7878_v0  ;;  %v7981_v47 = vpop.f32.mrf.mxu1 }
 0x9a4   : > { %v8042_v60 = vadd.f32 %v7967_v31, %v6458_v9  ;;  %10641 = vmatmul.msk.bf16.gmra.mxu3 %vm10640_vm3, %v17402_v33  ;;  %vm5093_vm3 = vcmp.eq.s32.totalorder %v18530_v63, %v16481_v45 }
 0x9a5   : > { %vm10646_vm5 = vmpackc.low %vm5109_vm4, %vm5093_vm3 }
 0x9a6   : > { %8074 = vst [vmem:[#allocation2 + $0x18] sm:$0xff] %v8042_v60 }
 0x9a7   : > { %v7880_v32 = vpop.f32.mrf.mxu3 }
 0x9a8   : > { %v7881_v3 = vadd.f32 %v7880_v32, %v16408_v21  ;;  %v6461_v21 = vld [vmem:[#allocation2 + $0x30] sm:$0xff]  ;;  %v6464_v32 = vld [vmem:[#allocation2 + $0x88] sm:$0xff] }
 0x9aa   : > { %v7970_v1 = vadd.f32 %v7969_v19, %v7881_v3  ;;  %v7984_v23 = vpop.f32.mrf.mxu1 }
 0x9ab   : > { %10679 = vmatmul.msk.bf16.gmra.mxu1 %vm10678_vm12, %v17402_v33  ;;  %vm5157_vm12 = vcmp.eq.s32.totalorder %v17985_v24, %v16481_v45 }
 0x9ac   : > { %v8043_v59 = vadd.f32 %v7970_v1, %v6459_v56  ;;  %vm10650_vm14 = vmpackc.low %vm5173_vm13, %vm5157_vm12 }
 0x9ae   : > { %8075 = vst [vmem:[#allocation2 + $0x50] sm:$0xff] %v8043_v59 }
 0x9af   : > { %v7882_v7 = vpop.f32.mrf.mxu3 }
 0x9b0   : > { %v7883_v61 = vadd.f32 %v7882_v7, %v16415_v37  ;;  %v6466_v7 = vld [vmem:[#allocation2 + $0xb8] sm:$0xff] }
 0x9b2   : > { %v7972_v39 = vadd.f32 %v7971_v10, %v7883_v61  ;;  %v7986_v19 = vpop.f32.mrf.mxu1 }
 0x9b4   : > { %v8044_v55 = vadd.f32 %v7972_v39, %v6460_v50  ;;  %10643 = vmatmul.msk.bf16.gmra.mxu3 %vm10642_vm9, %v17402_v33  ;;  %vm5125_vm9 = vcmp.eq.s32.totalorder %v18515_v26, %v16481_v45 }
 0x9b5   : > { %vm10648_vm11 = vmpackc.low %vm5141_vm10, %vm5125_vm9 }
 0x9b6   : > { %8076 = vst [vmem:[#allocation2 + $0x68] sm:$0xff] %v8044_v55  ;;  %v6467_v55 = vld [vmem:[#allocation2 + $0x60] sm:$0xff] }
 0x9b7   : > { %v7885_v4 = vpop.f32.mrf.mxu3 }
 0x9b8   : > { %v7886_v14 = vadd.f32 %v7885_v4, %v16419_v16  ;;  %v6463_v16 = vld [vmem:[#allocation2 + $0x80] sm:$0xff] }
 0x9ba   : > { %v7975_v37 = vadd.f32 %v7974_v6, %v7886_v14  ;;  %v7989_v0 = vpop.f32.mrf.mxu1 }
 0x9bb   : > { %10681 = vmatmul.msk.bf16.gmra.mxu1 %vm10680_vm2, %v17402_v33 }
 0x9bc   : > { %v8045_v10 = vadd.f32 %v7975_v37, %v6461_v21  ;;  %v18586_v21 = vld [vmem:[#allocation52_spill] sm:$0xff] }
 0x9be   : > { %8077 = vst [vmem:[#allocation2 + $0x30] sm:$0xff] %v8045_v10 }
 0x9bf   : > { %v7887_v5 = vpop.f32.mrf.mxu3 }
 0x9c0   : > { %v7888_v38 = vadd.f32 %v7887_v5, %v16426_v29 }
 0x9c2   : > { %v7977_v15 = vadd.f32 %v7976_v35, %v7888_v38  ;;  %v7991_v35 = vpop.f32.mrf.mxu1 }
 0x9c4   : > { %v8046_v9 = vadd.f32 %v7977_v15, %v6462_v41  ;;  %10645 = vmatmul.msk.bf16.gmra.mxu3 %vm10644_vm15, %v17402_v33  ;;  %v6469_v15 = vld [vmem:[#allocation2 + $0x8] sm:$0xff] }
 0x9c6   : > { %8078 = vst [vmem:[#allocation2 + $0x48] sm:$0xff] %v8046_v9 }
 0x9c7   : > { %v7890_v48 = vpop.f32.mrf.mxu3 }
 0x9c8   : > { %v7891_v22 = vadd.f32 %v7890_v48, %v16430_v51  ;;  %v6470_v48 = vld [vmem:[#allocation2 + $0x78] sm:$0xff] }
 0x9ca   : > { %v7980_v29 = vadd.f32 %v7979_v12, %v7891_v22  ;;  %v7994_v51 = vpop.f32.mrf.mxu1 }
 0x9cb   : > { %10683 = vmatmul.msk.bf16.gmra.mxu1 %vm10682_vm8, %v17402_v33 }
 0x9cc   : > { %v8047_v6 = vadd.f32 %v7980_v29, %v6463_v16 }
 0x9ce   : > { %8079 = vst [vmem:[#allocation2 + $0x80] sm:$0xff] %v8047_v6  ;;  %v6471_v6 = vld [vmem:[#allocation2 + $0x38] sm:$0xff] }
 0x9cf   : > { %v7892_v31 = vpop.f32.mrf.mxu3 }
 0x9d0   : > { %v7893_v60 = vadd.f32 %v7892_v31, %v16438_v27  ;;  %v6465_v27 = vld [vmem:[#allocation2 + $0xe8] sm:$0xff] }
 0x9d2   : > { %v7982_v3 = vadd.f32 %v7981_v47, %v7893_v60  ;;  %v7996_v61 = vpop.f32.mrf.mxu1 }
 0x9d4   : > { %v8048_v56 = vadd.f32 %v7982_v3, %v6464_v32  ;;  %10647 = vmatmul.msk.bf16.gmra.mxu3 %vm10646_vm5, %v17402_v33  ;;  %v6472_v3 = vld [vmem:[#allocation2 + $0x58] sm:$0xff] }
 0x9d6   : > { %8080 = vst [vmem:[#allocation2 + $0x88] sm:$0xff] %v8048_v56 }
 0x9d7   : > { %v7895_v63 = vpop.f32.mrf.mxu3 }
 0x9d8   : > { %v7896_v36 = vadd.f32 %v7895_v63, %v16442_v13 }
 0x9da   : > { %v7985_v12 = vadd.f32 %v7984_v23, %v7896_v36  ;;  %v7999_v26 = vpop.f32.mrf.mxu1 }
 0x9dc   : > { %v8049_v1 = vadd.f32 %v7985_v12, %v6465_v27  ;;  %v6473_v27 = vld [vmem:[#allocation2 + $0x40] sm:$0xff] }
 0x9de   : > { %8081 = vst [vmem:[#allocation2 + $0xe8] sm:$0xff] %v8049_v1 }
 0x9df   : > { %v7897_v47 = vpop.f32.mrf.mxu3 }
 0x9e0   : > { %v7898_v59 = vadd.f32 %v7897_v47, %v18585_v42 }
 0x9e2   : > { %v7987_v50 = vadd.f32 %v7986_v19, %v7898_v59  ;;  %v6468_v19 = vld [vmem:[#allocation2 + $0xf0] sm:$0xff]  ;;  %v6474_v59 = vld [vmem:[#allocation2 + $0xc8] sm:$0xff] }
 0x9e4   : > { %v8050_v39 = vadd.f32 %v7987_v50, %v6466_v7  ;;  %10649 = vmatmul.msk.bf16.gmra.mxu3 %vm10648_vm11, %v17402_v33 }
 0x9e6   : > { %8082 = vst [vmem:[#allocation2 + $0xb8] sm:$0xff] %v8050_v39 }
 0x9e7   : > { %v7900_v13 = vpop.f32.mrf.mxu3 }
 0x9e8   : > { %v7901_v23 = vadd.f32 %v7900_v13, %v16462_v30  ;;  %v8001_v30 = vpop.f32.mrf.mxu1  ;;  %v6475_v13 = vld [vmem:[#allocation2 + $0xe0] sm:$0xff] }
 0x9ea   : > { %v7990_v4 = vadd.f32 %v7989_v0, %v7901_v23 }
 0x9ec   : > { %v8051_v14 = vadd.f32 %v7990_v4, %v6467_v55 }
 0x9ee   : > { %8083 = vst [vmem:[#allocation2 + $0x60] sm:$0xff] %v8051_v14 }
 0x9ef   : > { %v7902_v54 = vpop.f32.mrf.mxu3 }
 0x9f0   : > { %v7903_v37 = vadd.f32 %v7902_v54, %v18586_v21  ;;  %v8004_v52 = vpop.f32.mrf.mxu1 }
 0x9f2   : > { %v7992_v10 = vadd.f32 %v7991_v35, %v7903_v37 }
 0x9f4   : > { %v8052_v5 = vadd.f32 %v7992_v10, %v6468_v19  ;;  %10651 = vmatmul.msk.bf16.gmra.mxu3 %vm10650_vm14, %v17402_v33  ;;  %v6477_v19 = vld [vmem:[#allocation2 + $0x70] sm:$0xff] }
 0x9f6   : > { %8084 = vst [vmem:[#allocation2 + $0xf0] sm:$0xff] %v8052_v5 }
 0x9f7   : > { %v7905_v38 = vpop.f32.mrf.mxu3 }
 0x9f8   : > { %v7906_v41 = vadd.f32 %v7905_v38, %v16479_v25  ;;  %v8006_v35 = vpop.f32.mrf.mxu1 }
 0x9fa   : > { %v7995_v0 = vadd.f32 %v7994_v51, %v7906_v41  ;;  %v6478_v41 = vld [vmem:[#allocation2 + $0xc0] sm:$0xff] }
 0x9fc   : > { %v8053_v24 = vadd.f32 %v7995_v0, %v6469_v15 }
 0x9fe   : > { %8085 = vst [vmem:[#allocation2 + $0x8] sm:$0xff] %v8053_v24 }
 0x9ff   : > { %v7907_v9 = vpop.f32.mrf.mxu3 }
 0xa00   : > { %v7908_v45 = vadd.f32 %v7907_v9, %v16489_v40  ;;  %v8009_v63 = vpop.f32.mrf.mxu1 }
 0xa02   : > { %v7997_v22 = vadd.f32 %v7996_v61, %v7908_v45 }
 0xa04   : > { %v8054_v16 = vadd.f32 %v7997_v22, %v6470_v48 }
 0xa06   : > { %8086 = vst [vmem:[#allocation2 + $0x78] sm:$0xff] %v8054_v16 }
 0xa07   : > { %v7910_v29 = vpop.f32.mrf.mxu3 }
 0xa08   : > { %v7911_v33 = vadd.f32 %v7910_v29, %v16498_v58  ;;  %v8011_v58 = vpop.f32.mrf.mxu1  ;;  %v6480_v29 = vld [vmem:[#allocation2 + $0xd0] sm:$0xff] }
 0xa0a   : > { %v8000_v31 = vadd.f32 %v7999_v26, %v7911_v33  ;;  %v6476_v26 = vld [vmem:[#allocation2 + $0x90] sm:$0xff] }
 0xa0c   : > { %v8055_v60 = vadd.f32 %v8000_v31, %v6471_v6  ;;  %v6481_v31 = vld [vmem:[#allocation2 + $0x10] sm:$0xff] }
 0xa0e   : > { %8087 = vst [vmem:[#allocation2 + $0x38] sm:$0xff] %v8055_v60 }
 0xa0f   : > { %v7912_v25 = vpop.f32.mrf.mxu3 }
 0xa10   : > { %v7913_v32 = vadd.f32 %v7912_v25, %v16506_v57  ;;  %v8014_v50 = vpop.f32.mrf.mxu1 }
 0xa12   : > { %v8002_v56 = vadd.f32 %v8001_v30, %v7913_v32 }
 0xa14   : > { %v8056_v51 = vadd.f32 %v8002_v56, %v6472_v3  ;;  %v6482_v56 = vld [vmem:[#allocation2 + $0x28] sm:$0xff] }
 0xa16   : > { %8088 = vst [vmem:[#allocation2 + $0x58] sm:$0xff] %v8056_v51 }
 0xa17   : > { %v7915_v40 = vpop.f32.mrf.mxu3 }
 0xa18   : > { %v7916_v36 = vadd.f32 %v7915_v40, %v16515_v18  ;;  %v8016_v14 = vpop.f32.mrf.mxu1 }
 0xa1a   : > { %v8005_v12 = vadd.f32 %v8004_v52, %v7916_v36  ;;  %v6479_v52 = vld [vmem:[#allocation2 + $0xa8] sm:$0xff] }
 0xa1c   : > { %v8057_v1 = vadd.f32 %v8005_v12, %v6473_v27  ;;  %v6483_v27 = vld [vmem:[#allocation2 + $0xa0] sm:$0xff] }
 0xa1e   : > { %8089 = vst [vmem:[#allocation2 + $0x40] sm:$0xff] %v8057_v1 }
 0xa1f   : > { %v7917_v47 = vpop.f32.mrf.mxu3 }
 0xa20   : > { %v7918_v42 = vadd.f32 %v7917_v47, %v16523_v34  ;;  %v8019_v5 = vpop.f32.mrf.mxu1 }
 0xa22   : > { %v8007_v7 = vadd.f32 %v8006_v35, %v7918_v42  ;;  %v6484_v42 = vld [vmem:[#allocation2 + $0xf8] sm:$0xff] }
 0xa24   : > { %v8058_v61 = vadd.f32 %v8007_v7, %v6474_v59 }
 0xa26   : > { %8090 = vst [vmem:[#allocation2 + $0xc8] sm:$0xff] %v8058_v61 }
 0xa27   : > { %v7920_v57 = vpop.f32.mrf.mxu3 }
 0xa28   : > { %v7921_v39 = vadd.f32 %v7920_v57, %v16532_v28 }
 0xa2a   : > { %v8010_v23 = vadd.f32 %v8009_v63, %v7921_v39 }
 0xa2c   : > { %v8059_v55 = vadd.f32 %v8010_v23, %v6475_v13 }
 0xa2e   : > { %8091 = vst [vmem:[#allocation2 + $0xe0] sm:$0xff] %v8059_v55  ;;  %v6486_v55 = vld [vmem:[#allocation2 + $0x98] sm:$0xff] }
 0xa2f   : > { %v7922_v18 = vpop.f32.mrf.mxu3 }
 0xa30   : > { %v7923_v4 = vadd.f32 %v7922_v18, %v16540_v49  ;;  %v8021_v49 = vpop.f32.mrf.mxu1 }
 0xa32   : > { %v8012_v54 = vadd.f32 %v8011_v58, %v7923_v4 }
 0xa34   : > { %v8060_v21 = vadd.f32 %v8012_v54, %v6476_v26 }
 0xa36   : > { %8092 = vst [vmem:[#allocation2 + $0x90] sm:$0xff] %v8060_v21 }
 0xa37   : > { %v7925_v34 = vpop.f32.mrf.mxu3 }
 0xa38   : > { %v7926_v37 = vadd.f32 %v7925_v34, %v16549_v11  ;;  %v8024_v22 = vpop.f32.mrf.mxu1 }
 0xa3a   : > { %v8015_v10 = vadd.f32 %v8014_v50, %v7926_v37  ;;  %v6485_v50 = vld [vmem:[#allocation2 + $0x20] sm:$0xff] }
 0xa3c   : > { %v8061_v30 = vadd.f32 %v8015_v10, %v6477_v19 }
 0xa3e   : > { %8093 = vst [vmem:[#allocation2 + $0x70] sm:$0xff] %v8061_v30 }
 0xa3f   : > { %v7927_v28 = vpop.f32.mrf.mxu3 }
 0xa40   : > { %v7928_v38 = vadd.f32 %v7927_v28, %v16557_v46  ;;  %v8026_v60 = vpop.f32.mrf.mxu1 }
 0xa42   : > { %v8017_v15 = vadd.f32 %v8016_v14, %v7928_v38 }
 0xa44   : > { %v8062_v0 = vadd.f32 %v8017_v15, %v6478_v41 }
 0xa46   : > { %8094 = vst [vmem:[#allocation2 + $0xc0] sm:$0xff] %v8062_v0 }
 0xa47   : > { %v7930_v24 = vpop.f32.mrf.mxu3 }
 0xa48   : > { %v7931_v9 = vadd.f32 %v7930_v24, %v16566_v53  ;;  %v8029_v51 = vpop.f32.mrf.mxu1 }
 0xa4a   : > { %v8020_v45 = vadd.f32 %v8019_v5, %v7931_v9 }
 0xa4c   : > { %v8063_v48 = vadd.f32 %v8020_v45, %v6479_v52 }
 0xa4e   : > { %8095 = vst [vmem:[#allocation2 + $0xa8] sm:$0xff] %v8063_v48 }
 0xa4f   : > { %v7932_v11 = vpop.f32.mrf.mxu3 }
 0xa50   : > { %v7933_v16 = vadd.f32 %v7932_v11, %v16574_v44 }
 0xa52   : > { %v8022_v33 = vadd.f32 %v8021_v49, %v7933_v16 }
 0xa54   : > { %v8064_v6 = vadd.f32 %v8022_v33, %v6480_v29 }
 0xa56   : > { %8096 = vst [vmem:[#allocation2 + $0xd0] sm:$0xff] %v8064_v6 }
 0xa57   : > { %v7935_v46 = vpop.f32.mrf.mxu3 }
 0xa58   : > { %v7936_v35 = vadd.f32 %v7935_v46, %v16583_v17  ;;  %v8031_v17 = vpop.f32.mrf.mxu1 }
 0xa5a   : > { %v8025_v25 = vadd.f32 %v8024_v22, %v7936_v35 }
 0xa5c   : > { %v8065_v32 = vadd.f32 %v8025_v25, %v6481_v31 }
 0xa5e   : > { %8097 = vst [vmem:[#allocation2 + $0x10] sm:$0xff] %v8065_v32 }
 0xa5f   : > { %v7937_v53 = vpop.f32.mrf.mxu3 }
 0xa60   : > { %v7938_v3 = vadd.f32 %v7937_v53, %v16591_v43  ;;  %v8034_v61 = vpop.f32.mrf.mxu1 }
 0xa62   : > { %v8027_v63 = vadd.f32 %v8026_v60, %v7938_v3 }
 0xa64   : > { %v8066_v40 = vadd.f32 %v8027_v63, %v6482_v56 }
 0xa66   : > { %8098 = vst [vmem:[#allocation2 + $0x28] sm:$0xff] %v8066_v40 }
 0xa67   : > { %v7940_v44 = vpop.f32.mrf.mxu3 }
 0xa68   : > { %v7941_v36 = vadd.f32 %v7940_v44, %v16600_v2  ;;  %v8036_v18 = vpop.f32.mrf.mxu1 }
 0xa6a   : > { %v8030_v12 = vadd.f32 %v8029_v51, %v7941_v36 }
 0xa6c   : > { %v8067_v1 = vadd.f32 %v8030_v12, %v6483_v27 }
 0xa6e   : > { %8099 = vst [vmem:[#allocation2 + $0xa0] sm:$0xff] %v8067_v1 }
 0xa6f   : > { %v7942_v58 = vpop.f32.mrf.mxu3 }
 0xa70   : > { %v7943_v47 = vadd.f32 %v7942_v58, %v16608_v8 }
 0xa72   : > { %v8032_v59 = vadd.f32 %v8031_v17, %v7943_v47 }
 0xa74   : > { %v8068_v7 = vadd.f32 %v8032_v59, %v6484_v42 }
 0xa76   : > { %8100 = vst [vmem:[#allocation2 + $0xf8] sm:$0xff] %v8068_v7 }
 0xa77   : > { %v7945_v43 = vpop.f32.mrf.mxu3 }
 0xa78   : > { %v7946_v57 = vadd.f32 %v7945_v43, %v16617_v62 }
 0xa7a   : > { %v8035_v39 = vadd.f32 %v8034_v61, %v7946_v57 }
 0xa7c   : > { %v8069_v13 = vadd.f32 %v8035_v39, %v6485_v50 }
 0xa7e   : > { %8101 = vst [vmem:[#allocation2 + $0x20] sm:$0xff] %v8069_v13 }
 0xa7f   : > { %v7947_v2 = vpop.f32.mrf.mxu3 }
 0xa80   : > { %v7948_v23 = vadd.f32 %v7947_v2, %v16624_v20 }
 0xa82   : > { %v8037_v4 = vadd.f32 %v8036_v18, %v7948_v23 }
 0xa84   : > { %v8070_v26 = vadd.f32 %v8037_v4, %v6486_v55 }
 0xa86   : > { %8102 = vst [vmem:[#allocation2 + $0x98] sm:$0xff] %v8070_v26 }
 0xa87 PF: > { %p10684_p8 = scmp.ne.s32.totalorder %s11104_s27, 1 }
 0xa89   : > { %8106 = sbr.rel (%p10684_p8) target bundleno = 2973 (0xb9d), region = 68 }
 0xa8e   : > { %v8401_v8 = vld [vmem:[%s17072_s9 + $0x30] sm:$0xff]  ;;  %v8402_v62 = vld [vmem:[%s17072_s9 + $0x38] sm:$0xff]  ;;  %v8139_v14 = vld [vmem:[%s11290_s30] sm:$0xff]  ;;  %v11127_v21 = vmov 0   ;;  %vm8409_vm15 = vcmask 261120  }
 0xa8f   : > { %8518 = vmatpush.msra.mxu0 %v8401_v8  ;;  %10896 = vmatpush.msra.mxu2 %v8401_v8  ;;  %v8141_v20 = vld [vmem:[%s11290_s30 + $0x10] sm:$0xff]  ;;  %v8399_v54 = vld [vmem:[%s17072_s9 + $0x20] sm:$0xff]  ;;  %v8400_v34 = vld [vmem:[%s17072_s9 + $0x28] sm:$0xff] }
 0xa90   : > { %8631 = vmatpush.msra.mxu1 %v8402_v62  ;;  %10900 = vmatpush.msra.mxu3 %v8402_v62  ;;  %v8397_v37 = vld [vmem:[%s17072_s9 + $0x10] sm:$0xff]  ;;  %v8398_v19 = vld [vmem:[%s17072_s9 + $0x18] sm:$0xff]  ;;  %v8395_v10 = vld [vmem:[%s17072_s9] sm:$0xff] }
 0xa91   : > { %10998 = vset.pattern.permute.xlu1 %v11127_v21  ;;  %10997 = vset.pattern.permute.xlu0 %v11127_v21  ;;  %v8396_v5 = vld [vmem:[%s17072_s9 + $0x8] sm:$0xff]  ;;  %v8363_v30 = vld [vmem:[%s11295_s21] sm:$0xff]  ;;  %v8142_v38 = vld [vmem:[%s11290_s30 + $0x18] sm:$0xff] }
 0xa92   : > { %8183 = vperm.xlu1 %10998, %v8141_v20   ;;  %8173 = vperm.xlu0 %10997, %v8139_v14   ;;  %v8379_v28 = vld [vmem:[%s11295_s21 + $0x80] sm:$0xff]  ;;  %v8140_v41 = vld [vmem:[%s11290_s30 + $0x8] sm:$0xff]  ;;  %v8146_v24 = vld [vmem:[%s11290_s30 + $0x38] sm:$0xff] }
 0xa93   : > { %8519 = vmatpush.msra.mxu0 %v8399_v54  ;;  %10897 = vmatpush.msra.mxu2 %v8399_v54  ;;  %v8143_v15 = vld [vmem:[%s11290_s30 + $0x20] sm:$0xff]  ;;  %v8364_v0 = vld [vmem:[%s11295_s21 + $0x8] sm:$0xff]  ;;  %v8145_v9 = vld [vmem:[%s11290_s30 + $0x30] sm:$0xff] }
 0xa94   : > { %8632 = vmatpush.msra.mxu1 %v8400_v34  ;;  %10901 = vmatpush.msra.mxu3 %v8400_v34  ;;  %v8380_v49 = vld [vmem:[%s11295_s21 + $0x88] sm:$0xff]  ;;  %v8365_v45 = vld [vmem:[%s11295_s21 + $0x10] sm:$0xff]  ;;  %v8147_v16 = vld [vmem:[%s11290_s30 + $0x40] sm:$0xff] }
 0xa95   : > { %8520 = vmatpush.msra.mxu0 %v8397_v37  ;;  %10898 = vmatpush.msra.mxu2 %v8397_v37  ;;  %v8144_v52 = vld [vmem:[%s11290_s30 + $0x28] sm:$0xff]  ;;  %v8381_v48 = vld [vmem:[%s11295_s21 + $0x90] sm:$0xff]  ;;  %v8366_v29 = vld [vmem:[%s11295_s21 + $0x18] sm:$0xff] }
 0xa96   : > { %8633 = vmatpush.msra.mxu1 %v8398_v19  ;;  %10902 = vmatpush.msra.mxu3 %v8398_v19  ;;  %v8149_v11 = vld [vmem:[%s11290_s30 + $0x50] sm:$0xff]  ;;  %v8148_v22 = vld [vmem:[%s11290_s30 + $0x48] sm:$0xff]  ;;  %v8382_v33 = vld [vmem:[%s11295_s21 + $0x98] sm:$0xff] }
 0xa97   : > { %8521 = vmatpush.msra.mxu0 %v8395_v10  ;;  %10899 = vmatpush.msra.mxu2 %v8395_v10  ;;  %v8152_v6 = vld [vmem:[%s11290_s30 + $0x68] sm:$0xff]  ;;  %v8151_v46 = vld [vmem:[%s11290_s30 + $0x60] sm:$0xff]  ;;  %v8150_v35 = vld [vmem:[%s11290_s30 + $0x58] sm:$0xff] }
 0xa98   : > { %8634 = vmatpush.msra.mxu1 %v8396_v5  ;;  %10903 = vmatpush.msra.mxu3 %v8396_v5  ;;  %v8367_v31 = vld [vmem:[%s11295_s21 + $0x20] sm:$0xff]  ;;  %v8154_v32 = vld [vmem:[%s11290_s30 + $0x78] sm:$0xff]  ;;  %v8153_v53 = vld [vmem:[%s11290_s30 + $0x70] sm:$0xff] }
 0xa99   : > { %10685 = vmatmul.msk.f32.vlgmr.msra.gmra.mxu0 %vm8409_vm15, %v8363_v30  ;;  %10701 = vmatmul.msk.f32.vlgmr.msra.gmra.mxu2 %vm8409_vm15, %v8379_v28  ;;  %v8383_v60 = vld [vmem:[%s11295_s21 + $0xa0] sm:$0xff]  ;;  %v8368_v3 = vld [vmem:[%s11295_s21 + $0x28] sm:$0xff]  ;;  %v8158_v63 = vld [vmem:[%s11290_s30 + $0x98] sm:$0xff] }
 0xa9a   : > { %10717 = vmatmul.msk.f32.vlgmr.msra.gmra.mxu1 %vm8409_vm15, %v8363_v30  ;;  %10733 = vmatmul.msk.f32.vlgmr.msra.gmra.mxu3 %vm8409_vm15, %v8379_v28  ;;  %v8155_v25 = vld [vmem:[%s11290_s30 + $0x80] sm:$0xff]  ;;  %v8384_v56 = vld [vmem:[%s11295_s21 + $0xa8] sm:$0xff]  ;;  %v8157_v51 = vld [vmem:[%s11290_s30 + $0x90] sm:$0xff] }
 0xa9b   : > { %8188 = vperm.xlu1 %10998, %v8142_v38   ;;  %8178 = vperm.xlu0 %10997, %v8140_v41   ;;  %v8156_v40 = vld [vmem:[%s11290_s30 + $0x88] sm:$0xff]  ;;  %v8369_v44 = vld [vmem:[%s11295_s21 + $0x30] sm:$0xff]  ;;  %v8159_v1 = vld [vmem:[%s11290_s30 + $0xa0] sm:$0xff] }
 0xa9c   : > { %10999 = vset.pattern.permute.xlu2 %v11127_v21  ;;  %v8385_v36 = vld [vmem:[%s11295_s21 + $0xb0] sm:$0xff]  ;;  %v8160_v12 = vld [vmem:[%s11290_s30 + $0xa8] sm:$0xff]  ;;  %v8370_v17 = vld [vmem:[%s11295_s21 + $0x38] sm:$0xff] }
 0xa9d   : > { %8193 = vperm.xlu2 %10999, %v8143_v15   ;;  %v8161_v27 = vld [vmem:[%s11290_s30 + $0xb0] sm:$0xff]  ;;  %v8386_v58 = vld [vmem:[%s11295_s21 + $0xb8] sm:$0xff]  ;;  %v8164_v47 = vld [vmem:[%s11290_s30 + $0xc8] sm:$0xff] }
 0xa9e   : > { %v8163_v42 = vld [vmem:[%s11290_s30 + $0xc0] sm:$0xff]  ;;  %v8162_v59 = vld [vmem:[%s11290_s30 + $0xb8] sm:$0xff]  ;;  %v8165_v50 = vld [vmem:[%s11290_s30 + $0xd0] sm:$0xff] }
 0xa9f   : > { %v8371_v7 = vld [vmem:[%s11295_s21 + $0x40] sm:$0xff]  ;;  %v8166_v57 = vld [vmem:[%s11290_s30 + $0xd8] sm:$0xff]  ;;  %v8372_v39 = vld [vmem:[%s11295_s21 + $0x48] sm:$0xff] }
 0xaa0   : > { %v8387_v43 = vld [vmem:[%s11295_s21 + $0xc0] sm:$0xff]  ;;  %v8388_v13 = vld [vmem:[%s11295_s21 + $0xc8] sm:$0xff]  ;;  %v8170_v2 = vld [vmem:[%s11290_s30 + $0xf8] sm:$0xff] }
 0xaa1   : > { %10686 = vmatmul.msk.f32.gmra.mxu0 %vm8409_vm15, %v8364_v0  ;;  %10702 = vmatmul.msk.f32.gmra.mxu2 %vm8409_vm15, %v8380_v49  ;;  %v8167_v61 = vld [vmem:[%s11290_s30 + $0xe0] sm:$0xff]  ;;  %v8169_v23 = vld [vmem:[%s11290_s30 + $0xf0] sm:$0xff]  ;;  %v8168_v55 = vld [vmem:[%s11290_s30 + $0xe8] sm:$0xff] }
 0xaa2   : > { %10718 = vmatmul.msk.f32.gmra.mxu1 %vm8409_vm15, %v8364_v0  ;;  %10734 = vmatmul.msk.f32.gmra.mxu3 %vm8409_vm15, %v8380_v49  ;;  %v8373_v18 = vld [vmem:[%s11295_s21 + $0x50] sm:$0xff]  ;;  %v8374_v26 = vld [vmem:[%s11295_s21 + $0x58] sm:$0xff]  ;;  %v8375_v62 = vld [vmem:[%s11295_s21 + $0x60] sm:$0xff] }
 0xaa3   : > { %8208 = vperm.xlu1 %10998, %v8146_v24   ;;  %8203 = vperm.xlu0 %10997, %v8145_v9   ;;  %v8389_v4 = vld [vmem:[%s11295_s21 + $0xd0] sm:$0xff]  ;;  %v8390_v8 = vld [vmem:[%s11295_s21 + $0xd8] sm:$0xff]  ;;  %v8391_v20 = vld [vmem:[%s11295_s21 + $0xe0] sm:$0xff] }
 0xaa4   : > { %v8376_v54 = vld [vmem:[%s11295_s21 + $0x68] sm:$0xff]  ;;  %v8377_v10 = vld [vmem:[%s11295_s21 + $0x70] sm:$0xff]  ;;  %v8378_v41 = vld [vmem:[%s11295_s21 + $0x78] sm:$0xff] }
 0xaa5   : > { %8198 = vperm.xlu2 %10999, %v8144_v52   ;;  %v8392_v21 = vld [vmem:[%s11295_s21 + $0xe8] sm:$0xff]  ;;  %v8393_v5 = vld [vmem:[%s11295_s21 + $0xf0] sm:$0xff]  ;;  %v8394_v15 = vld [vmem:[%s11295_s21 + $0xf8] sm:$0xff] }
 0xaa6   : > { %v8403_v49 = vld [vmem:[%s17073_s10] sm:$0x3]  ;;  %v8107_v24 = vld [vmem:[#allocation2 + $0xb0] sm:$0xff] }
 0xaa7   : > { %v16890_v9 = vperm.slane %v8403_v49, 0  ;;  %v16892_v52 = vperm.slane %v8403_v49, 1 }
 0xaa9   : > { %10687 = vmatmul.msk.f32.gmra.mxu0 %vm8409_vm15, %v8365_v45  ;;  %10703 = vmatmul.msk.f32.gmra.mxu2 %vm8409_vm15, %v8381_v48 }
 0xaaa   : > { %10719 = vmatmul.msk.f32.gmra.mxu1 %vm8409_vm15, %v8365_v45  ;;  %10735 = vmatmul.msk.f32.gmra.mxu3 %vm8409_vm15, %v8381_v48 }
 0xaab   : > { %8223 = vperm.xlu1 %10998, %v8149_v11   ;;  %8218 = vperm.xlu0 %10997, %v8148_v22  }
 0xaad   : > { %8213 = vperm.xlu2 %10999, %v8147_v16  }
 0xab1   : > { %10688 = vmatmul.msk.f32.gmra.mxu0 %vm8409_vm15, %v8366_v29  ;;  %10704 = vmatmul.msk.f32.gmra.mxu2 %vm8409_vm15, %v8382_v33 }
 0xab2   : > { %10720 = vmatmul.msk.f32.gmra.mxu1 %vm8409_vm15, %v8366_v29  ;;  %10736 = vmatmul.msk.f32.gmra.mxu3 %vm8409_vm15, %v8382_v33 }
 0xab3   : > { %8238 = vperm.xlu1 %10998, %v8152_v6   ;;  %8233 = vperm.xlu0 %10997, %v8151_v46  }
 0xab5   : > { %8228 = vperm.xlu2 %10999, %v8150_v35   ;;  %v8108_v35 = vld [vmem:[#allocation2] sm:$0xff] }
 0xab9   : > { %10689 = vmatmul.msk.f32.gmra.mxu0 %vm8409_vm15, %v8367_v31  ;;  %10705 = vmatmul.msk.f32.gmra.mxu2 %vm8409_vm15, %v8383_v60 }
 0xaba   : > { %10721 = vmatmul.msk.f32.gmra.mxu1 %vm8409_vm15, %v8367_v31  ;;  %10737 = vmatmul.msk.f32.gmra.mxu3 %vm8409_vm15, %v8383_v60 }
 0xabb   : > { %8253 = vperm.xlu1 %10998, %v8155_v25   ;;  %8248 = vperm.xlu0 %10997, %v8154_v32  }
 0xabd   : > { %8243 = vperm.xlu2 %10999, %v8153_v53  }
 0xac1   : > { %10690 = vmatmul.msk.f32.gmra.mxu0 %vm8409_vm15, %v8368_v3  ;;  %10706 = vmatmul.msk.f32.gmra.mxu2 %vm8409_vm15, %v8384_v56 }
 0xac2   : > { %10722 = vmatmul.msk.f32.gmra.mxu1 %vm8409_vm15, %v8368_v3  ;;  %10738 = vmatmul.msk.f32.gmra.mxu3 %vm8409_vm15, %v8384_v56 }
 0xac3   : > { %8268 = vperm.xlu1 %10998, %v8158_v63   ;;  %8263 = vperm.xlu0 %10997, %v8157_v51  }
 0xac5   : > { %8258 = vperm.xlu2 %10999, %v8156_v40  }
 0xac9   : > { %10691 = vmatmul.msk.f32.gmra.mxu0 %vm8409_vm15, %v8369_v44  ;;  %10707 = vmatmul.msk.f32.gmra.mxu2 %vm8409_vm15, %v8385_v36 }
 0xaca   : > { %10723 = vmatmul.msk.f32.gmra.mxu1 %vm8409_vm15, %v8369_v44  ;;  %10739 = vmatmul.msk.f32.gmra.mxu3 %vm8409_vm15, %v8385_v36 }
 0xacb   : > { %8283 = vperm.xlu1 %10998, %v8161_v27   ;;  %8278 = vperm.xlu0 %10997, %v8160_v12   ;;  %v8124_v27 = vld [vmem:[#allocation2 + $0x58] sm:$0xff] }
 0xacd   : > { %8273 = vperm.xlu2 %10999, %v8159_v1   ;;  %v8109_v1 = vld [vmem:[#allocation2 + $0xd8] sm:$0xff] }
 0xad1   : > { %10692 = vmatmul.msk.f32.gmra.mxu0 %vm8409_vm15, %v8370_v17  ;;  %10708 = vmatmul.msk.f32.gmra.mxu2 %vm8409_vm15, %v8386_v58 }
 0xad2   : > { %10724 = vmatmul.msk.f32.gmra.mxu1 %vm8409_vm15, %v8370_v17  ;;  %10740 = vmatmul.msk.f32.gmra.mxu3 %vm8409_vm15, %v8386_v58 }
 0xad3   : > { %8298 = vperm.xlu1 %10998, %v8164_v47   ;;  %8293 = vperm.xlu0 %10997, %v8163_v42  }
 0xad5   : > { %8288 = vperm.xlu2 %10999, %v8162_v59  }
 0xad9   : > { %10693 = vmatmul.msk.f32.gmra.mxu0 %vm8409_vm15, %v8371_v7  ;;  %10709 = vmatmul.msk.f32.gmra.mxu2 %vm8409_vm15, %v8387_v43 }
 0xada   : > { %10725 = vmatmul.msk.f32.gmra.mxu1 %vm8409_vm15, %v8371_v7  ;;  %10741 = vmatmul.msk.f32.gmra.mxu3 %vm8409_vm15, %v8387_v43 }
 0xadb   : > { %8313 = vperm.xlu1 %10998, %v8167_v61   ;;  %8308 = vperm.xlu0 %10997, %v8166_v57  }
 0xadd   : > { %8303 = vperm.xlu2 %10999, %v8165_v50  }
 0xae1   : > { %10694 = vmatmul.msk.f32.gmra.mxu0 %vm8409_vm15, %v8372_v39  ;;  %10710 = vmatmul.msk.f32.gmra.mxu2 %vm8409_vm15, %v8388_v13 }
 0xae2   : > { %10726 = vmatmul.msk.f32.gmra.mxu1 %vm8409_vm15, %v8372_v39  ;;  %10742 = vmatmul.msk.f32.gmra.mxu3 %vm8409_vm15, %v8388_v13 }
 0xae3   : > { %8328 = vperm.xlu1 %10998, %v8170_v2   ;;  %8323 = vperm.xlu0 %10997, %v8169_v23  }
 0xae5   : > { %8318 = vperm.xlu2 %10999, %v8168_v55  }
 0xae9   : > { %10695 = vmatmul.msk.f32.gmra.mxu0 %vm8409_vm15, %v8373_v18  ;;  %10711 = vmatmul.msk.f32.gmra.mxu2 %vm8409_vm15, %v8389_v4 }
 0xaea   : > { %10727 = vmatmul.msk.f32.gmra.mxu1 %vm8409_vm15, %v8373_v18  ;;  %10743 = vmatmul.msk.f32.gmra.mxu3 %vm8409_vm15, %v8389_v4 }
 0xaf1   : > { %10696 = vmatmul.msk.f32.gmra.mxu0 %vm8409_vm15, %v8374_v26  ;;  %10712 = vmatmul.msk.f32.gmra.mxu2 %vm8409_vm15, %v8390_v8 }
 0xaf2   : > { %10728 = vmatmul.msk.f32.gmra.mxu1 %vm8409_vm15, %v8374_v26  ;;  %10744 = vmatmul.msk.f32.gmra.mxu3 %vm8409_vm15, %v8390_v8  ;;  %v8110_v26 = vld [vmem:[#allocation2 + $0x18] sm:$0xff] }
 0xaf7   : > { %v16855_v14 = vpop.permute.xlu2 %8193 }
 0xaf9   : > { %10697 = vmatmul.msk.f32.gmra.mxu0 %vm8409_vm15, %v8375_v62  ;;  %10713 = vmatmul.msk.f32.gmra.mxu2 %vm8409_vm15, %v8391_v20 }
 0xafa   : > { %10729 = vmatmul.msk.f32.gmra.mxu1 %vm8409_vm15, %v8375_v62  ;;  %10745 = vmatmul.msk.f32.gmra.mxu3 %vm8409_vm15, %v8391_v20  ;;  %v8123_v20 = vld [vmem:[#allocation2 + $0x38] sm:$0xff] }
 0xaff   : > { %v16863_v34 = vpop.permute.xlu2 %8198 }
 0xb01   : > { %10698 = vmatmul.msk.f32.gmra.mxu0 %vm8409_vm15, %v8376_v54  ;;  %10714 = vmatmul.msk.f32.gmra.mxu2 %vm8409_vm15, %v8392_v21 }
 0xb02   : > { %10730 = vmatmul.msk.f32.gmra.mxu1 %vm8409_vm15, %v8376_v54  ;;  %10746 = vmatmul.msk.f32.gmra.mxu3 %vm8409_vm15, %v8392_v21 }
 0xb04   : > { %v8184_v37 = vpop.permute.xlu1 %8183  ;;  %v8174_v19 = vpop.permute.xlu0 %8173 }
 0xb05   : > { %v8331_v45 = vmul.f32 %v8174_v19, %v8107_v24  ;;  %v8333_v59 = vmul.f32 %v8184_v37, %v8109_v1 }
 0xb07   : > { %v16871_v30 = vpop.permute.xlu2 %8213 }
 0xb09   : > { %10699 = vmatmul.msk.f32.gmra.mxu0 %vm8409_vm15, %v8377_v10  ;;  %10715 = vmatmul.msk.f32.gmra.mxu2 %vm8409_vm15, %v8393_v5 }
 0xb0a   : > { %10731 = vmatmul.msk.f32.gmra.mxu1 %vm8409_vm15, %v8377_v10  ;;  %10747 = vmatmul.msk.f32.gmra.mxu3 %vm8409_vm15, %v8393_v5 }
 0xb0d   : > { %v16877_v28 = vpop.permute.xlu1 %8188  ;;  %v8179_v38 = vpop.permute.xlu0 %8178 }
 0xb0e   : > { %v8332_v32 = vmul.f32 %v8179_v38, %v8108_v35  ;;  %v8334_v19 = vmul.f32 %v16877_v28, %v8110_v26  ;;  %v8111_v28 = vld [vmem:[#allocation2 + $0x50] sm:$0xff] }
 0xb0f   : > { %v16881_v0 = vpop.permute.xlu2 %8228 }
 0xb11   : > { %10700 = vmatmul.msk.f32.gmra.mxu0 %vm8409_vm15, %v8378_v41  ;;  %10716 = vmatmul.msk.f32.gmra.mxu2 %vm8409_vm15, %v8394_v15 }
 0xb12   : > { %10732 = vmatmul.msk.f32.gmra.mxu1 %vm8409_vm15, %v8378_v41  ;;  %10748 = vmatmul.msk.f32.gmra.mxu3 %vm8409_vm15, %v8394_v15 }
 0xb15   : > { %v16894_v48 = vpop.permute.xlu1 %8208  ;;  %v16896_v11 = vpop.permute.xlu0 %8203 }
 0xb16   : > { %v8523_v22 = vpop.f32.mrf.mxu0 }
 0xb17   : > { %v8524_v16 = vadd.f32 %v8523_v22, %v16890_v9  ;;  %v8636_v29 = vpop.f32.mrf.mxu1  ;;  %v16899_v33 = vpop.permute.xlu2 %8243 }
 0xb18   : > { %v8637_v6 = vadd.f32 %v8636_v29, %v16892_v52 }
 0xb19   : > { %v8732_v46 = vadd.f32 %v8524_v16, %v8331_v45 }
 0xb1a   : > { %v8764_v31 = vmax.f32 %v8637_v6, 0.0 }
 0xb1c   : > { %v8796_v60 = vadd.f32 %v8764_v31, %v8732_v46  ;;  %v8571_v25 = vpop.f32.mrf.mxu2  ;;  %v8126_v31 = vld [vmem:[#allocation2 + $0xc8] sm:$0xff] }
 0xb1d   : > { %v8684_v53 = vpop.f32.mrf.mxu3  ;;  %v16902_v3 = vpop.permute.xlu1 %8223  ;;  %v8572_v38 = vadd.f32 %v8571_v25, %v16890_v9 }
 0xb1e   : > { %8828 = vst [vmem:[%s11303_s19] sm:$0xff] %v8796_v60  ;;  %v16905_v56 = vpop.permute.xlu0 %8218  ;;  %v8526_v63 = vpop.f32.mrf.mxu0  ;;  %v8685_v54 = vadd.f32 %v8684_v53, %v16892_v52  ;;  %v8335_v53 = vmul.f32 %v16855_v14, %v8111_v28 }
 0xb1f   : > { %v8527_v51 = vadd.f32 %v8526_v63, %v16890_v9  ;;  %v8639_v40 = vpop.f32.mrf.mxu1  ;;  %v8259_v36 = vpop.permute.xlu2 %8258 }
 0xb20   : > { %v8640_v44 = vadd.f32 %v8639_v40, %v16892_v52  ;;  %v8348_v58 = vmul.f32 %v8259_v36, %v8124_v27  ;;  %v8780_v22 = vmax.f32 %v8685_v54, 0.0 }
 0xb21   : > { %v8733_v12 = vadd.f32 %v8527_v51, %v8332_v32  ;;  %v8125_v32 = vld [vmem:[#allocation2 + $0x40] sm:$0xff] }
 0xb22   : > { %v8765_v17 = vmax.f32 %v8640_v44, 0.0 }
 0xb24   : > { %v8797_v47 = vadd.f32 %v8765_v17, %v8733_v12  ;;  %v8574_v42 = vpop.f32.mrf.mxu2 }
 0xb25   : > { %v8575_v7 = vadd.f32 %v8574_v42, %v16890_v9  ;;  %v8687_v43 = vpop.f32.mrf.mxu3  ;;  %v16910_v61 = vpop.permute.xlu1 %8238 }
 0xb26   : > { %8829 = vst [vmem:[%s11303_s19 + $0x8] sm:$0xff] %v8797_v47  ;;  %v8688_v57 = vadd.f32 %v8687_v43, %v16892_v52  ;;  %v16914_v50 = vpop.permute.xlu0 %8233  ;;  %v8529_v39 = vpop.f32.mrf.mxu0 }
 0xb27   : > { %v8749_v13 = vadd.f32 %v8575_v7, %v8348_v58  ;;  %v8530_v2 = vadd.f32 %v8529_v39, %v16890_v9  ;;  %v8642_v23 = vpop.f32.mrf.mxu1 }
 0xb28   : > { %v8781_v55 = vmax.f32 %v8688_v57, 0.0  ;;  %v8643_v18 = vadd.f32 %v8642_v23, %v16892_v52  ;;  %v8274_v23 = vpop.permute.xlu2 %8273 }
 0xb29   : > { %v8734_v4 = vadd.f32 %v8530_v2, %v8333_v59  ;;  %v8127_v59 = vld [vmem:[#allocation2 + $0xe0] sm:$0xff]  ;;  %v8112_v2 = vld [vmem:[#allocation2 + $0x68] sm:$0xff] }
 0xb2a   : > { %v8813_v8 = vadd.f32 %v8781_v55, %v8749_v13  ;;  %v8766_v62 = vmax.f32 %v8643_v18, 0.0 }
 0xb2c   : > { %8845 = vst [vmem:[%s11303_s19 + $0x88] sm:$0xff] %v8813_v8  ;;  %v8798_v21 = vadd.f32 %v8766_v62, %v8734_v4  ;;  %v8577_v37 = vpop.f32.mrf.mxu2  ;;  %v8351_v4 = vmul.f32 %v8274_v23, %v8127_v59 }
 0xb2d   : > { %v8690_v10 = vpop.f32.mrf.mxu3  ;;  %v8254_v5 = vpop.permute.xlu1 %8253  ;;  %v8578_v17 = vadd.f32 %v8577_v37, %v16890_v9 }
 0xb2e   : > { %8830 = vst [vmem:[%s11303_s19 + $0x10] sm:$0xff] %v8798_v21  ;;  %v8347_v41 = vmul.f32 %v8254_v5, %v8123_v20  ;;  %v16923_v15 = vpop.permute.xlu0 %8248  ;;  %v8532_v49 = vpop.f32.mrf.mxu0  ;;  %v8691_v63 = vadd.f32 %v8690_v10, %v16892_v52  ;;  %v8336_v20 = vmul.f32 %v16863_v34, %v8112_v2 }
 0xb2f   : > { %v8533_v24 = vadd.f32 %v8532_v49, %v16890_v9  ;;  %v8645_v45 = vpop.f32.mrf.mxu1  ;;  %v8128_v49 = vld [vmem:[#allocation2 + $0x90] sm:$0xff] }
 0xb30   : > { %v8748_v16 = vadd.f32 %v8572_v38, %v8347_v41  ;;  %v8646_v29 = vadd.f32 %v8645_v45, %v16892_v52  ;;  %v8782_v57 = vmax.f32 %v8691_v63, 0.0 }
 0xb31   : > { %v8735_v6 = vadd.f32 %v8533_v24, %v8334_v19 }
 0xb32   : > { %v8812_v46 = vadd.f32 %v8780_v22, %v8748_v16  ;;  %v8767_v35 = vmax.f32 %v8646_v29, 0.0 }
 0xb34   : > { %8844 = vst [vmem:[%s11303_s19 + $0x80] sm:$0xff] %v8812_v46  ;;  %v8799_v60 = vadd.f32 %v8767_v35, %v8735_v6  ;;  %v8580_v25 = vpop.f32.mrf.mxu2  ;;  %v8113_v6 = vld [vmem:[#allocation2 + $0x30] sm:$0xff] }
 0xb35   : > { %v8581_v51 = vadd.f32 %v8580_v25, %v16890_v9  ;;  %v8693_v40 = vpop.f32.mrf.mxu3  ;;  %v8269_v44 = vpop.permute.xlu1 %8268 }
 0xb36   : > { %8831 = vst [vmem:[%s11303_s19 + $0x18] sm:$0xff] %v8799_v60  ;;  %v8694_v36 = vadd.f32 %v8693_v40, %v16892_v52  ;;  %v8350_v27 = vmul.f32 %v8269_v44, %v8126_v31  ;;  %v8264_v12 = vpop.permute.xlu0 %8263  ;;  %v8535_v1 = vpop.f32.mrf.mxu0 }
 0xb37   : > { %v8349_v58 = vmul.f32 %v8264_v12, %v8125_v32  ;;  %v8536_v47 = vadd.f32 %v8535_v1, %v16890_v9  ;;  %v8648_v42 = vpop.f32.mrf.mxu1  ;;  %v8337_v32 = vmul.f32 %v16896_v11, %v8113_v6 }
 0xb38   : > { %v8783_v14 = vmax.f32 %v8694_v36, 0.0  ;;  %v8751_v7 = vadd.f32 %v8581_v51, %v8350_v27  ;;  %v8649_v43 = vadd.f32 %v8648_v42, %v16892_v52  ;;  %v8129_v27 = vld [vmem:[#allocation2 + $0x70] sm:$0xff] }
 0xb39   : > { %v8750_v39 = vadd.f32 %v8578_v17, %v8349_v58  ;;  %v8736_v13 = vadd.f32 %v8536_v47, %v8335_v53  ;;  %v8114_v17 = vld [vmem:[#allocation2 + $0x48] sm:$0xff] }
 0xb3a   : > { %v8815_v55 = vadd.f32 %v8783_v14, %v8751_v7  ;;  %v8768_v18 = vmax.f32 %v8649_v43, 0.0 }
 0xb3b   : > { %v8814_v26 = vadd.f32 %v8782_v57, %v8750_v39  ;;  %v8338_v57 = vmul.f32 %v16894_v48, %v8114_v17  ;;  %v8132_v17 = vld [vmem:[#allocation2 + $0xd0] sm:$0xff] }
 0xb3c   : > { %8847 = vst [vmem:[%s11303_s19 + $0x98] sm:$0xff] %v8815_v55  ;;  %v8800_v8 = vadd.f32 %v8768_v18, %v8736_v13  ;;  %v8583_v62 = vpop.f32.mrf.mxu2 }
 0xb3d   : > { %8846 = vst [vmem:[%s11303_s19 + $0x90] sm:$0xff] %v8814_v26  ;;  %v8584_v54 = vadd.f32 %v8583_v62, %v16890_v9  ;;  %v8696_v21 = vpop.f32.mrf.mxu3  ;;  %v8284_v58 = vpop.permute.xlu1 %8283  ;;  %v8115_v62 = vld [vmem:[#allocation2 + $0x80] sm:$0xff] }
 0xb3e   : > { %8832 = vst [vmem:[%s11303_s19 + $0x20] sm:$0xff] %v8800_v8  ;;  %v8697_v37 = vadd.f32 %v8696_v21, %v16892_v52  ;;  %v8538_v19 = vpop.f32.mrf.mxu0  ;;  %v8279_v22 = vpop.permute.xlu0 %8278  ;;  %v8353_v14 = vmul.f32 %v8284_v58, %v8129_v27 }
 0xb3f   : > { %v8752_v10 = vadd.f32 %v8584_v54, %v8351_v4  ;;  %v8539_v5 = vadd.f32 %v8538_v19, %v16890_v9  ;;  %v8651_v38 = vpop.f32.mrf.mxu1  ;;  %v8352_v29 = vmul.f32 %v8279_v22, %v8128_v49  ;;  %v8130_v4 = vld [vmem:[#allocation2 + $0xc0] sm:$0xff] }
 0xb40   : > { %v8784_v41 = vmax.f32 %v8697_v37, 0.0  ;;  %v8652_v24 = vadd.f32 %v8651_v38, %v16892_v52  ;;  %v8339_v38 = vmul.f32 %v16871_v30, %v8115_v62 }
 0xb41   : > { %v8737_v45 = vadd.f32 %v8539_v5, %v8336_v20  ;;  %v8289_v20 = vpop.permute.xlu2 %8288 }
 0xb42   : > { %v8816_v34 = vadd.f32 %v8784_v41, %v8752_v10  ;;  %v8769_v16 = vmax.f32 %v8652_v24, 0.0  ;;  %v8354_v37 = vmul.f32 %v8289_v20, %v8130_v4  ;;  %v8118_v20 = vld [vmem:[#allocation2 + $0xb8] sm:$0xff] }
 0xb44   : > { %8848 = vst [vmem:[%s11303_s19 + $0xa0] sm:$0xff] %v8816_v34  ;;  %v8801_v28 = vadd.f32 %v8769_v16, %v8737_v45  ;;  %v8586_v46 = vpop.f32.mrf.mxu2 }
 0xb45   : > { %v8587_v35 = vadd.f32 %v8586_v46, %v16890_v9  ;;  %v8699_v31 = vpop.f32.mrf.mxu3  ;;  %v8116_v46 = vld [vmem:[#allocation2 + $0x88] sm:$0xff] }
 0xb46   : > { %8833 = vst [vmem:[%s11303_s19 + $0x28] sm:$0xff] %v8801_v28  ;;  %v8700_v60 = vadd.f32 %v8699_v31, %v16892_v52  ;;  %v8541_v25 = vpop.f32.mrf.mxu0  ;;  %v8294_v16 = vpop.permute.xlu0 %8293 }
 0xb47   : > { %v8753_v53 = vadd.f32 %v8587_v35, %v8352_v29  ;;  %v8542_v63 = vadd.f32 %v8541_v25, %v16890_v9  ;;  %v8654_v51 = vpop.f32.mrf.mxu1  ;;  %v8131_v29 = vld [vmem:[#allocation2 + $0xa8] sm:$0xff] }
 0xb48   : > { %v8785_v40 = vmax.f32 %v8700_v60, 0.0  ;;  %v8655_v44 = vadd.f32 %v8654_v51, %v16892_v52  ;;  %v8355_v60 = vmul.f32 %v8294_v16, %v8131_v29  ;;  %v8134_v29 = vld [vmem:[#allocation2 + $0x28] sm:$0xff] }
 0xb49   : > { %v8738_v36 = vadd.f32 %v8542_v63, %v8337_v32  ;;  %v8340_v63 = vmul.f32 %v16905_v56, %v8116_v46  ;;  %v8119_v46 = vld [vmem:[#allocation2 + $0x60] sm:$0xff] }
 0xb4a   : > { %v8817_v12 = vadd.f32 %v8785_v40, %v8753_v53  ;;  %v8770_v1 = vmax.f32 %v8655_v44, 0.0 }
 0xb4c   : > { %8849 = vst [vmem:[%s11303_s19 + $0xa8] sm:$0xff] %v8817_v12  ;;  %v8802_v47 = vadd.f32 %v8770_v1, %v8738_v36  ;;  %v8589_v42 = vpop.f32.mrf.mxu2  ;;  %v8299_v1 = vpop.permute.xlu1 %8298 }
 0xb4d   : > { %v8590_v11 = vadd.f32 %v8589_v42, %v16890_v9  ;;  %v8702_v59 = vpop.f32.mrf.mxu3  ;;  %v8117_v42 = vld [vmem:[#allocation2 + $0xe8] sm:$0xff] }
 0xb4e   : > { %8834 = vst [vmem:[%s11303_s19 + $0x30] sm:$0xff] %v8802_v47  ;;  %v8703_v7 = vadd.f32 %v8702_v59, %v16892_v52  ;;  %v8544_v43 = vpop.f32.mrf.mxu0  ;;  %v8356_v59 = vmul.f32 %v8299_v1, %v8132_v17  ;;  %v8309_v16 = vpop.permute.xlu0 %8308  ;;  %v8135_v1 = vld [vmem:[#allocation2 + $0xa0] sm:$0xff] }
 0xb4f   : > { %v8754_v39 = vadd.f32 %v8590_v11, %v8353_v14  ;;  %v8545_v13 = vadd.f32 %v8544_v43, %v16890_v9  ;;  %v8657_v2 = vpop.f32.mrf.mxu1 }
 0xb50   : > { %v8786_v23 = vmax.f32 %v8703_v7, 0.0  ;;  %v8658_v55 = vadd.f32 %v8657_v2, %v16892_v52 }
 0xb51   : > { %v8739_v18 = vadd.f32 %v8545_v13, %v8338_v57 }
 0xb52   : > { %v8818_v26 = vadd.f32 %v8786_v23, %v8754_v39  ;;  %v8771_v8 = vmax.f32 %v8658_v55, 0.0  ;;  %v8341_v39 = vmul.f32 %v16902_v3, %v8117_v42 }
 0xb54   : > { %8850 = vst [vmem:[%s11303_s19 + $0xb0] sm:$0xff] %v8818_v26  ;;  %v8803_v54 = vadd.f32 %v8771_v8, %v8739_v18  ;;  %v8592_v21 = vpop.f32.mrf.mxu2  ;;  %v8133_v26 = vld [vmem:[#allocation2 + $0x10] sm:$0xff] }
 0xb55   : > { %v8593_v48 = vadd.f32 %v8592_v21, %v16890_v9  ;;  %v8705_v19 = vpop.f32.mrf.mxu3 }
 0xb56   : > { %8835 = vst [vmem:[%s11303_s19 + $0x38] sm:$0xff] %v8803_v54  ;;  %v8706_v10 = vadd.f32 %v8705_v19, %v16892_v52  ;;  %v8547_v5 = vpop.f32.mrf.mxu0  ;;  %v8304_v54 = vpop.permute.xlu2 %8303 }
 0xb57   : > { %v8755_v41 = vadd.f32 %v8593_v48, %v8354_v37  ;;  %v8548_v49 = vadd.f32 %v8547_v5, %v16890_v9  ;;  %v8660_v24 = vpop.f32.mrf.mxu1  ;;  %v8357_v48 = vmul.f32 %v8304_v54, %v8133_v26 }
 0xb58   : > { %v8787_v45 = vmax.f32 %v8706_v10, 0.0  ;;  %v8661_v34 = vadd.f32 %v8660_v24, %v16892_v52 }
 0xb59   : > { %v8740_v22 = vadd.f32 %v8548_v49, %v8339_v38  ;;  %v8342_v38 = vmul.f32 %v16881_v0, %v8118_v20 }
 0xb5a   : > { %v8819_v6 = vadd.f32 %v8787_v45, %v8755_v41  ;;  %v8772_v28 = vmax.f32 %v8661_v34, 0.0 }
 0xb5c   : > { %8851 = vst [vmem:[%s11303_s19 + $0xb8] sm:$0xff] %v8819_v6  ;;  %v8804_v35 = vadd.f32 %v8772_v28, %v8740_v22  ;;  %v8595_v31 = vpop.f32.mrf.mxu2 }
 0xb5d   : > { %v8596_v30 = vadd.f32 %v8595_v31, %v16890_v9  ;;  %v8708_v25 = vpop.f32.mrf.mxu3 }
 0xb5e   : > { %8836 = vst [vmem:[%s11303_s19 + $0x40] sm:$0xff] %v8804_v35  ;;  %v8709_v32 = vadd.f32 %v8708_v25, %v16892_v52  ;;  %v8550_v53 = vpop.f32.mrf.mxu0 }
 0xb5f   : > { %v8756_v51 = vadd.f32 %v8596_v30, %v8355_v60  ;;  %v8551_v40 = vadd.f32 %v8550_v53, %v16890_v9  ;;  %v8663_v44 = vpop.f32.mrf.mxu1  ;;  %v8358_v60 = vmul.f32 %v8309_v16, %v8134_v29  ;;  %v8343_v53 = vmul.f32 %v16914_v50, %v8119_v46  ;;  %v8122_v29 = vld [vmem:[#allocation2 + $0x78] sm:$0xff] }
 0xb60   : > { %v8788_v36 = vmax.f32 %v8709_v32, 0.0  ;;  %v8664_v27 = vadd.f32 %v8663_v44, %v16892_v52 }
 0xb61   : > { %v8741_v12 = vadd.f32 %v8551_v40, %v8340_v63 }
 0xb62   : > { %v8820_v58 = vadd.f32 %v8788_v36, %v8756_v51  ;;  %v8773_v47 = vmax.f32 %v8664_v27, 0.0 }
 0xb64   : > { %8852 = vst [vmem:[%s11303_s19 + $0xc0] sm:$0xff] %v8820_v58  ;;  %v8805_v14 = vadd.f32 %v8773_v47, %v8741_v12  ;;  %v8598_v11 = vpop.f32.mrf.mxu2  ;;  %v8314_v12 = vpop.permute.xlu1 %8313  ;;  %v8120_v47 = vld [vmem:[#allocation2 + $0xf0] sm:$0xff] }
 0xb65   : > { %v8599_v56 = vadd.f32 %v8598_v11, %v16890_v9  ;;  %v8711_v7 = vpop.f32.mrf.mxu3  ;;  %v8359_v11 = vmul.f32 %v8314_v12, %v8135_v1 }
 0xb66   : > { %8837 = vst [vmem:[%s11303_s19 + $0x48] sm:$0xff] %v8805_v14  ;;  %v8712_v43 = vadd.f32 %v8711_v7, %v16892_v52  ;;  %v8553_v57 = vpop.f32.mrf.mxu0 }
 0xb67   : > { %v8757_v13 = vadd.f32 %v8599_v56, %v8356_v59  ;;  %v8554_v2 = vadd.f32 %v8553_v57, %v16890_v9  ;;  %v8666_v23 = vpop.f32.mrf.mxu1 }
 0xb68   : > { %v8789_v55 = vmax.f32 %v8712_v43, 0.0  ;;  %v8667_v18 = vadd.f32 %v8666_v23, %v16892_v52  ;;  %v8344_v43 = vmul.f32 %v16910_v61, %v8120_v47 }
 0xb69   : > { %v8742_v4 = vadd.f32 %v8554_v2, %v8341_v39 }
 0xb6a   : > { %v8821_v8 = vadd.f32 %v8789_v55, %v8757_v13  ;;  %v8774_v62 = vmax.f32 %v8667_v18, 0.0  ;;  %v8319_v18 = vpop.permute.xlu2 %8318 }
 0xb6c   : > { %8853 = vst [vmem:[%s11303_s19 + $0xc8] sm:$0xff] %v8821_v8  ;;  %v8806_v21 = vadd.f32 %v8774_v62, %v8742_v4  ;;  %v8601_v37 = vpop.f32.mrf.mxu2  ;;  %v8136_v4 = vld [vmem:[#allocation2 + $0xf8] sm:$0xff]  ;;  %v8121_v62 = vld [vmem:[#allocation2 + $0x8] sm:$0xff] }
 0xb6d   : > { %v8602_v3 = vadd.f32 %v8601_v37, %v16890_v9  ;;  %v8714_v19 = vpop.f32.mrf.mxu3 }
 0xb6e   : > { %8838 = vst [vmem:[%s11303_s19 + $0x50] sm:$0xff] %v8806_v21  ;;  %v8715_v10 = vadd.f32 %v8714_v19, %v16892_v52  ;;  %v8556_v5 = vpop.f32.mrf.mxu0  ;;  %v8360_v21 = vmul.f32 %v8319_v18, %v8136_v4  ;;  %v8345_v19 = vmul.f32 %v16899_v33, %v8121_v62 }
 0xb6f   : > { %v8758_v41 = vadd.f32 %v8602_v3, %v8357_v48  ;;  %v8557_v49 = vadd.f32 %v8556_v5, %v16890_v9  ;;  %v8669_v24 = vpop.f32.mrf.mxu1 }
 0xb70   : > { %v8790_v45 = vmax.f32 %v8715_v10, 0.0  ;;  %v8670_v34 = vadd.f32 %v8669_v24, %v16892_v52 }
 0xb71   : > { %v8743_v22 = vadd.f32 %v8557_v49, %v8342_v38 }
 0xb72   : > { %v8822_v6 = vadd.f32 %v8790_v45, %v8758_v41  ;;  %v8775_v28 = vmax.f32 %v8670_v34, 0.0  ;;  %v8324_v45 = vpop.permute.xlu0 %8323  ;;  %v8137_v34 = vld [vmem:[#allocation2 + $0x20] sm:$0xff] }
 0xb73   : > { %v8361_v46 = vmul.f32 %v8324_v45, %v8137_v34 }
 0xb74   : > { %8854 = vst [vmem:[%s11303_s19 + $0xd0] sm:$0xff] %v8822_v6  ;;  %v8807_v35 = vadd.f32 %v8775_v28, %v8743_v22  ;;  %v8604_v31 = vpop.f32.mrf.mxu2 }
 0xb75   : > { %v8605_v0 = vadd.f32 %v8604_v31, %v16890_v9  ;;  %v8717_v30 = vpop.f32.mrf.mxu3 }
 0xb76   : > { %8839 = vst [vmem:[%s11303_s19 + $0x58] sm:$0xff] %v8807_v35  ;;  %v8718_v25 = vadd.f32 %v8717_v30, %v16892_v52  ;;  %v8559_v32 = vpop.f32.mrf.mxu0 }
 0xb77   : > { %v8759_v63 = vadd.f32 %v8605_v0, %v8358_v60  ;;  %v8560_v51 = vadd.f32 %v8559_v32, %v16890_v9  ;;  %v8672_v40 = vpop.f32.mrf.mxu1  ;;  %v8346_v0 = vmul.f32 %v16923_v15, %v8122_v29 }
 0xb78   : > { %v8791_v44 = vmax.f32 %v8718_v25, 0.0  ;;  %v8673_v36 = vadd.f32 %v8672_v40, %v16892_v52  ;;  %v8329_v40 = vpop.permute.xlu1 %8328 }
 0xb79   : > { %v8744_v27 = vadd.f32 %v8560_v51, %v8343_v53 }
 0xb7a   : > { %v8823_v17 = vadd.f32 %v8791_v44, %v8759_v63  ;;  %v8776_v58 = vmax.f32 %v8673_v36, 0.0  ;;  %v8138_v44 = vld [vmem:[#allocation2 + $0x98] sm:$0xff] }
 0xb7c   : > { %8855 = vst [vmem:[%s11303_s19 + $0xd8] sm:$0xff] %v8823_v17  ;;  %v8808_v42 = vadd.f32 %v8776_v58, %v8744_v27  ;;  %v8607_v14 = vpop.f32.mrf.mxu2  ;;  %v8362_v17 = vmul.f32 %v8329_v40, %v8138_v44 }
 0xb7d   : > { %v8608_v50 = vadd.f32 %v8607_v14, %v16890_v9  ;;  %v8720_v59 = vpop.f32.mrf.mxu3 }
 0xb7e   : > { %8840 = vst [vmem:[%s11303_s19 + $0x60] sm:$0xff] %v8808_v42  ;;  %v8721_v56 = vadd.f32 %v8720_v59, %v16892_v52  ;;  %v8562_v7 = vpop.f32.mrf.mxu0 }
 0xb7f   : > { %v8760_v57 = vadd.f32 %v8608_v50, %v8359_v11  ;;  %v8563_v39 = vadd.f32 %v8562_v7, %v16890_v9  ;;  %v8675_v13 = vpop.f32.mrf.mxu1 }
 0xb80   : > { %v8792_v2 = vmax.f32 %v8721_v56, 0.0  ;;  %v8676_v23 = vadd.f32 %v8675_v13, %v16892_v52 }
 0xb81   : > { %v8745_v55 = vadd.f32 %v8563_v39, %v8344_v43 }
 0xb82   : > { %v8824_v26 = vadd.f32 %v8792_v2, %v8760_v57  ;;  %v8777_v8 = vmax.f32 %v8676_v23, 0.0 }
 0xb84   : > { %8856 = vst [vmem:[%s11303_s19 + $0xe0] sm:$0xff] %v8824_v26  ;;  %v8809_v20 = vadd.f32 %v8777_v8, %v8745_v55  ;;  %v8610_v54 = vpop.f32.mrf.mxu2 }
 0xb85   : > { %v8611_v61 = vadd.f32 %v8610_v54, %v16890_v9  ;;  %v8723_v37 = vpop.f32.mrf.mxu3 }
 0xb86   : > { %8841 = vst [vmem:[%s11303_s19 + $0x68] sm:$0xff] %v8809_v20  ;;  %v8724_v48 = vadd.f32 %v8723_v37, %v16892_v52  ;;  %v8565_v3 = vpop.f32.mrf.mxu0 }
 0xb87   : > { %v8761_v10 = vadd.f32 %v8611_v61, %v8360_v21  ;;  %v8566_v5 = vadd.f32 %v8565_v3, %v16890_v9  ;;  %v8678_v38 = vpop.f32.mrf.mxu1 }
 0xb88   : > { %v8793_v41 = vmax.f32 %v8724_v48, 0.0  ;;  %v8679_v49 = vadd.f32 %v8678_v38, %v16892_v52 }
 0xb89   : > { %v8746_v24 = vadd.f32 %v8566_v5, %v8345_v19 }
 0xb8a   : > { %v8825_v22 = vadd.f32 %v8793_v41, %v8761_v10  ;;  %v8778_v16 = vmax.f32 %v8679_v49, 0.0 }
 0xb8c   : > { %8857 = vst [vmem:[%s11303_s19 + $0xe8] sm:$0xff] %v8825_v22  ;;  %v8810_v6 = vadd.f32 %v8778_v16, %v8746_v24  ;;  %v8613_v28 = vpop.f32.mrf.mxu2 }
 0xb8d   : > { %v8614_v33 = vadd.f32 %v8613_v28, %v16890_v9  ;;  %v8726_v35 = vpop.f32.mrf.mxu3 }
 0xb8e   : > { %8842 = vst [vmem:[%s11303_s19 + $0x70] sm:$0xff] %v8810_v6  ;;  %v8727_v31 = vadd.f32 %v8726_v35, %v16892_v52  ;;  %v8568_v60 = vpop.f32.mrf.mxu0 }
 0xb8f   : > { %v8762_v30 = vadd.f32 %v8614_v33, %v8361_v46  ;;  %v8569_v25 = vadd.f32 %v8568_v60, %v16890_v9  ;;  %v8681_v32 = vpop.f32.mrf.mxu1 }
 0xb90   : > { %v8794_v53 = vmax.f32 %v8727_v31, 0.0  ;;  %v8682_v63 = vadd.f32 %v8681_v32, %v16892_v52 }
 0xb91   : > { %v8747_v51 = vadd.f32 %v8569_v25, %v8346_v0 }
 0xb92   : > { %v8826_v36 = vadd.f32 %v8794_v53, %v8762_v30  ;;  %v8779_v27 = vmax.f32 %v8682_v63, 0.0 }
 0xb94   : > { %8858 = vst [vmem:[%s11303_s19 + $0xf0] sm:$0xff] %v8826_v36  ;;  %v8811_v12 = vadd.f32 %v8779_v27, %v8747_v51  ;;  %v8616_v1 = vpop.f32.mrf.mxu2 }
 0xb95   : > { %v8617_v15 = vadd.f32 %v8616_v1, %v16890_v9  ;;  %v8729_v58 = vpop.f32.mrf.mxu3 }
 0xb96   : > { %8843 = vst [vmem:[%s11303_s19 + $0x78] sm:$0xff] %v8811_v12  ;;  %v8730_v47 = vadd.f32 %v8729_v58, %v16892_v52 }
 0xb97   : > { %v8763_v42 = vadd.f32 %v8617_v15, %v8362_v17 }
 0xb98   : > { %v8795_v14 = vmax.f32 %v8730_v47, 0.0 }
 0xb9a   : > { %v8827_v11 = vadd.f32 %v8795_v14, %v8763_v42 }
 0xb9c   : > { %8859 = vst [vmem:[%s11303_s19 + $0xf8] sm:$0xff] %v8827_v11 }
 0xb9d PF: > { %s10884_s21 = sshll.u32 %s11108_s1, 8  ;;  %s8873_s17 = sshll.u32 %s11303_s19, 4  ;;  %s8874_s17 = int_to_ptr.vmem [resolvable:$true] %s8873_s17 }
 0xb9e   : > { %s8872_s14 = scalar_lea.hbm %s17074_s11, %s10884_s21  ;;  %s18587_s0 = sand.u32 1, %s11096_s26  }
 0xb9f   : > { %s8875_s27 = sshll.u32 %s8872_s14, 4  ;;  %s8861_s23 = scalar_lea.sflag [#allocation7], %s18587_s0  ;;  %s8876_s27 = int_to_ptr.hbm [resolvable:$true] %s8875_s27 }
 0xba0   : > { %s11038_s13 = sshra.s32 %s8876_s27, 4  ;;  %s11044_s1 = scalar_lea.hbm %s17074_s11, 512  ;;  %s11039_s13 = int_to_ptr.hbm [resolvable:$true] %s11038_s13 }
 0xba1   : > { %s11040_s18 = scalar_lea.hbm %s11039_s13, 256  ;;  %p11045_p13 = scmp.lt.s32.totalorder %s11039_s13, %s17074_s11 }
 0xba2   : > { %p11041_p10 = scmp.ne.s32.totalorder %s11039_s13, %s11040_s18  ;;  %p11046_p0 = scmp.lt.s32.totalorder %s11044_s1, %s11040_s18 }
 0xba4   : > { %p11042_p11 = pnand %p11041_p10, %p11245_p3  ;;  %p11047_p1 = por %p11046_p0, %p11045_p13 }
 0xba6   : > { %p11043_p12 = pneg %p11042_p11 }
 0xba8   : > { %p11048_p2 = pnand %p11047_p1, %p11043_p12 }
 0xbaa   : > { %11051 = shalt.err (!%p11048_p2)
}
 0xbab   : > { %s11128_s19 = smov 128   ;;  %s11129_s20 = smov 8  }
 0xbac   : > { %10904 = dma.vmem_to_hbm [thread:$0]  (%p11245_p3), %s8874_s17, 4096, %s8876_s27, %s8861_s23, %s11128_s19, %s11128_s19, %s11129_s20  }
 0xbad PF: > { %s18588_s30 = sld [smem:[#allocation14_spill]] }
 0xbae   : > { %s18589_s24 = sld [smem:[#allocation10_spill]] }
 0xbb3   : > { %p10910_p4 = scmp.ge.s32.totalorder %s18588_s30, 2 }
 0xbb4   : > { %s8890_s22 = sand.u32 1, %s18589_s24  }
 0xbb5   : > { %p10907_p5 = pnand %p10910_p4, %p11255_p9  ;;  %s8891_s25 = scalar_lea.sflag [#allocation7], %s8890_s22 }
 0xbb7   : > { %p10908_p6 = pneg %p10907_p5 }
 0xbb9   : > { %11087 = dma.done.wait (%p10908_p6), %s8891_s25, 4096  }
 0xbba   : > { %11089 = vsyncadd (%p10908_p6), %s8891_s25, 4294963200  ;;  %s37_s30 = sadd.s32 1, %s18588_s30   ;;  %s18591_s14 = sld [smem:[#allocation11_spill]] }
 0xbbb   : > { %p34_p7 = scmp.ge.s32.totalorder %s37_s30, 6   ;;  %s18592_s0 = sld [smem:[#allocation18_spill]] }
 0xbbc   : > { %s18593_s27 = sld [smem:[#allocation12_spill]]  ;;  %s18597_s25 = smov %s11096_s26 }
 0xbbd   : > { %s18594_s1 = sld [smem:[#allocation13_spill]]  ;;  %36 = sbr.rel (!%p34_p7) target bundleno = 12 (0xc), region = 115 }
 0xbbe   : > { %s18595_s28 = sld [smem:[#allocation15_spill]] }
 0xbbf   : > { %s18596_s29 = sld [smem:[#allocation16_spill]] }
 0xbc0   : > { %s18598_s26 = smov %s18591_s14 }
 0xbc2   :  { %8897 = vsyncpa [#allocation7], 1 }
 0xbc3   :  { %8899 = vsyncpa [#allocation7 + $0x1], 1 }

</bundles_post_ra>
